<compile_context>
chip_gen: v7x
topology: tpu7x:2x2x1
jax: 0.10.0
libtpu: 0.0.40
codegen_flags: <defaults>
</compile_context>

<pallas_src>
import jax
import jax.numpy as jnp
from jax.experimental import pallas as pl
from jax.experimental.pallas import tpu as pltpu

HIDDEN = 128
NUM_ENC = 6
XYZ_DIMS = 3 + 3 * 2 * NUM_ENC        # 39
VIEW_DIMS = 3 + 3 * 2 * NUM_ENC       # 39 (use_viewdirs=True)
IN_DIMS = XYZ_DIMS + VIEW_DIMS        # 78
OUT_DIMS = 4                          # [rgb(3) | sigma(1)]
TILE_M = 1024                         # rows per grid step


def _nerf_kernel(x_ref,
                 wx_ref, b1_ref, w2_ref, b2_ref, w32_ref, b32_ref,
                 w4f_ref, b4_ref, w5_ref, b5_ref,
                 wout_ref, bout_ref,
                 out_ref):
    f32 = jnp.float32
    bf16 = jnp.bfloat16

    x = x_ref[...].astype(bf16)                               # (TILE_M, 78)

    # Fused first matmul on the unsplit x:
    #   xw[:, :128]  = xyz  @ W1          (viewdir rows of that half are zero)
    #   xw[:, 128:]  = view @ W4_view     (xyz rows of that half are zero)
    xw = jnp.dot(x, wx_ref[...], preferred_element_type=f32)  # (TILE_M, 256)
    h4_view = xw[:, HIDDEN:]                                  # f32, used later
    h = jnp.maximum(xw[:, :HIDDEN] + b1_ref[...], 0.0).astype(bf16)

    # layer2 + relu (h2 feeds both the feature path and the sigma head)
    h2 = jnp.dot(h, w2_ref[...], preferred_element_type=f32) + b2_ref[...]
    h2 = jnp.maximum(h2, 0.0).astype(bf16)

    # feature head (layer3_2) + relu
    feat = jnp.dot(h2, w32_ref[...], preferred_element_type=f32) + b32_ref[...]
    feat = jnp.maximum(feat, 0.0).astype(bf16)

    # layer4 on cat((feat, view)) == feat @ W4_feat + view @ W4_view + b4
    h4 = (jnp.dot(feat, w4f_ref[...], preferred_element_type=f32)
          + h4_view + b4_ref[...])
    h4 = jnp.maximum(h4, 0.0).astype(bf16)

    # layer5 + relu
    h5 = jnp.dot(h4, w5_ref[...], preferred_element_type=f32) + b5_ref[...]
    h5 = jnp.maximum(h5, 0.0).astype(bf16)

    # fused heads: [h5 | h2] (TILE_M, 256) @ (256, 4) -> [rgb | sigma]
    cat = jnp.concatenate([h5, h2], axis=-1)
    out = jnp.dot(cat, wout_ref[...], preferred_element_type=f32) + bout_ref[...]

    out_ref[...] = out.astype(out_ref.dtype)


def _const_spec(shape):
    # Whole (small) parameter array, constant index_map -> resident in VMEM,
    # DMA'd once (block index never changes across the grid).
    return pl.BlockSpec(shape, lambda i: (0,) * len(shape))


@jax.jit
def multihead_nerf_forward(x, kernel_params):
    """x: (N, 78) float32. Returns (N, 4) = cat(rgb, sigma), float32."""
    n = x.shape[0]
    grid = (pl.cdiv(n, TILE_M),)   # last block padded/masked by Pallas

    in_specs = ([pl.BlockSpec((TILE_M, IN_DIMS), lambda i: (i, 0))]
                + [_const_spec(p.shape) for p in kernel_params])
    out_specs = pl.BlockSpec((TILE_M, OUT_DIMS), lambda i: (i, 0))

    return pl.pallas_call(
        _nerf_kernel,
        out_shape=jax.ShapeDtypeStruct((n, OUT_DIMS), jnp.float32),
        grid_spec=pltpu.PrefetchScalarGridSpec(
            num_scalar_prefetch=0,
            grid=grid,
            in_specs=in_specs,
            out_specs=out_specs,
        ),
        compiler_params=pltpu.CompilerParams(
            dimension_semantics=("parallel",)),
    )(x, *kernel_params)


def init_params(key):
    """Master f32 params, nn.Linear init, stored transposed as (in, out)."""
    def linear(key, fan_in, fan_out):
        kw, kb = jax.random.split(key)
        bound = 1.0 / jnp.sqrt(fan_in)
        w = jax.random.uniform(kw, (fan_in, fan_out), jnp.float32, -bound, bound)
        b = jax.random.uniform(kb, (1, fan_out), jnp.float32, -bound, bound)
        return w, b

    keys = jax.random.split(key, 7)
    w1, b1 = linear(keys[0], XYZ_DIMS, HIDDEN)                 # layer1
    w2, b2 = linear(keys[1], HIDDEN, HIDDEN)                   # layer2
    w31, b31 = linear(keys[2], HIDDEN, 1)                      # layer3_1 (sigma)
    w32, b32 = linear(keys[3], HIDDEN, HIDDEN)                 # layer3_2 (feat)
    w4, b4 = linear(keys[4], HIDDEN + VIEW_DIMS, HIDDEN)       # layer4
    w5, b5 = linear(keys[5], HIDDEN, HIDDEN)                   # layer5
    w6, b6 = linear(keys[6], HIDDEN, 3)                        # layer6 (rgb)
    return dict(w1=w1, b1=b1, w2=w2, b2=b2, w31=w31, b31=b31, w32=w32, b32=b32,
                w4=w4, b4=b4, w5=w5, b5=b5, w6=w6, b6=b6)


def pack_params(p):
    """Pack master f32 params into the kernel layout (bf16 weights, f32 biases)."""
    f32, bf16 = jnp.float32, jnp.bfloat16
    # Fused first-layer weight (78, 256):
    #   [:39, :128]  <- W1 (applied to xyz features)
    #   [39:, 128:]  <- W4's view-direction rows (applied to view features)
    wx = (jnp.zeros((IN_DIMS, 2 * HIDDEN), f32)
          .at[:XYZ_DIMS, :HIDDEN].set(p["w1"])
          .at[XYZ_DIMS:, HIDDEN:].set(p["w4"][HIDDEN:, :]))
    # layer4 feature part (128, 128)
    w4f = p["w4"][:HIDDEN, :]
    # fused output head (256, 4): rows 0..127 <- h5 (rgb, cols 0..2),
    #                             rows 128..255 <- h2 (sigma, col 3).
    wout = (jnp.zeros((2 * HIDDEN, OUT_DIMS), f32)
            .at[:HIDDEN, :3].set(p["w6"])
            .at[HIDDEN:, 3:4].set(p["w31"]))
    bout = jnp.concatenate([p["b6"], p["b31"]], axis=-1)       # (1, 4)

    return (wx.astype(bf16), p["b1"],
            p["w2"].astype(bf16), p["b2"],
            p["w32"].astype(bf16), p["b32"],
            w4f.astype(bf16), p["b4"],
            p["w5"].astype(bf16), p["b5"],
            wout.astype(bf16), bout)


def reference_forward(x, p):
    """Pure-JAX f32 reference mirroring the PyTorch forward exactly."""
    xyz, view = x[..., :XYZ_DIMS], x[..., XYZ_DIMS:]
    h = jax.nn.relu(xyz @ p["w1"] + p["b1"])
    h = jax.nn.relu(h @ p["w2"] + p["b2"])
    sigma = h @ p["w31"] + p["b31"]
    feat = jax.nn.relu(h @ p["w32"] + p["b32"])
    cat = jnp.concatenate([feat, view], axis=-1)
    h = jax.nn.relu(cat @ p["w4"] + p["b4"])
    h = jax.nn.relu(h @ p["w5"] + p["b5"])
    rgb = h @ p["w6"] + p["b6"]
    return jnp.concatenate([rgb, sigma], axis=-1)


if __name__ == "__main__":
    key = jax.random.PRNGKey(0)
    k_x, k_p = jax.random.split(key)

    # Deliberately NOT a multiple of TILE_M: grid = cdiv(2500, 1024) = 3,
    # exercising both the multi-step pipeline and the masked remainder block.
    N = 2500
    x = jax.random.normal(k_x, (N, IN_DIMS), dtype=jnp.float32)

    params = init_params(k_p)            # f32 master params (reference)
    kparams = pack_params(params)        # bf16-packed kernel params

    out = multihead_nerf_forward(x, kparams)
    out = jax.block_until_ready(out)

    ref = reference_forward(x, params)
    assert out.shape == (N, OUT_DIMS)
    # bf16 weights/activations vs. f32 reference -> loosened tolerance.
    max_err = jnp.max(jnp.abs(out - ref))
    assert jnp.allclose(out, ref, atol=5e-2, rtol=5e-2), (
        f"mismatch vs reference, max abs err = {max_err}")

    print("KERNEL_OK")
</pallas_src>

<mosaic_0001>
module attributes {stable_mosaic.version = 11 : i64} {
  func.func @_nerf_kernel(%arg0: i32, %arg1: memref<1024x78xf32, #tpu.memory_space<vmem>>, %arg2: memref<78x256xbf16, #tpu.memory_space<vmem>>, %arg3: memref<1x128xf32, #tpu.memory_space<vmem>>, %arg4: memref<128x128xbf16, #tpu.memory_space<vmem>>, %arg5: memref<1x128xf32, #tpu.memory_space<vmem>>, %arg6: memref<128x128xbf16, #tpu.memory_space<vmem>>, %arg7: memref<1x128xf32, #tpu.memory_space<vmem>>, %arg8: memref<128x128xbf16, #tpu.memory_space<vmem>>, %arg9: memref<1x128xf32, #tpu.memory_space<vmem>>, %arg10: memref<128x128xbf16, #tpu.memory_space<vmem>>, %arg11: memref<1x128xf32, #tpu.memory_space<vmem>>, %arg12: memref<256x4xbf16, #tpu.memory_space<vmem>>, %arg13: memref<1x4xf32, #tpu.memory_space<vmem>>, %arg14: memref<1024x4xf32, #tpu.memory_space<vmem>>) attributes {dimension_semantics = [#tpu.dimension_semantics<parallel>], iteration_bounds = array<i64: 3>, scalar_prefetch = 0 : i64, scratch_operands = 0 : i64, tpu.core_type = #tpu.core_type<tc>, window_params = [{transform_indices = @transform_0, window_bounds = array<i64: 1024, 78>}, {pipeline_mode = #tpu.pipeline_mode<synchronous>, transform_indices = @transform_1, window_bounds = array<i64: 78, 256>}, {pipeline_mode = #tpu.pipeline_mode<synchronous>, transform_indices = @transform_2, window_bounds = array<i64: 1, 128>}, {pipeline_mode = #tpu.pipeline_mode<synchronous>, transform_indices = @transform_3, window_bounds = array<i64: 128, 128>}, {pipeline_mode = #tpu.pipeline_mode<synchronous>, transform_indices = @transform_4, window_bounds = array<i64: 1, 128>}, {pipeline_mode = #tpu.pipeline_mode<synchronous>, transform_indices = @transform_5, window_bounds = array<i64: 128, 128>}, {pipeline_mode = #tpu.pipeline_mode<synchronous>, transform_indices = @transform_6, window_bounds = array<i64: 1, 128>}, {pipeline_mode = #tpu.pipeline_mode<synchronous>, transform_indices = @transform_7, window_bounds = array<i64: 128, 128>}, {pipeline_mode = #tpu.pipeline_mode<synchronous>, transform_indices = @transform_8, window_bounds = array<i64: 1, 128>}, {pipeline_mode = #tpu.pipeline_mode<synchronous>, transform_indices = @transform_9, window_bounds = array<i64: 128, 128>}, {pipeline_mode = #tpu.pipeline_mode<synchronous>, transform_indices = @transform_10, window_bounds = array<i64: 1, 128>}, {pipeline_mode = #tpu.pipeline_mode<synchronous>, transform_indices = @transform_11, window_bounds = array<i64: 256, 4>}, {pipeline_mode = #tpu.pipeline_mode<synchronous>, transform_indices = @transform_12, window_bounds = array<i64: 1, 4>}, {transform_indices = @transform_13, window_bounds = array<i64: 1024, 4>}]} {
    %c0 = arith.constant 0 : index
    %c0_0 = arith.constant 0 : index
    %0 = vector.load %arg1[%c0, %c0_0] : memref<1024x78xf32, #tpu.memory_space<vmem>>, vector<1024x78xf32>
    %1 = arith.truncf %0 : vector<1024x78xf32> to vector<1024x78xbf16>
    %c0_1 = arith.constant 0 : index
    %c0_2 = arith.constant 0 : index
    %2 = vector.load %arg2[%c0_1, %c0_2] : memref<78x256xbf16, #tpu.memory_space<vmem>>, vector<78x256xbf16>
    %cst = arith.constant dense<0.000000e+00> : vector<1024x256xf32>
    %3 = tpu.matmul %1, %2, %cst {dimension_numbers = #tpu.dot_dimension_numbers<[1], [0], [0], [1], [0, 0, 1, 1], [], []>} : vector<1024x78xbf16>, vector<78x256xbf16>, vector<1024x256xf32> -> vector<1024x256xf32>
    %4 = vector.extract_strided_slice %3 {offsets = [0, 128], sizes = [1024, 128], strides = [1, 1]} : vector<1024x256xf32> to vector<1024x128xf32>
    %5 = vector.extract_strided_slice %3 {offsets = [0, 0], sizes = [1024, 128], strides = [1, 1]} : vector<1024x256xf32> to vector<1024x128xf32>
    %c0_3 = arith.constant 0 : index
    %c0_4 = arith.constant 0 : index
    %6 = vector.load %arg3[%c0_3, %c0_4] : memref<1x128xf32, #tpu.memory_space<vmem>>, vector<1x128xf32>
    %7 = vector.broadcast %6 : vector<1x128xf32> to vector<1024x128xf32>
    %8 = arith.addf %5, %7 : vector<1024x128xf32>
    %cst_5 = arith.constant 0.000000e+00 : f32
    %9 = vector.broadcast %cst_5 : f32 to vector<1024x128xf32>
    %10 = arith.maximumf %8, %9 : vector<1024x128xf32>
    %11 = arith.truncf %10 : vector<1024x128xf32> to vector<1024x128xbf16>
    %c0_6 = arith.constant 0 : index
    %c0_7 = arith.constant 0 : index
    %12 = vector.load %arg4[%c0_6, %c0_7] : memref<128x128xbf16, #tpu.memory_space<vmem>>, vector<128x128xbf16>
    %cst_8 = arith.constant dense<0.000000e+00> : vector<1024x128xf32>
    %13 = tpu.matmul %11, %12, %cst_8 {dimension_numbers = #tpu.dot_dimension_numbers<[1], [0], [0], [1], [0, 0, 1, 1], [], []>} : vector<1024x128xbf16>, vector<128x128xbf16>, vector<1024x128xf32> -> vector<1024x128xf32>
    %c0_9 = arith.constant 0 : index
    %c0_10 = arith.constant 0 : index
    %14 = vector.load %arg5[%c0_9, %c0_10] : memref<1x128xf32, #tpu.memory_space<vmem>>, vector<1x128xf32>
    %15 = vector.broadcast %14 : vector<1x128xf32> to vector<1024x128xf32>
    %16 = arith.addf %13, %15 : vector<1024x128xf32>
    %cst_11 = arith.constant 0.000000e+00 : f32
    %17 = vector.broadcast %cst_11 : f32 to vector<1024x128xf32>
    %18 = arith.maximumf %16, %17 : vector<1024x128xf32>
    %19 = arith.truncf %18 : vector<1024x128xf32> to vector<1024x128xbf16>
    %c0_12 = arith.constant 0 : index
    %c0_13 = arith.constant 0 : index
    %20 = vector.load %arg6[%c0_12, %c0_13] : memref<128x128xbf16, #tpu.memory_space<vmem>>, vector<128x128xbf16>
    %cst_14 = arith.constant dense<0.000000e+00> : vector<1024x128xf32>
    %21 = tpu.matmul %19, %20, %cst_14 {dimension_numbers = #tpu.dot_dimension_numbers<[1], [0], [0], [1], [0, 0, 1, 1], [], []>} : vector<1024x128xbf16>, vector<128x128xbf16>, vector<1024x128xf32> -> vector<1024x128xf32>
    %c0_15 = arith.constant 0 : index
    %c0_16 = arith.constant 0 : index
    %22 = vector.load %arg7[%c0_15, %c0_16] : memref<1x128xf32, #tpu.memory_space<vmem>>, vector<1x128xf32>
    %23 = vector.broadcast %22 : vector<1x128xf32> to vector<1024x128xf32>
    %24 = arith.addf %21, %23 : vector<1024x128xf32>
    %cst_17 = arith.constant 0.000000e+00 : f32
    %25 = vector.broadcast %cst_17 : f32 to vector<1024x128xf32>
    %26 = arith.maximumf %24, %25 : vector<1024x128xf32>
    %27 = arith.truncf %26 : vector<1024x128xf32> to vector<1024x128xbf16>
    %c0_18 = arith.constant 0 : index
    %c0_19 = arith.constant 0 : index
    %28 = vector.load %arg8[%c0_18, %c0_19] : memref<128x128xbf16, #tpu.memory_space<vmem>>, vector<128x128xbf16>
    %cst_20 = arith.constant dense<0.000000e+00> : vector<1024x128xf32>
    %29 = tpu.matmul %27, %28, %cst_20 {dimension_numbers = #tpu.dot_dimension_numbers<[1], [0], [0], [1], [0, 0, 1, 1], [], []>} : vector<1024x128xbf16>, vector<128x128xbf16>, vector<1024x128xf32> -> vector<1024x128xf32>
    %30 = arith.addf %29, %4 : vector<1024x128xf32>
    %c0_21 = arith.constant 0 : index
    %c0_22 = arith.constant 0 : index
    %31 = vector.load %arg9[%c0_21, %c0_22] : memref<1x128xf32, #tpu.memory_space<vmem>>, vector<1x128xf32>
    %32 = vector.broadcast %31 : vector<1x128xf32> to vector<1024x128xf32>
    %33 = arith.addf %30, %32 : vector<1024x128xf32>
    %cst_23 = arith.constant 0.000000e+00 : f32
    %34 = vector.broadcast %cst_23 : f32 to vector<1024x128xf32>
    %35 = arith.maximumf %33, %34 : vector<1024x128xf32>
    %36 = arith.truncf %35 : vector<1024x128xf32> to vector<1024x128xbf16>
    %c0_24 = arith.constant 0 : index
    %c0_25 = arith.constant 0 : index
    %37 = vector.load %arg10[%c0_24, %c0_25] : memref<128x128xbf16, #tpu.memory_space<vmem>>, vector<128x128xbf16>
    %cst_26 = arith.constant dense<0.000000e+00> : vector<1024x128xf32>
    %38 = tpu.matmul %36, %37, %cst_26 {dimension_numbers = #tpu.dot_dimension_numbers<[1], [0], [0], [1], [0, 0, 1, 1], [], []>} : vector<1024x128xbf16>, vector<128x128xbf16>, vector<1024x128xf32> -> vector<1024x128xf32>
    %c0_27 = arith.constant 0 : index
    %c0_28 = arith.constant 0 : index
    %39 = vector.load %arg11[%c0_27, %c0_28] : memref<1x128xf32, #tpu.memory_space<vmem>>, vector<1x128xf32>
    %40 = vector.broadcast %39 : vector<1x128xf32> to vector<1024x128xf32>
    %41 = arith.addf %38, %40 : vector<1024x128xf32>
    %cst_29 = arith.constant 0.000000e+00 : f32
    %42 = vector.broadcast %cst_29 : f32 to vector<1024x128xf32>
    %43 = arith.maximumf %41, %42 : vector<1024x128xf32>
    %44 = arith.truncf %43 : vector<1024x128xf32> to vector<1024x128xbf16>
    %45 = tpu.concatenate %44, %19 in 1 : vector<1024x128xbf16>, vector<1024x128xbf16> -> vector<1024x256xbf16>
    %c0_30 = arith.constant 0 : index
    %c0_31 = arith.constant 0 : index
    %46 = vector.load %arg12[%c0_30, %c0_31] : memref<256x4xbf16, #tpu.memory_space<vmem>>, vector<256x4xbf16>
    %cst_32 = arith.constant dense<0.000000e+00> : vector<1024x4xf32>
    %47 = tpu.matmul %45, %46, %cst_32 {dimension_numbers = #tpu.dot_dimension_numbers<[1], [0], [0], [1], [0, 0, 1, 1], [], []>} : vector<1024x256xbf16>, vector<256x4xbf16>, vector<1024x4xf32> -> vector<1024x4xf32>
    %c0_33 = arith.constant 0 : index
    %c0_34 = arith.constant 0 : index
    %48 = vector.load %arg13[%c0_33, %c0_34] : memref<1x4xf32, #tpu.memory_space<vmem>>, vector<1x4xf32>
    %49 = vector.broadcast %48 : vector<1x4xf32> to vector<1024x4xf32>
    %50 = arith.addf %47, %49 : vector<1024x4xf32>
    %c0_35 = arith.constant 0 : index
    %c0_36 = arith.constant 0 : index
    %51 = vector.load %arg14[%c0_35, %c0_36] : memref<1024x4xf32, #tpu.memory_space<vmem>>, vector<1024x4xf32>
    tpu.vector_store %arg14[%c0_35, %c0_36], %50 {strides = array<i32>} : memref<1024x4xf32, #tpu.memory_space<vmem>>, vector<1024x4xf32>,
    return
  }
  func.func @transform_0(%arg0: i32) -> (i32, i32) {
    %c0_i32 = arith.constant 0 : i32
    %c0_i32_0 = arith.constant 0 : i32
    return %arg0, %c0_i32 : i32, i32
  }
  func.func @transform_1(%arg0: i32) -> (i32, i32) {
    %c0_i32 = arith.constant 0 : i32
    %c0_i32_0 = arith.constant 0 : i32
    %c0_i32_1 = arith.constant 0 : i32
    return %c0_i32, %c0_i32_0 : i32, i32
  }
  func.func @transform_2(%arg0: i32) -> (i32, i32) {
    %c0_i32 = arith.constant 0 : i32
    %c0_i32_0 = arith.constant 0 : i32
    %c0_i32_1 = arith.constant 0 : i32
    return %c0_i32, %c0_i32_0 : i32, i32
  }
  func.func @transform_3(%arg0: i32) -> (i32, i32) {
    %c0_i32 = arith.constant 0 : i32
    %c0_i32_0 = arith.constant 0 : i32
    %c0_i32_1 = arith.constant 0 : i32
    return %c0_i32, %c0_i32_0 : i32, i32
  }
  func.func @transform_4(%arg0: i32) -> (i32, i32) {
    %c0_i32 = arith.constant 0 : i32
    %c0_i32_0 = arith.constant 0 : i32
    %c0_i32_1 = arith.constant 0 : i32
    return %c0_i32, %c0_i32_0 : i32, i32
  }
  func.func @transform_5(%arg0: i32) -> (i32, i32) {
    %c0_i32 = arith.constant 0 : i32
    %c0_i32_0 = arith.constant 0 : i32
    %c0_i32_1 = arith.constant 0 : i32
    return %c0_i32, %c0_i32_0 : i32, i32
  }
  func.func @transform_6(%arg0: i32) -> (i32, i32) {
    %c0_i32 = arith.constant 0 : i32
    %c0_i32_0 = arith.constant 0 : i32
    %c0_i32_1 = arith.constant 0 : i32
    return %c0_i32, %c0_i32_0 : i32, i32
  }
  func.func @transform_7(%arg0: i32) -> (i32, i32) {
    %c0_i32 = arith.constant 0 : i32
    %c0_i32_0 = arith.constant 0 : i32
    %c0_i32_1 = arith.constant 0 : i32
    return %c0_i32, %c0_i32_0 : i32, i32
  }
  func.func @transform_8(%arg0: i32) -> (i32, i32) {
    %c0_i32 = arith.constant 0 : i32
    %c0_i32_0 = arith.constant 0 : i32
    %c0_i32_1 = arith.constant 0 : i32
    return %c0_i32, %c0_i32_0 : i32, i32
  }
  func.func @transform_9(%arg0: i32) -> (i32, i32) {
    %c0_i32 = arith.constant 0 : i32
    %c0_i32_0 = arith.constant 0 : i32
    %c0_i32_1 = arith.constant 0 : i32
    return %c0_i32, %c0_i32_0 : i32, i32
  }
  func.func @transform_10(%arg0: i32) -> (i32, i32) {
    %c0_i32 = arith.constant 0 : i32
    %c0_i32_0 = arith.constant 0 : i32
    %c0_i32_1 = arith.constant 0 : i32
    return %c0_i32, %c0_i32_0 : i32, i32
  }
  func.func @transform_11(%arg0: i32) -> (i32, i32) {
    %c0_i32 = arith.constant 0 : i32
    %c0_i32_0 = arith.constant 0 : i32
    %c0_i32_1 = arith.constant 0 : i32
    return %c0_i32, %c0_i32_0 : i32, i32
  }
  func.func @transform_12(%arg0: i32) -> (i32, i32) {
    %c0_i32 = arith.constant 0 : i32
    %c0_i32_0 = arith.constant 0 : i32
    %c0_i32_1 = arith.constant 0 : i32
    return %c0_i32, %c0_i32_0 : i32, i32
  }
  func.func @transform_13(%arg0: i32) -> (i32, i32) {
    %c0_i32 = arith.constant 0 : i32
    %c0_i32_0 = arith.constant 0 : i32
    return %arg0, %c0_i32 : i32, i32
  }
}

</mosaic_0001>

<bundles_post_ra>
// kernel: multihead_nerf_forward.1
= control target key start
LH: loop header
LB: loop body
LE: loop exit
PB: predicated region body
PF: predicated region fallthrough
CT: control target
= control target key end

     0   :  { %s10589_s0 = inlined_call_operand.vmem [shape: f32[2500,78], index: 0, kind: input, shape index: {}]   ;;  %s10590_s1 = inlined_call_operand.vmem [shape: bf16[78,256], index: 1, kind: input, shape index: {}]   ;;  %s10591_s2 = inlined_call_operand.vmem [shape: f32[1,128], index: 2, kind: input, shape index: {}]   ;;  %s10592_s3 = inlined_call_operand.vmem [shape: bf16[128,128], index: 3, kind: input, shape index: {}]   ;;  %s10593_s4 = inlined_call_operand.vmem [shape: f32[1,128], index: 4, kind: input, shape index: {}]   ;;  %s10594_s5 = inlined_call_operand.vmem [shape: bf16[128,128], index: 5, kind: input, shape index: {}]   ;;  %s10595_s6 = inlined_call_operand.vmem [shape: f32[1,128], index: 6, kind: input, shape index: {}]   ;;  %s10596_s7 = inlined_call_operand.vmem [shape: bf16[128,128], index: 7, kind: input, shape index: {}]   ;;  %s10597_s8 = inlined_call_operand.vmem [shape: f32[1,128], index: 8, kind: input, shape index: {}]   ;;  %s10598_s9 = inlined_call_operand.vmem [shape: bf16[128,128], index: 9, kind: input, shape index: {}]   ;;  %s10599_s10 = inlined_call_operand.vmem [shape: f32[1,128], index: 10, kind: input, shape index: {}]   ;;  %s10600_s11 = inlined_call_operand.vmem [shape: bf16[256,4], index: 11, kind: input, shape index: {}]   ;;  %s10601_s12 = inlined_call_operand.vmem [shape: f32[1,4], index: 12, kind: input, shape index: {}]   ;;  %s10602_s13 = inlined_call_operand.vmem [shape: f32[2500,4], index: 13, kind: output, shape index: {}]  }
   0x1   :  { %10645 = sst [smem:[#allocation156_spill]] %s10589_s0 }
   0x2   :  { %10646 = sst [smem:[#allocation157_spill]] %s10590_s1 }
   0x3   :  { %s7896_s25 = smov 0   ;;  %s7898_s26 = smov 0  }
   0x4   :  { %s7900_s27 = smov 0  }
   0x5 LB: > { %s7909_s28 = sadd.s32 4294967295, %s7791_s27   ;;  %s7911_s29 = sadd.s32 1, %s7791_s27   ;;  %s7791_s27 = sphi %s7900_s27, %s10964_s27   ;;  %s7787_s26 = sphi %s7898_s26, %s10963_s26   ;;  %s7783_s25 = sphi %s7896_s25, %s10962_s25  }
   0x6   : > { %s305_s30 = ssub.s32 %s7791_s27, %s7911_s29  ;;  %s308_s14 = sadd.s32 1, %s7787_s26 }
   0x7   : > { %p306_p0 = scmp.eq.s32.totalorder %s305_s30, 0  ;;  %p318_p1 = scmp.ne.s32.totalorder %s7787_s26, %s7783_s25 }
   0x8   : > { %p319_p2 = scmp.eq.s32.totalorder %s7909_s28, 2  ;;  %p6552_p3 = scmp.ge.s32.totalorder %s7791_s27, 1 }
   0x9   : > { %s7919_s15 = scalar_select %p306_p0, %s7787_s26, %s308_s14  }
   0xa   : > { %p7921_p4 = por %p319_p2, %p318_p1  ;;  %p396_p5 = scmp.lt.s32.totalorder %s7791_s27, 4 }
   0xc   : > { %p397_p6 = pnand %p6552_p3, %p396_p5 }
   0xe   : > { %400 = sbr.rel (%p397_p6) target bundleno = 2112 (0x840), region = 72 }
  0x15   : > { %s10648_s1 = sld [smem:[#allocation157_spill]]  ;;  %v10603_v2 = vmov 0   ;;  %s7934_s21 = sshll.u32 %s7909_s28, 7  ;;  %vm906_vm0 = vcmask 1046528   ;;  %v7683_v16 = vld [vmem:[%s10592_s3] sm:$0xff]   ;;  %vm713_vm1 = vcmask 637952  }
  0x16   : > { %945 = vmatprep.mubr.bf16.mxu0 %v10603_v2  ;;  %1265 = vmatprep.mubr.bf16.mxu1 %v10603_v2  ;;  %p448_p7 = scmp.lt.s32.totalorder %s7934_s21, 312  ;;  %s10649_s0 = sld [smem:[#allocation156_spill]]  ;;  %v7684_v26 = vld [vmem:[%s10592_s3 + $0x8] sm:$0xff]   ;;  %v7685_v40 = vld [vmem:[%s10592_s3 + $0x10] sm:$0xff]   ;;  %vm5953_vm2 = vcmask 31744  }
  0x17   : > { %s6090_s30 = ssub.s32 (%p7921_p4), 313, %s7934_s21  ;;  %s6702_s14 = sshll.u32 (%p7921_p4), %s7909_s28, 10 }
  0x18   : > { %s449_s17 = scalar_select %p448_p7, %s7934_s21, 312 }
  0x19   : > { %p6091_p8 = scmp.lt.s32.totalorder (%p7921_p4), %s6090_s30, 128 }
  0x1a   : > { %s6555_s23 = sshll.u32 %s449_s17, 3  ;;  %s440_s17 = sand.u32 1, %s7783_s25  }
  0x1b   : > { %v7668_v0 = vld [vmem:[%s10648_s1 + $0x4] ss:$8 sps:$4 sm:$0xff]   ;;  %v7670_v1 = vld [vmem:[%s10648_s1] ss:$8 sps:$4 sm:$0xff]   ;;  %v7671_v3 = vld [vmem:[%s10648_s1 + $0x14] ss:$8 sps:$4 sm:$0xff]  }
  0x1c   : > { %913 = vmatprep.subr.bf16.mxu0 %v7668_v0  ;;  %7569 = vmatprep.subr.bf16.mxu1 %v7668_v0  ;;  %v7673_v4 = vld [vmem:[%s10648_s1 + $0x10] ss:$8 sps:$4 sm:$0xff]   ;;  %v7674_v5 = vld [vmem:[%s10648_s1 + $0x24] ss:$8 sps:$4 sm:$0xff]   ;;  %v7676_v6 = vld [vmem:[%s10648_s1 + $0x20] ss:$8 sps:$4 sm:$0xff]   ;;  %s7959_s18 = scalar_lea.vmem %s10649_s0, %s6555_s23 }
  0x1d   : > { %914 = vmatpush1.bf16.msra.mxu0 %v7670_v1  ;;  %7574 = vmatpush1.bf16.msra.mxu1 %v7670_v1  ;;  %v7677_v7 = vld [vmem:[%s10648_s1 + $0x34] ss:$8 sps:$4 sm:$0xff]   ;;  %v7679_v8 = vld [vmem:[%s10648_s1 + $0x30] ss:$8 sps:$4 sm:$0xff]   ;;  %v463_v11 = vld [vmem:[%s7959_s18] sm:$0xff]  ;;  %s6553_s22 = sshll.u32 %s440_s17, 10  ;;  %s10390_s17 = scalar_lea.vmem (%p7921_p4), %s10602_s13, %s6702_s14  }
  0x1e   : > { %915 = vmatprep.subr.bf16.mxu0 %v7671_v3  ;;  %7570 = vmatprep.subr.bf16.mxu1 %v7671_v3  ;;  %v7680_v9 = vld [vmem:[%s10648_s1 + $0x44] ss:$8 sps:$4 sm:$0x7f]   ;;  %v7682_v10 = vld [vmem:[%s10648_s1 + $0x40] ss:$8 sps:$4 sm:$0x7f]  }
  0x1f   : > { %v464_v12 = vld [vmem:[%s7959_s18 + $0x8] sm:$0xff]  ;;  %v527_v13 = vld [vmem:[%s7959_s18 + $0x200] sm:$0xff]  ;;  %v908_v15 = vsel %vm906_vm0, %v7682_v10, 0  ;;  %v465_v19 = vld [vmem:[%s7959_s18 + $0x10] sm:$0xff]  ;;  %s9888_s25 = scalar_lea.vmem [#allocation2], %s6553_s22  }
  0x20   : > { %v528_v14 = vld [vmem:[%s7959_s18 + $0x208] sm:$0xff]  ;;  %v591_v17 = vpack.c.bf16 %v464_v12, %v463_v11  ;;  %v466_v20 = vld [vmem:[%s7959_s18 + $0x18] sm:$0xff]  ;;  %v529_v21 = vld [vmem:[%s7959_s18 + $0x210] sm:$0xff] }
  0x21   : > { %916 = vmatpush1.bf16.msra.mxu0 %v7673_v4  ;;  %7575 = vmatpush1.bf16.msra.mxu1 %v7673_v4  ;;  %v623_v18 = vpack.c.bf16 %v528_v14, %v527_v13  ;;  %v530_v22 = vld [vmem:[%s7959_s18 + $0x218] sm:$0xff]  ;;  %v592_v23 = vpack.c.bf16 %v466_v20, %v465_v19  ;;  %v467_v25 = vld [vmem:[%s7959_s18 + $0x20] sm:$0xff]  ;;  %v468_v27 = vld [vmem:[%s7959_s18 + $0x28] sm:$0xff] }
  0x22   : > { %917 = vmatprep.subr.bf16.mxu0 %v7674_v5  ;;  %7571 = vmatprep.subr.bf16.mxu1 %v7674_v5  ;;  %v624_v24 = vpack.c.bf16 %v530_v22, %v529_v21  ;;  %v531_v28 = vld [vmem:[%s7959_s18 + $0x220] sm:$0xff]  ;;  %v532_v29 = vld [vmem:[%s7959_s18 + $0x228] sm:$0xff]  ;;  %v593_v30 = vpack.c.bf16 %v468_v27, %v467_v25  ;;  %v469_v32 = vld [vmem:[%s7959_s18 + $0x30] sm:$0xff] }
  0x23   : > { %v625_v31 = vpack.c.bf16 %v532_v29, %v531_v28  ;;  %v470_v33 = vld [vmem:[%s7959_s18 + $0x38] sm:$0xff]  ;;  %v533_v34 = vld [vmem:[%s7959_s18 + $0x230] sm:$0xff]  ;;  %v471_v38 = vld [vmem:[%s7959_s18 + $0x40] sm:$0xff] }
  0x24   : > { %v534_v35 = vld [vmem:[%s7959_s18 + $0x238] sm:$0xff]  ;;  %v594_v36 = vpack.c.bf16 %v470_v33, %v469_v32  ;;  %v472_v39 = vld [vmem:[%s7959_s18 + $0x48] sm:$0xff]  ;;  %v535_v41 = vld [vmem:[%s7959_s18 + $0x240] sm:$0xff] }
  0x25   : > { %918 = vmatpush1.bf16.msra.mxu0 %v7676_v6  ;;  %7576 = vmatpush1.bf16.msra.mxu1 %v7676_v6  ;;  %v626_v37 = vpack.c.bf16 %v534_v35, %v533_v34  ;;  %v536_v42 = vld [vmem:[%s7959_s18 + $0x248] sm:$0xff]  ;;  %v595_v43 = vpack.c.bf16 %v472_v39, %v471_v38  ;;  %v473_v45 = vld [vmem:[%s7959_s18 + $0x50] sm:$0xff]  ;;  %v474_v46 = vld [vmem:[%s7959_s18 + $0x58] sm:$0xff] }
  0x26   : > { %919 = vmatprep.subr.bf16.mxu0 %v7677_v7  ;;  %7572 = vmatprep.subr.bf16.mxu1 %v7677_v7  ;;  %v627_v44 = vpack.c.bf16 %v536_v42, %v535_v41  ;;  %v537_v47 = vld [vmem:[%s7959_s18 + $0x250] sm:$0xff]  ;;  %v538_v48 = vld [vmem:[%s7959_s18 + $0x258] sm:$0xff]  ;;  %v596_v49 = vpack.c.bf16 %v474_v46, %v473_v45  ;;  %v475_v51 = vld [vmem:[%s7959_s18 + $0x60] sm:$0xff] }
  0x27   : > { %v628_v50 = vpack.c.bf16 %v538_v48, %v537_v47  ;;  %v476_v52 = vld [vmem:[%s7959_s18 + $0x68] sm:$0xff]  ;;  %v539_v53 = vld [vmem:[%s7959_s18 + $0x260] sm:$0xff]  ;;  %v477_v57 = vld [vmem:[%s7959_s18 + $0x70] sm:$0xff] }
  0x28   : > { %v540_v54 = vld [vmem:[%s7959_s18 + $0x268] sm:$0xff]  ;;  %v597_v55 = vpack.c.bf16 %v476_v52, %v475_v51  ;;  %v478_v58 = vld [vmem:[%s7959_s18 + $0x78] sm:$0xff]  ;;  %v541_v59 = vld [vmem:[%s7959_s18 + $0x270] sm:$0xff] }
  0x29   : > { %920 = vmatpush1.bf16.msra.mxu0 %v7679_v8  ;;  %7577 = vmatpush1.bf16.msra.mxu1 %v7679_v8  ;;  %v629_v56 = vpack.c.bf16 %v540_v54, %v539_v53  ;;  %v542_v60 = vld [vmem:[%s7959_s18 + $0x278] sm:$0xff]  ;;  %v598_v61 = vpack.c.bf16 %v478_v58, %v477_v57  ;;  %v479_v63 = vld [vmem:[%s7959_s18 + $0x80] sm:$0xff]  ;;  %v480_v1 = vld [vmem:[%s7959_s18 + $0x88] sm:$0xff] }
  0x2a   : > { %6566 = vmatprep.subr.msk.bf16.mxu0 %vm906_vm0, %v7680_v9  ;;  %7573 = vmatprep.subr.msk.bf16.mxu1 %vm906_vm0, %v7680_v9  ;;  %v630_v62 = vpack.c.bf16 %v542_v60, %v541_v59  ;;  %v7686_v0 = vld [vmem:[%s10592_s3 + $0x18] sm:$0xff]   ;;  %v543_v3 = vld [vmem:[%s7959_s18 + $0x280] sm:$0xff]  ;;  %v544_v4 = vld [vmem:[%s7959_s18 + $0x288] sm:$0xff]  ;;  %v599_v5 = vpack.c.bf16 %v480_v1, %v479_v63 }
  0x2b   : > { %v631_v6 = vpack.c.bf16 %v544_v4, %v543_v3  ;;  %v481_v7 = vld [vmem:[%s7959_s18 + $0x90] sm:$0xff]  ;;  %v482_v8 = vld [vmem:[%s7959_s18 + $0x98] sm:$0xff]  ;;  %v483_v13 = vld [vmem:[%s7959_s18 + $0xa0] sm:$0xff] }
  0x2c   : > { %v545_v9 = vld [vmem:[%s7959_s18 + $0x290] sm:$0xff]  ;;  %v546_v10 = vld [vmem:[%s7959_s18 + $0x298] sm:$0xff]  ;;  %v600_v11 = vpack.c.bf16 %v482_v8, %v481_v7  ;;  %v484_v14 = vld [vmem:[%s7959_s18 + $0xa8] sm:$0xff] }
  0x2d   : > { %922 = vmatpush1.bf16.msra.mxu0 %v908_v15  ;;  %7578 = vmatpush1.bf16.msra.mxu1 %v908_v15  ;;  %v632_v12 = vpack.c.bf16 %v546_v10, %v545_v9  ;;  %v547_v15 = vld [vmem:[%s7959_s18 + $0x2a0] sm:$0xff]  ;;  %v485_v19 = vld [vmem:[%s7959_s18 + $0xb0] sm:$0xff]  ;;  %v486_v20 = vld [vmem:[%s7959_s18 + $0xb8] sm:$0xff] }
  0x2e   : > { %6993 = vmatprep.subr.bf16.mxu1 %v7683_v16  ;;  %v549_v21 = vld [vmem:[%s7959_s18 + $0x2b0] sm:$0xff]  ;;  %v550_v22 = vld [vmem:[%s7959_s18 + $0x2b8] sm:$0xff]  ;;  %v487_v25 = vld [vmem:[%s7959_s18 + $0xc0] sm:$0xff] }
  0x2f   : > { %v551_v27 = vld [vmem:[%s7959_s18 + $0x2c0] sm:$0xff]  ;;  %v552_v28 = vld [vmem:[%s7959_s18 + $0x2c8] sm:$0xff]  ;;  %v489_v32 = vld [vmem:[%s7959_s18 + $0xd0] sm:$0xff] }
  0x30   : > { %6567 = vmatmul.mubr.msk.bf16.vlgmr.msra.gmra.mrb[0].mxu0 %vm713_vm1, %v591_v17  ;;  %6599 = vmatmul.mubr.msk.bf16.vlgmr.msra.gmra.mrb[0].mxu1 %vm713_vm1, %v623_v18  ;;  %v601_v17 = vpack.c.bf16 %v484_v14, %v483_v13  ;;  %v490_v33 = vld [vmem:[%s7959_s18 + $0xd8] sm:$0xff]  ;;  %v553_v34 = vld [vmem:[%s7959_s18 + $0x2d0] sm:$0xff]  ;;  %v491_v38 = vld [vmem:[%s7959_s18 + $0xe0] sm:$0xff] }
  0x31   : > { %955 = vmatprep.mubr.bf16.mxu0 %v10603_v2  ;;  %1275 = vmatprep.mubr.bf16.mxu1 %v10603_v2  ;;  %v554_v35 = vld [vmem:[%s7959_s18 + $0x2d8] sm:$0xff]  ;;  %v492_v39 = vld [vmem:[%s7959_s18 + $0xe8] sm:$0xff]  ;;  %v557_v46 = vld [vmem:[%s7959_s18 + $0x2f0] sm:$0xff] }
  0x32   : > { %6994 = vmatpush3.bf16.msra.mxu1 %v7683_v16  ;;  %v548_v16 = vld [vmem:[%s7959_s18 + $0x2a8] sm:$0xff]  ;;  %v605_v42 = vpack.c.bf16 %v492_v39, %v491_v38  ;;  %v494_v45 = vld [vmem:[%s7959_s18 + $0xf8] sm:$0xff]  ;;  %v7689_v51 = vld [vmem:[%s10592_s3 + $0x30] sm:$0xff]  }
  0x33   : > { %6995 = vmatprep.subr.bf16.mxu1 %v7684_v26  ;;  %v633_v18 = vpack.c.bf16 %v548_v16, %v547_v15  ;;  %v556_v41 = vld [vmem:[%s7959_s18 + $0x2e8] sm:$0xff]  ;;  %v558_v47 = vld [vmem:[%s7959_s18 + $0x2f8] sm:$0xff]  ;;  %v495_v52 = vld [vmem:[%s7959_s18 + $0x100] sm:$0xff] }
  0x34   : > { %v7688_v48 = vld [vmem:[%s10592_s3 + $0x28] sm:$0xff]   ;;  %v559_v54 = vld [vmem:[%s7959_s18 + $0x300] sm:$0xff]  ;;  %v497_v59 = vld [vmem:[%s7959_s18 + $0x110] sm:$0xff] }
  0x35   : > { %v496_v53 = vld [vmem:[%s7959_s18 + $0x108] sm:$0xff]  ;;  %v498_v60 = vld [vmem:[%s7959_s18 + $0x118] sm:$0xff]  ;;  %v499_v1 = vld [vmem:[%s7959_s18 + $0x120] sm:$0xff] }
  0x36   : > { %6996 = vmatpush3.bf16.msra.mxu1 %v7684_v26  ;;  %v488_v26 = vld [vmem:[%s7959_s18 + $0xc8] sm:$0xff]  ;;  %v607_v57 = vpack.c.bf16 %v496_v53, %v495_v52  ;;  %v608_v63 = vpack.c.bf16 %v498_v60, %v497_v59  ;;  %v563_v4 = vld [vmem:[%s7959_s18 + $0x320] sm:$0xff]  ;;  %v501_v8 = vld [vmem:[%s7959_s18 + $0x130] sm:$0xff] }
  0x37   : > { %6997 = vmatprep.subr.bf16.mxu1 %v7685_v40  ;;  %v603_v29 = vpack.c.bf16 %v488_v26, %v487_v25  ;;  %v500_v3 = vld [vmem:[%s7959_s18 + $0x128] sm:$0xff]  ;;  %v502_v9 = vld [vmem:[%s7959_s18 + $0x138] sm:$0xff]  ;;  %v565_v10 = vld [vmem:[%s7959_s18 + $0x330] sm:$0xff] }
  0x38   : > { %6568 = vmatmul.mubr.msk.bf16.gmra.mrb[4].mxu0 %vm713_vm1, %v592_v23  ;;  %6600 = vmatmul.mubr.msk.bf16.gmra.mrb[4].mxu1 %vm713_vm1, %v624_v24  ;;  %v602_v23 = vpack.c.bf16 %v486_v20, %v485_v19  ;;  %v634_v24 = vpack.c.bf16 %v550_v22, %v549_v21  ;;  %v503_v14 = vld [vmem:[%s7959_s18 + $0x140] sm:$0xff]  ;;  %v504_v15 = vld [vmem:[%s7959_s18 + $0x148] sm:$0xff]  ;;  %v505_v20 = vld [vmem:[%s7959_s18 + $0x150] sm:$0xff] }
  0x39   : > { %965 = vmatprep.mubr.bf16.mxu0 %v10603_v2  ;;  %1285 = vmatprep.mubr.bf16.mxu1 %v10603_v2  ;;  %v567_v16 = vld [vmem:[%s7959_s18 + $0x340] sm:$0xff]  ;;  %v506_v21 = vld [vmem:[%s7959_s18 + $0x158] sm:$0xff]  ;;  %v569_v22 = vld [vmem:[%s7959_s18 + $0x350] sm:$0xff] }
  0x3a   : > { %6998 = vmatpush3.bf16.msra.mxu1 %v7685_v40  ;;  %v555_v40 = vld [vmem:[%s7959_s18 + $0x2e0] sm:$0xff]  ;;  %v512_v39 = vld [vmem:[%s7959_s18 + $0x188] sm:$0xff]  ;;  %v581_v59 = vld [vmem:[%s7959_s18 + $0x3b0] sm:$0xff] }
  0x3b   : > { %6999 = vmatprep.subr.bf16.mxu1 %v7686_v0  ;;  %v507_v26 = vld [vmem:[%s7959_s18 + $0x160] sm:$0xff]  ;;  %v580_v53 = vld [vmem:[%s7959_s18 + $0x3a8] sm:$0xff]  ;;  %v582_v60 = vld [vmem:[%s7959_s18 + $0x3b8] sm:$0xff] }
  0x3c   : > { %v511_v38 = vld [vmem:[%s7959_s18 + $0x180] sm:$0xff] }
  0x3d   : > { %v579_v52 = vld [vmem:[%s7959_s18 + $0x3a0] sm:$0xff] }
  0x3e   : > { %7000 = vmatpush3.bf16.msra.mxu1 %v7686_v0 }
  0x40   : > { %6569 = vmatmul.mubr.msk.bf16.gmra.mrb[8].mxu0 %vm713_vm1, %v593_v30  ;;  %6601 = vmatmul.mubr.msk.bf16.gmra.mrb[8].mxu1 %vm713_vm1, %v625_v31  ;;  %v635_v30 = vpack.c.bf16 %v552_v28, %v551_v27  ;;  %v7687_v31 = vld [vmem:[%s10592_s3 + $0x20] sm:$0xff]   ;;  %v508_v27 = vld [vmem:[%s7959_s18 + $0x168] sm:$0xff] }
  0x41   : > { %975 = vmatprep.mubr.bf16.mxu0 %v10603_v2  ;;  %1295 = vmatprep.mubr.bf16.mxu1 %v10603_v2  ;;  %v571_v28 = vld [vmem:[%s7959_s18 + $0x360] sm:$0xff] }
  0x42   : > { %7001 = vmatprep.subr.bf16.mxu1 %v7687_v31 }
  0x43   : > { %7002 = vmatpush3.bf16.msra.mxu1 %v7687_v31 }
  0x44   : > { %7003 = vmatprep.subr.bf16.mxu1 %v7688_v48 }
  0x47   : > { %7004 = vmatpush3.bf16.msra.mxu1 %v7688_v48 }
  0x48   : > { %6570 = vmatmul.mubr.msk.bf16.gmra.mrb[12].mxu0 %vm713_vm1, %v594_v36  ;;  %6602 = vmatmul.mubr.msk.bf16.gmra.mrb[12].mxu1 %vm713_vm1, %v626_v37  ;;  %v604_v36 = vpack.c.bf16 %v490_v33, %v489_v32  ;;  %v636_v37 = vpack.c.bf16 %v554_v35, %v553_v34  ;;  %v509_v32 = vld [vmem:[%s7959_s18 + $0x170] sm:$0xff]  ;;  %v510_v33 = vld [vmem:[%s7959_s18 + $0x178] sm:$0xff] }
  0x49   : > { %985 = vmatprep.mubr.bf16.mxu0 %v10603_v2  ;;  %1305 = vmatprep.mubr.bf16.mxu1 %v10603_v2  ;;  %v573_v34 = vld [vmem:[%s7959_s18 + $0x370] sm:$0xff]  ;;  %v574_v35 = vld [vmem:[%s7959_s18 + $0x378] sm:$0xff] }
  0x4a   : > { %7005 = vmatprep.subr.bf16.mxu1 %v7689_v51 }
  0x4b   : > { %7006 = vmatpush3.bf16.msra.mxu1 %v7689_v51  ;;  %v516_v51 = vld [vmem:[%s7959_s18 + $0x1a8] sm:$0xff] }
  0x50   : > { %6571 = vmatmul.mubr.msk.bf16.gmra.mrb[16].mxu0 %vm713_vm1, %v595_v43  ;;  %6603 = vmatmul.mubr.msk.bf16.gmra.mrb[16].mxu1 %vm713_vm1, %v627_v44  ;;  %v637_v43 = vpack.c.bf16 %v556_v41, %v555_v40  ;;  %v493_v44 = vld [vmem:[%s7959_s18 + $0xf0] sm:$0xff]  ;;  %v575_v40 = vld [vmem:[%s7959_s18 + $0x380] sm:$0xff]  ;;  %v576_v41 = vld [vmem:[%s7959_s18 + $0x388] sm:$0xff] }
  0x51   : > { %995 = vmatprep.mubr.bf16.mxu0 %v10603_v2  ;;  %1315 = vmatprep.mubr.bf16.mxu1 %v10603_v2 }
  0x58   : > { %6572 = vmatmul.mubr.msk.bf16.gmra.mrb[20].mxu0 %vm713_vm1, %v596_v49  ;;  %6604 = vmatmul.mubr.msk.bf16.gmra.mrb[20].mxu1 %vm713_vm1, %v628_v50  ;;  %v606_v49 = vpack.c.bf16 %v494_v45, %v493_v44  ;;  %v638_v50 = vpack.c.bf16 %v558_v47, %v557_v46  ;;  %v513_v44 = vld [vmem:[%s7959_s18 + $0x190] sm:$0xff]  ;;  %v514_v45 = vld [vmem:[%s7959_s18 + $0x198] sm:$0xff] }
  0x59   : > { %1005 = vmatprep.mubr.bf16.mxu0 %v10603_v2  ;;  %1325 = vmatprep.mubr.bf16.mxu1 %v10603_v2  ;;  %v577_v46 = vld [vmem:[%s7959_s18 + $0x390] sm:$0xff]  ;;  %v578_v47 = vld [vmem:[%s7959_s18 + $0x398] sm:$0xff]  ;;  %v616_v48 = vpack.c.bf16 %v514_v45, %v513_v44 }
  0x5a   : > { %v586_v44 = vld [vmem:[%s7959_s18 + $0x3d8] sm:$0xff] }
  0x60   : > { %6573 = vmatmul.mubr.msk.bf16.gmra.mrb[24].mxu0 %vm713_vm1, %v597_v55  ;;  %6605 = vmatmul.mubr.msk.bf16.gmra.mrb[24].mxu1 %vm713_vm1, %v629_v56  ;;  %v560_v55 = vld [vmem:[%s7959_s18 + $0x308] sm:$0xff]  ;;  %v7690_v56 = vld [vmem:[%s10592_s3 + $0x38] sm:$0xff]  }
  0x61   : > { %1015 = vmatprep.mubr.bf16.mxu0 %v10603_v2  ;;  %1335 = vmatprep.mubr.bf16.mxu1 %v10603_v2  ;;  %v639_v58 = vpack.c.bf16 %v560_v55, %v559_v54  ;;  %v649_v55 = vpack.c.bf16 %v580_v53, %v579_v52 }
  0x62   : > { %7007 = vmatprep.subr.bf16.mxu1 %v7690_v56 }
  0x63   : > { %7008 = vmatpush3.bf16.msra.mxu1 %v7690_v56  ;;  %v8208_v56 = vld [vmem:[%s10591_s2] ss:$0 sm:$0xff] }
  0x68   : > { %6574 = vmatmul.mubr.msk.bf16.gmra.mrb[28].mxu0 %vm713_vm1, %v598_v61  ;;  %6606 = vmatmul.mubr.msk.bf16.gmra.mrb[28].mxu1 %vm713_vm1, %v630_v62  ;;  %v561_v61 = vld [vmem:[%s7959_s18 + $0x310] sm:$0xff]  ;;  %v562_v62 = vld [vmem:[%s7959_s18 + $0x318] sm:$0xff] }
  0x69   : > { %1025 = vmatprep.mubr.bf16.mxu0 %v10603_v2  ;;  %1345 = vmatprep.mubr.bf16.mxu1 %v10603_v2  ;;  %v640_v0 = vpack.c.bf16 %v562_v62, %v561_v61 }
  0x70   : > { %6575 = vmatmul.mubr.msk.bf16.gmra.mrb[32].mxu0 %vm713_vm1, %v599_v5  ;;  %6607 = vmatmul.mubr.msk.bf16.gmra.mrb[32].mxu1 %vm713_vm1, %v631_v6  ;;  %v564_v5 = vld [vmem:[%s7959_s18 + $0x328] sm:$0xff]  ;;  %v609_v6 = vpack.c.bf16 %v500_v3, %v499_v1  ;;  %v650_v3 = vpack.c.bf16 %v582_v60, %v581_v59 }
  0x71   : > { %1035 = vmatprep.mubr.bf16.mxu0 %v10603_v2  ;;  %1355 = vmatprep.mubr.bf16.mxu1 %v10603_v2  ;;  %v641_v7 = vpack.c.bf16 %v564_v5, %v563_v4 }
  0x78   : > { %6576 = vmatmul.mubr.msk.bf16.gmra.mrb[36].mxu0 %vm713_vm1, %v600_v11  ;;  %6608 = vmatmul.mubr.msk.bf16.gmra.mrb[36].mxu1 %vm713_vm1, %v632_v12  ;;  %v566_v11 = vld [vmem:[%s7959_s18 + $0x338] sm:$0xff]  ;;  %v610_v12 = vpack.c.bf16 %v502_v9, %v501_v8 }
  0x79   : > { %1045 = vmatprep.mubr.bf16.mxu0 %v10603_v2  ;;  %1365 = vmatprep.mubr.bf16.mxu1 %v10603_v2  ;;  %v642_v13 = vpack.c.bf16 %v566_v11, %v565_v10 }
  0x80   : > { %6577 = vmatmul.mubr.msk.bf16.gmra.mrb[40].mxu0 %vm713_vm1, %v601_v17  ;;  %6609 = vmatmul.mubr.msk.bf16.gmra.mrb[40].mxu1 %vm713_vm1, %v633_v18  ;;  %v568_v17 = vld [vmem:[%s7959_s18 + $0x348] sm:$0xff]  ;;  %v611_v18 = vpack.c.bf16 %v504_v15, %v503_v14  ;;  %v519_v15 = vld [vmem:[%s7959_s18 + $0x1c0] sm:$0xff] }
  0x81   : > { %1055 = vmatprep.mubr.bf16.mxu0 %v10603_v2  ;;  %1375 = vmatprep.mubr.bf16.mxu1 %v10603_v2  ;;  %v643_v19 = vpack.c.bf16 %v568_v17, %v567_v16  ;;  %v520_v17 = vld [vmem:[%s7959_s18 + $0x1c8] sm:$0xff] }
  0x88   : > { %6578 = vmatmul.mubr.msk.bf16.gmra.mrb[44].mxu0 %vm713_vm1, %v602_v23  ;;  %6610 = vmatmul.mubr.msk.bf16.gmra.mrb[44].mxu1 %vm713_vm1, %v634_v24  ;;  %v570_v23 = vld [vmem:[%s7959_s18 + $0x358] sm:$0xff]  ;;  %v612_v24 = vpack.c.bf16 %v506_v21, %v505_v20 }
  0x89   : > { %1065 = vmatprep.mubr.bf16.mxu0 %v10603_v2  ;;  %1385 = vmatprep.mubr.bf16.mxu1 %v10603_v2  ;;  %v644_v25 = vpack.c.bf16 %v570_v23, %v569_v22 }
  0x90   : > { %6579 = vmatmul.mubr.msk.bf16.gmra.mrb[48].mxu0 %vm713_vm1, %v603_v29  ;;  %6611 = vmatmul.mubr.msk.bf16.gmra.mrb[48].mxu1 %vm713_vm1, %v635_v30  ;;  %v572_v29 = vld [vmem:[%s7959_s18 + $0x368] sm:$0xff]  ;;  %v613_v30 = vpack.c.bf16 %v508_v27, %v507_v26  ;;  %v619_v26 = vpack.c.bf16 %v520_v17, %v519_v15 }
  0x91   : > { %1075 = vmatprep.mubr.bf16.mxu0 %v10603_v2  ;;  %1395 = vmatprep.mubr.bf16.mxu1 %v10603_v2  ;;  %v645_v31 = vpack.c.bf16 %v572_v29, %v571_v28 }
  0x98   : > { %6580 = vmatmul.mubr.msk.bf16.gmra.mrb[52].mxu0 %vm713_vm1, %v604_v36  ;;  %6612 = vmatmul.mubr.msk.bf16.gmra.mrb[52].mxu1 %vm713_vm1, %v636_v37  ;;  %v614_v36 = vpack.c.bf16 %v510_v33, %v509_v32  ;;  %v646_v37 = vpack.c.bf16 %v574_v35, %v573_v34 }
  0x99   : > { %1085 = vmatprep.mubr.bf16.mxu0 %v10603_v2  ;;  %1405 = vmatprep.mubr.bf16.mxu1 %v10603_v2 }
  0xa0   : > { %6581 = vmatmul.mubr.msk.bf16.gmra.mrb[56].mxu0 %vm713_vm1, %v605_v42  ;;  %6613 = vmatmul.mubr.msk.bf16.gmra.mrb[56].mxu1 %vm713_vm1, %v637_v43  ;;  %v615_v42 = vpack.c.bf16 %v512_v39, %v511_v38  ;;  %v647_v43 = vpack.c.bf16 %v576_v41, %v575_v40  ;;  %v521_v40 = vld [vmem:[%s7959_s18 + $0x1d0] sm:$0xff] }
  0xa1   : > { %1095 = vmatprep.mubr.bf16.mxu0 %v10603_v2  ;;  %1415 = vmatprep.mubr.bf16.mxu1 %v10603_v2 }
  0xa8   : > { %6582 = vmatmul.mubr.msk.bf16.gmra.mrb[60].mxu0 %vm713_vm1, %v606_v49  ;;  %6614 = vmatmul.mubr.msk.bf16.gmra.mrb[60].mxu1 %vm713_vm1, %v638_v50  ;;  %v648_v49 = vpack.c.bf16 %v578_v47, %v577_v46  ;;  %v515_v50 = vld [vmem:[%s7959_s18 + $0x1a0] sm:$0xff] }
  0xa9   : > { %1105 = vmatprep.mubr.bf16.mxu0 %v10603_v2  ;;  %1425 = vmatprep.mubr.bf16.mxu1 %v10603_v2  ;;  %v617_v54 = vpack.c.bf16 %v516_v51, %v515_v50 }
  0xb0   : > { %6583 = vmatmul.mubr.msk.bf16.gmra.mrb[64].mxu0 %vm713_vm1, %v607_v57  ;;  %6615 = vmatmul.mubr.msk.bf16.gmra.mrb[64].mxu1 %vm713_vm1, %v639_v58  ;;  %v517_v57 = vld [vmem:[%s7959_s18 + $0x1b0] sm:$0xff]  ;;  %v518_v58 = vld [vmem:[%s7959_s18 + $0x1b8] sm:$0xff] }
  0xb1   : > { %1115 = vmatprep.mubr.bf16.mxu0 %v10603_v2  ;;  %1435 = vmatprep.mubr.bf16.mxu1 %v10603_v2  ;;  %v618_v1 = vpack.c.bf16 %v518_v58, %v517_v57 }
  0xb8   : > { %6584 = vmatmul.mubr.msk.bf16.gmra.mrb[68].mxu0 %vm713_vm1, %v608_v63  ;;  %6616 = vmatmul.mubr.msk.bf16.gmra.mrb[68].mxu1 %vm713_vm1, %v640_v0 }
  0xb9   : > { %1125 = vmatprep.mubr.bf16.mxu0 %v10603_v2  ;;  %1445 = vmatprep.mubr.bf16.mxu1 %v10603_v2 }
  0xc0   : > { %6585 = vmatmul.mubr.msk.bf16.gmra.mrb[72].mxu0 %vm713_vm1, %v609_v6  ;;  %6617 = vmatmul.mubr.msk.bf16.gmra.mrb[72].mxu1 %vm713_vm1, %v641_v7 }
  0xc1   : > { %1135 = vmatprep.mubr.bf16.mxu0 %v10603_v2  ;;  %1455 = vmatprep.mubr.bf16.mxu1 %v10603_v2 }
  0xc8   : > { %6586 = vmatmul.mubr.msk.bf16.gmra.mrb[76].mxu0 %vm713_vm1, %v610_v12  ;;  %6618 = vmatmul.mubr.msk.bf16.gmra.mrb[76].mxu1 %vm713_vm1, %v642_v13 }
  0xc9   : > { %1145 = vmatprep.mubr.bf16.mxu0 %v10603_v2  ;;  %1465 = vmatprep.mubr.bf16.mxu1 %v10603_v2 }
  0xd0   : > { %6587 = vmatmul.mubr.msk.bf16.gmra.mrb[80].mxu0 %vm713_vm1, %v611_v18  ;;  %6619 = vmatmul.mubr.msk.bf16.gmra.mrb[80].mxu1 %vm713_vm1, %v643_v19  ;;  %v583_v18 = vld [vmem:[%s7959_s18 + $0x3c0] sm:$0xff]  ;;  %v584_v19 = vld [vmem:[%s7959_s18 + $0x3c8] sm:$0xff] }
  0xd1   : > { %1155 = vmatprep.mubr.bf16.mxu0 %v10603_v2  ;;  %1475 = vmatprep.mubr.bf16.mxu1 %v10603_v2  ;;  %v651_v27 = vpack.c.bf16 %v584_v19, %v583_v18 }
  0xd8   : > { %6588 = vmatmul.mubr.msk.bf16.gmra.mrb[84].mxu0 %vm713_vm1, %v612_v24  ;;  %6620 = vmatmul.mubr.msk.bf16.gmra.mrb[84].mxu1 %vm713_vm1, %v644_v25 }
  0xd9   : > { %1165 = vmatprep.mubr.bf16.mxu0 %v10603_v2  ;;  %1485 = vmatprep.mubr.bf16.mxu1 %v10603_v2 }
  0xe0   : > { %6589 = vmatmul.mubr.msk.bf16.gmra.mrb[88].mxu0 %vm713_vm1, %v613_v30  ;;  %6621 = vmatmul.mubr.msk.bf16.gmra.mrb[88].mxu1 %vm713_vm1, %v645_v31 }
  0xe1   : > { %1175 = vmatprep.mubr.bf16.mxu0 %v10603_v2  ;;  %1495 = vmatprep.mubr.bf16.mxu1 %v10603_v2 }
  0xe8   : > { %6590 = vmatmul.mubr.msk.bf16.gmra.mrb[92].mxu0 %vm713_vm1, %v614_v36  ;;  %6622 = vmatmul.mubr.msk.bf16.gmra.mrb[92].mxu1 %vm713_vm1, %v646_v37  ;;  %v8255_v37 = vld [vmem:[%s10594_s5] sm:$0xff]  }
  0xe9   : > { %1185 = vmatprep.mubr.bf16.mxu0 %v10603_v2  ;;  %1505 = vmatprep.mubr.bf16.mxu1 %v10603_v2 }
  0xea   : > { %7137 = vmatprep.subr.bf16.mxu1 %v8255_v37 }
  0xf0   : > { %6591 = vmatmul.mubr.msk.bf16.gmra.mrb[96].mxu0 %vm713_vm1, %v615_v42  ;;  %6623 = vmatmul.mubr.msk.bf16.gmra.mrb[96].mxu1 %vm713_vm1, %v647_v43  ;;  %v522_v42 = vld [vmem:[%s7959_s18 + $0x1d8] sm:$0xff]  ;;  %v585_v43 = vld [vmem:[%s7959_s18 + $0x3d0] sm:$0xff] }
  0xf1   : > { %1195 = vmatprep.mubr.bf16.mxu0 %v10603_v2  ;;  %1515 = vmatprep.mubr.bf16.mxu1 %v10603_v2  ;;  %v620_v51 = vpack.c.bf16 %v522_v42, %v521_v40  ;;  %v652_v52 = vpack.c.bf16 %v586_v44, %v585_v43  ;;  %v589_v40 = vld [vmem:[%s7959_s18 + $0x3f0] sm:$0xff] }
  0xf8   : > { %6592 = vmatmul.mubr.msk.bf16.gmra.mrb[100].mxu0 %vm713_vm1, %v616_v48  ;;  %6624 = vmatmul.mubr.msk.bf16.gmra.mrb[100].mxu1 %vm713_vm1, %v648_v49 }
  0xf9   : > { %1205 = vmatprep.mubr.bf16.mxu0 %v10603_v2  ;;  %1525 = vmatprep.mubr.bf16.mxu1 %v10603_v2 }
 0x100   : > { %6593 = vmatmul.mubr.msk.bf16.gmra.mrb[104].mxu0 %vm713_vm1, %v617_v54  ;;  %6625 = vmatmul.mubr.msk.bf16.gmra.mrb[104].mxu1 %vm713_vm1, %v649_v55 }
 0x101   : > { %1215 = vmatprep.mubr.bf16.mxu0 %v10603_v2  ;;  %1535 = vmatprep.mubr.bf16.mxu1 %v10603_v2 }
 0x103   : > { %v947_v61 = vpop.f32.mrb[0].mxu0  ;;  %v1267_v62 = vpop.f32.mrb[0].mxu1 }
 0x104   : > { %v1593_v63 = vadd.f32 %v8208_v56, %v947_v61  ;;  %v8217_v0 = vpop.f32.mrb[1].mxu0  ;;  %v1657_v4 = vadd.f32 %v8208_v56, %v1267_v62  ;;  %v8220_v5 = vpop.f32.mrb[1].mxu1 }
 0x105   : > { %10650 = vst [vmem:[#allocation3_spill] sm:$0xff] %v8220_v5  ;;  %v951_v6 = vpop.f32.mrb[2].mxu0  ;;  %v1271_v7 = vpop.f32.mrb[2].mxu1 }
 0x106   : > { %v1594_v8 = vadd.f32 %v8208_v56, %v951_v6  ;;  %v8223_v9 = vpop.f32.mrb[3].mxu0  ;;  %v1785_v10 = vmax.f32 %v1657_v4, 0.0  ;;  %v1658_v11 = vadd.f32 %v8208_v56, %v1271_v7  ;;  %v8226_v12 = vpop.f32.mrb[3].mxu1  ;;  %v1721_v13 = vmax.f32 %v1593_v63, 0.0  ;;  %v524_v6 = vld [vmem:[%s7959_s18 + $0x1e8] sm:$0xff]  ;;  %v587_v7 = vld [vmem:[%s7959_s18 + $0x3e0] sm:$0xff] }
 0x107   : > { %10651 = vst [vmem:[#allocation4_spill] sm:$0xff] %v8226_v12 }
 0x108   : > { %v1722_v14 = vmax.f32 %v1594_v8, 0.0  ;;  %6594 = vmatmul.mubr.msk.bf16.gmra.mrb[108].mxu0 %vm713_vm1, %v618_v1  ;;  %6626 = vmatmul.mubr.msk.bf16.gmra.mrb[108].mxu1 %vm713_vm1, %v650_v3  ;;  %v1786_v16 = vmax.f32 %v1658_v11, 0.0  ;;  %v523_v3 = vld [vmem:[%s7959_s18 + $0x1e0] sm:$0xff]  ;;  %v588_v8 = vld [vmem:[%s7959_s18 + $0x3e8] sm:$0xff] }
 0x109   : > { %1225 = vmatprep.mubr.bf16.mxu0 %v10603_v2  ;;  %1545 = vmatprep.mubr.bf16.mxu1 %v10603_v2  ;;  %v621_v17 = vpack.c.bf16 %v524_v6, %v523_v3  ;;  %v653_v18 = vpack.c.bf16 %v588_v8, %v587_v7 }
 0x10a   : > { %v8236_v20 = vpack.c.bf16 %v1722_v14, %v1721_v13  ;;  %v8238_v21 = vpack.c.bf16 %v1786_v16, %v1785_v10 }
 0x10b   : > { %v957_v22 = vpop.f32.mrb[4].mxu0  ;;  %v1277_v23 = vpop.f32.mrb[4].mxu1 }
 0x10c   : > { %v1595_v24 = vadd.f32 %v8208_v56, %v957_v22  ;;  %v8241_v25 = vpop.f32.mrb[5].mxu0  ;;  %v1659_v28 = vadd.f32 %v8208_v56, %v1277_v23  ;;  %v8244_v29 = vpop.f32.mrb[5].mxu1 }
 0x10d   : > { %10652 = vst [vmem:[#allocation5_spill] sm:$0xff] %v8244_v29  ;;  %v961_v30 = vpop.f32.mrb[6].mxu0  ;;  %v1281_v31 = vpop.f32.mrb[6].mxu1 }
 0x10e   : > { %v1596_v32 = vadd.f32 %v8208_v56, %v961_v30  ;;  %v8247_v33 = vpop.f32.mrb[7].mxu0  ;;  %v1787_v34 = vmax.f32 %v1659_v28, 0.0  ;;  %v1660_v35 = vadd.f32 %v8208_v56, %v1281_v31  ;;  %v8250_v36 = vpop.f32.mrb[7].mxu1  ;;  %v1723_v38 = vmax.f32 %v1595_v24, 0.0 }
 0x10f   : > { %10653 = vst [vmem:[#allocation6_spill] sm:$0xff] %v8250_v36 }
 0x110   : > { %v1724_v39 = vmax.f32 %v1596_v32, 0.0  ;;  %6595 = vmatmul.mubr.msk.bf16.gmra.mrb[112].mxu0 %vm713_vm1, %v619_v26  ;;  %6627 = vmatmul.mubr.msk.bf16.gmra.mrb[112].mxu1 %vm713_vm1, %v651_v27  ;;  %v1788_v41 = vmax.f32 %v1660_v35, 0.0  ;;  %v525_v35 = vld [vmem:[%s7959_s18 + $0x1f0] sm:$0xff] }
 0x111   : > { %1235 = vmatprep.mubr.bf16.mxu0 %v10603_v2  ;;  %1555 = vmatprep.mubr.bf16.mxu1 %v10603_v2 }
 0x112   : > { %v8265_v45 = vpack.c.bf16 %v1724_v39, %v1723_v38  ;;  %v8268_v46 = vpack.c.bf16 %v1788_v41, %v1787_v34  ;;  %v526_v39 = vld [vmem:[%s7959_s18 + $0x1f8] sm:$0xff] }
 0x113   : > { %v967_v47 = vpop.f32.mrb[8].mxu0  ;;  %v1287_v48 = vpop.f32.mrb[8].mxu1  ;;  %v590_v41 = vld [vmem:[%s7959_s18 + $0x3f8] sm:$0xff] }
 0x114   : > { %v1597_v49 = vadd.f32 %v8208_v56, %v967_v47  ;;  %v8271_v50 = vpop.f32.mrb[9].mxu0  ;;  %v1661_v53 = vadd.f32 %v8208_v56, %v1287_v48  ;;  %v8274_v54 = vpop.f32.mrb[9].mxu1 }
 0x115   : > { %10654 = vst [vmem:[#allocation7_spill] sm:$0xff] %v8274_v54  ;;  %v971_v55 = vpop.f32.mrb[10].mxu0  ;;  %v1291_v57 = vpop.f32.mrb[10].mxu1 }
 0x116   : > { %v1598_v58 = vadd.f32 %v8208_v56, %v971_v55  ;;  %v8277_v59 = vpop.f32.mrb[11].mxu0  ;;  %v1789_v60 = vmax.f32 %v1661_v53, 0.0  ;;  %v1662_v61 = vadd.f32 %v8208_v56, %v1291_v57  ;;  %v8280_v62 = vpop.f32.mrb[11].mxu1  ;;  %v1725_v63 = vmax.f32 %v1597_v49, 0.0 }
 0x117   : > { %10655 = vst [vmem:[#allocation8_spill] sm:$0xff] %v8280_v62 }
 0x118   : > { %v1726_v1 = vmax.f32 %v1598_v58, 0.0  ;;  %6596 = vmatmul.mubr.msk.bf16.gmra.mrb[116].mxu0 %vm713_vm1, %v620_v51  ;;  %6628 = vmatmul.mubr.msk.bf16.gmra.mrb[116].mxu1 %vm713_vm1, %v652_v52  ;;  %v1790_v4 = vmax.f32 %v1662_v61, 0.0  ;;  %v622_v51 = vpack.c.bf16 %v526_v39, %v525_v35  ;;  %v654_v52 = vpack.c.bf16 %v590_v41, %v589_v40  ;;  %v7692_v35 = vld [vmem:[%s10594_s5 + $0x8] sm:$0xff]  }
 0x119   : > { %1245 = vmatprep.mubr.bf16.mxu0 %v10603_v2  ;;  %1565 = vmatprep.mubr.bf16.mxu1 %v10603_v2 }
 0x11a   : > { %v8290_v10 = vpack.c.bf16 %v1726_v1, %v1725_v63  ;;  %v8292_v11 = vpack.c.bf16 %v1790_v4, %v1789_v60 }
 0x11b   : > { %v977_v13 = vpop.f32.mrb[12].mxu0  ;;  %v1297_v14 = vpop.f32.mrb[12].mxu1 }
 0x11c   : > { %v1599_v15 = vadd.f32 %v8208_v56, %v977_v13  ;;  %v8295_v16 = vpop.f32.mrb[13].mxu0  ;;  %v1663_v19 = vadd.f32 %v8208_v56, %v1297_v14  ;;  %v8298_v22 = vpop.f32.mrb[13].mxu1 }
 0x11d   : > { %10656 = vst [vmem:[#allocation9_spill] sm:$0xff] %v8298_v22  ;;  %v981_v23 = vpop.f32.mrb[14].mxu0  ;;  %v1301_v24 = vpop.f32.mrb[14].mxu1 }
 0x11e   : > { %v1600_v26 = vadd.f32 %v8208_v56, %v981_v23  ;;  %v8301_v27 = vpop.f32.mrb[15].mxu0  ;;  %v1791_v28 = vmax.f32 %v1663_v19, 0.0  ;;  %v1664_v30 = vadd.f32 %v8208_v56, %v1301_v24  ;;  %v8304_v31 = vpop.f32.mrb[15].mxu1  ;;  %v1727_v32 = vmax.f32 %v1599_v15, 0.0 }
 0x11f   : > { %10657 = vst [vmem:[#allocation10_spill] sm:$0xff] %v8304_v31 }
 0x120   : > { %v1728_v34 = vmax.f32 %v1600_v26, 0.0  ;;  %6597 = vmatmul.mubr.msk.bf16.gmra.mrb[120].mxu0 %vm713_vm1, %v621_v17  ;;  %6629 = vmatmul.mubr.msk.bf16.gmra.mrb[120].mxu1 %vm713_vm1, %v653_v18  ;;  %v1792_v38 = vmax.f32 %v1664_v30, 0.0 }
 0x121   : > { %1255 = vmatprep.mubr.bf16.mxu0 %v10603_v2  ;;  %1575 = vmatprep.mubr.bf16.mxu1 %v10603_v2 }
 0x122   : > { %v8314_v42 = vpack.c.bf16 %v1728_v34, %v1727_v32  ;;  %v8316_v43 = vpack.c.bf16 %v1792_v38, %v1791_v28 }
 0x123   : > { %v987_v44 = vpop.f32.mrb[16].mxu0  ;;  %v1307_v47 = vpop.f32.mrb[16].mxu1 }
 0x124   : > { %v1601_v48 = vadd.f32 %v8208_v56, %v987_v44  ;;  %v8319_v49 = vpop.f32.mrb[17].mxu0  ;;  %v1665_v53 = vadd.f32 %v8208_v56, %v1307_v47  ;;  %v8322_v55 = vpop.f32.mrb[17].mxu1 }
 0x125   : > { %10658 = vst [vmem:[#allocation11_spill] sm:$0xff] %v8322_v55  ;;  %v991_v57 = vpop.f32.mrb[18].mxu0  ;;  %v1311_v58 = vpop.f32.mrb[18].mxu1 }
 0x126   : > { %v1602_v60 = vadd.f32 %v8208_v56, %v991_v57  ;;  %v8325_v61 = vpop.f32.mrb[19].mxu0  ;;  %v1793_v63 = vmax.f32 %v1665_v53, 0.0  ;;  %v1666_v1 = vadd.f32 %v8208_v56, %v1311_v58  ;;  %v8328_v3 = vpop.f32.mrb[19].mxu1  ;;  %v1729_v4 = vmax.f32 %v1601_v48, 0.0 }
 0x127   : > { %10659 = vst [vmem:[#allocation12_spill] sm:$0xff] %v8328_v3 }
 0x128   : > { %v1730_v6 = vmax.f32 %v1602_v60, 0.0  ;;  %6598 = vmatmul.mubr.msk.bf16.gmra.mrb[124].mxu0 %vm713_vm1, %v622_v51  ;;  %6630 = vmatmul.mubr.msk.bf16.gmra.mrb[124].mxu1 %vm713_vm1, %v654_v52  ;;  %v1794_v7 = vmax.f32 %v1666_v1, 0.0 }
 0x129   : > { %7009 = vmatprep.mubr.bf16.mxu1 %v8236_v20 }
 0x12a   : > { %v1853_v8 = vpack.c.bf16 %v1730_v6, %v1729_v4  ;;  %v8333_v13 = vpack.c.bf16 %v1794_v7, %v1793_v63 }
 0x12b   : > { %v997_v14 = vpop.f32.mrb[20].mxu0  ;;  %v1317_v15 = vpop.f32.mrb[20].mxu1 }
 0x12c   : > { %v1603_v17 = vadd.f32 %v8208_v56, %v997_v14  ;;  %v8336_v18 = vpop.f32.mrb[21].mxu0  ;;  %v1667_v19 = vadd.f32 %v8208_v56, %v1317_v15  ;;  %v8339_v23 = vpop.f32.mrb[21].mxu1 }
 0x12d   : > { %10660 = vst [vmem:[#allocation13_spill] sm:$0xff] %v8339_v23  ;;  %v1001_v24 = vpop.f32.mrb[22].mxu0  ;;  %v1321_v26 = vpop.f32.mrb[22].mxu1 }
 0x12e   : > { %v1604_v28 = vadd.f32 %v8208_v56, %v1001_v24  ;;  %v8342_v30 = vpop.f32.mrb[23].mxu0  ;;  %v1795_v20 = vmax.f32 %v1667_v19, 0.0  ;;  %v1668_v32 = vadd.f32 %v8208_v56, %v1321_v26  ;;  %v8345_v34 = vpop.f32.mrb[23].mxu1  ;;  %v1731_v38 = vmax.f32 %v1603_v17, 0.0 }
 0x12f   : > { %10661 = vst [vmem:[#allocation14_spill] sm:$0xff] %v8345_v34 }
 0x130   : > { %v1732_v39 = vmax.f32 %v1604_v28, 0.0  ;;  %7010 = vmatmul.mubr.bf16.vlgmr.msra.gmra.mrb[128].mxu1 %v8265_v45  ;;  %v1796_v40 = vmax.f32 %v1668_v32, 0.0 }
 0x131   : > { %7013 = vmatprep.mubr.bf16.mxu1 %v8290_v10  ;;  %7138 = vmatpush3.bf16.msra.mxu1 %v8255_v37 }
 0x132   : > { %v1854_v41 = vpack.c.bf16 %v1732_v39, %v1731_v38  ;;  %7139 = vmatprep.subr.bf16.mxu1 %v7692_v35  ;;  %v8353_v44 = vpack.c.bf16 %v1796_v40, %v1795_v20 }
 0x133   : > { %v1007_v47 = vpop.f32.mrb[24].mxu0  ;;  %v1327_v48 = vpop.f32.mrb[24].mxu1 }
 0x134   : > { %v1605_v51 = vadd.f32 %v8208_v56, %v1007_v47  ;;  %v8356_v52 = vpop.f32.mrb[25].mxu0  ;;  %v1669_v53 = vadd.f32 %v8208_v56, %v1327_v48  ;;  %v8359_v57 = vpop.f32.mrb[25].mxu1 }
 0x135   : > { %10662 = vst [vmem:[#allocation15_spill] sm:$0xff] %v8359_v57  ;;  %v1011_v45 = vpop.f32.mrb[26].mxu0  ;;  %v1331_v58 = vpop.f32.mrb[26].mxu1  ;;  %7140 = vmatpush3.bf16.msra.mxu1 %v7692_v35 }
 0x136   : > { %v1606_v10 = vadd.f32 %v8208_v56, %v1011_v45  ;;  %v8362_v37 = vpop.f32.mrb[27].mxu0  ;;  %v1797_v60 = vmax.f32 %v1669_v53, 0.0  ;;  %v1670_v63 = vadd.f32 %v8208_v56, %v1331_v58  ;;  %v8365_v1 = vpop.f32.mrb[27].mxu1  ;;  %v1733_v4 = vmax.f32 %v1605_v51, 0.0 }
 0x137   : > { %10663 = vst [vmem:[#allocation16_spill] sm:$0xff] %v8362_v37  ;;  %10664 = vst [vmem:[#allocation17_spill] sm:$0xff] %v8365_v1 }
 0x138   : > { %v1734_v6 = vmax.f32 %v1606_v10, 0.0  ;;  %7014 = vmatmul.mubr.bf16.gmra.mrb[132].mxu1 %v8314_v42  ;;  %v1798_v7 = vmax.f32 %v1670_v63, 0.0 }
 0x139   : > { %7017 = vmatprep.mubr.bf16.mxu1 %v1853_v8 }
 0x13a   : > { %v1855_v14 = vpack.c.bf16 %v1734_v6, %v1733_v4  ;;  %v8368_v15 = vpack.c.bf16 %v1798_v7, %v1797_v60 }
 0x13b   : > { %v1017_v17 = vpop.f32.mrb[28].mxu0  ;;  %v1337_v19 = vpop.f32.mrb[28].mxu1 }
 0x13c   : > { %v1607_v24 = vadd.f32 %v8208_v56, %v1017_v17  ;;  %v8371_v26 = vpop.f32.mrb[29].mxu0  ;;  %v1671_v28 = vadd.f32 %v8208_v56, %v1337_v19  ;;  %v8374_v20 = vpop.f32.mrb[29].mxu1 }
 0x13d   : > { %10665 = vst [vmem:[#allocation18_spill] sm:$0xff] %v8374_v20  ;;  %v1021_v32 = vpop.f32.mrb[30].mxu0  ;;  %v1341_v35 = vpop.f32.mrb[30].mxu1 }
 0x13e   : > { %v1608_v38 = vadd.f32 %v8208_v56, %v1021_v32  ;;  %v8377_v42 = vpop.f32.mrb[31].mxu0  ;;  %v1799_v8 = vmax.f32 %v1671_v28, 0.0  ;;  %v1672_v39 = vadd.f32 %v8208_v56, %v1341_v35  ;;  %v8380_v40 = vpop.f32.mrb[31].mxu1  ;;  %v1735_v47 = vmax.f32 %v1607_v24, 0.0 }
 0x13f   : > { %10666 = vst [vmem:[#allocation19_spill] sm:$0xff] %v8380_v40 }
 0x140   : > { %v1736_v48 = vmax.f32 %v1608_v38, 0.0  ;;  %7018 = vmatmul.mubr.bf16.gmra.mrb[136].mxu1 %v1854_v41  ;;  %v1800_v51 = vmax.f32 %v1672_v39, 0.0 }
 0x141   : > { %7021 = vmatprep.mubr.bf16.mxu1 %v1855_v14 }
 0x142   : > { %v1856_v53 = vpack.c.bf16 %v1736_v48, %v1735_v47  ;;  %v8382_v45 = vpack.c.bf16 %v1800_v51, %v1799_v8 }
 0x143   : > { %v1027_v58 = vpop.f32.mrb[32].mxu0  ;;  %v1347_v10 = vpop.f32.mrb[32].mxu1 }
 0x144   : > { %v1609_v60 = vadd.f32 %v8208_v56, %v1027_v58  ;;  %v8385_v63 = vpop.f32.mrb[33].mxu0  ;;  %v1673_v4 = vadd.f32 %v8208_v56, %v1347_v10  ;;  %v8388_v6 = vpop.f32.mrb[33].mxu1 }
 0x145   : > { %10667 = vst [vmem:[#allocation20_spill] sm:$0xff] %v8385_v63  ;;  %10668 = vst [vmem:[#allocation21_spill] sm:$0xff] %v8388_v6  ;;  %v1031_v7 = vpop.f32.mrb[34].mxu0  ;;  %v1351_v17 = vpop.f32.mrb[34].mxu1 }
 0x146   : > { %v1610_v19 = vadd.f32 %v8208_v56, %v1031_v7  ;;  %v8391_v41 = vpop.f32.mrb[35].mxu0  ;;  %v1801_v14 = vmax.f32 %v1673_v4, 0.0  ;;  %v1674_v24 = vadd.f32 %v8208_v56, %v1351_v17  ;;  %v8394_v28 = vpop.f32.mrb[35].mxu1  ;;  %v1737_v32 = vmax.f32 %v1609_v60, 0.0 }
 0x147   : > { %10669 = vst [vmem:[#allocation22_spill] sm:$0xff] %v8391_v41  ;;  %10670 = vst [vmem:[#allocation23_spill] sm:$0xff] %v8394_v28 }
 0x148   : > { %v1738_v35 = vmax.f32 %v1610_v19, 0.0  ;;  %7022 = vmatmul.mubr.bf16.gmra.mrb[140].mxu1 %v1856_v53  ;;  %v1802_v38 = vmax.f32 %v1674_v24, 0.0 }
 0x14a   : > { %v1857_v8 = vpack.c.bf16 %v1738_v35, %v1737_v32  ;;  %v8396_v39 = vpack.c.bf16 %v1802_v38, %v1801_v14  ;;  %v7693_v32 = vld [vmem:[%s10594_s5 + $0x10] sm:$0xff]  }
 0x14b   : > { %v1037_v47 = vpop.f32.mrb[36].mxu0  ;;  %v1357_v48 = vpop.f32.mrb[36].mxu1  ;;  %7141 = vmatprep.subr.bf16.mxu1 %v7693_v32 }
 0x14c   : > { %v1611_v51 = vadd.f32 %v8208_v56, %v1037_v47  ;;  %v8399_v58 = vpop.f32.mrb[37].mxu0  ;;  %7025 = vmatprep.mubr.bf16.mxu1 %v1857_v8  ;;  %v1675_v10 = vadd.f32 %v8208_v56, %v1357_v48  ;;  %v8402_v4 = vpop.f32.mrb[37].mxu1  ;;  %7142 = vmatpush3.bf16.msra.mxu1 %v7693_v32 }
 0x14d   : > { %10671 = vst [vmem:[#allocation24_spill] sm:$0xff] %v8399_v58  ;;  %10672 = vst [vmem:[#allocation25_spill] sm:$0xff] %v8402_v4  ;;  %v1041_v7 = vpop.f32.mrb[38].mxu0  ;;  %v1361_v17 = vpop.f32.mrb[38].mxu1 }
 0x14e   : > { %v1612_v60 = vadd.f32 %v8208_v56, %v1041_v7  ;;  %v8405_v53 = vpop.f32.mrb[39].mxu0  ;;  %v1803_v19 = vmax.f32 %v1675_v10, 0.0  ;;  %v1676_v14 = vadd.f32 %v8208_v56, %v1361_v17  ;;  %v8408_v24 = vpop.f32.mrb[39].mxu1  ;;  %v1739_v35 = vmax.f32 %v1611_v51, 0.0 }
 0x14f   : > { %10673 = vst [vmem:[#allocation26_spill] sm:$0xff] %v8405_v53  ;;  %10674 = vst [vmem:[#allocation27_spill] sm:$0xff] %v8408_v24 }
 0x150   : > { %v1740_v38 = vmax.f32 %v1612_v60, 0.0  ;;  %v1804_v8 = vmax.f32 %v1676_v14, 0.0 }
 0x152   : > { %v1858_v47 = vpack.c.bf16 %v1740_v38, %v1739_v35  ;;  %v8413_v48 = vpack.c.bf16 %v1804_v8, %v1803_v19 }
 0x153   : > { %v1047_v7 = vpop.f32.mrb[40].mxu0  ;;  %v1367_v2 = vpop.f32.mrb[40].mxu1 }
 0x154   : > { %v1613_v10 = vadd.f32 %v8208_v56, %v1047_v7  ;;  %v8416_v28 = vpop.f32.mrb[41].mxu0  ;;  %7026 = vmatmul.mubr.bf16.gmra.mrb[144].mxu1 %v1858_v47  ;;  %v1677_v17 = vadd.f32 %v8208_v56, %v1367_v2  ;;  %v8419_v24 = vpop.f32.mrb[41].mxu1 }
 0x155   : > { %10675 = vst [vmem:[#allocation28_spill] sm:$0xff] %v8416_v28  ;;  %10676 = vst [vmem:[#allocation29_spill] sm:$0xff] %v8419_v24  ;;  %v1051_v6 = vpop.f32.mrb[42].mxu0  ;;  %v1371_v51 = vpop.f32.mrb[42].mxu1 }
 0x156   : > { %v1614_v60 = vadd.f32 %v8208_v56, %v1051_v6  ;;  %v8422_v14 = vpop.f32.mrb[43].mxu0  ;;  %v1805_v32 = vmax.f32 %v1677_v17, 0.0  ;;  %v1678_v19 = vadd.f32 %v8208_v56, %v1371_v51  ;;  %v8425_v35 = vpop.f32.mrb[43].mxu1  ;;  %v1741_v38 = vmax.f32 %v1613_v10, 0.0 }
 0x157   : > { %10677 = vst [vmem:[#allocation30_spill] sm:$0xff] %v8422_v14  ;;  %10678 = vst [vmem:[#allocation31_spill] sm:$0xff] %v8425_v35 }
 0x158   : > { %v1742_v8 = vmax.f32 %v1614_v60, 0.0  ;;  %v1806_v7 = vmax.f32 %v1678_v19, 0.0 }
 0x15a   : > { %v1859_v4 = vpack.c.bf16 %v1742_v8, %v1741_v38  ;;  %v8427_v47 = vpack.c.bf16 %v1806_v7, %v1805_v32 }
 0x15b   : > { %v1057_v2 = vpop.f32.mrb[44].mxu0  ;;  %v1377_v1 = vpop.f32.mrb[44].mxu1 }
 0x15c   : > { %v1615_v24 = vadd.f32 %v8208_v56, %v1057_v2  ;;  %v8430_v40 = vpop.f32.mrb[45].mxu0  ;;  %7029 = vmatprep.mubr.bf16.mxu1 %v1859_v4  ;;  %v1679_v6 = vadd.f32 %v8208_v56, %v1377_v1  ;;  %v8433_v17 = vpop.f32.mrb[45].mxu1 }
 0x15d   : > { %10679 = vst [vmem:[#allocation32_spill] sm:$0xff] %v8430_v40  ;;  %10680 = vst [vmem:[#allocation33_spill] sm:$0xff] %v8433_v17  ;;  %v1061_v51 = vpop.f32.mrb[46].mxu0  ;;  %v1381_v57 = vpop.f32.mrb[46].mxu1 }
 0x15e   : > { %v1616_v10 = vadd.f32 %v8208_v56, %v1061_v51  ;;  %v8436_v60 = vpop.f32.mrb[47].mxu0  ;;  %v1807_v19 = vmax.f32 %v1679_v6, 0.0  ;;  %v1680_v32 = vadd.f32 %v8208_v56, %v1381_v57  ;;  %v8439_v38 = vpop.f32.mrb[47].mxu1  ;;  %v1743_v8 = vmax.f32 %v1615_v24, 0.0 }
 0x15f   : > { %10681 = vst [vmem:[#allocation34_spill] sm:$0xff] %v8436_v60  ;;  %10682 = vst [vmem:[#allocation35_spill] sm:$0xff] %v8439_v38 }
 0x160   : > { %v1744_v7 = vmax.f32 %v1616_v10, 0.0  ;;  %v1808_v2 = vmax.f32 %v1680_v32, 0.0 }
 0x162   : > { %v1860_v35 = vpack.c.bf16 %v1744_v7, %v1743_v8  ;;  %v8441_v4 = vpack.c.bf16 %v1808_v2, %v1807_v19 }
 0x163   : > { %v1067_v1 = vpop.f32.mrb[48].mxu0  ;;  %v1387_v20 = vpop.f32.mrb[48].mxu1 }
 0x164   : > { %v1617_v17 = vadd.f32 %v8208_v56, %v1067_v1  ;;  %v8444_v3 = vpop.f32.mrb[49].mxu0  ;;  %7030 = vmatmul.mubr.bf16.gmra.mrb[148].mxu1 %v1860_v35  ;;  %v1681_v51 = vadd.f32 %v8208_v56, %v1387_v20  ;;  %v8447_v6 = vpop.f32.mrb[49].mxu1 }
 0x165   : > { %10683 = vst [vmem:[#allocation36_spill] sm:$0xff] %v8444_v3  ;;  %10684 = vst [vmem:[#allocation37_spill] sm:$0xff] %v8447_v6  ;;  %v1071_v57 = vpop.f32.mrb[50].mxu0  ;;  %v1391_v34 = vpop.f32.mrb[50].mxu1 }
 0x166   : > { %v1618_v24 = vadd.f32 %v8208_v56, %v1071_v57  ;;  %v8450_v10 = vpop.f32.mrb[51].mxu0  ;;  %v1809_v32 = vmax.f32 %v1681_v51, 0.0  ;;  %v1682_v19 = vadd.f32 %v8208_v56, %v1391_v34  ;;  %v8453_v8 = vpop.f32.mrb[51].mxu1  ;;  %v1745_v7 = vmax.f32 %v1617_v17, 0.0 }
 0x167   : > { %10685 = vst [vmem:[#allocation38_spill] sm:$0xff] %v8450_v10  ;;  %10686 = vst [vmem:[#allocation39_spill] sm:$0xff] %v8453_v8 }
 0x168   : > { %v1746_v2 = vmax.f32 %v1618_v24, 0.0  ;;  %v1810_v1 = vmax.f32 %v1682_v19, 0.0 }
 0x16a   : > { %v1861_v38 = vpack.c.bf16 %v1746_v2, %v1745_v7  ;;  %v8455_v35 = vpack.c.bf16 %v1810_v1, %v1809_v32  ;;  %v7694_v2 = vld [vmem:[%s10594_s5 + $0x18] sm:$0xff]  }
 0x16b   : > { %v1077_v20 = vpop.f32.mrb[52].mxu0  ;;  %v1397_v55 = vpop.f32.mrb[52].mxu1  ;;  %7143 = vmatprep.subr.bf16.mxu1 %v7694_v2 }
 0x16c   : > { %v1619_v6 = vadd.f32 %v8208_v56, %v1077_v20  ;;  %v8458_v23 = vpop.f32.mrb[53].mxu0  ;;  %7033 = vmatprep.mubr.bf16.mxu1 %v1861_v38  ;;  %v1683_v57 = vadd.f32 %v8208_v56, %v1397_v55  ;;  %v8461_v51 = vpop.f32.mrb[53].mxu1  ;;  %7144 = vmatpush3.bf16.msra.mxu1 %v7694_v2 }
 0x16d   : > { %10687 = vst [vmem:[#allocation40_spill] sm:$0xff] %v8458_v23  ;;  %10688 = vst [vmem:[#allocation41_spill] sm:$0xff] %v8461_v51  ;;  %v1081_v34 = vpop.f32.mrb[54].mxu0  ;;  %v1401_v62 = vpop.f32.mrb[54].mxu1 }
 0x16e   : > { %v1620_v17 = vadd.f32 %v8208_v56, %v1081_v34  ;;  %v8464_v24 = vpop.f32.mrb[55].mxu0  ;;  %v1811_v19 = vmax.f32 %v1683_v57, 0.0  ;;  %v1684_v32 = vadd.f32 %v8208_v56, %v1401_v62  ;;  %v8467_v7 = vpop.f32.mrb[55].mxu1  ;;  %v1747_v38 = vmax.f32 %v1619_v6, 0.0 }
 0x16f   : > { %10689 = vst [vmem:[#allocation42_spill] sm:$0xff] %v8464_v24  ;;  %10690 = vst [vmem:[#allocation43_spill] sm:$0xff] %v8467_v7 }
 0x170   : > { %v1748_v1 = vmax.f32 %v1620_v17, 0.0  ;;  %v1812_v55 = vmax.f32 %v1684_v32, 0.0 }
 0x172   : > { %v1862_v20 = vpack.c.bf16 %v1748_v1, %v1747_v38  ;;  %v8472_v8 = vpack.c.bf16 %v1812_v55, %v1811_v19 }
 0x173   : > { %v1087_v34 = vpop.f32.mrb[56].mxu0  ;;  %v1407_v51 = vpop.f32.mrb[56].mxu1 }
 0x174   : > { %v1621_v57 = vadd.f32 %v8208_v56, %v1087_v34  ;;  %v8475_v31 = vpop.f32.mrb[57].mxu0  ;;  %7034 = vmatmul.mubr.bf16.gmra.mrb[152].mxu1 %v1862_v20  ;;  %v1685_v62 = vadd.f32 %v8208_v56, %v1407_v51  ;;  %v8478_v7 = vpop.f32.mrb[57].mxu1 }
 0x175   : > { %10691 = vst [vmem:[#allocation44_spill] sm:$0xff] %v8475_v31  ;;  %10692 = vst [vmem:[#allocation45_spill] sm:$0xff] %v8478_v7  ;;  %v1091_v54 = vpop.f32.mrb[58].mxu0  ;;  %v1411_v6 = vpop.f32.mrb[58].mxu1 }
 0x176   : > { %v1622_v17 = vadd.f32 %v8208_v56, %v1091_v54  ;;  %v8481_v32 = vpop.f32.mrb[59].mxu0  ;;  %v1813_v2 = vmax.f32 %v1685_v62, 0.0  ;;  %v1686_v19 = vadd.f32 %v8208_v56, %v1411_v6  ;;  %v8484_v38 = vpop.f32.mrb[59].mxu1  ;;  %v1749_v1 = vmax.f32 %v1621_v57, 0.0 }
 0x177   : > { %10693 = vst [vmem:[#allocation46_spill] sm:$0xff] %v8481_v32  ;;  %10694 = vst [vmem:[#allocation47_spill] sm:$0xff] %v8484_v38 }
 0x178   : > { %v1750_v55 = vmax.f32 %v1622_v17, 0.0  ;;  %v1814_v34 = vmax.f32 %v1686_v19, 0.0 }
 0x17a   : > { %v1863_v22 = vpack.c.bf16 %v1750_v55, %v1749_v1  ;;  %v8486_v20 = vpack.c.bf16 %v1814_v34, %v1813_v2 }
 0x17b   : > { %v1097_v51 = vpop.f32.mrb[60].mxu0  ;;  %v1417_v12 = vpop.f32.mrb[60].mxu1 }
 0x17c   : > { %v1623_v7 = vadd.f32 %v8208_v56, %v1097_v51  ;;  %v8489_v36 = vpop.f32.mrb[61].mxu0  ;;  %7037 = vmatprep.mubr.bf16.mxu1 %v1863_v22  ;;  %v1687_v54 = vadd.f32 %v8208_v56, %v1417_v12  ;;  %v8492_v62 = vpop.f32.mrb[61].mxu1 }
 0x17d   : > { %10695 = vst [vmem:[#allocation48_spill] sm:$0xff] %v8489_v36  ;;  %10696 = vst [vmem:[#allocation49_spill] sm:$0xff] %v8492_v62  ;;  %v1101_v6 = vpop.f32.mrb[62].mxu0  ;;  %v1421_v5 = vpop.f32.mrb[62].mxu1 }
 0x17e   : > { %v1624_v57 = vadd.f32 %v8208_v56, %v1101_v6  ;;  %v8495_v17 = vpop.f32.mrb[63].mxu0  ;;  %v1815_v19 = vmax.f32 %v1687_v54, 0.0  ;;  %v1688_v2 = vadd.f32 %v8208_v56, %v1421_v5  ;;  %v8498_v1 = vpop.f32.mrb[63].mxu1  ;;  %v1751_v55 = vmax.f32 %v1623_v7, 0.0 }
 0x17f   : > { %10697 = vst [vmem:[#allocation50_spill] sm:$0xff] %v8495_v17  ;;  %10698 = vst [vmem:[#allocation51_spill] sm:$0xff] %v8498_v1 }
 0x180   : > { %v1752_v34 = vmax.f32 %v1624_v57, 0.0  ;;  %v1816_v51 = vmax.f32 %v1688_v2, 0.0 }
 0x182   : > { %v1864_v38 = vpack.c.bf16 %v1752_v34, %v1751_v55  ;;  %v8500_v22 = vpack.c.bf16 %v1816_v51, %v1815_v19 }
 0x183   : > { %v1107_v12 = vpop.f32.mrb[64].mxu0  ;;  %v1427_v29 = vpop.f32.mrb[64].mxu1 }
 0x184   : > { %v1625_v62 = vadd.f32 %v8208_v56, %v1107_v12  ;;  %v8503_v32 = vpop.f32.mrb[65].mxu0  ;;  %7038 = vmatmul.mubr.bf16.gmra.mrb[156].mxu1 %v1864_v38  ;;  %v1689_v6 = vadd.f32 %v8208_v56, %v1427_v29  ;;  %v8506_v54 = vpop.f32.mrb[65].mxu1 }
 0x185   : > { %10699 = vst [vmem:[#allocation52_spill] sm:$0xff] %v8503_v32  ;;  %10700 = vst [vmem:[#allocation53_spill] sm:$0xff] %v8506_v54  ;;  %v1111_v5 = vpop.f32.mrb[66].mxu0  ;;  %v1431_v17 = vpop.f32.mrb[66].mxu1 }
 0x186   : > { %v1626_v7 = vadd.f32 %v8208_v56, %v1111_v5  ;;  %v8509_v57 = vpop.f32.mrb[67].mxu0  ;;  %v1817_v2 = vmax.f32 %v1689_v6, 0.0  ;;  %v1690_v19 = vadd.f32 %v8208_v56, %v1431_v17  ;;  %v8512_v55 = vpop.f32.mrb[67].mxu1  ;;  %v1753_v34 = vmax.f32 %v1625_v62, 0.0 }
 0x187   : > { %10701 = vst [vmem:[#allocation54_spill] sm:$0xff] %v8509_v57  ;;  %10702 = vst [vmem:[#allocation55_spill] sm:$0xff] %v8512_v55 }
 0x188   : > { %v1754_v51 = vmax.f32 %v1626_v7, 0.0  ;;  %v1818_v12 = vmax.f32 %v1690_v19, 0.0 }
 0x18a   : > { %v1865_v1 = vpack.c.bf16 %v1754_v51, %v1753_v34  ;;  %v8514_v38 = vpack.c.bf16 %v1818_v12, %v1817_v2  ;;  %v7695_v51 = vld [vmem:[%s10594_s5 + $0x20] sm:$0xff]  }
 0x18b   : > { %v1117_v29 = vpop.f32.mrb[68].mxu0  ;;  %v1437_v32 = vpop.f32.mrb[68].mxu1  ;;  %7145 = vmatprep.subr.bf16.mxu1 %v7695_v51 }
 0x18c   : > { %v1627_v54 = vadd.f32 %v8208_v56, %v1117_v29  ;;  %v8517_v31 = vpop.f32.mrb[69].mxu0  ;;  %7041 = vmatprep.mubr.bf16.mxu1 %v1865_v1  ;;  %v1691_v5 = vadd.f32 %v8208_v56, %v1437_v32  ;;  %v8520_v6 = vpop.f32.mrb[69].mxu1  ;;  %7146 = vmatpush3.bf16.msra.mxu1 %v7695_v51 }
 0x18d   : > { %10703 = vst [vmem:[#allocation56_spill] sm:$0xff] %v8517_v31  ;;  %10704 = vst [vmem:[#allocation57_spill] sm:$0xff] %v8520_v6  ;;  %v1121_v17 = vpop.f32.mrb[70].mxu0  ;;  %v1441_v57 = vpop.f32.mrb[70].mxu1 }
 0x18e   : > { %v1628_v62 = vadd.f32 %v8208_v56, %v1121_v17  ;;  %v8523_v7 = vpop.f32.mrb[71].mxu0  ;;  %v1819_v19 = vmax.f32 %v1691_v5, 0.0  ;;  %v1692_v2 = vadd.f32 %v8208_v56, %v1441_v57  ;;  %v8526_v34 = vpop.f32.mrb[71].mxu1  ;;  %v1755_v1 = vmax.f32 %v1627_v54, 0.0 }
 0x18f   : > { %10705 = vst [vmem:[#allocation58_spill] sm:$0xff] %v8523_v7  ;;  %10706 = vst [vmem:[#allocation59_spill] sm:$0xff] %v8526_v34 }
 0x190   : > { %v1756_v12 = vmax.f32 %v1628_v62, 0.0  ;;  %v1820_v32 = vmax.f32 %v1692_v2, 0.0 }
 0x192   : > { %v1866_v29 = vpack.c.bf16 %v1756_v12, %v1755_v1  ;;  %v8531_v55 = vpack.c.bf16 %v1820_v32, %v1819_v19 }
 0x193   : > { %v1127_v17 = vpop.f32.mrb[72].mxu0  ;;  %v1447_v6 = vpop.f32.mrb[72].mxu1 }
 0x194   : > { %v1629_v5 = vadd.f32 %v8208_v56, %v1127_v17  ;;  %v8534_v7 = vpop.f32.mrb[73].mxu0  ;;  %7042 = vmatmul.mubr.bf16.gmra.mrb[160].mxu1 %v1866_v29  ;;  %v1693_v57 = vadd.f32 %v8208_v56, %v1447_v6  ;;  %v8537_v34 = vpop.f32.mrb[73].mxu1 }
 0x195   : > { %10707 = vst [vmem:[#allocation60_spill] sm:$0xff] %v8534_v7  ;;  %10708 = vst [vmem:[#allocation61_spill] sm:$0xff] %v8537_v34  ;;  %v1131_v31 = vpop.f32.mrb[74].mxu0  ;;  %v1451_v54 = vpop.f32.mrb[74].mxu1 }
 0x196   : > { %v1630_v62 = vadd.f32 %v8208_v56, %v1131_v31  ;;  %v8540_v2 = vpop.f32.mrb[75].mxu0  ;;  %v1821_v51 = vmax.f32 %v1693_v57, 0.0  ;;  %v1694_v19 = vadd.f32 %v8208_v56, %v1451_v54  ;;  %v8543_v1 = vpop.f32.mrb[75].mxu1  ;;  %v1757_v12 = vmax.f32 %v1629_v5, 0.0 }
 0x197   : > { %10709 = vst [vmem:[#allocation62_spill] sm:$0xff] %v8540_v2  ;;  %10710 = vst [vmem:[#allocation63_spill] sm:$0xff] %v8543_v1 }
 0x198   : > { %v1758_v32 = vmax.f32 %v1630_v62, 0.0  ;;  %v1822_v17 = vmax.f32 %v1694_v19, 0.0 }
 0x19a   : > { %v1867_v7 = vpack.c.bf16 %v1758_v32, %v1757_v12  ;;  %v8545_v29 = vpack.c.bf16 %v1822_v17, %v1821_v51 }
 0x19b   : > { %v1137_v6 = vpop.f32.mrb[76].mxu0  ;;  %v1457_v36 = vpop.f32.mrb[76].mxu1 }
 0x19c   : > { %v1631_v34 = vadd.f32 %v8208_v56, %v1137_v6  ;;  %v8548_v10 = vpop.f32.mrb[77].mxu0  ;;  %7045 = vmatprep.mubr.bf16.mxu1 %v1867_v7  ;;  %v1695_v31 = vadd.f32 %v8208_v56, %v1457_v36  ;;  %v8551_v57 = vpop.f32.mrb[77].mxu1 }
 0x19d   : > { %10711 = vst [vmem:[#allocation64_spill] sm:$0xff] %v8548_v10  ;;  %10712 = vst [vmem:[#allocation65_spill] sm:$0xff] %v8551_v57  ;;  %v1141_v54 = vpop.f32.mrb[78].mxu0  ;;  %v1461_v2 = vpop.f32.mrb[78].mxu1 }
 0x19e   : > { %v1632_v5 = vadd.f32 %v8208_v56, %v1141_v54  ;;  %v8554_v62 = vpop.f32.mrb[79].mxu0  ;;  %v1823_v19 = vmax.f32 %v1695_v31, 0.0  ;;  %v1696_v51 = vadd.f32 %v8208_v56, %v1461_v2  ;;  %v8557_v12 = vpop.f32.mrb[79].mxu1  ;;  %v1759_v32 = vmax.f32 %v1631_v34, 0.0 }
 0x19f   : > { %10713 = vst [vmem:[#allocation66_spill] sm:$0xff] %v8554_v62  ;;  %10714 = vst [vmem:[#allocation67_spill] sm:$0xff] %v8557_v12 }
 0x1a0   : > { %v1760_v17 = vmax.f32 %v1632_v5, 0.0  ;;  %v1824_v6 = vmax.f32 %v1696_v51, 0.0 }
 0x1a2   : > { %v1868_v1 = vpack.c.bf16 %v1760_v17, %v1759_v32  ;;  %v8559_v7 = vpack.c.bf16 %v1824_v6, %v1823_v19 }
 0x1a3   : > { %v1147_v36 = vpop.f32.mrb[80].mxu0  ;;  %v1467_v10 = vpop.f32.mrb[80].mxu1 }
 0x1a4   : > { %v1633_v57 = vadd.f32 %v8208_v56, %v1147_v36  ;;  %v8562_v24 = vpop.f32.mrb[81].mxu0  ;;  %7046 = vmatmul.mubr.bf16.gmra.mrb[164].mxu1 %v1868_v1  ;;  %v1697_v54 = vadd.f32 %v8208_v56, %v1467_v10  ;;  %v8565_v31 = vpop.f32.mrb[81].mxu1 }
 0x1a5   : > { %10715 = vst [vmem:[#allocation68_spill] sm:$0xff] %v8562_v24  ;;  %10716 = vst [vmem:[#allocation69_spill] sm:$0xff] %v8565_v31  ;;  %v1151_v2 = vpop.f32.mrb[82].mxu0  ;;  %v1471_v62 = vpop.f32.mrb[82].mxu1 }
 0x1a6   : > { %v1634_v34 = vadd.f32 %v8208_v56, %v1151_v2  ;;  %v8568_v5 = vpop.f32.mrb[83].mxu0  ;;  %v1825_v51 = vmax.f32 %v1697_v54, 0.0  ;;  %v1698_v19 = vadd.f32 %v8208_v56, %v1471_v62  ;;  %v8571_v32 = vpop.f32.mrb[83].mxu1  ;;  %v1761_v17 = vmax.f32 %v1633_v57, 0.0 }
 0x1a7   : > { %10717 = vst [vmem:[#allocation70_spill] sm:$0xff] %v8568_v5  ;;  %10718 = vst [vmem:[#allocation71_spill] sm:$0xff] %v8571_v32 }
 0x1a8   : > { %v1762_v6 = vmax.f32 %v1634_v34, 0.0  ;;  %v1826_v36 = vmax.f32 %v1698_v19, 0.0 }
 0x1aa   : > { %v1869_v12 = vpack.c.bf16 %v1762_v6, %v1761_v17  ;;  %v8573_v1 = vpack.c.bf16 %v1826_v36, %v1825_v51  ;;  %v7696_v6 = vld [vmem:[%s10594_s5 + $0x28] sm:$0xff]  }
 0x1ab   : > { %v1157_v10 = vpop.f32.mrb[84].mxu0  ;;  %v1477_v24 = vpop.f32.mrb[84].mxu1  ;;  %7147 = vmatprep.subr.bf16.mxu1 %v7696_v6 }
 0x1ac   : > { %v1635_v31 = vadd.f32 %v8208_v56, %v1157_v10  ;;  %v8576_v3 = vpop.f32.mrb[85].mxu0  ;;  %7049 = vmatprep.mubr.bf16.mxu1 %v1869_v12  ;;  %v1699_v2 = vadd.f32 %v8208_v56, %v1477_v24  ;;  %v8579_v54 = vpop.f32.mrb[85].mxu1  ;;  %7148 = vmatpush3.bf16.msra.mxu1 %v7696_v6 }
 0x1ad   : > { %10719 = vst [vmem:[#allocation72_spill] sm:$0xff] %v8576_v3  ;;  %10720 = vst [vmem:[#allocation73_spill] sm:$0xff] %v8579_v54  ;;  %v1161_v62 = vpop.f32.mrb[86].mxu0  ;;  %v1481_v5 = vpop.f32.mrb[86].mxu1 }
 0x1ae   : > { %v1636_v57 = vadd.f32 %v8208_v56, %v1161_v62  ;;  %v8582_v34 = vpop.f32.mrb[87].mxu0  ;;  %v1827_v19 = vmax.f32 %v1699_v2, 0.0  ;;  %v1700_v51 = vadd.f32 %v8208_v56, %v1481_v5  ;;  %v8585_v17 = vpop.f32.mrb[87].mxu1  ;;  %v1763_v12 = vmax.f32 %v1635_v31, 0.0 }
 0x1af   : > { %10721 = vst [vmem:[#allocation74_spill] sm:$0xff] %v8582_v34  ;;  %10722 = vst [vmem:[#allocation75_spill] sm:$0xff] %v8585_v17 }
 0x1b0   : > { %v1764_v36 = vmax.f32 %v1636_v57, 0.0  ;;  %v1828_v24 = vmax.f32 %v1700_v51, 0.0 }
 0x1b2   : > { %v1870_v10 = vpack.c.bf16 %v1764_v36, %v1763_v12  ;;  %v8590_v32 = vpack.c.bf16 %v1828_v24, %v1827_v19 }
 0x1b3   : > { %v1167_v62 = vpop.f32.mrb[88].mxu0  ;;  %v1487_v54 = vpop.f32.mrb[88].mxu1 }
 0x1b4   : > { %v1637_v2 = vadd.f32 %v8208_v56, %v1167_v62  ;;  %v8593_v34 = vpop.f32.mrb[89].mxu0  ;;  %7050 = vmatmul.mubr.bf16.gmra.mrb[168].mxu1 %v1870_v10  ;;  %v1701_v5 = vadd.f32 %v8208_v56, %v1487_v54  ;;  %v8596_v17 = vpop.f32.mrb[89].mxu1 }
 0x1b5   : > { %10723 = vst [vmem:[#allocation76_spill] sm:$0xff] %v8593_v34  ;;  %10724 = vst [vmem:[#allocation77_spill] sm:$0xff] %v8596_v17  ;;  %v1171_v3 = vpop.f32.mrb[90].mxu0  ;;  %v1491_v31 = vpop.f32.mrb[90].mxu1 }
 0x1b6   : > { %v1638_v57 = vadd.f32 %v8208_v56, %v1171_v3  ;;  %v8599_v51 = vpop.f32.mrb[91].mxu0  ;;  %v1829_v6 = vmax.f32 %v1701_v5, 0.0  ;;  %v1702_v19 = vadd.f32 %v8208_v56, %v1491_v31  ;;  %v8602_v12 = vpop.f32.mrb[91].mxu1  ;;  %v1765_v36 = vmax.f32 %v1637_v2, 0.0  ;;  %v8615_v2 = vld [vmem:[%s10591_s2] ss:$0 sm:$0xff] }
 0x1b7   : > { %10725 = vst [vmem:[#allocation78_spill] sm:$0xff] %v8599_v51  ;;  %10726 = vst [vmem:[#allocation79_spill] sm:$0xff] %v8602_v12 }
 0x1b8   : > { %v1766_v24 = vmax.f32 %v1638_v57, 0.0  ;;  %v1830_v62 = vmax.f32 %v1702_v19, 0.0 }
 0x1ba   : > { %v1871_v34 = vpack.c.bf16 %v1766_v24, %v1765_v36  ;;  %v8604_v10 = vpack.c.bf16 %v1830_v62, %v1829_v6 }
 0x1bb   : > { %v1177_v54 = vpop.f32.mrb[92].mxu0  ;;  %v1497_v23 = vpop.f32.mrb[92].mxu1 }
 0x1bc   : > { %v1639_v17 = vadd.f32 %v8208_v56, %v1177_v54  ;;  %v8607_v14 = vpop.f32.mrb[93].mxu0  ;;  %7053 = vmatprep.mubr.bf16.mxu1 %v1871_v34  ;;  %v1703_v3 = vadd.f32 %v8208_v56, %v1497_v23  ;;  %v8610_v5 = vpop.f32.mrb[93].mxu1 }
 0x1bd   : > { %10727 = vst [vmem:[#allocation80_spill] sm:$0xff] %v8607_v14  ;;  %10728 = vst [vmem:[#allocation81_spill] sm:$0xff] %v8610_v5  ;;  %v1181_v31 = vpop.f32.mrb[94].mxu0  ;;  %v1501_v51 = vpop.f32.mrb[94].mxu1 }
 0x1be   : > { %v1640_v57 = vadd.f32 %v8615_v2, %v1181_v31  ;;  %v8618_v6 = vpop.f32.mrb[95].mxu0  ;;  %v1831_v19 = vmax.f32 %v1703_v3, 0.0  ;;  %v1704_v36 = vadd.f32 %v8615_v2, %v1501_v51  ;;  %v8621_v24 = vpop.f32.mrb[95].mxu1  ;;  %v1767_v34 = vmax.f32 %v1639_v17, 0.0 }
 0x1bf   : > { %10729 = vst [vmem:[#allocation82_spill] sm:$0xff] %v8618_v6  ;;  %10730 = vst [vmem:[#allocation83_spill] sm:$0xff] %v8621_v24 }
 0x1c0   : > { %v1768_v56 = vmax.f32 %v1640_v57, 0.0  ;;  %v1832_v23 = vmax.f32 %v1704_v36, 0.0 }
 0x1c2   : > { %v1872_v62 = vpack.c.bf16 %v1768_v56, %v1767_v34  ;;  %v8623_v54 = vpack.c.bf16 %v1832_v23, %v1831_v19 }
 0x1c3   : > { %v1187_v12 = vpop.f32.mrb[96].mxu0  ;;  %v1507_v5 = vpop.f32.mrb[96].mxu1 }
 0x1c4   : > { %v1641_v14 = vadd.f32 %v8615_v2, %v1187_v12  ;;  %v8626_v60 = vpop.f32.mrb[97].mxu0  ;;  %7054 = vmatmul.mubr.bf16.gmra.mrb[172].mxu1 %v1872_v62  ;;  %v1705_v31 = vadd.f32 %v8615_v2, %v1507_v5  ;;  %v8629_v3 = vpop.f32.mrb[97].mxu1 }
 0x1c5   : > { %10731 = vst [vmem:[#allocation84_spill] sm:$0xff] %v8626_v60  ;;  %10732 = vst [vmem:[#allocation85_spill] sm:$0xff] %v8629_v3  ;;  %v1191_v51 = vpop.f32.mrb[98].mxu0  ;;  %v1511_v6 = vpop.f32.mrb[98].mxu1 }
 0x1c6   : > { %v1642_v17 = vadd.f32 %v8615_v2, %v1191_v51  ;;  %v8632_v57 = vpop.f32.mrb[99].mxu0  ;;  %v1833_v36 = vmax.f32 %v1705_v31, 0.0  ;;  %v1706_v19 = vadd.f32 %v8615_v2, %v1511_v6  ;;  %v8635_v34 = vpop.f32.mrb[99].mxu1  ;;  %v1769_v56 = vmax.f32 %v1641_v14, 0.0 }
 0x1c7   : > { %10733 = vst [vmem:[#allocation86_spill] sm:$0xff] %v8632_v57  ;;  %10734 = vst [vmem:[#allocation87_spill] sm:$0xff] %v8635_v34 }
 0x1c8   : > { %v1770_v12 = vmax.f32 %v1642_v17, 0.0  ;;  %v1834_v23 = vmax.f32 %v1706_v19, 0.0 }
 0x1ca   : > { %v1873_v24 = vpack.c.bf16 %v1770_v12, %v1769_v56  ;;  %v8637_v62 = vpack.c.bf16 %v1834_v23, %v1833_v36  ;;  %v7697_v12 = vld [vmem:[%s10594_s5 + $0x30] sm:$0xff]  }
 0x1cb   : > { %v1197_v5 = vpop.f32.mrb[100].mxu0  ;;  %v1517_v60 = vpop.f32.mrb[100].mxu1  ;;  %7149 = vmatprep.subr.bf16.mxu1 %v7697_v12 }
 0x1cc   : > { %v1643_v3 = vadd.f32 %v8615_v2, %v1197_v5  ;;  %v8640_v28 = vpop.f32.mrb[101].mxu0  ;;  %7057 = vmatprep.mubr.bf16.mxu1 %v1873_v24  ;;  %v1707_v51 = vadd.f32 %v8615_v2, %v1517_v60  ;;  %v8643_v31 = vpop.f32.mrb[101].mxu1  ;;  %7150 = vmatpush3.bf16.msra.mxu1 %v7697_v12 }
 0x1cd   : > { %10735 = vst [vmem:[#allocation88_spill] sm:$0xff] %v8640_v28  ;;  %10736 = vst [vmem:[#allocation89_spill] sm:$0xff] %v8643_v31  ;;  %v1201_v6 = vpop.f32.mrb[102].mxu0  ;;  %v1521_v57 = vpop.f32.mrb[102].mxu1 }
 0x1ce   : > { %v1644_v14 = vadd.f32 %v8615_v2, %v1201_v6  ;;  %v8646_v17 = vpop.f32.mrb[103].mxu0  ;;  %v1835_v19 = vmax.f32 %v1707_v51, 0.0  ;;  %v1708_v36 = vadd.f32 %v8615_v2, %v1521_v57  ;;  %v8649_v56 = vpop.f32.mrb[103].mxu1  ;;  %v1771_v24 = vmax.f32 %v1643_v3, 0.0 }
 0x1cf   : > { %10737 = vst [vmem:[#allocation90_spill] sm:$0xff] %v8646_v17  ;;  %10738 = vst [vmem:[#allocation91_spill] sm:$0xff] %v8649_v56 }
 0x1d0   : > { %v1772_v23 = vmax.f32 %v1644_v14, 0.0  ;;  %v1836_v60 = vmax.f32 %v1708_v36, 0.0 }
 0x1d2   : > { %v1874_v5 = vpack.c.bf16 %v1772_v23, %v1771_v24  ;;  %v8654_v34 = vpack.c.bf16 %v1836_v60, %v1835_v19 }
 0x1d3   : > { %v1207_v6 = vpop.f32.mrb[104].mxu0  ;;  %v1527_v31 = vpop.f32.mrb[104].mxu1 }
 0x1d4   : > { %v1645_v51 = vadd.f32 %v8615_v2, %v1207_v6  ;;  %v8657_v17 = vpop.f32.mrb[105].mxu0  ;;  %7058 = vmatmul.mubr.bf16.gmra.mrb[176].mxu1 %v1874_v5  ;;  %v1709_v57 = vadd.f32 %v8615_v2, %v1527_v31  ;;  %v8660_v56 = vpop.f32.mrb[105].mxu1 }
 0x1d5   : > { %10739 = vst [vmem:[#allocation92_spill] sm:$0xff] %v8657_v17  ;;  %10740 = vst [vmem:[#allocation93_spill] sm:$0xff] %v8660_v56  ;;  %v1211_v28 = vpop.f32.mrb[106].mxu0  ;;  %v1531_v3 = vpop.f32.mrb[106].mxu1 }
 0x1d6   : > { %v1646_v14 = vadd.f32 %v8615_v2, %v1211_v28  ;;  %v8663_v36 = vpop.f32.mrb[107].mxu0  ;;  %v1837_v12 = vmax.f32 %v1709_v57, 0.0  ;;  %v1710_v19 = vadd.f32 %v8615_v2, %v1531_v3  ;;  %v8666_v24 = vpop.f32.mrb[107].mxu1  ;;  %v1773_v23 = vmax.f32 %v1645_v51, 0.0 }
 0x1d7   : > { %10741 = vst [vmem:[#allocation94_spill] sm:$0xff] %v8663_v36  ;;  %10742 = vst [vmem:[#allocation95_spill] sm:$0xff] %v8666_v24 }
 0x1d8   : > { %v1774_v60 = vmax.f32 %v1646_v14, 0.0  ;;  %v1838_v6 = vmax.f32 %v1710_v19, 0.0 }
 0x1da   : > { %v1875_v17 = vpack.c.bf16 %v1774_v60, %v1773_v23  ;;  %v8668_v5 = vpack.c.bf16 %v1838_v6, %v1837_v12 }
 0x1db   : > { %v1217_v31 = vpop.f32.mrb[108].mxu0  ;;  %v1537_v40 = vpop.f32.mrb[108].mxu1 }
 0x1dc   : > { %v1647_v56 = vadd.f32 %v8615_v2, %v1217_v31  ;;  %v8671_v41 = vpop.f32.mrb[109].mxu0  ;;  %7061 = vmatprep.mubr.bf16.mxu1 %v1875_v17  ;;  %v1711_v28 = vadd.f32 %v8615_v2, %v1537_v40  ;;  %v8674_v57 = vpop.f32.mrb[109].mxu1 }
 0x1dd   : > { %10743 = vst [vmem:[#allocation96_spill] sm:$0xff] %v8671_v41  ;;  %10744 = vst [vmem:[#allocation97_spill] sm:$0xff] %v8674_v57  ;;  %v1221_v3 = vpop.f32.mrb[110].mxu0  ;;  %v1541_v36 = vpop.f32.mrb[110].mxu1 }
 0x1de   : > { %v1648_v51 = vadd.f32 %v8615_v2, %v1221_v3  ;;  %v8677_v14 = vpop.f32.mrb[111].mxu0  ;;  %v1839_v19 = vmax.f32 %v1711_v28, 0.0  ;;  %v1712_v12 = vadd.f32 %v8615_v2, %v1541_v36  ;;  %v8680_v23 = vpop.f32.mrb[111].mxu1  ;;  %v1775_v60 = vmax.f32 %v1647_v56, 0.0 }
 0x1df   : > { %10745 = vst [vmem:[#allocation98_spill] sm:$0xff] %v8677_v14  ;;  %10746 = vst [vmem:[#allocation99_spill] sm:$0xff] %v8680_v23 }
 0x1e0   : > { %v1776_v6 = vmax.f32 %v1648_v51, 0.0  ;;  %v1840_v31 = vmax.f32 %v1712_v12, 0.0 }
 0x1e2   : > { %v1876_v24 = vpack.c.bf16 %v1776_v6, %v1775_v60  ;;  %v8682_v17 = vpack.c.bf16 %v1840_v31, %v1839_v19 }
 0x1e3   : > { %v1227_v40 = vpop.f32.mrb[112].mxu0  ;;  %v1547_v41 = vpop.f32.mrb[112].mxu1 }
 0x1e4   : > { %v1649_v57 = vadd.f32 %v8615_v2, %v1227_v40  ;;  %v8685_v53 = vpop.f32.mrb[113].mxu0  ;;  %7062 = vmatmul.mubr.bf16.gmra.mrb[180].mxu1 %v1876_v24  ;;  %v1713_v3 = vadd.f32 %v8615_v2, %v1547_v41  ;;  %v8688_v28 = vpop.f32.mrb[113].mxu1 }
 0x1e5   : > { %10747 = vst [vmem:[#allocation100_spill] sm:$0xff] %v8685_v53  ;;  %10748 = vst [vmem:[#allocation101_spill] sm:$0xff] %v8688_v28  ;;  %v1231_v36 = vpop.f32.mrb[114].mxu0  ;;  %v1551_v14 = vpop.f32.mrb[114].mxu1 }
 0x1e6   : > { %v1650_v56 = vadd.f32 %v8615_v2, %v1231_v36  ;;  %v8691_v51 = vpop.f32.mrb[115].mxu0  ;;  %v1841_v12 = vmax.f32 %v1713_v3, 0.0  ;;  %v1714_v19 = vadd.f32 %v8615_v2, %v1551_v14  ;;  %v8694_v60 = vpop.f32.mrb[115].mxu1  ;;  %v1777_v6 = vmax.f32 %v1649_v57, 0.0 }
 0x1e7   : > { %10749 = vst [vmem:[#allocation102_spill] sm:$0xff] %v8691_v51  ;;  %10750 = vst [vmem:[#allocation103_spill] sm:$0xff] %v8694_v60 }
 0x1e8   : > { %v1778_v31 = vmax.f32 %v1650_v56, 0.0  ;;  %v1842_v40 = vmax.f32 %v1714_v19, 0.0 }
 0x1ea   : > { %v1877_v23 = vpack.c.bf16 %v1778_v31, %v1777_v6  ;;  %v8696_v24 = vpack.c.bf16 %v1842_v40, %v1841_v12  ;;  %v7698_v31 = vld [vmem:[%s10596_s7] sm:$0xff]  }
 0x1eb   : > { %v1237_v41 = vpop.f32.mrb[116].mxu0  ;;  %v1557_v53 = vpop.f32.mrb[116].mxu1  ;;  %7281 = vmatprep.subr.bf16.mxu0 %v7698_v31 }
 0x1ec   : > { %v1651_v28 = vadd.f32 %v8615_v2, %v1237_v41  ;;  %v8699_v63 = vpop.f32.mrb[117].mxu0  ;;  %7065 = vmatprep.mubr.bf16.mxu1 %v1877_v23  ;;  %v1715_v36 = vadd.f32 %v8615_v2, %v1557_v53  ;;  %v8702_v3 = vpop.f32.mrb[117].mxu1  ;;  %v7699_v53 = vld [vmem:[%s10594_s5 + $0x38] sm:$0xff]   ;;  %7282 = vmatpush3.bf16.msra.mxu0 %v7698_v31 }
 0x1ed   : > { %10751 = vst [vmem:[#allocation104_spill] sm:$0xff] %v8699_v63  ;;  %10752 = vst [vmem:[#allocation105_spill] sm:$0xff] %v8702_v3  ;;  %v1241_v14 = vpop.f32.mrb[118].mxu0  ;;  %v1561_v51 = vpop.f32.mrb[118].mxu1  ;;  %7151 = vmatprep.subr.bf16.mxu1 %v7699_v53 }
 0x1ee   : > { %v1652_v57 = vadd.f32 %v8615_v2, %v1241_v14  ;;  %v8705_v56 = vpop.f32.mrb[119].mxu0  ;;  %v1843_v19 = vmax.f32 %v1715_v36, 0.0  ;;  %v1716_v12 = vadd.f32 %v8615_v2, %v1561_v51  ;;  %v8708_v6 = vpop.f32.mrb[119].mxu1  ;;  %v1779_v23 = vmax.f32 %v1651_v28, 0.0  ;;  %7152 = vmatpush3.bf16.msra.mxu1 %v7699_v53 }
 0x1ef   : > { %10753 = vst [vmem:[#allocation106_spill] sm:$0xff] %v8705_v56  ;;  %10754 = vst [vmem:[#allocation107_spill] sm:$0xff] %v8708_v6 }
 0x1f0   : > { %v1780_v40 = vmax.f32 %v1652_v57, 0.0  ;;  %v1844_v41 = vmax.f32 %v1716_v12, 0.0 }
 0x1f2   : > { %v1878_v36 = vpack.c.bf16 %v1780_v40, %v1779_v23  ;;  %v8716_v14 = vpack.c.bf16 %v1844_v41, %v1843_v19 }
 0x1f3   : > { %v1247_v51 = vpop.f32.mrb[120].mxu0  ;;  %v1567_v60 = vpop.f32.mrb[120].mxu1 }
 0x1f4   : > { %v1653_v6 = vadd.f32 %v8615_v2, %v1247_v51  ;;  %v8719_v3 = vpop.f32.mrb[121].mxu0  ;;  %7066 = vmatmul.mubr.bf16.gmra.mrb[184].mxu1 %v1878_v36  ;;  %v1717_v56 = vadd.f32 %v8615_v2, %v1567_v60  ;;  %v8722_v63 = vpop.f32.mrb[121].mxu1 }
 0x1f5   : > { %10755 = vst [vmem:[#allocation108_spill] sm:$0xff] %v8719_v3  ;;  %10756 = vst [vmem:[#allocation109_spill] sm:$0xff] %v8722_v63  ;;  %v1251_v28 = vpop.f32.mrb[122].mxu0  ;;  %v1571_v57 = vpop.f32.mrb[122].mxu1 }
 0x1f6   : > { %v1654_v12 = vadd.f32 %v8615_v2, %v1251_v28  ;;  %v8725_v31 = vpop.f32.mrb[123].mxu0  ;;  %v1845_v53 = vmax.f32 %v1717_v56, 0.0  ;;  %v1718_v19 = vadd.f32 %v8615_v2, %v1571_v57  ;;  %v8728_v23 = vpop.f32.mrb[123].mxu1  ;;  %v1781_v40 = vmax.f32 %v1653_v6, 0.0 }
 0x1f7   : > { %10757 = vst [vmem:[#allocation110_spill] sm:$0xff] %v8725_v31  ;;  %10758 = vst [vmem:[#allocation111_spill] sm:$0xff] %v8728_v23 }
 0x1f8   : > { %v1782_v41 = vmax.f32 %v1654_v12, 0.0  ;;  %v1846_v51 = vmax.f32 %v1718_v19, 0.0 }
 0x1fa   : > { %v1879_v3 = vpack.c.bf16 %v1782_v41, %v1781_v40  ;;  %v8730_v36 = vpack.c.bf16 %v1846_v51, %v1845_v53 }
 0x1fb   : > { %v1257_v60 = vpop.f32.mrb[124].mxu0  ;;  %v1577_v58 = vpop.f32.mrb[124].mxu1 }
 0x1fc   : > { %v1655_v63 = vadd.f32 %v8615_v2, %v1257_v60  ;;  %v8733_v37 = vpop.f32.mrb[125].mxu0  ;;  %7069 = vmatprep.mubr.bf16.mxu1 %v1879_v3  ;;  %v1719_v28 = vadd.f32 %v8615_v2, %v1577_v58  ;;  %v8736_v56 = vpop.f32.mrb[125].mxu1  ;;  %v8747_v58 = vld [vmem:[%s10593_s4] ss:$0 sm:$0xff] }
 0x1fd   : > { %10759 = vst [vmem:[#allocation112_spill] sm:$0xff] %v8733_v37  ;;  %10760 = vst [vmem:[#allocation113_spill] sm:$0xff] %v8736_v56  ;;  %v1261_v57 = vpop.f32.mrb[126].mxu0  ;;  %v1581_v31 = vpop.f32.mrb[126].mxu1 }
 0x1fe   : > { %v1656_v6 = vadd.f32 %v8615_v2, %v1261_v57  ;;  %v8739_v12 = vpop.f32.mrb[127].mxu0  ;;  %v1847_v19 = vmax.f32 %v1719_v28, 0.0  ;;  %v1720_v53 = vadd.f32 %v8615_v2, %v1581_v31  ;;  %v8742_v40 = vpop.f32.mrb[127].mxu1  ;;  %v1783_v41 = vmax.f32 %v1655_v63, 0.0 }
 0x1ff   : > { %10761 = vst [vmem:[#allocation114_spill] sm:$0xff] %v8739_v12  ;;  %10762 = vst [vmem:[#allocation115_spill] sm:$0xff] %v8742_v40 }
 0x200   : > { %v1784_v51 = vmax.f32 %v1656_v6, 0.0  ;;  %v1848_v60 = vmax.f32 %v1720_v53, 0.0 }
 0x202   : > { %v1880_v3 = vpack.c.bf16 %v1784_v51, %v1783_v41  ;;  %v8749_v23 = vpack.c.bf16 %v1848_v60, %v1847_v19 }
 0x203   : > { %v7011_v56 = vpop.f32.mrb[128].mxu1 }
 0x204   : > { %v2027_v57 = vadd.f32 %v7011_v56, %v8747_v58  ;;  %v2018_v12 = vpop.f32.mrb[129].mxu1  ;;  %7070 = vmatmul.mubr.bf16.gmra.mrb[188].mxu1 %v1880_v3 }
 0x205   : > { %v2019_v2 = vadd.f32 %v8747_v58, %v2018_v12  ;;  %v7012_v31 = vpop.f32.mrb[130].mxu1  ;;  %7073 = vmatprep.mubr.bf16.mxu1 %v8238_v21 }
 0x206   : > { %v2030_v63 = vadd.f32 %v7012_v31, %v8747_v58  ;;  %v2021_v28 = vpop.f32.mrb[131].mxu1  ;;  %v2531_v53 = vmax.f32 %v2027_v57, 0.0 }
 0x207   : > { %v2022_v6 = vadd.f32 %v8747_v58, %v2021_v28  ;;  %v2529_v41 = vmax.f32 %v2019_v2, 0.0 }
 0x208   : > { %v2532_v40 = vmax.f32 %v2030_v63, 0.0 }
 0x209   : > { %v2530_v19 = vmax.f32 %v2022_v6, 0.0 }
 0x20a   : > { %v8756_v51 = vpack.c.bf16 %v2532_v40, %v2531_v53  ;;  %v7700_v40 = vld [vmem:[%s10596_s7 + $0x8] sm:$0xff]  }
 0x20b   : > { %v7015_v60 = vpop.f32.mrb[132].mxu1  ;;  %v8758_v56 = vpack.c.bf16 %v2530_v19, %v2529_v41  ;;  %7283 = vmatprep.subr.bf16.mxu0 %v7700_v40 }
 0x20c   : > { %v2043_v3 = vadd.f32 %v7015_v60, %v8747_v58  ;;  %v2034_v12 = vpop.f32.mrb[133].mxu1  ;;  %7074 = vmatmul.mubr.bf16.gmra.mrb[192].mxu1 %v8268_v46  ;;  %7284 = vmatpush3.bf16.msra.mxu0 %v7700_v40 }
 0x20d   : > { %v2035_v21 = vadd.f32 %v8747_v58, %v2034_v12  ;;  %v7016_v31 = vpop.f32.mrb[134].mxu1  ;;  %7077 = vmatprep.mubr.bf16.mxu1 %v8292_v11 }
 0x20e   : > { %v2046_v57 = vadd.f32 %v7016_v31, %v8747_v58  ;;  %v2037_v63 = vpop.f32.mrb[135].mxu1  ;;  %v2535_v28 = vmax.f32 %v2043_v3, 0.0 }
 0x20f   : > { %v2038_v2 = vadd.f32 %v8747_v58, %v2037_v63  ;;  %v2533_v53 = vmax.f32 %v2035_v21, 0.0 }
 0x210   : > { %v2536_v6 = vmax.f32 %v2046_v57, 0.0 }
 0x211   : > { %v2534_v41 = vmax.f32 %v2038_v2, 0.0 }
 0x212   : > { %v8769_v46 = vpack.c.bf16 %v2536_v6, %v2535_v28 }
 0x213   : > { %v7019_v19 = vpop.f32.mrb[136].mxu1  ;;  %v8771_v60 = vpack.c.bf16 %v2534_v41, %v2533_v53 }
 0x214   : > { %v2059_v11 = vadd.f32 %v7019_v19, %v8747_v58  ;;  %v2050_v12 = vpop.f32.mrb[137].mxu1  ;;  %7078 = vmatmul.mubr.bf16.gmra.mrb[196].mxu1 %v8316_v43 }
 0x215   : > { %v2051_v31 = vadd.f32 %v8747_v58, %v2050_v12  ;;  %v7020_v37 = vpop.f32.mrb[138].mxu1  ;;  %7081 = vmatprep.mubr.bf16.mxu1 %v8333_v13 }
 0x216   : > { %v2062_v3 = vadd.f32 %v7020_v37, %v8747_v58  ;;  %v2053_v21 = vpop.f32.mrb[139].mxu1  ;;  %v2539_v63 = vmax.f32 %v2059_v11, 0.0 }
 0x217   : > { %v2054_v57 = vadd.f32 %v8747_v58, %v2053_v21  ;;  %v2537_v2 = vmax.f32 %v2051_v31, 0.0 }
 0x218   : > { %v2540_v40 = vmax.f32 %v2062_v3, 0.0 }
 0x219   : > { %v2538_v28 = vmax.f32 %v2054_v57, 0.0 }
 0x21a   : > { %v8779_v6 = vpack.c.bf16 %v2540_v40, %v2539_v63 }
 0x21b   : > { %v7023_v53 = vpop.f32.mrb[140].mxu1  ;;  %v8781_v41 = vpack.c.bf16 %v2538_v28, %v2537_v2 }
 0x21c   : > { %v2075_v43 = vadd.f32 %v7023_v53, %v8747_v58  ;;  %v2066_v19 = vpop.f32.mrb[141].mxu1  ;;  %7082 = vmatmul.mubr.bf16.gmra.mrb[200].mxu1 %v8353_v44 }
 0x21d   : > { %v2067_v13 = vadd.f32 %v8747_v58, %v2066_v19  ;;  %v7024_v37 = vpop.f32.mrb[142].mxu1  ;;  %7085 = vmatprep.mubr.bf16.mxu1 %v8368_v15 }
 0x21e   : > { %v2078_v11 = vadd.f32 %v7024_v37, %v8747_v58  ;;  %v2069_v12 = vpop.f32.mrb[143].mxu1  ;;  %v2543_v3 = vmax.f32 %v2075_v43, 0.0 }
 0x21f   : > { %v2070_v31 = vadd.f32 %v8747_v58, %v2069_v12  ;;  %v2541_v57 = vmax.f32 %v2067_v13, 0.0 }
 0x220   : > { %v2544_v21 = vmax.f32 %v2078_v11, 0.0 }
 0x221   : > { %v2542_v63 = vmax.f32 %v2070_v31, 0.0 }
 0x222   : > { %v8789_v40 = vpack.c.bf16 %v2544_v21, %v2543_v3  ;;  %v7701_v3 = vld [vmem:[%s10596_s7 + $0x10] sm:$0xff]  }
 0x223   : > { %v8791_v2 = vpack.c.bf16 %v2542_v63, %v2541_v57  ;;  %7285 = vmatprep.subr.bf16.mxu0 %v7701_v3 }
 0x224   : > { %7086 = vmatmul.mubr.bf16.gmra.mrb[204].mxu1 %v8382_v45  ;;  %7286 = vmatpush3.bf16.msra.mxu0 %v7701_v3 }
 0x225   : > { %7089 = vmatprep.mubr.bf16.mxu1 %v8396_v39 }
 0x227   : > { %v7027_v44 = vpop.f32.mrb[144].mxu1 }
 0x228   : > { %v2091_v15 = vadd.f32 %v7027_v44, %v8747_v58  ;;  %v2082_v28 = vpop.f32.mrb[145].mxu1 }
 0x229   : > { %v2083_v53 = vadd.f32 %v8747_v58, %v2082_v28  ;;  %v7028_v19 = vpop.f32.mrb[146].mxu1 }
 0x22a   : > { %v2094_v43 = vadd.f32 %v7028_v19, %v8747_v58  ;;  %v2085_v37 = vpop.f32.mrb[147].mxu1  ;;  %v2547_v11 = vmax.f32 %v2091_v15, 0.0 }
 0x22b   : > { %v2086_v13 = vadd.f32 %v8747_v58, %v2085_v37  ;;  %v2545_v31 = vmax.f32 %v2083_v53, 0.0 }
 0x22c   : > { %v2548_v12 = vmax.f32 %v2094_v43, 0.0  ;;  %7090 = vmatmul.mubr.bf16.gmra.mrb[208].mxu1 %v8413_v48 }
 0x22d   : > { %v2546_v45 = vmax.f32 %v2086_v13, 0.0  ;;  %7093 = vmatprep.mubr.bf16.mxu1 %v8427_v47 }
 0x22e   : > { %v8801_v39 = vpack.c.bf16 %v2548_v12, %v2547_v11 }
 0x22f   : > { %v8806_v21 = vpack.c.bf16 %v2546_v45, %v2545_v31 }
 0x234   : > { %7094 = vmatmul.mubr.bf16.gmra.mrb[212].mxu1 %v8441_v4 }
 0x235   : > { %7097 = vmatprep.mubr.bf16.mxu1 %v8455_v35 }
 0x237   : > { %v7031_v57 = vpop.f32.mrb[148].mxu1 }
 0x238   : > { %v2107_v48 = vadd.f32 %v7031_v57, %v8747_v58  ;;  %v2098_v63 = vpop.f32.mrb[149].mxu1 }
 0x239   : > { %v2099_v47 = vadd.f32 %v8747_v58, %v2098_v63  ;;  %v7032_v44 = vpop.f32.mrb[150].mxu1 }
 0x23a   : > { %v2110_v15 = vadd.f32 %v7032_v44, %v8747_v58  ;;  %v2101_v28 = vpop.f32.mrb[151].mxu1  ;;  %v2551_v19 = vmax.f32 %v2107_v48, 0.0  ;;  %v7702_v44 = vld [vmem:[%s10596_s7 + $0x18] sm:$0xff]  }
 0x23b   : > { %v2102_v53 = vadd.f32 %v8747_v58, %v2101_v28  ;;  %v2549_v37 = vmax.f32 %v2099_v47, 0.0  ;;  %7287 = vmatprep.subr.bf16.mxu0 %v7702_v44 }
 0x23c   : > { %v2552_v43 = vmax.f32 %v2110_v15, 0.0  ;;  %7098 = vmatmul.mubr.bf16.gmra.mrb[216].mxu1 %v8472_v8  ;;  %7288 = vmatpush3.bf16.msra.mxu0 %v7702_v44 }
 0x23d   : > { %v2550_v4 = vmax.f32 %v2102_v53, 0.0  ;;  %7101 = vmatprep.mubr.bf16.mxu1 %v8486_v20 }
 0x23e   : > { %v8816_v35 = vpack.c.bf16 %v2552_v43, %v2551_v19 }
 0x23f   : > { %v8818_v13 = vpack.c.bf16 %v2550_v4, %v2549_v37 }
 0x244   : > { %7102 = vmatmul.mubr.bf16.gmra.mrb[220].mxu1 %v8500_v22 }
 0x245   : > { %7105 = vmatprep.mubr.bf16.mxu1 %v8514_v38 }
 0x247   : > { %v7035_v11 = vpop.f32.mrb[152].mxu1 }
 0x248   : > { %v2123_v12 = vadd.f32 %v7035_v11, %v8747_v58  ;;  %v2114_v31 = vpop.f32.mrb[153].mxu1 }
 0x249   : > { %v2115_v45 = vadd.f32 %v8747_v58, %v2114_v31  ;;  %v7036_v3 = vpop.f32.mrb[154].mxu1 }
 0x24a   : > { %v2126_v8 = vadd.f32 %v7036_v3, %v8747_v58  ;;  %v2117_v57 = vpop.f32.mrb[155].mxu1  ;;  %v2555_v48 = vmax.f32 %v2123_v12, 0.0 }
 0x24b   : > { %v2118_v20 = vadd.f32 %v8747_v58, %v2117_v57  ;;  %v2553_v47 = vmax.f32 %v2115_v45, 0.0 }
 0x24c   : > { %v2556_v63 = vmax.f32 %v2126_v8, 0.0  ;;  %7106 = vmatmul.mubr.bf16.gmra.mrb[224].mxu1 %v8531_v55 }
 0x24d   : > { %v2554_v22 = vmax.f32 %v2118_v20, 0.0  ;;  %7109 = vmatprep.mubr.bf16.mxu1 %v8545_v29 }
 0x24e   : > { %v8828_v38 = vpack.c.bf16 %v2556_v63, %v2555_v48 }
 0x24f   : > { %v8833_v15 = vpack.c.bf16 %v2554_v22, %v2553_v47 }
 0x254   : > { %7110 = vmatmul.mubr.bf16.gmra.mrb[228].mxu1 %v8559_v7 }
 0x255   : > { %7113 = vmatprep.mubr.bf16.mxu1 %v8573_v1 }
 0x257   : > { %v7039_v28 = vpop.f32.mrb[156].mxu1 }
 0x258   : > { %v2139_v55 = vadd.f32 %v7039_v28, %v8747_v58  ;;  %v2130_v53 = vpop.f32.mrb[157].mxu1  ;;  %v7703_v28 = vld [vmem:[%s10596_s7 + $0x20] sm:$0xff]  }
 0x259   : > { %v2131_v29 = vadd.f32 %v8747_v58, %v2130_v53  ;;  %v7040_v19 = vpop.f32.mrb[158].mxu1  ;;  %7289 = vmatprep.subr.bf16.mxu0 %v7703_v28 }
 0x25a   : > { %v2142_v43 = vadd.f32 %v7040_v19, %v8747_v58  ;;  %v2133_v37 = vpop.f32.mrb[159].mxu1  ;;  %v2559_v11 = vmax.f32 %v2139_v55, 0.0  ;;  %7290 = vmatpush3.bf16.msra.mxu0 %v7703_v28 }
 0x25b   : > { %v2134_v4 = vadd.f32 %v8747_v58, %v2133_v37  ;;  %v2557_v31 = vmax.f32 %v2131_v29, 0.0 }
 0x25c   : > { %v2560_v12 = vmax.f32 %v2142_v43, 0.0  ;;  %7114 = vmatmul.mubr.bf16.gmra.mrb[232].mxu1 %v8590_v32 }
 0x25d   : > { %v2558_v7 = vmax.f32 %v2134_v4, 0.0  ;;  %7117 = vmatprep.mubr.bf16.mxu1 %v8604_v10 }
 0x25e   : > { %v8843_v1 = vpack.c.bf16 %v2560_v12, %v2559_v11 }
 0x25f   : > { %v8845_v45 = vpack.c.bf16 %v2558_v7, %v2557_v31 }
 0x264   : > { %7118 = vmatmul.mubr.bf16.gmra.mrb[236].mxu1 %v8623_v54 }
 0x265   : > { %7121 = vmatprep.mubr.bf16.mxu1 %v8637_v62 }
 0x267   : > { %v7043_v3 = vpop.f32.mrb[160].mxu1 }
 0x268   : > { %v2155_v8 = vadd.f32 %v7043_v3, %v8747_v58  ;;  %v2146_v57 = vpop.f32.mrb[161].mxu1 }
 0x269   : > { %v2147_v20 = vadd.f32 %v8747_v58, %v2146_v57  ;;  %v7044_v48 = vpop.f32.mrb[162].mxu1 }
 0x26a   : > { %v2158_v32 = vadd.f32 %v7044_v48, %v8747_v58  ;;  %v2149_v63 = vpop.f32.mrb[163].mxu1  ;;  %v2563_v47 = vmax.f32 %v2155_v8, 0.0 }
 0x26b   : > { %v2150_v10 = vadd.f32 %v8747_v58, %v2149_v63  ;;  %v2561_v44 = vmax.f32 %v2147_v20, 0.0 }
 0x26c   : > { %v2564_v22 = vmax.f32 %v2158_v32, 0.0  ;;  %7122 = vmatmul.mubr.bf16.gmra.mrb[240].mxu1 %v8654_v34 }
 0x26d   : > { %v2562_v54 = vmax.f32 %v2150_v10, 0.0  ;;  %7125 = vmatprep.mubr.bf16.mxu1 %v8668_v5 }
 0x26e   : > { %v8855_v62 = vpack.c.bf16 %v2564_v22, %v2563_v47 }
 0x26f   : > { %v8860_v55 = vpack.c.bf16 %v2562_v54, %v2561_v44  ;;  %v7704_v44 = vld [vmem:[%s10596_s7 + $0x28] sm:$0xff]  }
 0x270   : > { %7291 = vmatprep.subr.bf16.mxu0 %v7704_v44 }
 0x271   : > { %7292 = vmatpush3.bf16.msra.mxu0 %v7704_v44 }
 0x274   : > { %7126 = vmatmul.mubr.bf16.gmra.mrb[244].mxu1 %v8682_v17 }
 0x275   : > { %7129 = vmatprep.mubr.bf16.mxu1 %v8696_v24 }
 0x277   : > { %v7047_v53 = vpop.f32.mrb[164].mxu1 }
 0x278   : > { %v2171_v34 = vadd.f32 %v7047_v53, %v8747_v58  ;;  %v2162_v29 = vpop.f32.mrb[165].mxu1 }
 0x279   : > { %v2163_v5 = vadd.f32 %v8747_v58, %v2162_v29  ;;  %v7048_v19 = vpop.f32.mrb[166].mxu1 }
 0x27a   : > { %v2174_v43 = vadd.f32 %v7048_v19, %v8747_v58  ;;  %v2165_v37 = vpop.f32.mrb[167].mxu1  ;;  %v2567_v11 = vmax.f32 %v2171_v34, 0.0 }
 0x27b   : > { %v2166_v4 = vadd.f32 %v8747_v58, %v2165_v37  ;;  %v2565_v31 = vmax.f32 %v2163_v5, 0.0 }
 0x27c   : > { %v2568_v12 = vmax.f32 %v2174_v43, 0.0  ;;  %7130 = vmatmul.mubr.bf16.gmra.mrb[248].mxu1 %v8716_v14 }
 0x27d   : > { %v2566_v17 = vmax.f32 %v2166_v4, 0.0  ;;  %7133 = vmatprep.mubr.bf16.mxu1 %v8730_v36 }
 0x27e   : > { %v8870_v24 = vpack.c.bf16 %v2568_v12, %v2567_v11 }
 0x27f   : > { %v8872_v7 = vpack.c.bf16 %v2566_v17, %v2565_v31 }
 0x284   : > { %7134 = vmatmul.mubr.bf16.gmra.mrb[252].mxu1 %v8749_v23 }
 0x285   : > { %7153 = vmatprep.mubr.bf16.mxu1 %v8758_v56 }
 0x287   : > { %v7051_v3 = vpop.f32.mrb[168].mxu1 }
 0x288   : > { %v2187_v8 = vadd.f32 %v7051_v3, %v8747_v58  ;;  %v2178_v57 = vpop.f32.mrb[169].mxu1 }
 0x289   : > { %v2179_v20 = vadd.f32 %v8747_v58, %v2178_v57  ;;  %v7052_v48 = vpop.f32.mrb[170].mxu1 }
 0x28a   : > { %v2190_v14 = vadd.f32 %v7052_v48, %v8747_v58  ;;  %v2181_v32 = vpop.f32.mrb[171].mxu1  ;;  %v2571_v63 = vmax.f32 %v2187_v8, 0.0 }
 0x28b   : > { %v2182_v36 = vadd.f32 %v8747_v58, %v2181_v32  ;;  %v2569_v47 = vmax.f32 %v2179_v20, 0.0 }
 0x28c   : > { %v2572_v10 = vmax.f32 %v2190_v14, 0.0  ;;  %7154 = vmatmul.mubr.bf16.vlgmr.msra.gmra.mrb[0].mxu1 %v8756_v51 }
 0x28d   : > { %v2570_v23 = vmax.f32 %v2182_v36, 0.0  ;;  %7157 = vmatprep.mubr.bf16.mxu1 %v8771_v60 }
 0x28e   : > { %v8882_v22 = vpack.c.bf16 %v2572_v10, %v2571_v63 }
 0x28f   : > { %v8887_v54 = vpack.c.bf16 %v2570_v23, %v2569_v47 }
 0x290   : > { %10763 = vst [vmem:[#allocation116_spill] sm:$0xff] %v8882_v22 }
 0x291   : > { %10764 = vst [vmem:[#allocation117_spill] sm:$0xff] %v8887_v54 }
 0x294   : > { %7158 = vmatmul.mubr.bf16.gmra.mrb[4].mxu1 %v8769_v46 }
 0x295   : > { %7161 = vmatprep.mubr.bf16.mxu1 %v8781_v41 }
 0x297   : > { %v7055_v28 = vpop.f32.mrb[172].mxu1 }
 0x298   : > { %v2203_v53 = vadd.f32 %v7055_v28, %v8747_v58  ;;  %v2194_v34 = vpop.f32.mrb[173].mxu1 }
 0x299   : > { %v2195_v29 = vadd.f32 %v8747_v58, %v2194_v34  ;;  %v7056_v5 = vpop.f32.mrb[174].mxu1 }
 0x29a   : > { %v2206_v19 = vadd.f32 %v7056_v5, %v8747_v58  ;;  %v2197_v43 = vpop.f32.mrb[175].mxu1  ;;  %v2575_v4 = vmax.f32 %v2203_v53, 0.0  ;;  %v7705_v53 = vld [vmem:[%s10596_s7 + $0x30] sm:$0xff]  }
 0x29b   : > { %v2198_v37 = vadd.f32 %v8747_v58, %v2197_v43  ;;  %v2573_v12 = vmax.f32 %v2195_v29, 0.0  ;;  %7293 = vmatprep.subr.bf16.mxu0 %v7705_v53 }
 0x29c   : > { %v2576_v11 = vmax.f32 %v2206_v19, 0.0  ;;  %7162 = vmatmul.mubr.bf16.gmra.mrb[8].mxu1 %v8779_v6  ;;  %7294 = vmatpush3.bf16.msra.mxu0 %v7705_v53 }
 0x29d   : > { %v2574_v31 = vmax.f32 %v2198_v37, 0.0  ;;  %7165 = vmatprep.mubr.bf16.mxu1 %v8791_v2 }
 0x29e   : > { %v8897_v17 = vpack.c.bf16 %v2576_v11, %v2575_v4 }
 0x29f   : > { %v8899_v3 = vpack.c.bf16 %v2574_v31, %v2573_v12 }
 0x2a0   : > { %10765 = vst [vmem:[#allocation118_spill] sm:$0xff] %v8897_v17 }
 0x2a1   : > { %10766 = vst [vmem:[#allocation119_spill] sm:$0xff] %v8899_v3 }
 0x2a4   : > { %7166 = vmatmul.mubr.bf16.gmra.mrb[12].mxu1 %v8789_v40 }
 0x2a5   : > { %7169 = vmatprep.mubr.bf16.mxu1 %v8806_v21 }
 0x2a7   : > { %v7059_v8 = vpop.f32.mrb[176].mxu1 }
 0x2a8   : > { %v2219_v57 = vadd.f32 %v7059_v8, %v8747_v58  ;;  %v2210_v20 = vpop.f32.mrb[177].mxu1 }
 0x2a9   : > { %v2211_v48 = vadd.f32 %v8747_v58, %v2210_v20  ;;  %v7060_v14 = vpop.f32.mrb[178].mxu1 }
 0x2aa   : > { %v2222_v32 = vadd.f32 %v7060_v14, %v8747_v58  ;;  %v2213_v36 = vpop.f32.mrb[179].mxu1  ;;  %v2579_v10 = vmax.f32 %v2219_v57, 0.0 }
 0x2ab   : > { %v2214_v63 = vadd.f32 %v8747_v58, %v2213_v36  ;;  %v2577_v23 = vmax.f32 %v2211_v48, 0.0 }
 0x2ac   : > { %v2580_v47 = vmax.f32 %v2222_v32, 0.0  ;;  %7170 = vmatmul.mubr.bf16.gmra.mrb[16].mxu1 %v8801_v39 }
 0x2ad   : > { %v2578_v44 = vmax.f32 %v2214_v63, 0.0  ;;  %7173 = vmatprep.mubr.bf16.mxu1 %v8818_v13 }
 0x2ae   : > { %v8909_v28 = vpack.c.bf16 %v2580_v47, %v2579_v10 }
 0x2af   : > { %v8914_v34 = vpack.c.bf16 %v2578_v44, %v2577_v23 }
 0x2b0   : > { %10767 = vst [vmem:[#allocation120_spill] sm:$0xff] %v8909_v28 }
 0x2b1   : > { %10768 = vst [vmem:[#allocation121_spill] sm:$0xff] %v8914_v34 }
 0x2b4   : > { %7174 = vmatmul.mubr.bf16.gmra.mrb[20].mxu1 %v8816_v35 }
 0x2b5   : > { %7177 = vmatprep.mubr.bf16.mxu1 %v8833_v15 }
 0x2b7   : > { %v7063_v29 = vpop.f32.mrb[180].mxu1 }
 0x2b8   : > { %v2235_v5 = vadd.f32 %v7063_v29, %v8747_v58  ;;  %v2226_v19 = vpop.f32.mrb[181].mxu1 }
 0x2b9   : > { %v2227_v43 = vadd.f32 %v8747_v58, %v2226_v19  ;;  %v7064_v37 = vpop.f32.mrb[182].mxu1 }
 0x2ba   : > { %v2238_v4 = vadd.f32 %v7064_v37, %v8747_v58  ;;  %v2229_v11 = vpop.f32.mrb[183].mxu1  ;;  %v2583_v31 = vmax.f32 %v2235_v5, 0.0 }
 0x2bb   : > { %v2230_v12 = vadd.f32 %v8747_v58, %v2229_v11  ;;  %v2581_v57 = vmax.f32 %v2227_v43, 0.0  ;;  %v7707_v11 = vld [vmem:[%s10598_s9] sm:$0xff]  }
 0x2bc   : > { %v2584_v8 = vmax.f32 %v2238_v4, 0.0  ;;  %7178 = vmatmul.mubr.bf16.gmra.mrb[24].mxu1 %v8828_v38  ;;  %v7706_v4 = vld [vmem:[%s10596_s7 + $0x38] sm:$0xff]   ;;  %7425 = vmatprep.subr.bf16.mxu1 %v7707_v11 }
 0x2bd   : > { %v2582_v20 = vmax.f32 %v2230_v12, 0.0  ;;  %7181 = vmatprep.mubr.bf16.mxu1 %v8845_v45  ;;  %7295 = vmatprep.subr.bf16.mxu0 %v7706_v4 }
 0x2be   : > { %v8924_v48 = vpack.c.bf16 %v2584_v8, %v2583_v31  ;;  %7296 = vmatpush3.bf16.msra.mxu0 %v7706_v4  ;;  %7426 = vmatpush3.bf16.msra.mxu1 %v7707_v11  ;;  %v10773_v31 = vmov 0  }
 0x2bf   : > { %v8926_v14 = vpack.c.bf16 %v2582_v20, %v2581_v57  ;;  %5408 = vmatprep.subr.bf16.mxu0 %v10773_v31 }
 0x2c0   : > { %10769 = vst [vmem:[#allocation122_spill] sm:$0xff] %v8924_v48 }
 0x2c1   : > { %10770 = vst [vmem:[#allocation123_spill] sm:$0xff] %v8926_v14 }
 0x2c4   : > { %7182 = vmatmul.mubr.bf16.gmra.mrb[28].mxu1 %v8843_v1 }
 0x2c5   : > { %7185 = vmatprep.mubr.bf16.mxu1 %v8860_v55 }
 0x2c7   : > { %v7067_v32 = vpop.f32.mrb[184].mxu1 }
 0x2c8   : > { %v2251_v36 = vadd.f32 %v7067_v32, %v8747_v58  ;;  %v2242_v63 = vpop.f32.mrb[185].mxu1 }
 0x2c9   : > { %v2243_v10 = vadd.f32 %v8747_v58, %v2242_v63  ;;  %v7068_v47 = vpop.f32.mrb[186].mxu1 }
 0x2ca   : > { %v2254_v23 = vadd.f32 %v7068_v47, %v8747_v58  ;;  %v2245_v44 = vpop.f32.mrb[187].mxu1  ;;  %v2587_v29 = vmax.f32 %v2251_v36, 0.0 }
 0x2cb   : > { %v2246_v53 = vadd.f32 %v8747_v58, %v2245_v44  ;;  %v2585_v19 = vmax.f32 %v2243_v10, 0.0 }
 0x2cc   : > { %v2588_v5 = vmax.f32 %v2254_v23, 0.0  ;;  %7186 = vmatmul.mubr.bf16.gmra.mrb[32].mxu1 %v8855_v62 }
 0x2cd   : > { %v2586_v43 = vmax.f32 %v2246_v53, 0.0  ;;  %7189 = vmatprep.mubr.bf16.mxu1 %v8872_v7 }
 0x2ce   : > { %v8936_v37 = vpack.c.bf16 %v2588_v5, %v2587_v29 }
 0x2cf   : > { %v8944_v12 = vpack.c.bf16 %v2586_v43, %v2585_v19 }
 0x2d0   : > { %10771 = vst [vmem:[#allocation124_spill] sm:$0xff] %v8936_v37 }
 0x2d1   : > { %10772 = vst [vmem:[#allocation125_spill] sm:$0xff] %v8944_v12 }
 0x2d4   : > { %7190 = vmatmul.mubr.bf16.gmra.mrb[36].mxu1 %v8870_v24 }
 0x2d5   : > { %7193 = vmatprep.mubr.bf16.mxu1 %v8887_v54 }
 0x2d7   : > { %v7071_v8 = vpop.f32.mrb[188].mxu1 }
 0x2d8   : > { %v2267_v57 = vadd.f32 %v7071_v8, %v8747_v58  ;;  %v2258_v20 = vpop.f32.mrb[189].mxu1 }
 0x2d9   : > { %v2259_v32 = vadd.f32 %v8747_v58, %v2258_v20  ;;  %v7072_v36 = vpop.f32.mrb[190].mxu1 }
 0x2da   : > { %v2270_v63 = vadd.f32 %v7072_v36, %v8747_v58  ;;  %v2261_v10 = vpop.f32.mrb[191].mxu1  ;;  %v2591_v23 = vmax.f32 %v2267_v57, 0.0 }
 0x2db   : > { %v2262_v47 = vadd.f32 %v8747_v58, %v2261_v10  ;;  %v2589_v53 = vmax.f32 %v2259_v32, 0.0 }
 0x2dc   : > { %v2592_v44 = vmax.f32 %v2270_v63, 0.0  ;;  %7194 = vmatmul.mubr.bf16.gmra.mrb[40].mxu1 %v8882_v22 }
 0x2dd   : > { %v2590_v29 = vmax.f32 %v2262_v47, 0.0  ;;  %7197 = vmatprep.mubr.bf16.mxu1 %v8899_v3 }
 0x2de   : > { %v8955_v5 = vpack.c.bf16 %v2592_v44, %v2591_v23 }
 0x2df   : > { %v7075_v19 = vpop.f32.mrb[192].mxu1  ;;  %v8957_v43 = vpack.c.bf16 %v2590_v29, %v2589_v53 }
 0x2e0   : > { %10774 = vst [vmem:[#allocation126_spill] sm:$0xff] %v8955_v5  ;;  %v2283_v4 = vadd.f32 %v7075_v19, %v8747_v58  ;;  %v2274_v11 = vpop.f32.mrb[193].mxu1 }
 0x2e1   : > { %10775 = vst [vmem:[#allocation127_spill] sm:$0xff] %v8957_v43  ;;  %v2275_v8 = vadd.f32 %v8747_v58, %v2274_v11  ;;  %v7076_v20 = vpop.f32.mrb[194].mxu1 }
 0x2e2   : > { %v2286_v57 = vadd.f32 %v7076_v20, %v8747_v58  ;;  %v2277_v36 = vpop.f32.mrb[195].mxu1  ;;  %v2595_v32 = vmax.f32 %v2283_v4, 0.0 }
 0x2e3   : > { %v2278_v63 = vadd.f32 %v8747_v58, %v2277_v36  ;;  %v2593_v47 = vmax.f32 %v2275_v8, 0.0 }
 0x2e4   : > { %v2596_v10 = vmax.f32 %v2286_v57, 0.0  ;;  %7198 = vmatmul.mubr.bf16.gmra.mrb[44].mxu1 %v8897_v17 }
 0x2e5   : > { %v2594_v23 = vmax.f32 %v2278_v63, 0.0  ;;  %7201 = vmatprep.mubr.bf16.mxu1 %v8914_v34 }
 0x2e6   : > { %v8965_v44 = vpack.c.bf16 %v2596_v10, %v2595_v32 }
 0x2e7   : > { %v7079_v53 = vpop.f32.mrb[196].mxu1  ;;  %v8967_v29 = vpack.c.bf16 %v2594_v23, %v2593_v47  ;;  %v7708_v23 = vld [vmem:[%s10598_s9 + $0x8] sm:$0xff]  }
 0x2e8   : > { %10776 = vst [vmem:[#allocation128_spill] sm:$0xff] %v8965_v44  ;;  %v2299_v19 = vadd.f32 %v7079_v53, %v8747_v58  ;;  %v2290_v11 = vpop.f32.mrb[197].mxu1  ;;  %7427 = vmatprep.subr.bf16.mxu1 %v7708_v23 }
 0x2e9   : > { %10777 = vst [vmem:[#allocation129_spill] sm:$0xff] %v8967_v29  ;;  %v2291_v20 = vadd.f32 %v8747_v58, %v2290_v11  ;;  %v7080_v3 = vpop.f32.mrb[198].mxu1  ;;  %7428 = vmatpush3.bf16.msra.mxu1 %v7708_v23 }
 0x2ea   : > { %v2302_v4 = vadd.f32 %v7080_v3, %v8747_v58  ;;  %v2293_v57 = vpop.f32.mrb[199].mxu1  ;;  %v2599_v8 = vmax.f32 %v2299_v19, 0.0 }
 0x2eb   : > { %v2294_v36 = vadd.f32 %v8747_v58, %v2293_v57  ;;  %v2597_v32 = vmax.f32 %v2291_v20, 0.0 }
 0x2ec   : > { %v2600_v63 = vmax.f32 %v2302_v4, 0.0  ;;  %7202 = vmatmul.mubr.bf16.gmra.mrb[48].mxu1 %v8909_v28 }
 0x2ed   : > { %v2598_v10 = vmax.f32 %v2294_v36, 0.0  ;;  %7205 = vmatprep.mubr.bf16.mxu1 %v8926_v14 }
 0x2ee   : > { %v8975_v47 = vpack.c.bf16 %v2600_v63, %v2599_v8 }
 0x2ef   : > { %v7083_v53 = vpop.f32.mrb[200].mxu1  ;;  %v8980_v11 = vpack.c.bf16 %v2598_v10, %v2597_v32 }
 0x2f0   : > { %10778 = vst [vmem:[#allocation130_spill] sm:$0xff] %v8975_v47  ;;  %v2315_v3 = vadd.f32 %v7083_v53, %v8747_v58  ;;  %v2306_v57 = vpop.f32.mrb[201].mxu1 }
 0x2f1   : > { %10779 = vst [vmem:[#allocation131_spill] sm:$0xff] %v8980_v11  ;;  %v2307_v19 = vadd.f32 %v8747_v58, %v2306_v57  ;;  %v7084_v4 = vpop.f32.mrb[202].mxu1 }
 0x2f2   : > { %v2318_v20 = vadd.f32 %v7084_v4, %v8747_v58  ;;  %v2309_v36 = vpop.f32.mrb[203].mxu1  ;;  %v2603_v63 = vmax.f32 %v2315_v3, 0.0 }
 0x2f3   : > { %v2310_v8 = vadd.f32 %v8747_v58, %v2309_v36  ;;  %v2601_v28 = vmax.f32 %v2307_v19, 0.0 }
 0x2f4   : > { %v2604_v14 = vmax.f32 %v2318_v20, 0.0  ;;  %7206 = vmatmul.mubr.bf16.gmra.mrb[52].mxu1 %v8924_v48 }
 0x2f5   : > { %v2602_v32 = vmax.f32 %v2310_v8, 0.0  ;;  %7209 = vmatprep.mubr.bf16.mxu1 %v8944_v12 }
 0x2f6   : > { %v8988_v10 = vpack.c.bf16 %v2604_v14, %v2603_v63 }
 0x2f7   : > { %v7087_v53 = vpop.f32.mrb[204].mxu1  ;;  %v8990_v34 = vpack.c.bf16 %v2602_v32, %v2601_v28 }
 0x2f8   : > { %10780 = vst [vmem:[#allocation132_spill] sm:$0xff] %v8988_v10  ;;  %v2331_v23 = vadd.f32 %v7087_v53, %v8747_v58  ;;  %v2322_v57 = vpop.f32.mrb[205].mxu1 }
 0x2f9   : > { %10781 = vst [vmem:[#allocation133_spill] sm:$0xff] %v8990_v34  ;;  %v2323_v4 = vadd.f32 %v8747_v58, %v2322_v57  ;;  %v7088_v17 = vpop.f32.mrb[206].mxu1 }
 0x2fa   : > { %v2334_v3 = vadd.f32 %v7088_v17, %v8747_v58  ;;  %v2325_v20 = vpop.f32.mrb[207].mxu1  ;;  %v2607_v19 = vmax.f32 %v2331_v23, 0.0 }
 0x2fb   : > { %v2326_v36 = vadd.f32 %v8747_v58, %v2325_v20  ;;  %v2605_v14 = vmax.f32 %v2323_v4, 0.0 }
 0x2fc   : > { %v2608_v8 = vmax.f32 %v2334_v3, 0.0  ;;  %7210 = vmatmul.mubr.bf16.gmra.mrb[56].mxu1 %v8936_v37 }
 0x2fd   : > { %v2606_v63 = vmax.f32 %v2326_v36, 0.0  ;;  %7213 = vmatprep.mubr.bf16.mxu1 %v8957_v43 }
 0x2fe   : > { %v8998_v28 = vpack.c.bf16 %v2608_v8, %v2607_v19 }
 0x2ff   : > { %v7091_v32 = vpop.f32.mrb[208].mxu1  ;;  %v9000_v53 = vpack.c.bf16 %v2606_v63, %v2605_v14 }
 0x300   : > { %10782 = vst [vmem:[#allocation134_spill] sm:$0xff] %v8998_v28  ;;  %v2347_v57 = vadd.f32 %v7091_v32, %v8747_v58  ;;  %v2338_v12 = vpop.f32.mrb[209].mxu1 }
 0x301   : > { %10783 = vst [vmem:[#allocation135_spill] sm:$0xff] %v9000_v53  ;;  %v2339_v17 = vadd.f32 %v8747_v58, %v2338_v12  ;;  %v7092_v48 = vpop.f32.mrb[210].mxu1 }
 0x302   : > { %v2350_v23 = vadd.f32 %v7092_v48, %v8747_v58  ;;  %v2341_v3 = vpop.f32.mrb[211].mxu1  ;;  %v2611_v4 = vmax.f32 %v2347_v57, 0.0 }
 0x303   : > { %v2342_v20 = vadd.f32 %v8747_v58, %v2341_v3  ;;  %v2609_v19 = vmax.f32 %v2339_v17, 0.0 }
 0x304   : > { %v2612_v36 = vmax.f32 %v2350_v23, 0.0  ;;  %7214 = vmatmul.mubr.bf16.gmra.mrb[60].mxu1 %v8955_v5 }
 0x305   : > { %v2610_v8 = vmax.f32 %v2342_v20, 0.0  ;;  %7217 = vmatprep.mubr.bf16.mxu1 %v8967_v29 }
 0x306   : > { %v9008_v14 = vpack.c.bf16 %v2612_v36, %v2611_v4 }
 0x307   : > { %v7095_v63 = vpop.f32.mrb[212].mxu1  ;;  %v9010_v32 = vpack.c.bf16 %v2610_v8, %v2609_v19 }
 0x308   : > { %10784 = vst [vmem:[#allocation136_spill] sm:$0xff] %v9008_v14  ;;  %v2363_v12 = vadd.f32 %v7095_v63, %v8747_v58  ;;  %v2354_v43 = vpop.f32.mrb[213].mxu1 }
 0x309   : > { %10785 = vst [vmem:[#allocation137_spill] sm:$0xff] %v9010_v32  ;;  %v2355_v48 = vadd.f32 %v8747_v58, %v2354_v43  ;;  %v7096_v37 = vpop.f32.mrb[214].mxu1  ;;  %v7709_v43 = vld [vmem:[%s10598_s9 + $0x10] sm:$0xff]  }
 0x30a   : > { %v2366_v57 = vadd.f32 %v7096_v37, %v8747_v58  ;;  %v2357_v23 = vpop.f32.mrb[215].mxu1  ;;  %v2615_v17 = vmax.f32 %v2363_v12, 0.0  ;;  %7429 = vmatprep.subr.bf16.mxu1 %v7709_v43 }
 0x30b   : > { %v2358_v3 = vadd.f32 %v8747_v58, %v2357_v23  ;;  %v2613_v4 = vmax.f32 %v2355_v48, 0.0  ;;  %7430 = vmatpush3.bf16.msra.mxu1 %v7709_v43 }
 0x30c   : > { %v2616_v20 = vmax.f32 %v2366_v57, 0.0  ;;  %7218 = vmatmul.mubr.bf16.gmra.mrb[64].mxu1 %v8965_v44 }
 0x30d   : > { %v2614_v36 = vmax.f32 %v2358_v3, 0.0  ;;  %7221 = vmatprep.mubr.bf16.mxu1 %v8980_v11 }
 0x30e   : > { %v9018_v19 = vpack.c.bf16 %v2616_v20, %v2615_v17 }
 0x30f   : > { %v7099_v8 = vpop.f32.mrb[216].mxu1  ;;  %v9023_v63 = vpack.c.bf16 %v2614_v36, %v2613_v4 }
 0x310   : > { %10786 = vst [vmem:[#allocation138_spill] sm:$0xff] %v9018_v19  ;;  %v2379_v37 = vadd.f32 %v7099_v8, %v8747_v58  ;;  %v2370_v23 = vpop.f32.mrb[217].mxu1 }
 0x311   : > { %10787 = vst [vmem:[#allocation139_spill] sm:$0xff] %v9023_v63  ;;  %v2371_v12 = vadd.f32 %v8747_v58, %v2370_v23  ;;  %v7100_v57 = vpop.f32.mrb[218].mxu1 }
 0x312   : > { %v2382_v48 = vadd.f32 %v7100_v57, %v8747_v58  ;;  %v2373_v3 = vpop.f32.mrb[219].mxu1  ;;  %v2619_v20 = vmax.f32 %v2379_v37, 0.0 }
 0x313   : > { %v2374_v17 = vadd.f32 %v8747_v58, %v2373_v3  ;;  %v2617_v44 = vmax.f32 %v2371_v12, 0.0 }
 0x314   : > { %v2620_v11 = vmax.f32 %v2382_v48, 0.0  ;;  %7222 = vmatmul.mubr.bf16.gmra.mrb[68].mxu1 %v8975_v47 }
 0x315   : > { %v2618_v4 = vmax.f32 %v2374_v17, 0.0  ;;  %7225 = vmatprep.mubr.bf16.mxu1 %v8990_v34 }
 0x316   : > { %v9031_v36 = vpack.c.bf16 %v2620_v11, %v2619_v20 }
 0x317   : > { %v7103_v8 = vpop.f32.mrb[220].mxu1  ;;  %v9033_v29 = vpack.c.bf16 %v2618_v4, %v2617_v44 }
 0x318   : > { %10788 = vst [vmem:[#allocation140_spill] sm:$0xff] %v9031_v36  ;;  %v2395_v43 = vadd.f32 %v7103_v8, %v8747_v58  ;;  %v2386_v23 = vpop.f32.mrb[221].mxu1 }
 0x319   : > { %10789 = vst [vmem:[#allocation141_spill] sm:$0xff] %v9033_v29  ;;  %v2387_v57 = vadd.f32 %v8747_v58, %v2386_v23  ;;  %v7104_v5 = vpop.f32.mrb[222].mxu1 }
 0x31a   : > { %v2398_v37 = vadd.f32 %v7104_v5, %v8747_v58  ;;  %v2389_v48 = vpop.f32.mrb[223].mxu1  ;;  %v2623_v12 = vmax.f32 %v2395_v43, 0.0 }
 0x31b   : > { %v2390_v3 = vadd.f32 %v8747_v58, %v2389_v48  ;;  %v2621_v11 = vmax.f32 %v2387_v57, 0.0 }
 0x31c   : > { %v2624_v17 = vmax.f32 %v2398_v37, 0.0  ;;  %7226 = vmatmul.mubr.bf16.gmra.mrb[72].mxu1 %v8988_v10 }
 0x31d   : > { %v2622_v20 = vmax.f32 %v2390_v3, 0.0  ;;  %7229 = vmatprep.mubr.bf16.mxu1 %v9000_v53 }
 0x31e   : > { %v9041_v44 = vpack.c.bf16 %v2624_v17, %v2623_v12 }
 0x31f   : > { %v7107_v4 = vpop.f32.mrb[224].mxu1  ;;  %v9043_v8 = vpack.c.bf16 %v2622_v20, %v2621_v11 }
 0x320   : > { %10790 = vst [vmem:[#allocation142_spill] sm:$0xff] %v9041_v44  ;;  %v2411_v23 = vadd.f32 %v7107_v4, %v8747_v58  ;;  %v2402_v34 = vpop.f32.mrb[225].mxu1 }
 0x321   : > { %10791 = vst [vmem:[#allocation143_spill] sm:$0xff] %v9043_v8  ;;  %v2403_v5 = vadd.f32 %v8747_v58, %v2402_v34  ;;  %v7108_v47 = vpop.f32.mrb[226].mxu1 }
 0x322   : > { %v2414_v43 = vadd.f32 %v7108_v47, %v8747_v58  ;;  %v2405_v37 = vpop.f32.mrb[227].mxu1  ;;  %v2627_v57 = vmax.f32 %v2411_v23, 0.0 }
 0x323   : > { %v2406_v48 = vadd.f32 %v8747_v58, %v2405_v37  ;;  %v2625_v12 = vmax.f32 %v2403_v5, 0.0 }
 0x324   : > { %v2628_v3 = vmax.f32 %v2414_v43, 0.0  ;;  %7230 = vmatmul.mubr.bf16.gmra.mrb[76].mxu1 %v8998_v28 }
 0x325   : > { %v2626_v17 = vmax.f32 %v2406_v48, 0.0  ;;  %7233 = vmatprep.mubr.bf16.mxu1 %v9010_v32 }
 0x326   : > { %v9051_v11 = vpack.c.bf16 %v2628_v3, %v2627_v57 }
 0x327   : > { %v7111_v20 = vpop.f32.mrb[228].mxu1  ;;  %v9053_v4 = vpack.c.bf16 %v2626_v17, %v2625_v12 }
 0x328   : > { %10792 = vst [vmem:[#allocation144_spill] sm:$0xff] %v9051_v11  ;;  %v2427_v34 = vadd.f32 %v7111_v20, %v8747_v58  ;;  %v2418_v53 = vpop.f32.mrb[229].mxu1 }
 0x329   : > { %10793 = vst [vmem:[#allocation145_spill] sm:$0xff] %v9053_v4  ;;  %v2419_v47 = vadd.f32 %v8747_v58, %v2418_v53  ;;  %v7112_v10 = vpop.f32.mrb[230].mxu1  ;;  %v7710_v53 = vld [vmem:[%s10598_s9 + $0x18] sm:$0xff]  }
 0x32a   : > { %v2430_v23 = vadd.f32 %v7112_v10, %v8747_v58  ;;  %v2421_v43 = vpop.f32.mrb[231].mxu1  ;;  %v2631_v5 = vmax.f32 %v2427_v34, 0.0  ;;  %7431 = vmatprep.subr.bf16.mxu1 %v7710_v53 }
 0x32b   : > { %v2422_v37 = vadd.f32 %v8747_v58, %v2421_v43  ;;  %v2629_v57 = vmax.f32 %v2419_v47, 0.0  ;;  %7432 = vmatpush3.bf16.msra.mxu1 %v7710_v53 }
 0x32c   : > { %v2632_v48 = vmax.f32 %v2430_v23, 0.0  ;;  %7234 = vmatmul.mubr.bf16.gmra.mrb[80].mxu1 %v9008_v14 }
 0x32d   : > { %v2630_v3 = vmax.f32 %v2422_v37, 0.0  ;;  %7237 = vmatprep.mubr.bf16.mxu1 %v9023_v63 }
 0x32e   : > { %v9061_v12 = vpack.c.bf16 %v2632_v48, %v2631_v5 }
 0x32f   : > { %v7115_v17 = vpop.f32.mrb[232].mxu1  ;;  %v9066_v20 = vpack.c.bf16 %v2630_v3, %v2629_v57 }
 0x330   : > { %v2443_v10 = vadd.f32 %v7115_v17, %v8747_v58  ;;  %v2434_v43 = vpop.f32.mrb[233].mxu1 }
 0x331   : > { %10794 = vst [vmem:[#allocation146_spill] sm:$0xff] %v9066_v20  ;;  %v2435_v34 = vadd.f32 %v8747_v58, %v2434_v43  ;;  %v7116_v23 = vpop.f32.mrb[234].mxu1 }
 0x332   : > { %v2446_v47 = vadd.f32 %v7116_v23, %v8747_v58  ;;  %v2437_v37 = vpop.f32.mrb[235].mxu1  ;;  %v2635_v48 = vmax.f32 %v2443_v10, 0.0 }
 0x333   : > { %v2438_v5 = vadd.f32 %v8747_v58, %v2437_v37  ;;  %v2633_v14 = vmax.f32 %v2435_v34, 0.0 }
 0x334   : > { %v2636_v63 = vmax.f32 %v2446_v47, 0.0  ;;  %7238 = vmatmul.mubr.bf16.gmra.mrb[84].mxu1 %v9018_v19 }
 0x335   : > { %v2634_v57 = vmax.f32 %v2438_v5, 0.0  ;;  %7241 = vmatprep.mubr.bf16.mxu1 %v9033_v29 }
 0x336   : > { %v9074_v3 = vpack.c.bf16 %v2636_v63, %v2635_v48 }
 0x337   : > { %v7119_v17 = vpop.f32.mrb[236].mxu1  ;;  %v9076_v32 = vpack.c.bf16 %v2634_v57, %v2633_v14 }
 0x338   : > { %10795 = vst [vmem:[#allocation147_spill] sm:$0xff] %v9074_v3  ;;  %v2459_v53 = vadd.f32 %v7119_v17, %v8747_v58  ;;  %v2450_v43 = vpop.f32.mrb[237].mxu1 }
 0x339   : > { %v2451_v23 = vadd.f32 %v8747_v58, %v2450_v43  ;;  %v7120_v28 = vpop.f32.mrb[238].mxu1 }
 0x33a   : > { %v2462_v10 = vadd.f32 %v7120_v28, %v8747_v58  ;;  %v2453_v47 = vpop.f32.mrb[239].mxu1  ;;  %v2639_v34 = vmax.f32 %v2459_v53, 0.0  ;;  %v7732_v28 = vld [vmem:[%s10593_s4] ss:$0 sm:$0xff] }
 0x33b   : > { %v2454_v37 = vadd.f32 %v8747_v58, %v2453_v47  ;;  %v2637_v63 = vmax.f32 %v2451_v23, 0.0 }
 0x33c   : > { %v2640_v5 = vmax.f32 %v2462_v10, 0.0  ;;  %7242 = vmatmul.mubr.bf16.gmra.mrb[88].mxu1 %v9031_v36 }
 0x33d   : > { %v2638_v48 = vmax.f32 %v2454_v37, 0.0  ;;  %7245 = vmatprep.mubr.bf16.mxu1 %v9043_v8 }
 0x33e   : > { %v9084_v14 = vpack.c.bf16 %v2640_v5, %v2639_v34 }
 0x33f   : > { %v7123_v57 = vpop.f32.mrb[240].mxu1  ;;  %v9086_v17 = vpack.c.bf16 %v2638_v48, %v2637_v63 }
 0x340   : > { %v2475_v43 = vadd.f32 %v7123_v57, %v8747_v58  ;;  %v2466_v29 = vpop.f32.mrb[241].mxu1 }
 0x341   : > { %10796 = vst [vmem:[#allocation148_spill] sm:$0xff] %v9086_v17  ;;  %v2467_v53 = vadd.f32 %v7732_v28, %v2466_v29  ;;  %v7124_v10 = vpop.f32.mrb[242].mxu1 }
 0x342   : > { %v2478_v47 = vadd.f32 %v7732_v28, %v7124_v10  ;;  %v2469_v36 = vpop.f32.mrb[243].mxu1  ;;  %v2643_v37 = vmax.f32 %v2475_v43, 0.0 }
 0x343   : > { %v2470_v23 = vadd.f32 %v7732_v28, %v2469_v36  ;;  %v2641_v34 = vmax.f32 %v2467_v53, 0.0 }
 0x344   : > { %v2644_v19 = vmax.f32 %v2478_v47, 0.0  ;;  %7246 = vmatmul.mubr.bf16.gmra.mrb[92].mxu1 %v9041_v44 }
 0x345   : > { %v2642_v5 = vmax.f32 %v2470_v23, 0.0  ;;  %7249 = vmatprep.mubr.bf16.mxu1 %v9053_v4 }
 0x346   : > { %v9094_v63 = vpack.c.bf16 %v2644_v19, %v2643_v37  ;;  %v7711_v37 = vld [vmem:[%s10598_s9 + $0x20] sm:$0xff]  }
 0x347   : > { %v7127_v58 = vpop.f32.mrb[244].mxu1  ;;  %v9096_v48 = vpack.c.bf16 %v2642_v5, %v2641_v34  ;;  %7433 = vmatprep.subr.bf16.mxu1 %v7711_v37 }
 0x348   : > { %10797 = vst [vmem:[#allocation149_spill] sm:$0xff] %v9094_v63  ;;  %v2491_v57 = vadd.f32 %v7732_v28, %v7127_v58  ;;  %v2482_v8 = vpop.f32.mrb[245].mxu1  ;;  %7434 = vmatpush3.bf16.msra.mxu1 %v7711_v37 }
 0x349   : > { %v2483_v29 = vadd.f32 %v7732_v28, %v2482_v8  ;;  %v7128_v22 = vpop.f32.mrb[246].mxu1 }
 0x34a   : > { %v2494_v10 = vadd.f32 %v7732_v28, %v7128_v22  ;;  %v2485_v54 = vpop.f32.mrb[247].mxu1  ;;  %v2647_v43 = vmax.f32 %v2491_v57, 0.0 }
 0x34b   : > { %v2486_v36 = vadd.f32 %v7732_v28, %v2485_v54  ;;  %v2645_v53 = vmax.f32 %v2483_v29, 0.0 }
 0x34c   : > { %v2648_v47 = vmax.f32 %v2494_v10, 0.0  ;;  %7250 = vmatmul.mubr.bf16.gmra.mrb[96].mxu1 %v9051_v11 }
 0x34d   : > { %v2646_v23 = vmax.f32 %v2486_v36, 0.0  ;;  %7253 = vmatprep.mubr.bf16.mxu1 %v9066_v20 }
 0x34e   : > { %v9100_v19 = vpack.c.bf16 %v2648_v47, %v2647_v43 }
 0x34f   : > { %v7131_v34 = vpop.f32.mrb[248].mxu1  ;;  %v9105_v8 = vpack.c.bf16 %v2646_v23, %v2645_v53 }
 0x350   : > { %10798 = vst [vmem:[#allocation150_spill] sm:$0xff] %v9100_v19  ;;  %v2507_v22 = vadd.f32 %v7732_v28, %v7131_v34  ;;  %v2498_v5 = vpop.f32.mrb[249].mxu1 }
 0x351   : > { %10799 = vst [vmem:[#allocation151_spill] sm:$0xff] %v9105_v8  ;;  %v2499_v54 = vadd.f32 %v7732_v28, %v2498_v5  ;;  %v7132_v58 = vpop.f32.mrb[250].mxu1 }
 0x352   : > { %v2510_v57 = vadd.f32 %v7732_v28, %v7132_v58  ;;  %v2501_v29 = vpop.f32.mrb[251].mxu1  ;;  %v2651_v36 = vmax.f32 %v2507_v22, 0.0 }
 0x353   : > { %v2502_v10 = vadd.f32 %v7732_v28, %v2501_v29  ;;  %v2649_v43 = vmax.f32 %v2499_v54, 0.0 }
 0x354   : > { %v2652_v20 = vmax.f32 %v2510_v57, 0.0  ;;  %7254 = vmatmul.mubr.bf16.gmra.mrb[100].mxu1 %v9061_v12 }
 0x355   : > { %v2650_v47 = vmax.f32 %v2502_v10, 0.0  ;;  %7257 = vmatprep.mubr.bf16.mxu1 %v9076_v32 }
 0x356   : > { %v9109_v11 = vpack.c.bf16 %v2652_v20, %v2651_v36  ;;  %v9118_v20 = vld [vmem:[%s10595_s6] ss:$0 sm:$0xff] }
 0x357   : > { %v7135_v53 = vpop.f32.mrb[252].mxu1  ;;  %v9111_v23 = vpack.c.bf16 %v2650_v47, %v2649_v43 }
 0x358   : > { %10800 = vst [vmem:[#allocation152_spill] sm:$0xff] %v9109_v11  ;;  %v2523_v34 = vadd.f32 %v7732_v28, %v7135_v53  ;;  %v2514_v5 = vpop.f32.mrb[253].mxu1 }
 0x359   : > { %10801 = vst [vmem:[#allocation153_spill] sm:$0xff] %v9111_v23  ;;  %v2515_v4 = vadd.f32 %v7732_v28, %v2514_v5  ;;  %v7136_v37 = vpop.f32.mrb[254].mxu1 }
 0x35a   : > { %v2526_v58 = vadd.f32 %v7732_v28, %v7136_v37  ;;  %v2517_v44 = vpop.f32.mrb[255].mxu1  ;;  %v2655_v22 = vmax.f32 %v2523_v34, 0.0 }
 0x35b   : > { %v2518_v29 = vadd.f32 %v7732_v28, %v2517_v44  ;;  %v2653_v54 = vmax.f32 %v2515_v4, 0.0 }
 0x35c   : > { %v2656_v57 = vmax.f32 %v2526_v58, 0.0  ;;  %7258 = vmatmul.mubr.bf16.gmra.mrb[104].mxu1 %v9074_v3 }
 0x35d   : > { %v2654_v10 = vmax.f32 %v2518_v29, 0.0  ;;  %7261 = vmatprep.mubr.bf16.mxu1 %v9086_v17 }
 0x35e   : > { %v9120_v36 = vpack.c.bf16 %v2656_v57, %v2655_v22 }
 0x35f   : > { %v7155_v43 = vpop.f32.mrb[0].mxu1  ;;  %v9122_v47 = vpack.c.bf16 %v2654_v10, %v2653_v54 }
 0x360   : > { %10802 = vst [vmem:[#allocation154_spill] sm:$0xff] %v9120_v36  ;;  %v2835_v44 = vadd.f32 %v7155_v43, %v9118_v20  ;;  %v2826_v28 = vpop.f32.mrb[1].mxu1 }
 0x361   : > { %10803 = vst [vmem:[#allocation155_spill] sm:$0xff] %v9122_v47  ;;  %v2827_v53 = vadd.f32 %v9118_v20, %v2826_v28  ;;  %v7156_v34 = vpop.f32.mrb[2].mxu1 }
 0x362   : > { %v2838_v4 = vadd.f32 %v7156_v34, %v9118_v20  ;;  %v2829_v5 = vpop.f32.mrb[3].mxu1  ;;  %v3339_v58 = vmax.f32 %v2835_v44, 0.0 }
 0x363   : > { %v2830_v37 = vadd.f32 %v9118_v20, %v2829_v5  ;;  %v3337_v22 = vmax.f32 %v2827_v53, 0.0 }
 0x364   : > { %v3340_v29 = vmax.f32 %v2838_v4, 0.0  ;;  %7262 = vmatmul.mubr.bf16.gmra.mrb[108].mxu1 %v9084_v14 }
 0x365   : > { %v3338_v57 = vmax.f32 %v2830_v37, 0.0  ;;  %7265 = vmatprep.mubr.bf16.mxu1 %v9096_v48 }
 0x366   : > { %v3466_v54 = vpack.c.bf16 %v3340_v29, %v3339_v58 }
 0x367   : > { %v3465_v10 = vpack.c.bf16 %v3338_v57, %v3337_v22  ;;  %v7159_v43 = vpop.f32.mrb[4].mxu1  ;;  %v7712_v57 = vld [vmem:[%s10598_s9 + $0x28] sm:$0xff]  }
 0x368   : > { %v2851_v17 = vadd.f32 %v7159_v43, %v9118_v20  ;;  %v2842_v28 = vpop.f32.mrb[5].mxu1  ;;  %7435 = vmatprep.subr.bf16.mxu1 %v7712_v57 }
 0x369   : > { %v2843_v3 = vadd.f32 %v9118_v20, %v2842_v28  ;;  %v7160_v34 = vpop.f32.mrb[6].mxu1  ;;  %7297 = vmatprep.mubr.bf16.mxu0 %v3465_v10  ;;  %7436 = vmatpush3.bf16.msra.mxu1 %v7712_v57 }
 0x36a   : > { %v2854_v5 = vadd.f32 %v7160_v34, %v9118_v20  ;;  %v2845_v44 = vpop.f32.mrb[7].mxu1  ;;  %7298 = vmatmul.mubr.bf16.vlgmr.msra.gmra.mrb[128].mxu0 %v3466_v54  ;;  %v3343_v53 = vmax.f32 %v2851_v17, 0.0 }
 0x36b   : > { %v2846_v4 = vadd.f32 %v9118_v20, %v2845_v44  ;;  %v3341_v58 = vmax.f32 %v2843_v3, 0.0 }
 0x36c   : > { %v3344_v37 = vmax.f32 %v2854_v5, 0.0  ;;  %7266 = vmatmul.mubr.bf16.gmra.mrb[112].mxu1 %v9094_v63 }
 0x36d   : > { %v3342_v29 = vmax.f32 %v2846_v4, 0.0  ;;  %7269 = vmatprep.mubr.bf16.mxu1 %v9105_v8 }
 0x36e   : > { %v3468_v22 = vpack.c.bf16 %v3344_v37, %v3343_v53 }
 0x36f   : > { %v3467_v10 = vpack.c.bf16 %v3342_v29, %v3341_v58  ;;  %v7163_v43 = vpop.f32.mrb[8].mxu1 }
 0x370   : > { %v2867_v28 = vadd.f32 %v7163_v43, %v9118_v20  ;;  %v2858_v54 = vpop.f32.mrb[9].mxu1 }
 0x371   : > { %v2859_v17 = vadd.f32 %v9118_v20, %v2858_v54  ;;  %v7164_v34 = vpop.f32.mrb[10].mxu1  ;;  %7301 = vmatprep.mubr.bf16.mxu0 %v3467_v10 }
 0x372   : > { %v2870_v3 = vadd.f32 %v7164_v34, %v9118_v20  ;;  %v2861_v5 = vpop.f32.mrb[11].mxu1  ;;  %7302 = vmatmul.mubr.bf16.gmra.mrb[132].mxu0 %v3468_v22  ;;  %v3347_v4 = vmax.f32 %v2867_v28, 0.0 }
 0x373   : > { %v2862_v44 = vadd.f32 %v9118_v20, %v2861_v5  ;;  %v3345_v37 = vmax.f32 %v2859_v17, 0.0 }
 0x374   : > { %v3348_v53 = vmax.f32 %v2870_v3, 0.0  ;;  %7270 = vmatmul.mubr.bf16.gmra.mrb[116].mxu1 %v9100_v19 }
 0x375   : > { %v3346_v58 = vmax.f32 %v2862_v44, 0.0  ;;  %7273 = vmatprep.mubr.bf16.mxu1 %v9111_v23 }
 0x376   : > { %v3470_v29 = vpack.c.bf16 %v3348_v53, %v3347_v4 }
 0x377   : > { %v3469_v43 = vpack.c.bf16 %v3346_v58, %v3345_v37  ;;  %v7167_v54 = vpop.f32.mrb[12].mxu1 }
 0x378   : > { %v2883_v10 = vadd.f32 %v7167_v54, %v9118_v20  ;;  %v2874_v57 = vpop.f32.mrb[13].mxu1 }
 0x379   : > { %v2875_v34 = vadd.f32 %v9118_v20, %v2874_v57  ;;  %v7168_v8 = vpop.f32.mrb[14].mxu1  ;;  %7305 = vmatprep.mubr.bf16.mxu0 %v3469_v43 }
 0x37a   : > { %v2886_v22 = vadd.f32 %v7168_v8, %v9118_v20  ;;  %v2877_v28 = vpop.f32.mrb[15].mxu1  ;;  %7306 = vmatmul.mubr.bf16.gmra.mrb[136].mxu0 %v3470_v29  ;;  %v3351_v17 = vmax.f32 %v2883_v10, 0.0 }
 0x37b   : > { %v2878_v3 = vadd.f32 %v9118_v20, %v2877_v28  ;;  %v3349_v44 = vmax.f32 %v2875_v34, 0.0 }
 0x37c   : > { %v3352_v5 = vmax.f32 %v2886_v22, 0.0  ;;  %7274 = vmatmul.mubr.bf16.gmra.mrb[120].mxu1 %v9109_v11 }
 0x37d   : > { %v3350_v4 = vmax.f32 %v2878_v3, 0.0  ;;  %7277 = vmatprep.mubr.bf16.mxu1 %v9122_v47 }
 0x37e   : > { %v3472_v53 = vpack.c.bf16 %v3352_v5, %v3351_v17 }
 0x37f   : > { %v3471_v37 = vpack.c.bf16 %v3350_v4, %v3349_v44  ;;  %v7171_v58 = vpop.f32.mrb[16].mxu1 }
 0x380   : > { %v2899_v54 = vadd.f32 %v7171_v58, %v9118_v20  ;;  %v2890_v43 = vpop.f32.mrb[17].mxu1 }
 0x381   : > { %v2891_v8 = vadd.f32 %v9118_v20, %v2890_v43  ;;  %v7172_v57 = vpop.f32.mrb[18].mxu1  ;;  %7309 = vmatprep.mubr.bf16.mxu0 %v3471_v37 }
 0x382   : > { %v2902_v29 = vadd.f32 %v7172_v57, %v9118_v20  ;;  %v2893_v10 = vpop.f32.mrb[19].mxu1  ;;  %7310 = vmatmul.mubr.bf16.gmra.mrb[140].mxu0 %v3472_v53  ;;  %v3355_v34 = vmax.f32 %v2899_v54, 0.0 }
 0x383   : > { %v2894_v22 = vadd.f32 %v9118_v20, %v2893_v10  ;;  %v3353_v3 = vmax.f32 %v2891_v8, 0.0 }
 0x384   : > { %v3356_v28 = vmax.f32 %v2902_v29, 0.0  ;;  %7278 = vmatmul.mubr.bf16.gmra.mrb[124].mxu1 %v9120_v36 }
 0x385   : > { %v3354_v17 = vmax.f32 %v2894_v22, 0.0 }
 0x386   : > { %v3474_v5 = vpack.c.bf16 %v3356_v28, %v3355_v34  ;;  %v7713_v28 = vld [vmem:[%s10598_s9 + $0x30] sm:$0xff]  }
 0x387   : > { %v3473_v44 = vpack.c.bf16 %v3354_v17, %v3353_v3  ;;  %v7175_v4 = vpop.f32.mrb[20].mxu1  ;;  %7437 = vmatprep.subr.bf16.mxu1 %v7713_v28 }
 0x388   : > { %v2915_v58 = vadd.f32 %v7175_v4, %v9118_v20  ;;  %v2906_v43 = vpop.f32.mrb[21].mxu1  ;;  %7438 = vmatpush3.bf16.msra.mxu1 %v7713_v28 }
 0x389   : > { %v2907_v37 = vadd.f32 %v9118_v20, %v2906_v43  ;;  %v7176_v47 = vpop.f32.mrb[22].mxu1  ;;  %7313 = vmatprep.mubr.bf16.mxu0 %v3473_v44 }
 0x38a   : > { %v2918_v53 = vadd.f32 %v7176_v47, %v9118_v20  ;;  %v2909_v57 = vpop.f32.mrb[23].mxu1  ;;  %7314 = vmatmul.mubr.bf16.gmra.mrb[144].mxu0 %v3474_v5  ;;  %v3359_v29 = vmax.f32 %v2915_v58, 0.0 }
 0x38b   : > { %v2910_v54 = vadd.f32 %v9118_v20, %v2909_v57  ;;  %v3357_v8 = vmax.f32 %v2907_v37, 0.0 }
 0x38c   : > { %v3360_v10 = vmax.f32 %v2918_v53, 0.0 }
 0x38d   : > { %v3358_v22 = vmax.f32 %v2910_v54, 0.0 }
 0x38e   : > { %v3476_v34 = vpack.c.bf16 %v3360_v10, %v3359_v29 }
 0x38f   : > { %v3475_v3 = vpack.c.bf16 %v3358_v22, %v3357_v8  ;;  %v7179_v17 = vpop.f32.mrb[24].mxu1 }
 0x390   : > { %v2931_v4 = vadd.f32 %v7179_v17, %v9118_v20  ;;  %v2922_v44 = vpop.f32.mrb[25].mxu1 }
 0x391   : > { %v2923_v47 = vadd.f32 %v9118_v20, %v2922_v44  ;;  %v7180_v5 = vpop.f32.mrb[26].mxu1  ;;  %7317 = vmatprep.mubr.bf16.mxu0 %v3475_v3 }
 0x392   : > { %v2934_v58 = vadd.f32 %v7180_v5, %v9118_v20  ;;  %v2925_v43 = vpop.f32.mrb[27].mxu1  ;;  %7318 = vmatmul.mubr.bf16.gmra.mrb[148].mxu0 %v3476_v34  ;;  %v3363_v53 = vmax.f32 %v2931_v4, 0.0 }
 0x393   : > { %v2926_v37 = vadd.f32 %v9118_v20, %v2925_v43  ;;  %v3361_v54 = vmax.f32 %v2923_v47, 0.0 }
 0x394   : > { %v3364_v57 = vmax.f32 %v2934_v58, 0.0 }
 0x395   : > { %v3362_v29 = vmax.f32 %v2926_v37, 0.0 }
 0x396   : > { %v3478_v10 = vpack.c.bf16 %v3364_v57, %v3363_v53 }
 0x397   : > { %v3477_v8 = vpack.c.bf16 %v3362_v29, %v3361_v54  ;;  %v7183_v22 = vpop.f32.mrb[28].mxu1 }
 0x398   : > { %v2947_v17 = vadd.f32 %v7183_v22, %v9118_v20  ;;  %v2938_v36 = vpop.f32.mrb[29].mxu1 }
 0x399   : > { %v2939_v44 = vadd.f32 %v9118_v20, %v2938_v36  ;;  %v7184_v3 = vpop.f32.mrb[30].mxu1  ;;  %7321 = vmatprep.mubr.bf16.mxu0 %v3477_v8 }
 0x39a   : > { %v2950_v28 = vadd.f32 %v7184_v3, %v9118_v20  ;;  %v2941_v5 = vpop.f32.mrb[31].mxu1  ;;  %7322 = vmatmul.mubr.bf16.gmra.mrb[152].mxu0 %v3478_v10  ;;  %v3367_v4 = vmax.f32 %v2947_v17, 0.0 }
 0x39b   : > { %v2942_v34 = vadd.f32 %v9118_v20, %v2941_v5  ;;  %v3365_v47 = vmax.f32 %v2939_v44, 0.0 }
 0x39c   : > { %v3368_v58 = vmax.f32 %v2950_v28, 0.0 }
 0x39d   : > { %v3366_v43 = vmax.f32 %v2942_v34, 0.0 }
 0x39e   : > { %v3480_v37 = vpack.c.bf16 %v3368_v58, %v3367_v4 }
 0x39f   : > { %v3479_v53 = vpack.c.bf16 %v3366_v43, %v3365_v47  ;;  %v7187_v57 = vpop.f32.mrb[32].mxu1 }
 0x3a0   : > { %v2963_v54 = vadd.f32 %v7187_v57, %v9118_v20  ;;  %v2954_v29 = vpop.f32.mrb[33].mxu1 }
 0x3a1   : > { %v2955_v36 = vadd.f32 %v9118_v20, %v2954_v29  ;;  %v7188_v22 = vpop.f32.mrb[34].mxu1  ;;  %7325 = vmatprep.mubr.bf16.mxu0 %v3479_v53 }
 0x3a2   : > { %v2966_v8 = vadd.f32 %v7188_v22, %v9118_v20  ;;  %v2957_v3 = vpop.f32.mrb[35].mxu1  ;;  %7326 = vmatmul.mubr.bf16.gmra.mrb[156].mxu0 %v3480_v37  ;;  %v3371_v17 = vmax.f32 %v2963_v54, 0.0  ;;  %v7714_v37 = vld [vmem:[%s10600_s11] sm:$0xff]  }
 0x3a3   : > { %v2958_v10 = vadd.f32 %v9118_v20, %v2957_v3  ;;  %v3369_v44 = vmax.f32 %v2955_v36, 0.0  ;;  %5409 = vmatpush1.bf16.msra.mxu0 %v7714_v37 }
 0x3a4   : > { %v3372_v28 = vmax.f32 %v2966_v8, 0.0  ;;  %5410 = vmatprep.subr.bf16.mxu0 %v10773_v31 }
 0x3a5   : > { %v3370_v5 = vmax.f32 %v2958_v10, 0.0 }
 0x3a6   : > { %v3482_v34 = vpack.c.bf16 %v3372_v28, %v3371_v17  ;;  %v7715_v28 = vld [vmem:[%s10598_s9 + $0x38] sm:$0xff]  }
 0x3a7   : > { %v3481_v4 = vpack.c.bf16 %v3370_v5, %v3369_v44  ;;  %v7191_v58 = vpop.f32.mrb[36].mxu1  ;;  %7439 = vmatprep.subr.bf16.mxu1 %v7715_v28 }
 0x3a8   : > { %v2979_v47 = vadd.f32 %v7191_v58, %v9118_v20  ;;  %v2970_v43 = vpop.f32.mrb[37].mxu1  ;;  %7440 = vmatpush3.bf16.msra.mxu1 %v7715_v28 }
 0x3a9   : > { %v2971_v57 = vadd.f32 %v9118_v20, %v2970_v43  ;;  %v7192_v29 = vpop.f32.mrb[38].mxu1  ;;  %7329 = vmatprep.mubr.bf16.mxu0 %v3481_v4 }
 0x3aa   : > { %v2982_v53 = vadd.f32 %v7192_v29, %v9118_v20  ;;  %v2973_v22 = vpop.f32.mrb[39].mxu1  ;;  %7330 = vmatmul.mubr.bf16.gmra.mrb[160].mxu0 %v3482_v34  ;;  %v3375_v36 = vmax.f32 %v2979_v47, 0.0 }
 0x3ab   : > { %v2974_v54 = vadd.f32 %v9118_v20, %v2973_v22  ;;  %v3373_v3 = vmax.f32 %v2971_v57, 0.0 }
 0x3ac   : > { %v3376_v8 = vmax.f32 %v2982_v53, 0.0 }
 0x3ad   : > { %v3374_v10 = vmax.f32 %v2974_v54, 0.0 }
 0x3ae   : > { %v3484_v17 = vpack.c.bf16 %v3376_v8, %v3375_v36 }
 0x3af   : > { %v3483_v44 = vpack.c.bf16 %v3374_v10, %v3373_v3  ;;  %v7195_v5 = vpop.f32.mrb[40].mxu1 }
 0x3b0   : > { %v2995_v34 = vadd.f32 %v7195_v5, %v9118_v20  ;;  %v2986_v4 = vpop.f32.mrb[41].mxu1 }
 0x3b1   : > { %v2987_v58 = vadd.f32 %v9118_v20, %v2986_v4  ;;  %v7196_v47 = vpop.f32.mrb[42].mxu1  ;;  %7333 = vmatprep.mubr.bf16.mxu0 %v3483_v44 }
 0x3b2   : > { %v2998_v43 = vadd.f32 %v7196_v47, %v9118_v20  ;;  %v2989_v57 = vpop.f32.mrb[43].mxu1  ;;  %7334 = vmatmul.mubr.bf16.gmra.mrb[164].mxu0 %v3484_v17  ;;  %v3379_v53 = vmax.f32 %v2995_v34, 0.0  ;;  %v7716_v17 = vld [vmem:[%s10600_s11 + $0x8] sm:$0xff]  }
 0x3b3   : > { %v2990_v29 = vadd.f32 %v9118_v20, %v2989_v57  ;;  %v3377_v37 = vmax.f32 %v2987_v58, 0.0  ;;  %5411 = vmatpush1.bf16.msra.mxu0 %v7716_v17 }
 0x3b4   : > { %v3380_v22 = vmax.f32 %v2998_v43, 0.0  ;;  %5412 = vmatprep.subr.bf16.mxu0 %v10773_v31 }
 0x3b5   : > { %v3378_v54 = vmax.f32 %v2990_v29, 0.0 }
 0x3b6   : > { %v3486_v36 = vpack.c.bf16 %v3380_v22, %v3379_v53 }
 0x3b7   : > { %v3485_v8 = vpack.c.bf16 %v3378_v54, %v3377_v37  ;;  %v7199_v3 = vpop.f32.mrb[44].mxu1 }
 0x3b8   : > { %v3011_v10 = vadd.f32 %v7199_v3, %v9118_v20  ;;  %v3002_v5 = vpop.f32.mrb[45].mxu1 }
 0x3b9   : > { %v3003_v4 = vadd.f32 %v9118_v20, %v3002_v5  ;;  %v7200_v44 = vpop.f32.mrb[46].mxu1  ;;  %7337 = vmatprep.mubr.bf16.mxu0 %v3485_v8 }
 0x3ba   : > { %v3014_v28 = vadd.f32 %v7200_v44, %v9118_v20  ;;  %v3005_v47 = vpop.f32.mrb[47].mxu1  ;;  %7338 = vmatmul.mubr.bf16.gmra.mrb[168].mxu0 %v3486_v36  ;;  %v3383_v58 = vmax.f32 %v3011_v10, 0.0 }
 0x3bb   : > { %v3006_v34 = vadd.f32 %v9118_v20, %v3005_v47  ;;  %v3381_v57 = vmax.f32 %v3003_v4, 0.0 }
 0x3bc   : > { %v3384_v43 = vmax.f32 %v3014_v28, 0.0 }
 0x3bd   : > { %v3382_v29 = vmax.f32 %v3006_v34, 0.0 }
 0x3be   : > { %v3488_v53 = vpack.c.bf16 %v3384_v43, %v3383_v58 }
 0x3bf   : > { %v3487_v22 = vpack.c.bf16 %v3382_v29, %v3381_v57  ;;  %v7203_v37 = vpop.f32.mrb[48].mxu1 }
 0x3c0   : > { %v3027_v54 = vadd.f32 %v7203_v37, %v9118_v20  ;;  %v3018_v8 = vpop.f32.mrb[49].mxu1 }
 0x3c1   : > { %v3019_v36 = vadd.f32 %v9118_v20, %v3018_v8  ;;  %v7204_v3 = vpop.f32.mrb[50].mxu1  ;;  %7341 = vmatprep.mubr.bf16.mxu0 %v3487_v22 }
 0x3c2   : > { %v3030_v5 = vadd.f32 %v7204_v3, %v9118_v20  ;;  %v3021_v44 = vpop.f32.mrb[51].mxu1  ;;  %7342 = vmatmul.mubr.bf16.gmra.mrb[172].mxu0 %v3488_v53  ;;  %v3387_v4 = vmax.f32 %v3027_v54, 0.0 }
 0x3c3   : > { %v3022_v10 = vadd.f32 %v9118_v20, %v3021_v44  ;;  %v3385_v47 = vmax.f32 %v3019_v36, 0.0 }
 0x3c4   : > { %v3388_v28 = vmax.f32 %v3030_v5, 0.0 }
 0x3c5   : > { %v3386_v17 = vmax.f32 %v3022_v10, 0.0 }
 0x3c6   : > { %v3490_v34 = vpack.c.bf16 %v3388_v28, %v3387_v4  ;;  %v7717_v4 = vld [vmem:[%s10600_s11 + $0x10] sm:$0xff]  }
 0x3c7   : > { %v3489_v58 = vpack.c.bf16 %v3386_v17, %v3385_v47  ;;  %v7207_v43 = vpop.f32.mrb[52].mxu1  ;;  %5413 = vmatpush1.bf16.msra.mxu0 %v7717_v4 }
 0x3c8   : > { %v3043_v57 = vadd.f32 %v7207_v43, %v9118_v20  ;;  %v3034_v29 = vpop.f32.mrb[53].mxu1  ;;  %5414 = vmatprep.subr.bf16.mxu0 %v10773_v31 }
 0x3c9   : > { %v3035_v37 = vadd.f32 %v9118_v20, %v3034_v29  ;;  %v7208_v8 = vpop.f32.mrb[54].mxu1  ;;  %7345 = vmatprep.mubr.bf16.mxu0 %v3489_v58 }
 0x3ca   : > { %v3046_v22 = vadd.f32 %v7208_v8, %v9118_v20  ;;  %v3037_v3 = vpop.f32.mrb[55].mxu1  ;;  %7346 = vmatmul.mubr.bf16.gmra.mrb[176].mxu0 %v3490_v34  ;;  %v3391_v54 = vmax.f32 %v3043_v57, 0.0 }
 0x3cb   : > { %v3038_v53 = vadd.f32 %v9118_v20, %v3037_v3  ;;  %v3389_v36 = vmax.f32 %v3035_v37, 0.0 }
 0x3cc   : > { %v3392_v5 = vmax.f32 %v3046_v22, 0.0 }
 0x3cd   : > { %v3390_v44 = vmax.f32 %v3038_v53, 0.0 }
 0x3ce   : > { %v3492_v10 = vpack.c.bf16 %v3392_v5, %v3391_v54 }
 0x3cf   : > { %v3491_v28 = vpack.c.bf16 %v3390_v44, %v3389_v36  ;;  %v7211_v47 = vpop.f32.mrb[56].mxu1 }
 0x3d0   : > { %v3059_v17 = vadd.f32 %v7211_v47, %v9118_v20  ;;  %v3050_v58 = vpop.f32.mrb[57].mxu1 }
 0x3d1   : > { %v3051_v43 = vadd.f32 %v9118_v20, %v3050_v58  ;;  %v7212_v34 = vpop.f32.mrb[58].mxu1  ;;  %7349 = vmatprep.mubr.bf16.mxu0 %v3491_v28 }
 0x3d2   : > { %v3062_v57 = vadd.f32 %v7212_v34, %v9118_v20  ;;  %v3053_v29 = vpop.f32.mrb[59].mxu1  ;;  %7350 = vmatmul.mubr.bf16.gmra.mrb[180].mxu0 %v3492_v10  ;;  %v3395_v8 = vmax.f32 %v3059_v17, 0.0 }
 0x3d3   : > { %v3054_v37 = vadd.f32 %v9118_v20, %v3053_v29  ;;  %v3393_v3 = vmax.f32 %v3051_v43, 0.0 }
 0x3d4   : > { %v3396_v22 = vmax.f32 %v3062_v57, 0.0 }
 0x3d5   : > { %v3394_v53 = vmax.f32 %v3054_v37, 0.0 }
 0x3d6   : > { %v3494_v54 = vpack.c.bf16 %v3396_v22, %v3395_v8  ;;  %v7718_v8 = vld [vmem:[%s10600_s11 + $0x18] sm:$0xff]  }
 0x3d7   : > { %v3493_v5 = vpack.c.bf16 %v3394_v53, %v3393_v3  ;;  %v7215_v36 = vpop.f32.mrb[60].mxu1  ;;  %5415 = vmatpush1.bf16.msra.mxu0 %v7718_v8 }
 0x3d8   : > { %v3075_v44 = vadd.f32 %v7215_v36, %v9118_v20  ;;  %v3066_v4 = vpop.f32.mrb[61].mxu1  ;;  %5416 = vmatprep.subr.bf16.mxu0 %v10773_v31 }
 0x3d9   : > { %v3067_v28 = vadd.f32 %v9118_v20, %v3066_v4  ;;  %v7216_v47 = vpop.f32.mrb[62].mxu1  ;;  %7353 = vmatprep.mubr.bf16.mxu0 %v3493_v5 }
 0x3da   : > { %v3078_v58 = vadd.f32 %v7216_v47, %v9118_v20  ;;  %v3069_v34 = vpop.f32.mrb[63].mxu1  ;;  %7354 = vmatmul.mubr.bf16.gmra.mrb[184].mxu0 %v3494_v54  ;;  %v3399_v17 = vmax.f32 %v3075_v44, 0.0 }
 0x3db   : > { %v3070_v10 = vadd.f32 %v9118_v20, %v3069_v34  ;;  %v3397_v43 = vmax.f32 %v3067_v28, 0.0 }
 0x3dc   : > { %v3400_v57 = vmax.f32 %v3078_v58, 0.0 }
 0x3dd   : > { %v3398_v29 = vmax.f32 %v3070_v10, 0.0 }
 0x3de   : > { %v3496_v37 = vpack.c.bf16 %v3400_v57, %v3399_v17 }
 0x3df   : > { %v3495_v22 = vpack.c.bf16 %v3398_v29, %v3397_v43  ;;  %v7219_v3 = vpop.f32.mrb[64].mxu1 }
 0x3e0   : > { %v3091_v53 = vadd.f32 %v7219_v3, %v9118_v20  ;;  %v3082_v5 = vpop.f32.mrb[65].mxu1 }
 0x3e1   : > { %v3083_v36 = vadd.f32 %v9118_v20, %v3082_v5  ;;  %v7220_v54 = vpop.f32.mrb[66].mxu1  ;;  %7357 = vmatprep.mubr.bf16.mxu0 %v3495_v22 }
 0x3e2   : > { %v3094_v44 = vadd.f32 %v7220_v54, %v9118_v20  ;;  %v3085_v4 = vpop.f32.mrb[67].mxu1  ;;  %7358 = vmatmul.mubr.bf16.gmra.mrb[188].mxu0 %v3496_v37  ;;  %v3403_v47 = vmax.f32 %v3091_v53, 0.0 }
 0x3e3   : > { %v3086_v28 = vadd.f32 %v9118_v20, %v3085_v4  ;;  %v3401_v34 = vmax.f32 %v3083_v36, 0.0 }
 0x3e4   : > { %v3404_v58 = vmax.f32 %v3094_v44, 0.0 }
 0x3e5   : > { %v3402_v10 = vmax.f32 %v3086_v28, 0.0 }
 0x3e6   : > { %v3498_v17 = vpack.c.bf16 %v3404_v58, %v3403_v47  ;;  %v7719_v47 = vld [vmem:[%s10600_s11 + $0x20] sm:$0xff]  }
 0x3e7   : > { %v3497_v57 = vpack.c.bf16 %v3402_v10, %v3401_v34  ;;  %v7223_v43 = vpop.f32.mrb[68].mxu1  ;;  %5417 = vmatpush1.bf16.msra.mxu0 %v7719_v47 }
 0x3e8   : > { %v3107_v29 = vadd.f32 %v7223_v43, %v9118_v20  ;;  %v3098_v8 = vpop.f32.mrb[69].mxu1  ;;  %5418 = vmatprep.subr.bf16.mxu0 %v10773_v31 }
 0x3e9   : > { %v3099_v22 = vadd.f32 %v9118_v20, %v3098_v8  ;;  %v7224_v3 = vpop.f32.mrb[70].mxu1  ;;  %7361 = vmatprep.mubr.bf16.mxu0 %v3497_v57 }
 0x3ea   : > { %v3110_v5 = vadd.f32 %v7224_v3, %v9118_v20  ;;  %v3101_v54 = vpop.f32.mrb[71].mxu1  ;;  %7362 = vmatmul.mubr.bf16.gmra.mrb[192].mxu0 %v3498_v17  ;;  %v3407_v53 = vmax.f32 %v3107_v29, 0.0 }
 0x3eb   : > { %v3102_v37 = vadd.f32 %v9118_v20, %v3101_v54  ;;  %v3405_v36 = vmax.f32 %v3099_v22, 0.0 }
 0x3ec   : > { %v3408_v44 = vmax.f32 %v3110_v5, 0.0 }
 0x3ed   : > { %v3406_v4 = vmax.f32 %v3102_v37, 0.0 }
 0x3ee   : > { %v3500_v28 = vpack.c.bf16 %v3408_v44, %v3407_v53 }
 0x3ef   : > { %v3499_v58 = vpack.c.bf16 %v3406_v4, %v3405_v36  ;;  %v7227_v34 = vpop.f32.mrb[72].mxu1 }
 0x3f0   : > { %v3123_v10 = vadd.f32 %v7227_v34, %v9118_v20  ;;  %v3114_v57 = vpop.f32.mrb[73].mxu1 }
 0x3f1   : > { %v3115_v43 = vadd.f32 %v9118_v20, %v3114_v57  ;;  %v7228_v17 = vpop.f32.mrb[74].mxu1  ;;  %7365 = vmatprep.mubr.bf16.mxu0 %v3499_v58 }
 0x3f2   : > { %v3126_v29 = vadd.f32 %v7228_v17, %v9118_v20  ;;  %v3117_v8 = vpop.f32.mrb[75].mxu1  ;;  %7366 = vmatmul.mubr.bf16.gmra.mrb[196].mxu0 %v3500_v28  ;;  %v3411_v3 = vmax.f32 %v3123_v10, 0.0 }
 0x3f3   : > { %v3118_v22 = vadd.f32 %v9118_v20, %v3117_v8  ;;  %v3409_v54 = vmax.f32 %v3115_v43, 0.0 }
 0x3f4   : > { %v3412_v5 = vmax.f32 %v3126_v29, 0.0 }
 0x3f5   : > { %v3410_v37 = vmax.f32 %v3118_v22, 0.0 }
 0x3f6   : > { %v3502_v53 = vpack.c.bf16 %v3412_v5, %v3411_v3  ;;  %v7720_v3 = vld [vmem:[%s10600_s11 + $0x28] sm:$0xff]  }
 0x3f7   : > { %v3501_v44 = vpack.c.bf16 %v3410_v37, %v3409_v54  ;;  %v7231_v36 = vpop.f32.mrb[76].mxu1  ;;  %5419 = vmatpush1.bf16.msra.mxu0 %v7720_v3 }
 0x3f8   : > { %v3139_v4 = vadd.f32 %v7231_v36, %v9118_v20  ;;  %v3130_v47 = vpop.f32.mrb[77].mxu1  ;;  %5420 = vmatprep.subr.bf16.mxu0 %v10773_v31 }
 0x3f9   : > { %v3131_v58 = vadd.f32 %v9118_v20, %v3130_v47  ;;  %v7232_v34 = vpop.f32.mrb[78].mxu1  ;;  %7369 = vmatprep.mubr.bf16.mxu0 %v3501_v44 }
 0x3fa   : > { %v3142_v57 = vadd.f32 %v7232_v34, %v9118_v20  ;;  %v3133_v17 = vpop.f32.mrb[79].mxu1  ;;  %7370 = vmatmul.mubr.bf16.gmra.mrb[200].mxu0 %v3502_v53  ;;  %v3415_v10 = vmax.f32 %v3139_v4, 0.0 }
 0x3fb   : > { %v3134_v28 = vadd.f32 %v9118_v20, %v3133_v17  ;;  %v3413_v43 = vmax.f32 %v3131_v58, 0.0 }
 0x3fc   : > { %v3416_v29 = vmax.f32 %v3142_v57, 0.0 }
 0x3fd   : > { %v3414_v8 = vmax.f32 %v3134_v28, 0.0 }
 0x3fe   : > { %v3504_v22 = vpack.c.bf16 %v3416_v29, %v3415_v10 }
 0x3ff   : > { %v3503_v5 = vpack.c.bf16 %v3414_v8, %v3413_v43  ;;  %v7235_v54 = vpop.f32.mrb[80].mxu1 }
 0x400   : > { %v3155_v37 = vadd.f32 %v7235_v54, %v9118_v20  ;;  %v3146_v44 = vpop.f32.mrb[81].mxu1 }
 0x401   : > { %v3147_v36 = vadd.f32 %v9118_v20, %v3146_v44  ;;  %v7236_v53 = vpop.f32.mrb[82].mxu1  ;;  %7373 = vmatprep.mubr.bf16.mxu0 %v3503_v5 }
 0x402   : > { %v3158_v4 = vadd.f32 %v7236_v53, %v9118_v20  ;;  %v3149_v47 = vpop.f32.mrb[83].mxu1  ;;  %7374 = vmatmul.mubr.bf16.gmra.mrb[204].mxu0 %v3504_v22  ;;  %v3419_v34 = vmax.f32 %v3155_v37, 0.0 }
 0x403   : > { %v3150_v58 = vadd.f32 %v9118_v20, %v3149_v47  ;;  %v3417_v17 = vmax.f32 %v3147_v36, 0.0 }
 0x404   : > { %v3420_v57 = vmax.f32 %v3158_v4, 0.0 }
 0x405   : > { %v3418_v28 = vmax.f32 %v3150_v58, 0.0 }
 0x406   : > { %v3506_v10 = vpack.c.bf16 %v3420_v57, %v3419_v34  ;;  %v7721_v34 = vld [vmem:[%s10600_s11 + $0x30] sm:$0xff]  }
 0x407   : > { %v3505_v29 = vpack.c.bf16 %v3418_v28, %v3417_v17  ;;  %v7239_v43 = vpop.f32.mrb[84].mxu1  ;;  %5421 = vmatpush1.bf16.msra.mxu0 %v7721_v34 }
 0x408   : > { %v3171_v8 = vadd.f32 %v7239_v43, %v9118_v20  ;;  %v3162_v3 = vpop.f32.mrb[85].mxu1  ;;  %5422 = vmatprep.subr.bf16.mxu0 %v10773_v31 }
 0x409   : > { %v3163_v5 = vadd.f32 %v9118_v20, %v3162_v3  ;;  %v7240_v54 = vpop.f32.mrb[86].mxu1  ;;  %7377 = vmatprep.mubr.bf16.mxu0 %v3505_v29 }
 0x40a   : > { %v3174_v44 = vadd.f32 %v7240_v54, %v9118_v20  ;;  %v3165_v53 = vpop.f32.mrb[87].mxu1  ;;  %7378 = vmatmul.mubr.bf16.gmra.mrb[208].mxu0 %v3506_v10  ;;  %v3423_v37 = vmax.f32 %v3171_v8, 0.0 }
 0x40b   : > { %v3166_v22 = vadd.f32 %v9118_v20, %v3165_v53  ;;  %v3421_v36 = vmax.f32 %v3163_v5, 0.0 }
 0x40c   : > { %v3424_v4 = vmax.f32 %v3174_v44, 0.0 }
 0x40d   : > { %v3422_v47 = vmax.f32 %v3166_v22, 0.0 }
 0x40e   : > { %v3508_v58 = vpack.c.bf16 %v3424_v4, %v3423_v37 }
 0x40f   : > { %v3507_v57 = vpack.c.bf16 %v3422_v47, %v3421_v36  ;;  %v7243_v17 = vpop.f32.mrb[88].mxu1 }
 0x410   : > { %v3187_v28 = vadd.f32 %v7243_v17, %v9118_v20  ;;  %v3178_v29 = vpop.f32.mrb[89].mxu1 }
 0x411   : > { %v3179_v43 = vadd.f32 %v9118_v20, %v3178_v29  ;;  %v7244_v10 = vpop.f32.mrb[90].mxu1  ;;  %7381 = vmatprep.mubr.bf16.mxu0 %v3507_v57 }
 0x412   : > { %v3190_v8 = vadd.f32 %v7244_v10, %v9118_v20  ;;  %v3181_v3 = vpop.f32.mrb[91].mxu1  ;;  %7382 = vmatmul.mubr.bf16.gmra.mrb[212].mxu0 %v3508_v58  ;;  %v3427_v54 = vmax.f32 %v3187_v28, 0.0 }
 0x413   : > { %v3182_v5 = vadd.f32 %v9118_v20, %v3181_v3  ;;  %v3425_v53 = vmax.f32 %v3179_v43, 0.0 }
 0x414   : > { %v3428_v44 = vmax.f32 %v3190_v8, 0.0 }
 0x415   : > { %v3426_v22 = vmax.f32 %v3182_v5, 0.0 }
 0x416   : > { %v3510_v37 = vpack.c.bf16 %v3428_v44, %v3427_v54  ;;  %v7722_v54 = vld [vmem:[%s10600_s11 + $0x38] sm:$0xff]  }
 0x417   : > { %v3509_v4 = vpack.c.bf16 %v3426_v22, %v3425_v53  ;;  %v7247_v36 = vpop.f32.mrb[92].mxu1  ;;  %5423 = vmatpush1.bf16.msra.mxu0 %v7722_v54 }
 0x418   : > { %v3203_v47 = vadd.f32 %v7247_v36, %v9118_v20  ;;  %v3194_v34 = vpop.f32.mrb[93].mxu1  ;;  %5424 = vmatprep.subr.bf16.mxu0 %v10773_v31 }
 0x419   : > { %v3195_v57 = vadd.f32 %v9118_v20, %v3194_v34  ;;  %v7248_v17 = vpop.f32.mrb[94].mxu1  ;;  %7385 = vmatprep.mubr.bf16.mxu0 %v3509_v4 }
 0x41a   : > { %v3206_v29 = vadd.f32 %v7248_v17, %v9118_v20  ;;  %v3197_v10 = vpop.f32.mrb[95].mxu1  ;;  %7386 = vmatmul.mubr.bf16.gmra.mrb[216].mxu0 %v3510_v37  ;;  %v3431_v28 = vmax.f32 %v3203_v47, 0.0 }
 0x41b   : > { %v3198_v58 = vadd.f32 %v9118_v20, %v3197_v10  ;;  %v3429_v43 = vmax.f32 %v3195_v57, 0.0 }
 0x41c   : > { %v3432_v8 = vmax.f32 %v3206_v29, 0.0 }
 0x41d   : > { %v3430_v3 = vmax.f32 %v3198_v58, 0.0 }
 0x41e   : > { %v3512_v5 = vpack.c.bf16 %v3432_v8, %v3431_v28 }
 0x41f   : > { %v3511_v44 = vpack.c.bf16 %v3430_v3, %v3429_v43  ;;  %v7251_v53 = vpop.f32.mrb[96].mxu1 }
 0x420   : > { %v3219_v22 = vadd.f32 %v7251_v53, %v9118_v20  ;;  %v3210_v4 = vpop.f32.mrb[97].mxu1 }
 0x421   : > { %v3211_v36 = vadd.f32 %v9118_v20, %v3210_v4  ;;  %v7252_v37 = vpop.f32.mrb[98].mxu1  ;;  %7389 = vmatprep.mubr.bf16.mxu0 %v3511_v44 }
 0x422   : > { %v3222_v47 = vadd.f32 %v7252_v37, %v9118_v20  ;;  %v3213_v34 = vpop.f32.mrb[99].mxu1  ;;  %7390 = vmatmul.mubr.bf16.gmra.mrb[220].mxu0 %v3512_v5  ;;  %v3435_v17 = vmax.f32 %v3219_v22, 0.0 }
 0x423   : > { %v3214_v57 = vadd.f32 %v9118_v20, %v3213_v34  ;;  %v3433_v10 = vmax.f32 %v3211_v36, 0.0 }
 0x424   : > { %v3436_v29 = vmax.f32 %v3222_v47, 0.0 }
 0x425   : > { %v3434_v58 = vmax.f32 %v3214_v57, 0.0 }
 0x426   : > { %v3514_v28 = vpack.c.bf16 %v3436_v29, %v3435_v17  ;;  %v7723_v17 = vld [vmem:[%s10600_s11 + $0x40] sm:$0xff]  }
 0x427   : > { %v3513_v8 = vpack.c.bf16 %v3434_v58, %v3433_v10  ;;  %v7255_v43 = vpop.f32.mrb[100].mxu1  ;;  %5425 = vmatpush1.bf16.msra.mxu0 %v7723_v17 }
 0x428   : > { %v3235_v3 = vadd.f32 %v7255_v43, %v9118_v20  ;;  %v3226_v54 = vpop.f32.mrb[101].mxu1  ;;  %5426 = vmatprep.subr.bf16.mxu0 %v10773_v31 }
 0x429   : > { %v3227_v44 = vadd.f32 %v9118_v20, %v3226_v54  ;;  %v7256_v53 = vpop.f32.mrb[102].mxu1  ;;  %7393 = vmatprep.mubr.bf16.mxu0 %v3513_v8 }
 0x42a   : > { %v3238_v4 = vadd.f32 %v7256_v53, %v9118_v20  ;;  %v3229_v37 = vpop.f32.mrb[103].mxu1  ;;  %7394 = vmatmul.mubr.bf16.gmra.mrb[224].mxu0 %v3514_v28  ;;  %v3439_v22 = vmax.f32 %v3235_v3, 0.0 }
 0x42b   : > { %v3230_v5 = vadd.f32 %v9118_v20, %v3229_v37  ;;  %v3437_v36 = vmax.f32 %v3227_v44, 0.0 }
 0x42c   : > { %v3440_v47 = vmax.f32 %v3238_v4, 0.0 }
 0x42d   : > { %v3438_v34 = vmax.f32 %v3230_v5, 0.0 }
 0x42e   : > { %v3516_v57 = vpack.c.bf16 %v3440_v47, %v3439_v22 }
 0x42f   : > { %v3515_v29 = vpack.c.bf16 %v3438_v34, %v3437_v36  ;;  %v7259_v10 = vpop.f32.mrb[104].mxu1 }
 0x430   : > { %v3251_v58 = vadd.f32 %v7259_v10, %v9118_v20  ;;  %v3242_v8 = vpop.f32.mrb[105].mxu1 }
 0x431   : > { %v3243_v43 = vadd.f32 %v9118_v20, %v3242_v8  ;;  %v7260_v28 = vpop.f32.mrb[106].mxu1  ;;  %7397 = vmatprep.mubr.bf16.mxu0 %v3515_v29 }
 0x432   : > { %v3254_v3 = vadd.f32 %v7260_v28, %v9118_v20  ;;  %v3245_v54 = vpop.f32.mrb[107].mxu1  ;;  %7398 = vmatmul.mubr.bf16.gmra.mrb[228].mxu0 %v3516_v57  ;;  %v3443_v53 = vmax.f32 %v3251_v58, 0.0 }
 0x433   : > { %v3246_v44 = vadd.f32 %v9118_v20, %v3245_v54  ;;  %v3441_v37 = vmax.f32 %v3243_v43, 0.0 }
 0x434   : > { %v3444_v4 = vmax.f32 %v3254_v3, 0.0 }
 0x435   : > { %v3442_v5 = vmax.f32 %v3246_v44, 0.0 }
 0x436   : > { %v3518_v22 = vpack.c.bf16 %v3444_v4, %v3443_v53  ;;  %v9293_v53 = vld [vmem:[%s10597_s8] ss:$0 sm:$0xff] }
 0x437   : > { %v3517_v47 = vpack.c.bf16 %v3442_v5, %v3441_v37  ;;  %v7263_v36 = vpop.f32.mrb[108].mxu1 }
 0x438   : > { %v3267_v34 = vadd.f32 %v7263_v36, %v9118_v20  ;;  %v3258_v17 = vpop.f32.mrb[109].mxu1 }
 0x439   : > { %v3259_v29 = vadd.f32 %v9118_v20, %v3258_v17  ;;  %v7264_v10 = vpop.f32.mrb[110].mxu1  ;;  %7401 = vmatprep.mubr.bf16.mxu0 %v3517_v47 }
 0x43a   : > { %v3270_v8 = vadd.f32 %v7264_v10, %v9118_v20  ;;  %v3261_v28 = vpop.f32.mrb[111].mxu1  ;;  %7402 = vmatmul.mubr.bf16.gmra.mrb[232].mxu0 %v3518_v22  ;;  %v3447_v58 = vmax.f32 %v3267_v34, 0.0  ;;  %v7724_v22 = vld [vmem:[%s10600_s11 + $0x48] sm:$0xff]  }
 0x43b   : > { %v3262_v57 = vadd.f32 %v9118_v20, %v3261_v28  ;;  %v3445_v43 = vmax.f32 %v3259_v29, 0.0  ;;  %5427 = vmatpush1.bf16.msra.mxu0 %v7724_v22 }
 0x43c   : > { %v3448_v3 = vmax.f32 %v3270_v8, 0.0  ;;  %5428 = vmatprep.subr.bf16.mxu0 %v10773_v31 }
 0x43d   : > { %v3446_v54 = vmax.f32 %v3262_v57, 0.0  ;;  %v7299_v44 = vpop.f32.mrb[128].mxu0 }
 0x43e   : > { %v3520_v4 = vpack.c.bf16 %v3448_v3, %v3447_v58  ;;  %v3636_v37 = vadd.f32 %v7299_v44, %v8241_v25  ;;  %v3627_v5 = vpop.f32.mrb[129].mxu0 }
 0x43f   : > { %v3519_v47 = vpack.c.bf16 %v3446_v54, %v3445_v43  ;;  %v3628_v36 = vadd.f32 %v3627_v5, %v8217_v0  ;;  %v7267_v34 = vpop.f32.mrb[112].mxu1  ;;  %v7300_v17 = vpop.f32.mrb[130].mxu0  ;;  %v9311_v54 = vld [vmem:[%s10595_s6] ss:$0 sm:$0xff] }
 0x440   : > { %v4147_v29 = vadd.f32 %v9293_v53, %v3636_v37  ;;  %v3283_v10 = vadd.f32 %v7267_v34, %v9118_v20  ;;  %v3639_v8 = vadd.f32 %v7300_v17, %v8247_v33  ;;  %v3274_v28 = vpop.f32.mrb[113].mxu1  ;;  %v3630_v57 = vpop.f32.mrb[131].mxu0 }
 0x441   : > { %v4145_v25 = vadd.f32 %v9293_v53, %v3628_v36  ;;  %v3275_v58 = vadd.f32 %v9118_v20, %v3274_v28  ;;  %v3631_v3 = vadd.f32 %v3630_v57, %v8223_v9  ;;  %v7268_v43 = vpop.f32.mrb[114].mxu1  ;;  %7405 = vmatprep.mubr.bf16.mxu0 %v3519_v47 }
 0x442   : > { %v4148_v0 = vadd.f32 %v9293_v53, %v3639_v8  ;;  %v3286_v33 = vadd.f32 %v9311_v54, %v7268_v43  ;;  %v3277_v44 = vpop.f32.mrb[115].mxu1  ;;  %7406 = vmatmul.mubr.bf16.gmra.mrb[236].mxu0 %v3520_v4  ;;  %v4275_v9 = vmax.f32 %v4147_v29, 0.0  ;;  %v3451_v5 = vmax.f32 %v3283_v10, 0.0 }
 0x443   : > { %v4146_v37 = vadd.f32 %v9293_v53, %v3631_v3  ;;  %v3278_v20 = vadd.f32 %v9311_v54, %v3277_v44  ;;  %v3449_v36 = vmax.f32 %v3275_v58, 0.0  ;;  %v4273_v8 = vmax.f32 %v4145_v25, 0.0 }
 0x444   : > { %v4276_v22 = vmax.f32 %v4148_v0, 0.0  ;;  %v3452_v47 = vmax.f32 %v3286_v33, 0.0 }
 0x445   : > { %v3450_v34 = vmax.f32 %v3278_v20, 0.0  ;;  %v7303_v17 = vpop.f32.mrb[132].mxu0  ;;  %v4274_v28 = vmax.f32 %v4146_v37, 0.0 }
 0x446   : > { %v4402_v57 = vpack.c.bf16 %v4276_v22, %v4275_v9  ;;  %v3522_v11 = vpack.c.bf16 %v3452_v47, %v3451_v5  ;;  %v3652_v23 = vadd.f32 %v7303_v17, %v8295_v16  ;;  %v3643_v43 = vpop.f32.mrb[133].mxu0 }
 0x447   : > { %v3521_v19 = vpack.c.bf16 %v3450_v34, %v3449_v36  ;;  %v3644_v4 = vadd.f32 %v3643_v43, %v8271_v50  ;;  %v7271_v3 = vpop.f32.mrb[116].mxu1  ;;  %v7304_v63 = vpop.f32.mrb[134].mxu0  ;;  %v4401_v44 = vpack.c.bf16 %v4274_v28, %v4273_v8 }
 0x448   : > { %v4151_v29 = vadd.f32 %v9293_v53, %v3652_v23  ;;  %v3299_v10 = vadd.f32 %v9311_v54, %v7271_v3  ;;  %v3655_v58 = vadd.f32 %v7304_v63, %v8301_v27  ;;  %v3290_v0 = vpop.f32.mrb[117].mxu1  ;;  %v3646_v25 = vpop.f32.mrb[135].mxu0 }
 0x449   : > { %v4149_v33 = vadd.f32 %v9293_v53, %v3644_v4  ;;  %v3291_v37 = vadd.f32 %v9311_v54, %v3290_v0  ;;  %v3647_v16 = vadd.f32 %v3646_v25, %v8277_v59  ;;  %v7272_v20 = vpop.f32.mrb[118].mxu1  ;;  %7409 = vmatprep.mubr.bf16.mxu0 %v3521_v19  ;;  %7441 = vmatprep.mubr.bf16.mxu1 %v4401_v44 }
 0x44a   : > { %v4152_v50 = vadd.f32 %v9293_v53, %v3655_v58  ;;  %v3302_v9 = vadd.f32 %v9311_v54, %v7272_v20  ;;  %v3293_v23 = vpop.f32.mrb[119].mxu1  ;;  %7410 = vmatmul.mubr.bf16.gmra.mrb[240].mxu0 %v3522_v11  ;;  %7442 = vmatmul.mubr.bf16.vlgmr.msra.gmra.mrb[128].mxu1 %v4402_v57  ;;  %v4279_v5 = vmax.f32 %v4151_v29, 0.0  ;;  %v3455_v22 = vmax.f32 %v3299_v10, 0.0  ;;  %v7725_v11 = vld [vmem:[%s10600_s11 + $0x50] sm:$0xff]  }
 0x44b   : > { %v4150_v27 = vadd.f32 %v9293_v53, %v3647_v16  ;;  %v3294_v63 = vadd.f32 %v9311_v54, %v3293_v23  ;;  %v3453_v34 = vmax.f32 %v3291_v37, 0.0  ;;  %v4277_v19 = vmax.f32 %v4149_v33, 0.0  ;;  %5429 = vmatpush1.bf16.msra.mxu0 %v7725_v11 }
 0x44c   : > { %v4280_v47 = vmax.f32 %v4152_v50, 0.0  ;;  %v3456_v36 = vmax.f32 %v3302_v9, 0.0  ;;  %5430 = vmatprep.subr.bf16.mxu0 %v10773_v31 }
 0x44d   : > { %v3454_v59 = vmax.f32 %v3294_v63, 0.0  ;;  %v7307_v17 = vpop.f32.mrb[136].mxu0  ;;  %v4278_v8 = vmax.f32 %v4150_v27, 0.0 }
 0x44e   : > { %v4404_v28 = vpack.c.bf16 %v4280_v47, %v4279_v5  ;;  %v3524_v43 = vpack.c.bf16 %v3456_v36, %v3455_v22  ;;  %v3668_v4 = vadd.f32 %v7307_v17, %v8336_v18  ;;  %v3659_v3 = vpop.f32.mrb[137].mxu0 }
 0x44f   : > { %v3523_v57 = vpack.c.bf16 %v3454_v59, %v3453_v34  ;;  %v3660_v44 = vadd.f32 %v3659_v3, %v8319_v49  ;;  %v7275_v29 = vpop.f32.mrb[120].mxu1  ;;  %v7308_v10 = vpop.f32.mrb[138].mxu0  ;;  %v4403_v58 = vpack.c.bf16 %v4278_v8, %v4277_v19 }
 0x450   : > { %v4155_v0 = vadd.f32 %v9293_v53, %v3668_v4  ;;  %v3315_v25 = vadd.f32 %v9311_v54, %v7275_v29  ;;  %v3671_v33 = vadd.f32 %v7308_v10, %v8342_v30  ;;  %v3306_v37 = vpop.f32.mrb[121].mxu1  ;;  %v3662_v16 = vpop.f32.mrb[139].mxu0 }
 0x451   : > { %v4153_v18 = vadd.f32 %v9293_v53, %v3660_v44  ;;  %v3307_v20 = vadd.f32 %v9311_v54, %v3306_v37  ;;  %v3663_v50 = vadd.f32 %v3662_v16, %v8325_v61  ;;  %v7276_v9 = vpop.f32.mrb[122].mxu1  ;;  %7413 = vmatprep.mubr.bf16.mxu0 %v3523_v57  ;;  %7445 = vmatprep.mubr.bf16.mxu1 %v4403_v58 }
 0x452   : > { %v4156_v49 = vadd.f32 %v9293_v53, %v3671_v33  ;;  %v3318_v23 = vadd.f32 %v9311_v54, %v7276_v9  ;;  %v3309_v27 = vpop.f32.mrb[123].mxu1  ;;  %7414 = vmatmul.mubr.bf16.gmra.mrb[244].mxu0 %v3524_v43  ;;  %7446 = vmatmul.mubr.bf16.gmra.mrb[132].mxu1 %v4404_v28  ;;  %v4283_v5 = vmax.f32 %v4155_v0, 0.0  ;;  %v3459_v22 = vmax.f32 %v3315_v25, 0.0 }
 0x453   : > { %v4154_v30 = vadd.f32 %v9293_v53, %v3663_v50  ;;  %v3310_v63 = vadd.f32 %v9311_v54, %v3309_v27  ;;  %v3457_v36 = vmax.f32 %v3307_v20, 0.0  ;;  %v4281_v17 = vmax.f32 %v4153_v18, 0.0 }
 0x454   : > { %v4284_v47 = vmax.f32 %v4156_v49, 0.0  ;;  %v3460_v61 = vmax.f32 %v3318_v23, 0.0 }
 0x455   : > { %v3458_v34 = vmax.f32 %v3310_v63, 0.0  ;;  %v7311_v59 = vpop.f32.mrb[140].mxu0  ;;  %v4282_v19 = vmax.f32 %v4154_v30, 0.0 }
 0x456   : > { %v4406_v8 = vpack.c.bf16 %v4284_v47, %v4283_v5  ;;  %v3526_v4 = vpack.c.bf16 %v3460_v61, %v3459_v22  ;;  %v3684_v43 = vadd.f32 %v7311_v59, %v8371_v26  ;;  %v3675_v28 = vpop.f32.mrb[141].mxu0  ;;  %v10804_v26 = vld [vmem:[#allocation16_spill] sm:$0xff] }
 0x457   : > { %v3525_v3 = vpack.c.bf16 %v3458_v34, %v3457_v36  ;;  %v3676_v11 = vadd.f32 %v3675_v28, %v8356_v52  ;;  %v7279_v57 = vpop.f32.mrb[124].mxu1  ;;  %v7312_v44 = vpop.f32.mrb[142].mxu0  ;;  %v4405_v29 = vpack.c.bf16 %v4282_v19, %v4281_v17  ;;  %v10805_v17 = vld [vmem:[#allocation24_spill] sm:$0xff] }
 0x458   : > { %v4159_v10 = vadd.f32 %v9293_v53, %v3684_v43  ;;  %v3331_v58 = vadd.f32 %v9311_v54, %v7279_v57  ;;  %v3687_v0 = vadd.f32 %v7312_v44, %v8377_v42  ;;  %v3322_v25 = vpop.f32.mrb[125].mxu1  ;;  %v3678_v33 = vpop.f32.mrb[143].mxu0  ;;  %v10807_v44 = vld [vmem:[#allocation26_spill] sm:$0xff] }
 0x459   : > { %v4157_v37 = vadd.f32 %v9293_v53, %v3676_v11  ;;  %v3323_v16 = vadd.f32 %v9311_v54, %v3322_v25  ;;  %v3679_v18 = vadd.f32 %v3678_v33, %v10804_v26  ;;  %v7280_v20 = vpop.f32.mrb[126].mxu1  ;;  %7417 = vmatprep.mubr.bf16.mxu0 %v3525_v3  ;;  %7449 = vmatprep.mubr.bf16.mxu1 %v4405_v29 }
 0x45a   : > { %v4160_v52 = vadd.f32 %v9293_v53, %v3687_v0  ;;  %v3334_v50 = vadd.f32 %v9311_v54, %v7280_v20  ;;  %v3325_v9 = vpop.f32.mrb[127].mxu1  ;;  %7418 = vmatmul.mubr.bf16.gmra.mrb[248].mxu0 %v3526_v4  ;;  %7450 = vmatmul.mubr.bf16.gmra.mrb[136].mxu1 %v4406_v8  ;;  %v4287_v23 = vmax.f32 %v4159_v10, 0.0  ;;  %v3463_v27 = vmax.f32 %v3331_v58, 0.0  ;;  %v7726_v8 = vld [vmem:[%s10600_s11 + $0x58] sm:$0xff]  }
 0x45b   : > { %v4158_v42 = vadd.f32 %v9293_v53, %v3679_v18  ;;  %v3326_v49 = vadd.f32 %v9311_v54, %v3325_v9  ;;  %v3461_v5 = vmax.f32 %v3323_v16, 0.0  ;;  %v4285_v61 = vmax.f32 %v4157_v37, 0.0  ;;  %v10806_v54 = vld [vmem:[#allocation20_spill] sm:$0xff]  ;;  %5431 = vmatpush1.bf16.msra.mxu0 %v7726_v8  ;;  %v10808_v0 = vld [vmem:[#allocation22_spill] sm:$0xff] }
 0x45c   : > { %v4288_v30 = vmax.f32 %v4160_v52, 0.0  ;;  %v3464_v63 = vmax.f32 %v3334_v50, 0.0  ;;  %5432 = vmatprep.subr.bf16.mxu0 %v10773_v31  ;;  %v10809_v9 = vld [vmem:[#allocation32_spill] sm:$0xff] }
 0x45d   : > { %v3462_v22 = vmax.f32 %v3326_v49, 0.0  ;;  %v7315_v47 = vpop.f32.mrb[144].mxu0  ;;  %v4286_v36 = vmax.f32 %v4158_v42, 0.0 }
 0x45e   : > { %v4408_v34 = vpack.c.bf16 %v4288_v30, %v4287_v23  ;;  %v3528_v59 = vpack.c.bf16 %v3464_v63, %v3463_v27  ;;  %v3700_v19 = vadd.f32 %v7315_v47, %v10805_v17  ;;  %v3691_v43 = vpop.f32.mrb[145].mxu0  ;;  %v10810_v23 = vld [vmem:[#allocation28_spill] sm:$0xff] }
 0x45f   : > { %v3527_v4 = vpack.c.bf16 %v3462_v22, %v3461_v5  ;;  %v3692_v28 = vadd.f32 %v3691_v43, %v10806_v54  ;;  %v7316_v3 = vpop.f32.mrb[146].mxu0  ;;  %v4407_v11 = vpack.c.bf16 %v4286_v36, %v4285_v61  ;;  %v10811_v22 = vld [vmem:[#allocation34_spill] sm:$0xff] }
 0x460   : > { %v4163_v57 = vadd.f32 %v9293_v53, %v3700_v19  ;;  %v3703_v29 = vadd.f32 %v7316_v3, %v10807_v44  ;;  %v3694_v10 = vpop.f32.mrb[147].mxu0  ;;  %v10812_v36 = vld [vmem:[#allocation30_spill] sm:$0xff]  ;;  %v10813_v3 = vld [vmem:[#allocation40_spill] sm:$0xff]  ;;  %v7727_v44 = vld [vmem:[%s10600_s11 + $0x60] sm:$0xff]  }
 0x461   : > { %v4161_v58 = vadd.f32 %v9293_v53, %v3692_v28  ;;  %v3695_v25 = vadd.f32 %v3694_v10, %v10808_v0  ;;  %7421 = vmatprep.mubr.bf16.mxu0 %v3527_v4  ;;  %7453 = vmatprep.mubr.bf16.mxu1 %v4407_v11 }
 0x462   : > { %v4164_v33 = vadd.f32 %v9293_v53, %v3703_v29  ;;  %7422 = vmatmul.mubr.bf16.gmra.mrb[252].mxu0 %v3528_v59  ;;  %7454 = vmatmul.mubr.bf16.gmra.mrb[140].mxu1 %v4408_v34  ;;  %v4291_v16 = vmax.f32 %v4163_v57, 0.0  ;;  %v10814_v29 = vld [vmem:[#allocation36_spill] sm:$0xff] }
 0x463   : > { %v4162_v37 = vadd.f32 %v9293_v53, %v3695_v25  ;;  %5440 = vmatprep.mubr.bf16.mxu0 %v8758_v56  ;;  %v4289_v20 = vmax.f32 %v4161_v58, 0.0  ;;  %5433 = vmatpush1.bf16.msra.mxu0 %v7727_v44 }
 0x464   : > { %v4292_v26 = vmax.f32 %v4164_v33, 0.0  ;;  %v10815_v33 = vld [vmem:[#allocation42_spill] sm:$0xff]  ;;  %5434 = vmatprep.subr.bf16.mxu0 %v10773_v31 }
 0x465   : > { %v7319_v18 = vpop.f32.mrb[148].mxu0  ;;  %v4290_v52 = vmax.f32 %v4162_v37, 0.0 }
 0x466   : > { %v4410_v50 = vpack.c.bf16 %v4292_v26, %v4291_v16  ;;  %v3716_v42 = vadd.f32 %v7319_v18, %v10809_v9  ;;  %v3707_v49 = vpop.f32.mrb[149].mxu0  ;;  %v10816_v18 = vld [vmem:[#allocation38_spill] sm:$0xff] }
 0x467   : > { %v3708_v27 = vadd.f32 %v3707_v49, %v10810_v23  ;;  %v7320_v30 = vpop.f32.mrb[150].mxu0  ;;  %v4409_v63 = vpack.c.bf16 %v4290_v52, %v4289_v20 }
 0x468   : > { %v4167_v5 = vadd.f32 %v9293_v53, %v3716_v42  ;;  %v3719_v47 = vadd.f32 %v7320_v30, %v10811_v22  ;;  %v3710_v56 = vpop.f32.mrb[151].mxu0 }
 0x469   : > { %v4165_v61 = vadd.f32 %v9293_v53, %v3708_v27  ;;  %v3711_v34 = vadd.f32 %v3710_v56, %v10812_v36  ;;  %7457 = vmatprep.mubr.bf16.mxu1 %v4409_v63  ;;  %v10817_v63 = vld [vmem:[#allocation48_spill] sm:$0xff] }
 0x46a   : > { %v4168_v59 = vadd.f32 %v9293_v53, %v3719_v47  ;;  %7458 = vmatmul.mubr.bf16.gmra.mrb[144].mxu1 %v4410_v50  ;;  %v4295_v19 = vmax.f32 %v4167_v5, 0.0  ;;  %v10818_v47 = vld [vmem:[#allocation44_spill] sm:$0xff] }
 0x46b   : > { %v4166_v17 = vadd.f32 %v9293_v53, %v3711_v34  ;;  %v4293_v4 = vmax.f32 %v4165_v61, 0.0 }
 0x46c   : > { %v4296_v43 = vmax.f32 %v4168_v59, 0.0  ;;  %v10819_v59 = vld [vmem:[#allocation50_spill] sm:$0xff] }
 0x46d   : > { %v7323_v8 = vpop.f32.mrb[152].mxu0  ;;  %v4294_v54 = vmax.f32 %v4166_v17, 0.0 }
 0x46e   : > { %v4412_v28 = vpack.c.bf16 %v4296_v43, %v4295_v19  ;;  %v3732_v11 = vadd.f32 %v7323_v8, %v10813_v3  ;;  %v3723_v57 = vpop.f32.mrb[153].mxu0  ;;  %v10820_v8 = vld [vmem:[#allocation46_spill] sm:$0xff] }
 0x46f   : > { %v3724_v10 = vadd.f32 %v3723_v57, %v10814_v29  ;;  %v7324_v58 = vpop.f32.mrb[154].mxu0  ;;  %v4411_v0 = vpack.c.bf16 %v4294_v54, %v4293_v4 }
 0x470   : > { %v4171_v25 = vadd.f32 %v9293_v53, %v3732_v11  ;;  %v3735_v37 = vadd.f32 %v7324_v58, %v10815_v33  ;;  %v3726_v16 = vpop.f32.mrb[155].mxu0  ;;  %v10821_v58 = vld [vmem:[#allocation56_spill] sm:$0xff] }
 0x471   : > { %v4169_v26 = vadd.f32 %v9293_v53, %v3724_v10  ;;  %v3727_v20 = vadd.f32 %v3726_v16, %v10816_v18  ;;  %7461 = vmatprep.mubr.bf16.mxu1 %v4411_v0  ;;  %v7728_v33 = vld [vmem:[%s10600_s11 + $0x68] sm:$0xff]  }
 0x472   : > { %v4172_v52 = vadd.f32 %v9293_v53, %v3735_v37  ;;  %7462 = vmatmul.mubr.bf16.gmra.mrb[148].mxu1 %v4412_v28  ;;  %v4299_v9 = vmax.f32 %v4171_v25, 0.0  ;;  %v10822_v37 = vld [vmem:[#allocation52_spill] sm:$0xff]  ;;  %5435 = vmatpush1.bf16.msra.mxu0 %v7728_v33 }
 0x473   : > { %v4170_v50 = vadd.f32 %v9293_v53, %v3727_v20  ;;  %v4297_v23 = vmax.f32 %v4169_v26, 0.0  ;;  %5436 = vmatprep.subr.bf16.mxu0 %v10773_v31 }
 0x474   : > { %v4300_v42 = vmax.f32 %v4172_v52, 0.0  ;;  %v10823_v52 = vld [vmem:[#allocation58_spill] sm:$0xff] }
 0x475   : > { %v7327_v49 = vpop.f32.mrb[156].mxu0  ;;  %v4298_v27 = vmax.f32 %v4170_v50, 0.0 }
 0x476   : > { %v4414_v30 = vpack.c.bf16 %v4300_v42, %v4299_v9  ;;  %v3748_v5 = vadd.f32 %v7327_v49, %v10817_v63  ;;  %v3739_v22 = vpop.f32.mrb[157].mxu0  ;;  %v10824_v49 = vld [vmem:[#allocation54_spill] sm:$0xff] }
 0x477   : > { %v3740_v56 = vadd.f32 %v3739_v22, %v10818_v47  ;;  %v7328_v61 = vpop.f32.mrb[158].mxu0  ;;  %v4413_v36 = vpack.c.bf16 %v4298_v27, %v4297_v23 }
 0x478   : > { %v4175_v34 = vadd.f32 %v9293_v53, %v3748_v5  ;;  %v3751_v17 = vadd.f32 %v7328_v61, %v10819_v59  ;;  %v3742_v19 = vpop.f32.mrb[159].mxu0 }
 0x479   : > { %v4173_v43 = vadd.f32 %v9293_v53, %v3740_v56  ;;  %v3743_v4 = vadd.f32 %v3742_v19, %v10820_v8  ;;  %7465 = vmatprep.mubr.bf16.mxu1 %v4413_v36  ;;  %v10825_v36 = vld [vmem:[#allocation64_spill] sm:$0xff] }
 0x47a   : > { %v4176_v54 = vadd.f32 %v9293_v53, %v3751_v17  ;;  %7466 = vmatmul.mubr.bf16.gmra.mrb[152].mxu1 %v4414_v30  ;;  %v4303_v3 = vmax.f32 %v4175_v34, 0.0  ;;  %v10826_v17 = vld [vmem:[#allocation60_spill] sm:$0xff] }
 0x47b   : > { %v4174_v28 = vadd.f32 %v9293_v53, %v3743_v4  ;;  %v4301_v44 = vmax.f32 %v4173_v43, 0.0 }
 0x47c   : > { %v4304_v11 = vmax.f32 %v4176_v54, 0.0  ;;  %v10827_v54 = vld [vmem:[#allocation66_spill] sm:$0xff] }
 0x47d   : > { %v7331_v57 = vpop.f32.mrb[160].mxu0  ;;  %v4302_v29 = vmax.f32 %v4174_v28, 0.0 }
 0x47e   : > { %v4416_v10 = vpack.c.bf16 %v4304_v11, %v4303_v3  ;;  %v3764_v0 = vadd.f32 %v7331_v57, %v10821_v58  ;;  %v3755_v25 = vpop.f32.mrb[161].mxu0  ;;  %v10828_v57 = vld [vmem:[#allocation62_spill] sm:$0xff] }
 0x47f   : > { %v3756_v16 = vadd.f32 %v3755_v25, %v10822_v37  ;;  %v7332_v26 = vpop.f32.mrb[162].mxu0  ;;  %v4415_v18 = vpack.c.bf16 %v4302_v29, %v4301_v44 }
 0x480   : > { %v4179_v20 = vadd.f32 %v9293_v53, %v3764_v0  ;;  %v3767_v50 = vadd.f32 %v7332_v26, %v10823_v52  ;;  %v3758_v9 = vpop.f32.mrb[163].mxu0  ;;  %v10829_v26 = vld [vmem:[#allocation72_spill] sm:$0xff]  ;;  %v7729_v52 = vld [vmem:[%s10600_s11 + $0x70] sm:$0xff]  }
 0x481   : > { %v4177_v42 = vadd.f32 %v9293_v53, %v3756_v16  ;;  %v3759_v23 = vadd.f32 %v3758_v9, %v10824_v49  ;;  %7469 = vmatprep.mubr.bf16.mxu1 %v4415_v18  ;;  %5437 = vmatpush1.bf16.msra.mxu0 %v7729_v52 }
 0x482   : > { %v4180_v27 = vadd.f32 %v9293_v53, %v3767_v50  ;;  %7470 = vmatmul.mubr.bf16.gmra.mrb[156].mxu1 %v4416_v10  ;;  %v4307_v63 = vmax.f32 %v4179_v20, 0.0  ;;  %v10830_v50 = vld [vmem:[#allocation68_spill] sm:$0xff]  ;;  %5438 = vmatprep.subr.bf16.mxu0 %v10773_v31 }
 0x483   : > { %v4178_v30 = vadd.f32 %v9293_v53, %v3759_v23  ;;  %v4305_v47 = vmax.f32 %v4177_v42, 0.0 }
 0x484   : > { %v4308_v5 = vmax.f32 %v4180_v27, 0.0  ;;  %v10831_v27 = vld [vmem:[#allocation74_spill] sm:$0xff] }
 0x485   : > { %v7335_v22 = vpop.f32.mrb[164].mxu0  ;;  %v4306_v56 = vmax.f32 %v4178_v30, 0.0 }
 0x486   : > { %v4418_v61 = vpack.c.bf16 %v4308_v5, %v4307_v63  ;;  %v3780_v34 = vadd.f32 %v7335_v22, %v10825_v36  ;;  %v3771_v59 = vpop.f32.mrb[165].mxu0  ;;  %v10832_v22 = vld [vmem:[#allocation70_spill] sm:$0xff] }
 0x487   : > { %v3772_v19 = vadd.f32 %v3771_v59, %v10826_v17  ;;  %v7336_v43 = vpop.f32.mrb[166].mxu0  ;;  %v4417_v8 = vpack.c.bf16 %v4306_v56, %v4305_v47 }
 0x488   : > { %v4183_v4 = vadd.f32 %v9293_v53, %v3780_v34  ;;  %v3783_v28 = vadd.f32 %v7336_v43, %v10827_v54  ;;  %v3774_v3 = vpop.f32.mrb[167].mxu0 }
 0x489   : > { %v4181_v11 = vadd.f32 %v9293_v53, %v3772_v19  ;;  %v3775_v44 = vadd.f32 %v3774_v3, %v10828_v57  ;;  %7473 = vmatprep.mubr.bf16.mxu1 %v4417_v8  ;;  %v10833_v8 = vld [vmem:[#allocation80_spill] sm:$0xff] }
 0x48a   : > { %v4184_v29 = vadd.f32 %v9293_v53, %v3783_v28  ;;  %7474 = vmatmul.mubr.bf16.gmra.mrb[160].mxu1 %v4418_v61  ;;  %v4311_v58 = vmax.f32 %v4183_v4, 0.0  ;;  %v10834_v28 = vld [vmem:[#allocation76_spill] sm:$0xff] }
 0x48b   : > { %v4182_v10 = vadd.f32 %v9293_v53, %v3775_v44  ;;  %v4309_v33 = vmax.f32 %v4181_v11, 0.0  ;;  %v10835_v44 = vld [vmem:[#allocation82_spill] sm:$0xff] }
 0x48c   : > { %v4312_v0 = vmax.f32 %v4184_v29, 0.0 }
 0x48d   : > { %v7339_v25 = vpop.f32.mrb[168].mxu0  ;;  %v4310_v37 = vmax.f32 %v4182_v10, 0.0 }
 0x48e   : > { %v4420_v16 = vpack.c.bf16 %v4312_v0, %v4311_v58  ;;  %v3796_v18 = vadd.f32 %v7339_v25, %v10829_v26  ;;  %v3787_v20 = vpop.f32.mrb[169].mxu0  ;;  %v10836_v0 = vld [vmem:[#allocation78_spill] sm:$0xff] }
 0x48f   : > { %v3788_v9 = vadd.f32 %v3787_v20, %v10830_v50  ;;  %v7340_v42 = vpop.f32.mrb[170].mxu0  ;;  %v4419_v49 = vpack.c.bf16 %v4310_v37, %v4309_v33 }
 0x490   : > { %v4187_v23 = vadd.f32 %v9293_v53, %v3796_v18  ;;  %v3799_v30 = vadd.f32 %v7340_v42, %v10831_v27  ;;  %v3790_v63 = vpop.f32.mrb[171].mxu0  ;;  %v10838_v27 = vld [vmem:[#allocation84_spill] sm:$0xff] }
 0x491   : > { %v4185_v5 = vadd.f32 %v9293_v53, %v3788_v9  ;;  %v3791_v47 = vadd.f32 %v3790_v63, %v10832_v22  ;;  %7477 = vmatprep.mubr.bf16.mxu1 %v4419_v49  ;;  %v10837_v9 = vld [vmem:[#allocation88_spill] sm:$0xff] }
 0x492   : > { %v4188_v56 = vadd.f32 %v9293_v53, %v3799_v30  ;;  %7478 = vmatmul.mubr.bf16.gmra.mrb[164].mxu1 %v4420_v16  ;;  %v4315_v36 = vmax.f32 %v4187_v23, 0.0  ;;  %v7730_v23 = vld [vmem:[%s10600_s11 + $0x78] sm:$0xff]  }
 0x493   : > { %v4186_v61 = vadd.f32 %v9293_v53, %v3791_v47  ;;  %v4313_v17 = vmax.f32 %v4185_v5, 0.0  ;;  %v10839_v47 = vld [vmem:[#allocation90_spill] sm:$0xff]  ;;  %5439 = vmatpush1.bf16.msra.mxu0 %v7730_v23 }
 0x494   : > { %v4316_v34 = vmax.f32 %v4188_v56, 0.0 }
 0x495   : > { %v7343_v59 = vpop.f32.mrb[172].mxu0  ;;  %v4314_v19 = vmax.f32 %v4186_v61, 0.0 }
 0x496   : > { %v4422_v43 = vpack.c.bf16 %v4316_v34, %v4315_v36  ;;  %v3812_v4 = vadd.f32 %v7343_v59, %v10833_v8  ;;  %v3803_v54 = vpop.f32.mrb[173].mxu0  ;;  %v10840_v34 = vld [vmem:[#allocation86_spill] sm:$0xff] }
 0x497   : > { %v3804_v3 = vadd.f32 %v3803_v54, %v10834_v28  ;;  %v7344_v11 = vpop.f32.mrb[174].mxu0  ;;  %v4421_v57 = vpack.c.bf16 %v4314_v19, %v4313_v17 }
 0x498   : > { %v4191_v31 = vadd.f32 %v9293_v53, %v3812_v4  ;;  %v3815_v29 = vadd.f32 %v7344_v11, %v10835_v44  ;;  %v3806_v10 = vpop.f32.mrb[175].mxu0  ;;  %v10841_v11 = vld [vmem:[#allocation96_spill] sm:$0xff] }
 0x499   : > { %v4189_v58 = vadd.f32 %v9293_v53, %v3804_v3  ;;  %v3807_v25 = vadd.f32 %v3806_v10, %v10836_v0  ;;  %7481 = vmatprep.mubr.bf16.mxu1 %v4421_v57  ;;  %v10842_v44 = vld [vmem:[#allocation92_spill] sm:$0xff] }
 0x49a   : > { %v4192_v33 = vadd.f32 %v9293_v53, %v3815_v29  ;;  %7482 = vmatmul.mubr.bf16.gmra.mrb[168].mxu1 %v4422_v43  ;;  %v4319_v16 = vmax.f32 %v4191_v31, 0.0 }
 0x49b   : > { %v4190_v37 = vadd.f32 %v9293_v53, %v3807_v25  ;;  %v4317_v20 = vmax.f32 %v4189_v58, 0.0  ;;  %v10843_v25 = vld [vmem:[#allocation98_spill] sm:$0xff] }
 0x49c   : > { %v4320_v26 = vmax.f32 %v4192_v33, 0.0 }
 0x49d   : > { %v7347_v18 = vpop.f32.mrb[176].mxu0  ;;  %v4318_v52 = vmax.f32 %v4190_v37, 0.0 }
 0x49e   : > { %v4424_v50 = vpack.c.bf16 %v4320_v26, %v4319_v16  ;;  %v3828_v42 = vadd.f32 %v7347_v18, %v10837_v9  ;;  %v3819_v49 = vpop.f32.mrb[177].mxu0  ;;  %v10844_v26 = vld [vmem:[#allocation94_spill] sm:$0xff] }
 0x49f   : > { %v3820_v30 = vadd.f32 %v3819_v49, %v10838_v27  ;;  %v7348_v63 = vpop.f32.mrb[178].mxu0  ;;  %v4423_v5 = vpack.c.bf16 %v4318_v52, %v4317_v20 }
 0x4a0   : > { %v4195_v22 = vadd.f32 %v9293_v53, %v3828_v42  ;;  %v3831_v56 = vadd.f32 %v7348_v63, %v10839_v47  ;;  %v3822_v61 = vpop.f32.mrb[179].mxu0 }
 0x4a1   : > { %v4193_v36 = vadd.f32 %v9293_v53, %v3820_v30  ;;  %v3823_v59 = vadd.f32 %v3822_v61, %v10840_v34  ;;  %7485 = vmatprep.mubr.bf16.mxu1 %v4423_v5  ;;  %v10845_v30 = vld [vmem:[#allocation104_spill] sm:$0xff]  ;;  %v10847_v34 = vld [vmem:[#allocation106_spill] sm:$0xff] }
 0x4a2   : > { %v4196_v17 = vadd.f32 %v9293_v53, %v3831_v56  ;;  %7486 = vmatmul.mubr.bf16.gmra.mrb[172].mxu1 %v4424_v50  ;;  %v4323_v43 = vmax.f32 %v4195_v22, 0.0  ;;  %v10846_v22 = vld [vmem:[#allocation100_spill] sm:$0xff] }
 0x4a3   : > { %v4194_v19 = vadd.f32 %v9293_v53, %v3823_v59  ;;  %v4321_v54 = vmax.f32 %v4193_v36, 0.0 }
 0x4a4   : > { %v4324_v8 = vmax.f32 %v4196_v17, 0.0 }
 0x4a5   : > { %v7351_v4 = vpop.f32.mrb[180].mxu0  ;;  %v4322_v28 = vmax.f32 %v4194_v19, 0.0 }
 0x4a6   : > { %v4426_v3 = vpack.c.bf16 %v4324_v8, %v4323_v43  ;;  %v3844_v57 = vadd.f32 %v7351_v4, %v10841_v11  ;;  %v3835_v31 = vpop.f32.mrb[181].mxu0  ;;  %v10848_v43 = vld [vmem:[#allocation102_spill] sm:$0xff] }
 0x4a7   : > { %v3836_v29 = vadd.f32 %v3835_v31, %v10842_v44  ;;  %v7352_v10 = vpop.f32.mrb[182].mxu0  ;;  %v4425_v58 = vpack.c.bf16 %v4322_v28, %v4321_v54 }
 0x4a8   : > { %v4199_v0 = vadd.f32 %v9293_v53, %v3844_v57  ;;  %v3847_v33 = vadd.f32 %v7352_v10, %v10843_v25  ;;  %v3838_v37 = vpop.f32.mrb[183].mxu0 }
 0x4a9   : > { %v4197_v16 = vadd.f32 %v9293_v53, %v3836_v29  ;;  %v3839_v18 = vadd.f32 %v3838_v37, %v10844_v26  ;;  %7489 = vmatprep.mubr.bf16.mxu1 %v4425_v58  ;;  %v10849_v29 = vld [vmem:[#allocation112_spill] sm:$0xff]  ;;  %v10851_v26 = vld [vmem:[#allocation114_spill] sm:$0xff] }
 0x4aa   : > { %v4200_v20 = vadd.f32 %v9293_v53, %v3847_v33  ;;  %7490 = vmatmul.mubr.bf16.gmra.mrb[176].mxu1 %v4426_v3  ;;  %v4327_v50 = vmax.f32 %v4199_v0, 0.0  ;;  %v10850_v0 = vld [vmem:[#allocation108_spill] sm:$0xff] }
 0x4ab   : > { %v4198_v52 = vadd.f32 %v9293_v53, %v3839_v18  ;;  %v4325_v49 = vmax.f32 %v4197_v16, 0.0 }
 0x4ac   : > { %v4328_v9 = vmax.f32 %v4200_v20, 0.0 }
 0x4ad   : > { %v7355_v42 = vpop.f32.mrb[184].mxu0  ;;  %v4326_v23 = vmax.f32 %v4198_v52, 0.0 }
 0x4ae   : > { %v4428_v27 = vpack.c.bf16 %v4328_v9, %v4327_v50  ;;  %v3860_v63 = vadd.f32 %v7355_v42, %v10845_v30  ;;  %v3851_v5 = vpop.f32.mrb[185].mxu0  ;;  %v10852_v50 = vld [vmem:[#allocation110_spill] sm:$0xff] }
 0x4af   : > { %v3852_v47 = vadd.f32 %v3851_v5, %v10846_v22  ;;  %v7356_v56 = vpop.f32.mrb[186].mxu0  ;;  %v4427_v61 = vpack.c.bf16 %v4326_v23, %v4325_v49 }
 0x4b0   : > { %v4203_v36 = vadd.f32 %v9293_v53, %v3860_v63  ;;  %v3863_v59 = vadd.f32 %v7356_v56, %v10847_v34  ;;  %v3854_v17 = vpop.f32.mrb[187].mxu0 }
 0x4b1   : > { %v4201_v19 = vadd.f32 %v9293_v53, %v3852_v47  ;;  %v3855_v8 = vadd.f32 %v3854_v17, %v10848_v43  ;;  %7493 = vmatprep.mubr.bf16.mxu1 %v4427_v61  ;;  %v10853_v47 = vld [vmem:[#allocation5_spill] sm:$0xff]  ;;  %v10855_v43 = vld [vmem:[#allocation6_spill] sm:$0xff] }
 0x4b2   : > { %v4204_v4 = vadd.f32 %v9293_v53, %v3863_v59  ;;  %7494 = vmatmul.mubr.bf16.gmra.mrb[180].mxu1 %v4428_v27  ;;  %v4331_v28 = vmax.f32 %v4203_v36, 0.0  ;;  %v10854_v36 = vld [vmem:[#allocation3_spill] sm:$0xff] }
 0x4b3   : > { %v4202_v54 = vadd.f32 %v9293_v53, %v3855_v8  ;;  %v4329_v57 = vmax.f32 %v4201_v19, 0.0 }
 0x4b4   : > { %v4332_v3 = vmax.f32 %v4204_v4, 0.0 }
 0x4b5   : > { %v7359_v11 = vpop.f32.mrb[188].mxu0  ;;  %v4330_v31 = vmax.f32 %v4202_v54, 0.0 }
 0x4b6   : > { %v4430_v44 = vpack.c.bf16 %v4332_v3, %v4331_v28  ;;  %v3876_v10 = vadd.f32 %v7359_v11, %v10849_v29  ;;  %v3867_v58 = vpop.f32.mrb[189].mxu0  ;;  %v10856_v28 = vld [vmem:[#allocation4_spill] sm:$0xff] }
 0x4b7   : > { %v3868_v25 = vadd.f32 %v3867_v58, %v10850_v0  ;;  %v7360_v33 = vpop.f32.mrb[190].mxu0  ;;  %v4429_v37 = vpack.c.bf16 %v4330_v31, %v4329_v57 }
 0x4b8   : > { %v4207_v16 = vadd.f32 %v9293_v53, %v3876_v10  ;;  %v3879_v18 = vadd.f32 %v7360_v33, %v10851_v26  ;;  %v3870_v20 = vpop.f32.mrb[191].mxu0 }
 0x4b9   : > { %v4205_v52 = vadd.f32 %v9293_v53, %v3868_v25  ;;  %v3871_v9 = vadd.f32 %v3870_v20, %v10852_v50  ;;  %7497 = vmatprep.mubr.bf16.mxu1 %v4429_v37  ;;  %v10857_v25 = vld [vmem:[#allocation9_spill] sm:$0xff]  ;;  %v10859_v50 = vld [vmem:[#allocation10_spill] sm:$0xff] }
 0x4ba   : > { %v4208_v42 = vadd.f32 %v9293_v53, %v3879_v18  ;;  %7498 = vmatmul.mubr.bf16.gmra.mrb[184].mxu1 %v4430_v44  ;;  %v4335_v23 = vmax.f32 %v4207_v16, 0.0  ;;  %v10858_v16 = vld [vmem:[#allocation7_spill] sm:$0xff] }
 0x4bb   : > { %v4206_v49 = vadd.f32 %v9293_v53, %v3871_v9  ;;  %v4333_v63 = vmax.f32 %v4205_v52, 0.0 }
 0x4bc   : > { %v4336_v27 = vmax.f32 %v4208_v42, 0.0 }
 0x4bd   : > { %v7363_v30 = vpop.f32.mrb[192].mxu0  ;;  %v4334_v5 = vmax.f32 %v4206_v49, 0.0 }
 0x4be   : > { %v4432_v22 = vpack.c.bf16 %v4336_v27, %v4335_v23  ;;  %v3892_v56 = vadd.f32 %v7363_v30, %v10853_v47  ;;  %v3883_v61 = vpop.f32.mrb[193].mxu0  ;;  %v10860_v23 = vld [vmem:[#allocation8_spill] sm:$0xff] }
 0x4bf   : > { %v3884_v34 = vadd.f32 %v3883_v61, %v10854_v36  ;;  %v7364_v59 = vpop.f32.mrb[194].mxu0  ;;  %v4431_v17 = vpack.c.bf16 %v4334_v5, %v4333_v63 }
 0x4c0   : > { %v4211_v19 = vadd.f32 %v9293_v53, %v3892_v56  ;;  %v3895_v8 = vadd.f32 %v7364_v59, %v10855_v43  ;;  %v3886_v4 = vpop.f32.mrb[195].mxu0 }
 0x4c1   : > { %v4209_v54 = vadd.f32 %v9293_v53, %v3884_v34  ;;  %v3887_v3 = vadd.f32 %v3886_v4, %v10856_v28  ;;  %7501 = vmatprep.mubr.bf16.mxu1 %v4431_v17  ;;  %v10861_v34 = vld [vmem:[#allocation13_spill] sm:$0xff]  ;;  %v10863_v28 = vld [vmem:[#allocation14_spill] sm:$0xff] }
 0x4c2   : > { %v4212_v11 = vadd.f32 %v9293_v53, %v3895_v8  ;;  %7502 = vmatmul.mubr.bf16.gmra.mrb[188].mxu1 %v4432_v22  ;;  %v4339_v31 = vmax.f32 %v4211_v19, 0.0  ;;  %v10862_v19 = vld [vmem:[#allocation11_spill] sm:$0xff] }
 0x4c3   : > { %v4210_v57 = vadd.f32 %v9293_v53, %v3887_v3  ;;  %v4337_v10 = vmax.f32 %v4209_v54, 0.0 }
 0x4c4   : > { %v4340_v44 = vmax.f32 %v4212_v11, 0.0 }
 0x4c5   : > { %v7367_v29 = vpop.f32.mrb[196].mxu0  ;;  %v4338_v58 = vmax.f32 %v4210_v57, 0.0 }
 0x4c6   : > { %v4434_v0 = vpack.c.bf16 %v4340_v44, %v4339_v31  ;;  %v3908_v33 = vadd.f32 %v7367_v29, %v10857_v25  ;;  %v3899_v37 = vpop.f32.mrb[197].mxu0  ;;  %v10864_v31 = vld [vmem:[#allocation12_spill] sm:$0xff] }
 0x4c7   : > { %v3900_v26 = vadd.f32 %v3899_v37, %v10858_v16  ;;  %v7368_v18 = vpop.f32.mrb[198].mxu0  ;;  %v4433_v20 = vpack.c.bf16 %v4338_v58, %v4337_v10 }
 0x4c8   : > { %v4215_v52 = vadd.f32 %v9293_v53, %v3908_v33  ;;  %v3911_v9 = vadd.f32 %v7368_v18, %v10859_v50  ;;  %v3902_v42 = vpop.f32.mrb[199].mxu0 }
 0x4c9   : > { %v4213_v49 = vadd.f32 %v9293_v53, %v3900_v26  ;;  %v3903_v27 = vadd.f32 %v3902_v42, %v10860_v23  ;;  %7505 = vmatprep.mubr.bf16.mxu1 %v4433_v20  ;;  %v10865_v26 = vld [vmem:[#allocation18_spill] sm:$0xff]  ;;  %v10867_v23 = vld [vmem:[#allocation19_spill] sm:$0xff] }
 0x4ca   : > { %v4216_v30 = vadd.f32 %v9293_v53, %v3911_v9  ;;  %7506 = vmatmul.mubr.bf16.gmra.mrb[192].mxu1 %v4434_v0  ;;  %v4343_v5 = vmax.f32 %v4215_v52, 0.0  ;;  %v10866_v52 = vld [vmem:[#allocation15_spill] sm:$0xff] }
 0x4cb   : > { %v4214_v63 = vadd.f32 %v9293_v53, %v3903_v27  ;;  %v4341_v56 = vmax.f32 %v4213_v49, 0.0 }
 0x4cc   : > { %v4344_v22 = vmax.f32 %v4216_v30, 0.0 }
 0x4cd   : > { %v7371_v47 = vpop.f32.mrb[200].mxu0  ;;  %v4342_v61 = vmax.f32 %v4214_v63, 0.0 }
 0x4ce   : > { %v4436_v36 = vpack.c.bf16 %v4344_v22, %v4343_v5  ;;  %v3924_v59 = vadd.f32 %v7371_v47, %v10861_v34  ;;  %v3915_v17 = vpop.f32.mrb[201].mxu0  ;;  %v10868_v5 = vld [vmem:[#allocation17_spill] sm:$0xff] }
 0x4cf   : > { %v3916_v43 = vadd.f32 %v3915_v17, %v10862_v19  ;;  %v7372_v8 = vpop.f32.mrb[202].mxu0  ;;  %v4435_v4 = vpack.c.bf16 %v4342_v61, %v4341_v56 }
 0x4d0   : > { %v4219_v54 = vadd.f32 %v9293_v53, %v3924_v59  ;;  %v3927_v3 = vadd.f32 %v7372_v8, %v10863_v28  ;;  %v3918_v11 = vpop.f32.mrb[203].mxu0 }
 0x4d1   : > { %v4217_v57 = vadd.f32 %v9293_v53, %v3916_v43  ;;  %v3919_v44 = vadd.f32 %v3918_v11, %v10864_v31  ;;  %7509 = vmatprep.mubr.bf16.mxu1 %v4435_v4  ;;  %v10869_v43 = vld [vmem:[#allocation25_spill] sm:$0xff]  ;;  %v10871_v31 = vld [vmem:[#allocation27_spill] sm:$0xff] }
 0x4d2   : > { %v4220_v29 = vadd.f32 %v9293_v53, %v3927_v3  ;;  %7510 = vmatmul.mubr.bf16.gmra.mrb[196].mxu1 %v4436_v36  ;;  %v4347_v58 = vmax.f32 %v4219_v54, 0.0  ;;  %v10870_v54 = vld [vmem:[#allocation21_spill] sm:$0xff] }
 0x4d3   : > { %v4218_v10 = vadd.f32 %v9293_v53, %v3919_v44  ;;  %v4345_v33 = vmax.f32 %v4217_v57, 0.0 }
 0x4d4   : > { %v4348_v0 = vmax.f32 %v4220_v29, 0.0 }
 0x4d5   : > { %v7375_v25 = vpop.f32.mrb[204].mxu0  ;;  %v4346_v37 = vmax.f32 %v4218_v10, 0.0 }
 0x4d6   : > { %v4438_v16 = vpack.c.bf16 %v4348_v0, %v4347_v58  ;;  %v3940_v18 = vadd.f32 %v7375_v25, %v10865_v26  ;;  %v3931_v20 = vpop.f32.mrb[205].mxu0  ;;  %v10872_v58 = vld [vmem:[#allocation23_spill] sm:$0xff] }
 0x4d7   : > { %v3932_v50 = vadd.f32 %v3931_v20, %v10866_v52  ;;  %v7376_v9 = vpop.f32.mrb[206].mxu0  ;;  %v4437_v42 = vpack.c.bf16 %v4346_v37, %v4345_v33 }
 0x4d8   : > { %v4223_v49 = vadd.f32 %v9293_v53, %v3940_v18  ;;  %v3943_v27 = vadd.f32 %v7376_v9, %v10867_v23  ;;  %v3934_v30 = vpop.f32.mrb[207].mxu0 }
 0x4d9   : > { %v4221_v63 = vadd.f32 %v9293_v53, %v3932_v50  ;;  %v3935_v22 = vadd.f32 %v3934_v30, %v10868_v5  ;;  %7513 = vmatprep.mubr.bf16.mxu1 %v4437_v42  ;;  %v10873_v50 = vld [vmem:[#allocation33_spill] sm:$0xff]  ;;  %v10875_v5 = vld [vmem:[#allocation35_spill] sm:$0xff] }
 0x4da   : > { %v4224_v47 = vadd.f32 %v9293_v53, %v3943_v27  ;;  %7514 = vmatmul.mubr.bf16.gmra.mrb[200].mxu1 %v4438_v16  ;;  %v4351_v61 = vmax.f32 %v4223_v49, 0.0  ;;  %v10874_v49 = vld [vmem:[#allocation29_spill] sm:$0xff] }
 0x4db   : > { %v4222_v56 = vadd.f32 %v9293_v53, %v3935_v22  ;;  %v4349_v59 = vmax.f32 %v4221_v63, 0.0  ;;  %v9517_v63 = vld [vmem:[%s10597_s8] ss:$0 sm:$0xff] }
 0x4dc   : > { %v4352_v36 = vmax.f32 %v4224_v47, 0.0 }
 0x4dd   : > { %v7379_v34 = vpop.f32.mrb[208].mxu0  ;;  %v4350_v17 = vmax.f32 %v4222_v56, 0.0 }
 0x4de   : > { %v4440_v19 = vpack.c.bf16 %v4352_v36, %v4351_v61  ;;  %v3956_v8 = vadd.f32 %v7379_v34, %v10869_v43  ;;  %v3947_v4 = vpop.f32.mrb[209].mxu0  ;;  %v10876_v61 = vld [vmem:[#allocation31_spill] sm:$0xff] }
 0x4df   : > { %v3948_v28 = vadd.f32 %v3947_v4, %v10870_v54  ;;  %v7380_v3 = vpop.f32.mrb[210].mxu0  ;;  %v4439_v11 = vpack.c.bf16 %v4350_v17, %v4349_v59 }
 0x4e0   : > { %v4227_v57 = vadd.f32 %v9293_v53, %v3956_v8  ;;  %v3959_v44 = vadd.f32 %v7380_v3, %v10871_v31  ;;  %v3950_v29 = vpop.f32.mrb[211].mxu0 }
 0x4e1   : > { %v4225_v10 = vadd.f32 %v9293_v53, %v3948_v28  ;;  %v3951_v0 = vadd.f32 %v3950_v29, %v10872_v58  ;;  %7517 = vmatprep.mubr.bf16.mxu1 %v4439_v11  ;;  %v10877_v28 = vld [vmem:[#allocation41_spill] sm:$0xff]  ;;  %v10879_v58 = vld [vmem:[#allocation43_spill] sm:$0xff] }
 0x4e2   : > { %v4228_v25 = vadd.f32 %v9293_v53, %v3959_v44  ;;  %7518 = vmatmul.mubr.bf16.gmra.mrb[204].mxu1 %v4440_v19  ;;  %v4355_v37 = vmax.f32 %v4227_v57, 0.0  ;;  %v10878_v57 = vld [vmem:[#allocation37_spill] sm:$0xff] }
 0x4e3   : > { %v4226_v33 = vadd.f32 %v9293_v53, %v3951_v0  ;;  %v4353_v18 = vmax.f32 %v4225_v10, 0.0 }
 0x4e4   : > { %v4356_v16 = vmax.f32 %v4228_v25, 0.0 }
 0x4e5   : > { %v7383_v26 = vpop.f32.mrb[212].mxu0  ;;  %v4354_v20 = vmax.f32 %v4226_v33, 0.0 }
 0x4e6   : > { %v4442_v52 = vpack.c.bf16 %v4356_v16, %v4355_v37  ;;  %v3972_v9 = vadd.f32 %v7383_v26, %v10873_v50  ;;  %v3963_v42 = vpop.f32.mrb[213].mxu0  ;;  %v10880_v37 = vld [vmem:[#allocation39_spill] sm:$0xff] }
 0x4e7   : > { %v3964_v23 = vadd.f32 %v3963_v42, %v10874_v49  ;;  %v7384_v27 = vpop.f32.mrb[214].mxu0  ;;  %v4441_v30 = vpack.c.bf16 %v4354_v20, %v4353_v18 }
 0x4e8   : > { %v4231_v53 = vadd.f32 %v9517_v63, %v3972_v9  ;;  %v3975_v22 = vadd.f32 %v7384_v27, %v10875_v5  ;;  %v3966_v47 = vpop.f32.mrb[215].mxu0 }
 0x4e9   : > { %v4229_v56 = vadd.f32 %v9517_v63, %v3964_v23  ;;  %v3967_v36 = vadd.f32 %v3966_v47, %v10876_v61  ;;  %7521 = vmatprep.mubr.bf16.mxu1 %v4441_v30  ;;  %v10881_v23 = vld [vmem:[#allocation49_spill] sm:$0xff]  ;;  %v10883_v61 = vld [vmem:[#allocation51_spill] sm:$0xff] }
 0x4ea   : > { %v4232_v34 = vadd.f32 %v9517_v63, %v3975_v22  ;;  %7522 = vmatmul.mubr.bf16.gmra.mrb[208].mxu1 %v4442_v52  ;;  %v4359_v17 = vmax.f32 %v4231_v53, 0.0  ;;  %v10882_v53 = vld [vmem:[#allocation45_spill] sm:$0xff] }
 0x4eb   : > { %v4230_v59 = vadd.f32 %v9517_v63, %v3967_v36  ;;  %v4357_v8 = vmax.f32 %v4229_v56, 0.0 }
 0x4ec   : > { %v4360_v19 = vmax.f32 %v4232_v34, 0.0 }
 0x4ed   : > { %v7387_v43 = vpop.f32.mrb[216].mxu0  ;;  %v4358_v4 = vmax.f32 %v4230_v59, 0.0 }
 0x4ee   : > { %v4444_v54 = vpack.c.bf16 %v4360_v19, %v4359_v17  ;;  %v3988_v3 = vadd.f32 %v7387_v43, %v10877_v28  ;;  %v3979_v11 = vpop.f32.mrb[217].mxu0  ;;  %v10884_v17 = vld [vmem:[#allocation47_spill] sm:$0xff] }
 0x4ef   : > { %v3980_v31 = vadd.f32 %v3979_v11, %v10878_v57  ;;  %v7388_v44 = vpop.f32.mrb[218].mxu0  ;;  %v4443_v29 = vpack.c.bf16 %v4358_v4, %v4357_v8 }
 0x4f0   : > { %v4235_v10 = vadd.f32 %v9517_v63, %v3988_v3  ;;  %v3991_v0 = vadd.f32 %v7388_v44, %v10879_v58  ;;  %v3982_v25 = vpop.f32.mrb[219].mxu0 }
 0x4f1   : > { %v4233_v33 = vadd.f32 %v9517_v63, %v3980_v31  ;;  %v3983_v16 = vadd.f32 %v3982_v25, %v10880_v37  ;;  %7525 = vmatprep.mubr.bf16.mxu1 %v4443_v29  ;;  %v10885_v31 = vld [vmem:[#allocation57_spill] sm:$0xff]  ;;  %v10887_v37 = vld [vmem:[#allocation59_spill] sm:$0xff] }
 0x4f2   : > { %v4236_v26 = vadd.f32 %v9517_v63, %v3991_v0  ;;  %7526 = vmatmul.mubr.bf16.gmra.mrb[212].mxu1 %v4444_v54  ;;  %v4363_v20 = vmax.f32 %v4235_v10, 0.0  ;;  %v10886_v10 = vld [vmem:[#allocation53_spill] sm:$0xff] }
 0x4f3   : > { %v4234_v18 = vadd.f32 %v9517_v63, %v3983_v16  ;;  %v4361_v9 = vmax.f32 %v4233_v33, 0.0 }
 0x4f4   : > { %v4364_v52 = vmax.f32 %v4236_v26, 0.0 }
 0x4f5   : > { %v7391_v50 = vpop.f32.mrb[220].mxu0  ;;  %v4362_v42 = vmax.f32 %v4234_v18, 0.0 }
 0x4f6   : > { %v4446_v49 = vpack.c.bf16 %v4364_v52, %v4363_v20  ;;  %v4004_v27 = vadd.f32 %v7391_v50, %v10881_v23  ;;  %v3995_v30 = vpop.f32.mrb[221].mxu0  ;;  %v10888_v20 = vld [vmem:[#allocation55_spill] sm:$0xff] }
 0x4f7   : > { %v3996_v5 = vadd.f32 %v3995_v30, %v10882_v53  ;;  %v7392_v22 = vpop.f32.mrb[222].mxu0  ;;  %v4445_v47 = vpack.c.bf16 %v4362_v42, %v4361_v9 }
 0x4f8   : > { %v4239_v56 = vadd.f32 %v9517_v63, %v4004_v27  ;;  %v4007_v36 = vadd.f32 %v7392_v22, %v10883_v61  ;;  %v3998_v34 = vpop.f32.mrb[223].mxu0 }
 0x4f9   : > { %v4237_v59 = vadd.f32 %v9517_v63, %v3996_v5  ;;  %v3999_v19 = vadd.f32 %v3998_v34, %v10884_v17  ;;  %7529 = vmatprep.mubr.bf16.mxu1 %v4445_v47  ;;  %v10889_v5 = vld [vmem:[#allocation65_spill] sm:$0xff]  ;;  %v10891_v17 = vld [vmem:[#allocation67_spill] sm:$0xff] }
 0x4fa   : > { %v4240_v43 = vadd.f32 %v9517_v63, %v4007_v36  ;;  %7530 = vmatmul.mubr.bf16.gmra.mrb[216].mxu1 %v4446_v49  ;;  %v4367_v4 = vmax.f32 %v4239_v56, 0.0  ;;  %v10890_v56 = vld [vmem:[#allocation61_spill] sm:$0xff] }
 0x4fb   : > { %v4238_v8 = vadd.f32 %v9517_v63, %v3999_v19  ;;  %v4365_v3 = vmax.f32 %v4237_v59, 0.0 }
 0x4fc   : > { %v4368_v54 = vmax.f32 %v4240_v43, 0.0 }
 0x4fd   : > { %v7395_v28 = vpop.f32.mrb[224].mxu0  ;;  %v4366_v11 = vmax.f32 %v4238_v8, 0.0 }
 0x4fe   : > { %v4448_v57 = vpack.c.bf16 %v4368_v54, %v4367_v4  ;;  %v4020_v44 = vadd.f32 %v7395_v28, %v10885_v31  ;;  %v4011_v29 = vpop.f32.mrb[225].mxu0  ;;  %v10892_v4 = vld [vmem:[#allocation63_spill] sm:$0xff] }
 0x4ff   : > { %v4012_v58 = vadd.f32 %v4011_v29, %v10886_v10  ;;  %v7396_v0 = vpop.f32.mrb[226].mxu0  ;;  %v4447_v25 = vpack.c.bf16 %v4366_v11, %v4365_v3 }
 0x500   : > { %v4243_v33 = vadd.f32 %v9517_v63, %v4020_v44  ;;  %v4023_v16 = vadd.f32 %v7396_v0, %v10887_v37  ;;  %v4014_v26 = vpop.f32.mrb[227].mxu0 }
 0x501   : > { %v4241_v18 = vadd.f32 %v9517_v63, %v4012_v58  ;;  %v4015_v52 = vadd.f32 %v4014_v26, %v10888_v20  ;;  %7533 = vmatprep.mubr.bf16.mxu1 %v4447_v25  ;;  %v10893_v58 = vld [vmem:[#allocation73_spill] sm:$0xff]  ;;  %v10895_v20 = vld [vmem:[#allocation75_spill] sm:$0xff] }
 0x502   : > { %v4244_v50 = vadd.f32 %v9517_v63, %v4023_v16  ;;  %7534 = vmatmul.mubr.bf16.gmra.mrb[220].mxu1 %v4448_v57  ;;  %v4371_v42 = vmax.f32 %v4243_v33, 0.0  ;;  %v10894_v33 = vld [vmem:[#allocation69_spill] sm:$0xff] }
 0x503   : > { %v4242_v9 = vadd.f32 %v9517_v63, %v4015_v52  ;;  %v4369_v27 = vmax.f32 %v4241_v18, 0.0 }
 0x504   : > { %v4372_v49 = vmax.f32 %v4244_v50, 0.0 }
 0x505   : > { %v7399_v23 = vpop.f32.mrb[228].mxu0  ;;  %v4370_v30 = vmax.f32 %v4242_v9, 0.0 }
 0x506   : > { %v4450_v53 = vpack.c.bf16 %v4372_v49, %v4371_v42  ;;  %v4036_v22 = vadd.f32 %v7399_v23, %v10889_v5  ;;  %v4027_v47 = vpop.f32.mrb[229].mxu0  ;;  %v10896_v42 = vld [vmem:[#allocation71_spill] sm:$0xff] }
 0x507   : > { %v4028_v61 = vadd.f32 %v4027_v47, %v10890_v56  ;;  %v7400_v36 = vpop.f32.mrb[230].mxu0  ;;  %v4449_v34 = vpack.c.bf16 %v4370_v30, %v4369_v27 }
 0x508   : > { %v4247_v59 = vadd.f32 %v9517_v63, %v4036_v22  ;;  %v4039_v19 = vadd.f32 %v7400_v36, %v10891_v17  ;;  %v4030_v43 = vpop.f32.mrb[231].mxu0 }
 0x509   : > { %v4245_v8 = vadd.f32 %v9517_v63, %v4028_v61  ;;  %v4031_v54 = vadd.f32 %v4030_v43, %v10892_v4  ;;  %7537 = vmatprep.mubr.bf16.mxu1 %v4449_v34  ;;  %v10897_v61 = vld [vmem:[#allocation81_spill] sm:$0xff]  ;;  %v10899_v4 = vld [vmem:[#allocation83_spill] sm:$0xff] }
 0x50a   : > { %v4248_v28 = vadd.f32 %v9517_v63, %v4039_v19  ;;  %7538 = vmatmul.mubr.bf16.gmra.mrb[224].mxu1 %v4450_v53  ;;  %v4375_v11 = vmax.f32 %v4247_v59, 0.0  ;;  %v10898_v59 = vld [vmem:[#allocation77_spill] sm:$0xff] }
 0x50b   : > { %v4246_v3 = vadd.f32 %v9517_v63, %v4031_v54  ;;  %v4373_v44 = vmax.f32 %v4245_v8, 0.0 }
 0x50c   : > { %v4376_v57 = vmax.f32 %v4248_v28, 0.0 }
 0x50d   : > { %v7403_v31 = vpop.f32.mrb[232].mxu0  ;;  %v4374_v29 = vmax.f32 %v4246_v3, 0.0 }
 0x50e   : > { %v4452_v10 = vpack.c.bf16 %v4376_v57, %v4375_v11  ;;  %v4052_v0 = vadd.f32 %v7403_v31, %v10893_v58  ;;  %v4043_v25 = vpop.f32.mrb[233].mxu0  ;;  %v10900_v11 = vld [vmem:[#allocation79_spill] sm:$0xff] }
 0x50f   : > { %v4044_v37 = vadd.f32 %v4043_v25, %v10894_v33  ;;  %v7404_v16 = vpop.f32.mrb[234].mxu0  ;;  %v4451_v26 = vpack.c.bf16 %v4374_v29, %v4373_v44  ;;  %v9576_v29 = vld [vmem:[%s10599_s10] ss:$0 sm:$0xff] }
 0x510   : > { %v4251_v18 = vadd.f32 %v9517_v63, %v4052_v0  ;;  %v4055_v52 = vadd.f32 %v7404_v16, %v10895_v20  ;;  %v4046_v50 = vpop.f32.mrb[235].mxu0 }
 0x511   : > { %v4249_v9 = vadd.f32 %v9517_v63, %v4044_v37  ;;  %v4047_v49 = vadd.f32 %v4046_v50, %v10896_v42  ;;  %7541 = vmatprep.mubr.bf16.mxu1 %v4451_v26  ;;  %v10901_v26 = vld [vmem:[#allocation89_spill] sm:$0xff] }
 0x512   : > { %v4252_v23 = vadd.f32 %v9517_v63, %v4055_v52  ;;  %7542 = vmatmul.mubr.bf16.gmra.mrb[228].mxu1 %v4452_v10  ;;  %v4379_v30 = vmax.f32 %v4251_v18, 0.0 }
 0x513   : > { %v4250_v27 = vadd.f32 %v9517_v63, %v4047_v49  ;;  %v4377_v22 = vmax.f32 %v4249_v9, 0.0  ;;  %v10902_v9 = vld [vmem:[#allocation85_spill] sm:$0xff] }
 0x514   : > { %v4380_v53 = vmax.f32 %v4252_v23, 0.0 }
 0x515   : > { %v7407_v5 = vpop.f32.mrb[236].mxu0  ;;  %v4378_v47 = vmax.f32 %v4250_v27, 0.0 }
 0x516   : > { %v4454_v56 = vpack.c.bf16 %v4380_v53, %v4379_v30  ;;  %v4068_v36 = vadd.f32 %v7407_v5, %v10897_v61  ;;  %v4059_v34 = vpop.f32.mrb[237].mxu0  ;;  %v10903_v5 = vld [vmem:[#allocation91_spill] sm:$0xff] }
 0x517   : > { %v4060_v17 = vadd.f32 %v4059_v34, %v10898_v59  ;;  %v7408_v19 = vpop.f32.mrb[238].mxu0  ;;  %v4453_v43 = vpack.c.bf16 %v4378_v47, %v4377_v22  ;;  %v10904_v34 = vld [vmem:[#allocation87_spill] sm:$0xff] }
 0x518   : > { %v4255_v8 = vadd.f32 %v9517_v63, %v4068_v36  ;;  %v4071_v54 = vadd.f32 %v7408_v19, %v10899_v4  ;;  %v4062_v28 = vpop.f32.mrb[239].mxu0 }
 0x519   : > { %v4253_v3 = vadd.f32 %v9517_v63, %v4060_v17  ;;  %v4063_v57 = vadd.f32 %v4062_v28, %v10900_v11  ;;  %7545 = vmatprep.mubr.bf16.mxu1 %v4453_v43 }
 0x51a   : > { %v4256_v31 = vadd.f32 %v9517_v63, %v4071_v54  ;;  %7546 = vmatmul.mubr.bf16.gmra.mrb[232].mxu1 %v4454_v56  ;;  %v4383_v10 = vmax.f32 %v4255_v8, 0.0 }
 0x51b   : > { %v4254_v44 = vadd.f32 %v9517_v63, %v4063_v57  ;;  %v4381_v33 = vmax.f32 %v4253_v3, 0.0 }
 0x51c   : > { %v4384_v58 = vmax.f32 %v4256_v31, 0.0 }
 0x51d   : > { %v7411_v0 = vpop.f32.mrb[240].mxu0  ;;  %v7443_v25 = vpop.f32.mrb[128].mxu1  ;;  %v4382_v37 = vmax.f32 %v4254_v44, 0.0 }
 0x51e   : > { %v4456_v16 = vpack.c.bf16 %v4384_v58, %v4383_v10  ;;  %v4084_v18 = vadd.f32 %v7411_v0, %v10901_v26  ;;  %v4579_v20 = vadd.f32 %v7443_v25, %v9576_v29  ;;  %v4075_v52 = vpop.f32.mrb[241].mxu0  ;;  %v4570_v50 = vpop.f32.mrb[129].mxu1 }
 0x51f   : > { %v4076_v42 = vadd.f32 %v4075_v52, %v10902_v9  ;;  %v4571_v49 = vadd.f32 %v9576_v29, %v4570_v50  ;;  %v7412_v23 = vpop.f32.mrb[242].mxu0  ;;  %v7444_v27 = vpop.f32.mrb[130].mxu1  ;;  %v4455_v30 = vpack.c.bf16 %v4382_v37, %v4381_v33  ;;  %v10905_v33 = vld [vmem:[#allocation97_spill] sm:$0xff] }
 0x520   : > { %v4259_v53 = vadd.f32 %v9517_v63, %v4084_v18  ;;  %v4087_v22 = vadd.f32 %v7412_v23, %v10903_v5  ;;  %v4582_v47 = vadd.f32 %v7444_v27, %v9576_v29  ;;  %v4078_v56 = vpop.f32.mrb[243].mxu0  ;;  %v4573_v61 = vpop.f32.mrb[131].mxu1  ;;  %v5083_v19 = vmax.f32 %v4579_v20, 0.0  ;;  %v10907_v27 = vld [vmem:[#allocation99_spill] sm:$0xff] }
 0x521   : > { %v4257_v36 = vadd.f32 %v9517_v63, %v4076_v42  ;;  %v4079_v59 = vadd.f32 %v4078_v56, %v10904_v34  ;;  %v4574_v17 = vadd.f32 %v9576_v29, %v4573_v61  ;;  %7549 = vmatprep.mubr.bf16.mxu1 %v4455_v30  ;;  %v5081_v4 = vmax.f32 %v4571_v49, 0.0  ;;  %v10908_v56 = vld [vmem:[#allocation95_spill] sm:$0xff] }
 0x522   : > { %v4260_v43 = vadd.f32 %v9517_v63, %v4087_v22  ;;  %v5084_v8 = vmax.f32 %v4582_v47, 0.0  ;;  %7550 = vmatmul.mubr.bf16.gmra.mrb[236].mxu1 %v4456_v16  ;;  %v4387_v3 = vmax.f32 %v4259_v53, 0.0  ;;  %v10906_v16 = vld [vmem:[#allocation93_spill] sm:$0xff] }
 0x523   : > { %v4258_v54 = vadd.f32 %v9517_v63, %v4079_v59  ;;  %v5082_v28 = vmax.f32 %v4574_v17, 0.0  ;;  %v4385_v58 = vmax.f32 %v4257_v36, 0.0 }
 0x524   : > { %v4388_v11 = vmax.f32 %v4260_v43, 0.0  ;;  %v5210_v57 = vpack.c.bf16 %v5084_v8, %v5083_v19 }
 0x525   : > { %v5209_v31 = vpack.c.bf16 %v5082_v28, %v5081_v4  ;;  %v7415_v44 = vpop.f32.mrb[244].mxu0  ;;  %v7447_v10 = vpop.f32.mrb[132].mxu1  ;;  %v4386_v0 = vmax.f32 %v4258_v54, 0.0 }
 0x526   : > { %v4458_v25 = vpack.c.bf16 %v4388_v11, %v4387_v3  ;;  %v4100_v37 = vadd.f32 %v7415_v44, %v10905_v33  ;;  %v4595_v26 = vadd.f32 %v7447_v10, %v9576_v29  ;;  %v4091_v18 = vpop.f32.mrb[245].mxu0  ;;  %v4586_v20 = vpop.f32.mrb[133].mxu1 }
 0x527   : > { %v4092_v52 = vadd.f32 %v4091_v18, %v10906_v16  ;;  %v4587_v50 = vadd.f32 %v9576_v29, %v4586_v20  ;;  %v7416_v9 = vpop.f32.mrb[246].mxu0  ;;  %v7448_v42 = vpop.f32.mrb[134].mxu1  ;;  %5441 = vmatmul.mubr.bf16.vlgmr.msra.gmra.mrb[0].mxu0 %v5209_v31  ;;  %v4457_v49 = vpack.c.bf16 %v4386_v0, %v4385_v58  ;;  %v10909_v58 = vld [vmem:[#allocation105_spill] sm:$0xff] }
 0x528   : > { %v4263_v23 = vadd.f32 %v9517_v63, %v4100_v37  ;;  %v4103_v30 = vadd.f32 %v7416_v9, %v10907_v27  ;;  %v4598_v53 = vadd.f32 %v7448_v42, %v9576_v29  ;;  %v4094_v5 = vpop.f32.mrb[247].mxu0  ;;  %v4589_v22 = vpop.f32.mrb[135].mxu1  ;;  %5448 = vmatprep.mubr.bf16.mxu0 %v8756_v51  ;;  %v5087_v34 = vmax.f32 %v4595_v26, 0.0  ;;  %v10910_v26 = vld [vmem:[#allocation101_spill] sm:$0xff]  ;;  %v10911_v42 = vld [vmem:[#allocation107_spill] sm:$0xff] }
 0x529   : > { %v4261_v47 = vadd.f32 %v9517_v63, %v4092_v52  ;;  %v4095_v61 = vadd.f32 %v4094_v5, %v10908_v56  ;;  %v4590_v36 = vadd.f32 %v9576_v29, %v4589_v22  ;;  %7553 = vmatprep.mubr.bf16.mxu1 %v4457_v49  ;;  %v5085_v19 = vmax.f32 %v4587_v50, 0.0  ;;  %v10912_v5 = vld [vmem:[#allocation103_spill] sm:$0xff] }
 0x52a   : > { %v4264_v59 = vadd.f32 %v9517_v63, %v4103_v30  ;;  %v5088_v17 = vmax.f32 %v4598_v53, 0.0  ;;  %7554 = vmatmul.mubr.bf16.gmra.mrb[240].mxu1 %v4458_v25  ;;  %v4391_v4 = vmax.f32 %v4263_v23, 0.0 }
 0x52b   : > { %v4262_v43 = vadd.f32 %v9517_v63, %v4095_v61  ;;  %v5086_v8 = vmax.f32 %v4590_v36, 0.0  ;;  %v4389_v31 = vmax.f32 %v4261_v47, 0.0 }
 0x52c   : > { %v4392_v54 = vmax.f32 %v4264_v59, 0.0  ;;  %v9603_v28 = vpack.c.bf16 %v5088_v17, %v5087_v34 }
 0x52d   : > { %v5211_v51 = vpack.c.bf16 %v5086_v8, %v5085_v19  ;;  %v7419_v3 = vpop.f32.mrb[248].mxu0  ;;  %v7451_v11 = vpop.f32.mrb[136].mxu1  ;;  %v4390_v44 = vmax.f32 %v4262_v43, 0.0 }
 0x52e   : > { %v4460_v10 = vpack.c.bf16 %v4392_v54, %v4391_v4  ;;  %v4116_v0 = vadd.f32 %v7419_v3, %v10909_v58  ;;  %v4611_v33 = vadd.f32 %v7451_v11, %v9576_v29  ;;  %v4107_v37 = vpop.f32.mrb[249].mxu0  ;;  %v4602_v25 = vpop.f32.mrb[137].mxu1 }
 0x52f   : > { %v4108_v18 = vadd.f32 %v4107_v37, %v10910_v26  ;;  %v4603_v20 = vadd.f32 %v9576_v29, %v4602_v25  ;;  %v7420_v16 = vpop.f32.mrb[250].mxu0  ;;  %v7452_v52 = vpop.f32.mrb[138].mxu1  ;;  %5449 = vmatmul.mubr.bf16.gmra.mrb[4].mxu0 %v5210_v57  ;;  %v4459_v50 = vpack.c.bf16 %v4390_v44, %v4389_v31  ;;  %v10913_v31 = vld [vmem:[#allocation113_spill] sm:$0xff] }
 0x530   : > { %v4267_v9 = vadd.f32 %v9517_v63, %v4116_v0  ;;  %v4119_v49 = vadd.f32 %v7420_v16, %v10911_v42  ;;  %v4614_v23 = vadd.f32 %v7452_v52, %v9576_v29  ;;  %v4110_v27 = vpop.f32.mrb[251].mxu0  ;;  %v4605_v30 = vpop.f32.mrb[139].mxu1  ;;  %5456 = vmatprep.mubr.bf16.mxu0 %v8771_v60  ;;  %v5091_v56 = vmax.f32 %v4611_v33, 0.0  ;;  %v10914_v33 = vld [vmem:[#allocation109_spill] sm:$0xff]  ;;  %v10915_v52 = vld [vmem:[#allocation115_spill] sm:$0xff] }
 0x531   : > { %v4265_v53 = vadd.f32 %v9517_v63, %v4108_v18  ;;  %v4111_v22 = vadd.f32 %v4110_v27, %v10912_v5  ;;  %v4606_v47 = vadd.f32 %v9576_v29, %v4605_v30  ;;  %7557 = vmatprep.mubr.bf16.mxu1 %v4459_v50  ;;  %v5089_v36 = vmax.f32 %v4603_v20, 0.0  ;;  %v10916_v27 = vld [vmem:[#allocation111_spill] sm:$0xff] }
 0x532   : > { %v4268_v57 = vadd.f32 %v9517_v63, %v4119_v49  ;;  %v5092_v61 = vmax.f32 %v4614_v23, 0.0  ;;  %7558 = vmatmul.mubr.bf16.gmra.mrb[244].mxu1 %v4460_v10  ;;  %v4395_v17 = vmax.f32 %v4267_v9, 0.0 }
 0x533   : > { %v4266_v34 = vadd.f32 %v9517_v63, %v4111_v22  ;;  %v5090_v59 = vmax.f32 %v4606_v47, 0.0  ;;  %v4393_v54 = vmax.f32 %v4265_v53, 0.0 }
 0x534   : > { %v4396_v19 = vmax.f32 %v4268_v57, 0.0  ;;  %v9618_v43 = vpack.c.bf16 %v5092_v61, %v5091_v56 }
 0x535   : > { %v9620_v60 = vpack.c.bf16 %v5090_v59, %v5089_v36  ;;  %v7423_v8 = vpop.f32.mrb[252].mxu0  ;;  %v7455_v4 = vpop.f32.mrb[140].mxu1  ;;  %v4394_v3 = vmax.f32 %v4266_v34, 0.0 }
 0x536   : > { %v4462_v11 = vpack.c.bf16 %v4396_v19, %v4395_v17  ;;  %v4132_v44 = vadd.f32 %v7423_v8, %v10913_v31  ;;  %v4627_v58 = vadd.f32 %v7455_v4, %v9576_v29  ;;  %v4123_v10 = vpop.f32.mrb[253].mxu0  ;;  %v4618_v0 = vpop.f32.mrb[141].mxu1 }
 0x537   : > { %v4124_v37 = vadd.f32 %v4123_v10, %v10914_v33  ;;  %v4619_v25 = vadd.f32 %v9576_v29, %v4618_v0  ;;  %v7424_v26 = vpop.f32.mrb[254].mxu0  ;;  %v7456_v18 = vpop.f32.mrb[142].mxu1  ;;  %5457 = vmatmul.mubr.bf16.gmra.mrb[8].mxu0 %v5211_v51  ;;  %v4461_v20 = vpack.c.bf16 %v4394_v3, %v4393_v54 }
 0x538   : > { %v4271_v16 = vadd.f32 %v9517_v63, %v4132_v44  ;;  %v4135_v50 = vadd.f32 %v7424_v26, %v10915_v52  ;;  %v4630_v9 = vadd.f32 %v7456_v18, %v9576_v29  ;;  %v4126_v42 = vpop.f32.mrb[255].mxu0  ;;  %v4621_v49 = vpop.f32.mrb[143].mxu1  ;;  %5464 = vmatprep.mubr.bf16.mxu0 %v8769_v46  ;;  %v5095_v5 = vmax.f32 %v4627_v58, 0.0 }
 0x539   : > { %v4269_v23 = vadd.f32 %v9517_v63, %v4124_v37  ;;  %v4127_v30 = vadd.f32 %v4126_v42, %v10916_v27  ;;  %v4622_v53 = vadd.f32 %v9576_v29, %v4621_v49  ;;  %7561 = vmatprep.mubr.bf16.mxu1 %v4461_v20  ;;  %v5093_v47 = vmax.f32 %v4619_v25, 0.0 }
 0x53a   : > { %v4272_v51 = vadd.f32 %v9517_v63, %v4135_v50  ;;  %v5096_v22 = vmax.f32 %v4630_v9, 0.0  ;;  %7562 = vmatmul.mubr.bf16.gmra.mrb[248].mxu1 %v4462_v11  ;;  %v4399_v61 = vmax.f32 %v4271_v16, 0.0 }
 0x53b   : > { %v4270_v56 = vadd.f32 %v9517_v63, %v4127_v30  ;;  %v5094_v57 = vmax.f32 %v4622_v53, 0.0  ;;  %v4397_v17 = vmax.f32 %v4269_v23, 0.0 }
 0x53c   : > { %v4400_v36 = vmax.f32 %v4272_v51, 0.0  ;;  %v9635_v34 = vpack.c.bf16 %v5096_v22, %v5095_v5 }
 0x53d   : > { %v5215_v46 = vpack.c.bf16 %v5094_v57, %v5093_v47  ;;  %v7459_v59 = vpop.f32.mrb[144].mxu1  ;;  %v4398_v19 = vmax.f32 %v4270_v56, 0.0 }
 0x53e   : > { %v4464_v8 = vpack.c.bf16 %v4400_v36, %v4399_v61  ;;  %v4643_v4 = vadd.f32 %v7459_v59, %v9576_v29  ;;  %v4634_v54 = vpop.f32.mrb[145].mxu1 }
 0x53f   : > { %v4635_v3 = vadd.f32 %v9576_v29, %v4634_v54  ;;  %v7460_v31 = vpop.f32.mrb[146].mxu1  ;;  %5465 = vmatmul.mubr.bf16.gmra.mrb[12].mxu0 %v9603_v28  ;;  %v4463_v11 = vpack.c.bf16 %v4398_v19, %v4397_v17 }
 0x540   : > { %v4646_v63 = vadd.f32 %v7460_v31, %v9576_v29  ;;  %v4637_v44 = vpop.f32.mrb[147].mxu1  ;;  %5472 = vmatprep.mubr.bf16.mxu0 %v8781_v41  ;;  %v5099_v10 = vmax.f32 %v4643_v4, 0.0 }
 0x541   : > { %v4638_v58 = vadd.f32 %v9576_v29, %v4637_v44  ;;  %7565 = vmatprep.mubr.bf16.mxu1 %v4463_v11  ;;  %v5097_v33 = vmax.f32 %v4635_v3, 0.0 }
 0x542   : > { %v5100_v0 = vmax.f32 %v4646_v63, 0.0  ;;  %7566 = vmatmul.mubr.bf16.gmra.mrb[252].mxu1 %v4464_v8 }
 0x543   : > { %v5098_v37 = vmax.f32 %v4638_v58, 0.0 }
 0x544   : > { %v9643_v25 = vpack.c.bf16 %v5100_v0, %v5099_v10 }
 0x545   : > { %v9645_v26 = vpack.c.bf16 %v5098_v37, %v5097_v33  ;;  %v7463_v18 = vpop.f32.mrb[148].mxu1 }
 0x546   : > { %v4659_v28 = vadd.f32 %v7463_v18, %v9576_v29  ;;  %v4650_v20 = vpop.f32.mrb[149].mxu1 }
 0x547   : > { %v4651_v16 = vadd.f32 %v9576_v29, %v4650_v20  ;;  %v7464_v52 = vpop.f32.mrb[150].mxu1  ;;  %5473 = vmatmul.mubr.bf16.gmra.mrb[16].mxu0 %v9620_v60 }
 0x548   : > { %v4662_v41 = vadd.f32 %v7464_v52, %v9576_v29  ;;  %v4653_v50 = vpop.f32.mrb[151].mxu1  ;;  %5480 = vmatprep.mubr.bf16.mxu0 %v8779_v6  ;;  %v5103_v42 = vmax.f32 %v4659_v28, 0.0 }
 0x549   : > { %v4654_v9 = vadd.f32 %v9576_v29, %v4653_v50  ;;  %v5101_v23 = vmax.f32 %v4651_v16, 0.0 }
 0x54a   : > { %v5104_v49 = vmax.f32 %v4662_v41, 0.0 }
 0x54b   : > { %v5102_v27 = vmax.f32 %v4654_v9, 0.0 }
 0x54c   : > { %v9653_v30 = vpack.c.bf16 %v5104_v49, %v5103_v42 }
 0x54d   : > { %v9655_v53 = vpack.c.bf16 %v5102_v27, %v5101_v23  ;;  %v7467_v5 = vpop.f32.mrb[152].mxu1 }
 0x54e   : > { %v4675_v51 = vadd.f32 %v7467_v5, %v9576_v29  ;;  %v4666_v22 = vpop.f32.mrb[153].mxu1 }
 0x54f   : > { %v4667_v60 = vadd.f32 %v9576_v29, %v4666_v22  ;;  %v7468_v47 = vpop.f32.mrb[154].mxu1  ;;  %5481 = vmatmul.mubr.bf16.gmra.mrb[20].mxu0 %v9618_v43 }
 0x550   : > { %v4678_v6 = vadd.f32 %v7468_v47, %v9576_v29  ;;  %v4669_v56 = vpop.f32.mrb[155].mxu1  ;;  %5488 = vmatprep.mubr.bf16.mxu0 %v8791_v2  ;;  %v5107_v61 = vmax.f32 %v4675_v51, 0.0 }
 0x551   : > { %v4670_v57 = vadd.f32 %v9576_v29, %v4669_v56  ;;  %v5105_v59 = vmax.f32 %v4667_v60, 0.0 }
 0x552   : > { %v5108_v36 = vmax.f32 %v4678_v6, 0.0 }
 0x553   : > { %v5106_v17 = vmax.f32 %v4670_v57, 0.0 }
 0x554   : > { %v9663_v19 = vpack.c.bf16 %v5108_v36, %v5107_v61 }
 0x555   : > { %v9665_v8 = vpack.c.bf16 %v5106_v17, %v5105_v59  ;;  %v7471_v4 = vpop.f32.mrb[156].mxu1 }
 0x556   : > { %v4691_v54 = vadd.f32 %v7471_v4, %v9576_v29  ;;  %v4682_v3 = vpop.f32.mrb[157].mxu1 }
 0x557   : > { %v4683_v43 = vadd.f32 %v9576_v29, %v4682_v3  ;;  %v7472_v31 = vpop.f32.mrb[158].mxu1  ;;  %5489 = vmatmul.mubr.bf16.gmra.mrb[24].mxu0 %v5215_v46 }
 0x558   : > { %v4694_v2 = vadd.f32 %v7472_v31, %v9576_v29  ;;  %v4685_v11 = vpop.f32.mrb[159].mxu1  ;;  %5496 = vmatprep.mubr.bf16.mxu0 %v8789_v40  ;;  %v5111_v44 = vmax.f32 %v4691_v54, 0.0 }
 0x559   : > { %v4686_v63 = vadd.f32 %v9576_v29, %v4685_v11  ;;  %v5109_v10 = vmax.f32 %v4683_v43, 0.0 }
 0x55a   : > { %v5112_v58 = vmax.f32 %v4694_v2, 0.0 }
 0x55b   : > { %v5110_v0 = vmax.f32 %v4686_v63, 0.0 }
 0x55c   : > { %v9672_v33 = vpack.c.bf16 %v5112_v58, %v5111_v44 }
 0x55d   : > { %v9674_v37 = vpack.c.bf16 %v5110_v0, %v5109_v10  ;;  %v7475_v18 = vpop.f32.mrb[160].mxu1 }
 0x55e   : > { %v4707_v28 = vadd.f32 %v7475_v18, %v9576_v29  ;;  %v4698_v20 = vpop.f32.mrb[161].mxu1 }
 0x55f   : > { %v4699_v46 = vadd.f32 %v9576_v29, %v4698_v20  ;;  %v7476_v16 = vpop.f32.mrb[162].mxu1  ;;  %5497 = vmatmul.mubr.bf16.gmra.mrb[28].mxu0 %v9635_v34 }
 0x560   : > { %v4710_v40 = vadd.f32 %v7476_v16, %v9576_v29  ;;  %v4701_v52 = vpop.f32.mrb[163].mxu1  ;;  %5504 = vmatprep.mubr.bf16.mxu0 %v8806_v21  ;;  %v5115_v50 = vmax.f32 %v4707_v28, 0.0 }
 0x561   : > { %v4702_v41 = vadd.f32 %v9576_v29, %v4701_v52  ;;  %v5113_v42 = vmax.f32 %v4699_v46, 0.0 }
 0x562   : > { %v5116_v9 = vmax.f32 %v4710_v40, 0.0 }
 0x563   : > { %v5114_v49 = vmax.f32 %v4702_v41, 0.0 }
 0x564   : > { %v9682_v23 = vpack.c.bf16 %v5116_v9, %v5115_v50 }
 0x565   : > { %v9684_v27 = vpack.c.bf16 %v5114_v49, %v5113_v42  ;;  %v7479_v5 = vpop.f32.mrb[164].mxu1 }
 0x566   : > { %v4723_v51 = vadd.f32 %v7479_v5, %v9576_v29  ;;  %v4714_v22 = vpop.f32.mrb[165].mxu1 }
 0x567   : > { %v4715_v34 = vadd.f32 %v9576_v29, %v4714_v22  ;;  %v7480_v60 = vpop.f32.mrb[166].mxu1  ;;  %5505 = vmatmul.mubr.bf16.gmra.mrb[32].mxu0 %v9645_v26 }
 0x568   : > { %v4726_v21 = vadd.f32 %v7480_v60, %v9576_v29  ;;  %v4717_v47 = vpop.f32.mrb[167].mxu1  ;;  %5512 = vmatprep.mubr.bf16.mxu0 %v8801_v39  ;;  %v5119_v56 = vmax.f32 %v4723_v51, 0.0 }
 0x569   : > { %v4718_v6 = vadd.f32 %v9576_v29, %v4717_v47  ;;  %v5117_v61 = vmax.f32 %v4715_v34, 0.0 }
 0x56a   : > { %v5120_v57 = vmax.f32 %v4726_v21, 0.0 }
 0x56b   : > { %v5118_v36 = vmax.f32 %v4718_v6, 0.0 }
 0x56c   : > { %v9692_v59 = vpack.c.bf16 %v5120_v57, %v5119_v56 }
 0x56d   : > { %v9694_v17 = vpack.c.bf16 %v5118_v36, %v5117_v61  ;;  %v7483_v4 = vpop.f32.mrb[168].mxu1 }
 0x56e   : > { %v4739_v54 = vadd.f32 %v7483_v4, %v9576_v29  ;;  %v4730_v3 = vpop.f32.mrb[169].mxu1 }
 0x56f   : > { %v4731_v26 = vadd.f32 %v9576_v29, %v4730_v3  ;;  %v7484_v43 = vpop.f32.mrb[170].mxu1  ;;  %5513 = vmatmul.mubr.bf16.gmra.mrb[36].mxu0 %v9643_v25 }
 0x570   : > { %v4742_v39 = vadd.f32 %v7484_v43, %v9576_v29  ;;  %v4733_v31 = vpop.f32.mrb[171].mxu1  ;;  %5520 = vmatprep.mubr.bf16.mxu0 %v8818_v13  ;;  %v5123_v11 = vmax.f32 %v4739_v54, 0.0 }
 0x571   : > { %v4734_v2 = vadd.f32 %v9576_v29, %v4733_v31  ;;  %v5121_v44 = vmax.f32 %v4731_v26, 0.0 }
 0x572   : > { %v5124_v63 = vmax.f32 %v4742_v39, 0.0 }
 0x573   : > { %v5122_v58 = vmax.f32 %v4734_v2, 0.0 }
 0x574   : > { %v9702_v10 = vpack.c.bf16 %v5124_v63, %v5123_v11 }
 0x575   : > { %v9704_v0 = vpack.c.bf16 %v5122_v58, %v5121_v44  ;;  %v7487_v18 = vpop.f32.mrb[172].mxu1 }
 0x576   : > { %v4755_v28 = vadd.f32 %v7487_v18, %v9576_v29  ;;  %v4746_v20 = vpop.f32.mrb[173].mxu1 }
 0x577   : > { %v4747_v25 = vadd.f32 %v9576_v29, %v4746_v20  ;;  %v7488_v46 = vpop.f32.mrb[174].mxu1  ;;  %5521 = vmatmul.mubr.bf16.gmra.mrb[40].mxu0 %v9655_v53 }
 0x578   : > { %v4758_v13 = vadd.f32 %v7488_v46, %v9576_v29  ;;  %v4749_v16 = vpop.f32.mrb[175].mxu1  ;;  %5528 = vmatprep.mubr.bf16.mxu0 %v8816_v35  ;;  %v5127_v52 = vmax.f32 %v4755_v28, 0.0 }
 0x579   : > { %v4750_v40 = vadd.f32 %v9576_v29, %v4749_v16  ;;  %v5125_v50 = vmax.f32 %v4747_v25, 0.0 }
 0x57a   : > { %v5128_v41 = vmax.f32 %v4758_v13, 0.0 }
 0x57b   : > { %v5126_v9 = vmax.f32 %v4750_v40, 0.0 }
 0x57c   : > { %v9712_v42 = vpack.c.bf16 %v5128_v41, %v5127_v52 }
 0x57d   : > { %v9714_v49 = vpack.c.bf16 %v5126_v9, %v5125_v50  ;;  %v7491_v5 = vpop.f32.mrb[176].mxu1 }
 0x57e   : > { %v4771_v51 = vadd.f32 %v7491_v5, %v9576_v29  ;;  %v4762_v22 = vpop.f32.mrb[177].mxu1 }
 0x57f   : > { %v4763_v53 = vadd.f32 %v9576_v29, %v4762_v22  ;;  %v7492_v34 = vpop.f32.mrb[178].mxu1  ;;  %5529 = vmatmul.mubr.bf16.gmra.mrb[44].mxu0 %v9653_v30 }
 0x580   : > { %v4774_v35 = vadd.f32 %v7492_v34, %v9576_v29  ;;  %v4765_v60 = vpop.f32.mrb[179].mxu1  ;;  %5536 = vmatprep.mubr.bf16.mxu0 %v8833_v15  ;;  %v5131_v47 = vmax.f32 %v4771_v51, 0.0 }
 0x581   : > { %v4766_v21 = vadd.f32 %v9576_v29, %v4765_v60  ;;  %v5129_v56 = vmax.f32 %v4763_v53, 0.0 }
 0x582   : > { %v5132_v6 = vmax.f32 %v4774_v35, 0.0 }
 0x583   : > { %v5130_v57 = vmax.f32 %v4766_v21, 0.0 }
 0x584   : > { %v9722_v61 = vpack.c.bf16 %v5132_v6, %v5131_v47 }
 0x585   : > { %v9724_v36 = vpack.c.bf16 %v5130_v57, %v5129_v56  ;;  %v7495_v4 = vpop.f32.mrb[180].mxu1 }
 0x586   : > { %v4787_v54 = vadd.f32 %v7495_v4, %v9576_v29  ;;  %v4778_v3 = vpop.f32.mrb[181].mxu1 }
 0x587   : > { %v4779_v30 = vadd.f32 %v9576_v29, %v4778_v3  ;;  %v7496_v26 = vpop.f32.mrb[182].mxu1  ;;  %5537 = vmatmul.mubr.bf16.gmra.mrb[48].mxu0 %v9665_v8 }
 0x588   : > { %v4790_v15 = vadd.f32 %v7496_v26, %v9576_v29  ;;  %v4781_v43 = vpop.f32.mrb[183].mxu1  ;;  %5544 = vmatprep.mubr.bf16.mxu0 %v8828_v38  ;;  %v5135_v31 = vmax.f32 %v4787_v54, 0.0 }
 0x589   : > { %v4782_v39 = vadd.f32 %v9576_v29, %v4781_v43  ;;  %v5133_v11 = vmax.f32 %v4779_v30, 0.0 }
 0x58a   : > { %v5136_v2 = vmax.f32 %v4790_v15, 0.0 }
 0x58b   : > { %v5134_v63 = vmax.f32 %v4782_v39, 0.0 }
 0x58c   : > { %v9732_v44 = vpack.c.bf16 %v5136_v2, %v5135_v31 }
 0x58d   : > { %v9734_v58 = vpack.c.bf16 %v5134_v63, %v5133_v11  ;;  %v7499_v18 = vpop.f32.mrb[184].mxu1 }
 0x58e   : > { %v4803_v28 = vadd.f32 %v7499_v18, %v9576_v29  ;;  %v4794_v20 = vpop.f32.mrb[185].mxu1 }
 0x58f   : > { %v4795_v8 = vadd.f32 %v9576_v29, %v4794_v20  ;;  %v7500_v25 = vpop.f32.mrb[186].mxu1  ;;  %5545 = vmatmul.mubr.bf16.gmra.mrb[52].mxu0 %v9663_v19 }
 0x590   : > { %v4806_v38 = vadd.f32 %v7500_v25, %v9576_v29  ;;  %v4797_v46 = vpop.f32.mrb[187].mxu1  ;;  %5552 = vmatprep.mubr.bf16.mxu0 %v8845_v45  ;;  %v5139_v16 = vmax.f32 %v4803_v28, 0.0 }
 0x591   : > { %v4798_v13 = vadd.f32 %v9576_v29, %v4797_v46  ;;  %v5137_v52 = vmax.f32 %v4795_v8, 0.0 }
 0x592   : > { %v5140_v40 = vmax.f32 %v4806_v38, 0.0 }
 0x593   : > { %v5138_v41 = vmax.f32 %v4798_v13, 0.0 }
 0x594   : > { %v9742_v50 = vpack.c.bf16 %v5140_v40, %v5139_v16 }
 0x595   : > { %v9744_v9 = vpack.c.bf16 %v5138_v41, %v5137_v52  ;;  %v7503_v5 = vpop.f32.mrb[188].mxu1 }
 0x596   : > { %v4819_v51 = vadd.f32 %v7503_v5, %v9576_v29  ;;  %v4810_v22 = vpop.f32.mrb[189].mxu1 }
 0x597   : > { %v4811_v19 = vadd.f32 %v9576_v29, %v4810_v22  ;;  %v7504_v53 = vpop.f32.mrb[190].mxu1  ;;  %5553 = vmatmul.mubr.bf16.gmra.mrb[56].mxu0 %v9674_v37 }
 0x598   : > { %v4822_v45 = vadd.f32 %v7504_v53, %v9576_v29  ;;  %v4813_v34 = vpop.f32.mrb[191].mxu1  ;;  %5560 = vmatprep.mubr.bf16.mxu0 %v8843_v1  ;;  %v5143_v60 = vmax.f32 %v4819_v51, 0.0 }
 0x599   : > { %v4814_v35 = vadd.f32 %v9576_v29, %v4813_v34  ;;  %v5141_v47 = vmax.f32 %v4811_v19, 0.0 }
 0x59a   : > { %v5144_v21 = vmax.f32 %v4822_v45, 0.0 }
 0x59b   : > { %v5142_v6 = vmax.f32 %v4814_v35, 0.0 }
 0x59c   : > { %v9752_v56 = vpack.c.bf16 %v5144_v21, %v5143_v60 }
 0x59d   : > { %v9754_v57 = vpack.c.bf16 %v5142_v6, %v5141_v47  ;;  %v7507_v4 = vpop.f32.mrb[192].mxu1 }
 0x59e   : > { %v4835_v54 = vadd.f32 %v7507_v4, %v9576_v29  ;;  %v4826_v3 = vpop.f32.mrb[193].mxu1 }
 0x59f   : > { %v4827_v37 = vadd.f32 %v9576_v29, %v4826_v3  ;;  %v7508_v30 = vpop.f32.mrb[194].mxu1  ;;  %5561 = vmatmul.mubr.bf16.gmra.mrb[60].mxu0 %v9672_v33 }
 0x5a0   : > { %v4838_v1 = vadd.f32 %v7508_v30, %v9576_v29  ;;  %v4829_v26 = vpop.f32.mrb[195].mxu1  ;;  %5568 = vmatprep.mubr.bf16.mxu0 %v8860_v55  ;;  %v5147_v43 = vmax.f32 %v4835_v54, 0.0 }
 0x5a1   : > { %v4830_v15 = vadd.f32 %v9576_v29, %v4829_v26  ;;  %v5145_v31 = vmax.f32 %v4827_v37, 0.0 }
 0x5a2   : > { %v5148_v39 = vmax.f32 %v4838_v1, 0.0 }
 0x5a3   : > { %v5146_v2 = vmax.f32 %v4830_v15, 0.0 }
 0x5a4   : > { %v9762_v11 = vpack.c.bf16 %v5148_v39, %v5147_v43 }
 0x5a5   : > { %v9764_v63 = vpack.c.bf16 %v5146_v2, %v5145_v31  ;;  %v7511_v18 = vpop.f32.mrb[196].mxu1 }
 0x5a6   : > { %v4851_v28 = vadd.f32 %v7511_v18, %v9576_v29  ;;  %v4842_v20 = vpop.f32.mrb[197].mxu1 }
 0x5a7   : > { %v4843_v33 = vadd.f32 %v9576_v29, %v4842_v20  ;;  %v7512_v8 = vpop.f32.mrb[198].mxu1  ;;  %5569 = vmatmul.mubr.bf16.gmra.mrb[64].mxu0 %v9684_v27 }
 0x5a8   : > { %v4854_v55 = vadd.f32 %v7512_v8, %v9576_v29  ;;  %v4845_v25 = vpop.f32.mrb[199].mxu1  ;;  %5576 = vmatprep.mubr.bf16.mxu0 %v8855_v62  ;;  %v5151_v46 = vmax.f32 %v4851_v28, 0.0 }
 0x5a9   : > { %v4846_v38 = vadd.f32 %v9576_v29, %v4845_v25  ;;  %v5149_v16 = vmax.f32 %v4843_v33, 0.0 }
 0x5aa   : > { %v5152_v13 = vmax.f32 %v4854_v55, 0.0  ;;  %v10917_v55 = vld [vmem:[#allocation117_spill] sm:$0xff] }
 0x5ab   : > { %v5150_v40 = vmax.f32 %v4846_v38, 0.0 }
 0x5ac   : > { %v9772_v52 = vpack.c.bf16 %v5152_v13, %v5151_v46 }
 0x5ad   : > { %v9774_v41 = vpack.c.bf16 %v5150_v40, %v5149_v16  ;;  %v7515_v5 = vpop.f32.mrb[200].mxu1 }
 0x5ae   : > { %v4867_v51 = vadd.f32 %v7515_v5, %v9576_v29  ;;  %v4858_v22 = vpop.f32.mrb[201].mxu1 }
 0x5af   : > { %v4859_v27 = vadd.f32 %v9576_v29, %v4858_v22  ;;  %v7516_v19 = vpop.f32.mrb[202].mxu1  ;;  %5577 = vmatmul.mubr.bf16.gmra.mrb[68].mxu0 %v9682_v23 }
 0x5b0   : > { %v4870_v62 = vadd.f32 %v7516_v19, %v9576_v29  ;;  %v4861_v53 = vpop.f32.mrb[203].mxu1  ;;  %5584 = vmatprep.mubr.bf16.mxu0 %v8872_v7  ;;  %v5155_v34 = vmax.f32 %v4867_v51, 0.0 }
 0x5b1   : > { %v4862_v45 = vadd.f32 %v9576_v29, %v4861_v53  ;;  %v5153_v60 = vmax.f32 %v4859_v27, 0.0 }
 0x5b2   : > { %v5156_v35 = vmax.f32 %v4870_v62, 0.0 }
 0x5b3   : > { %v5154_v21 = vmax.f32 %v4862_v45, 0.0  ;;  %v10918_v45 = vld [vmem:[#allocation116_spill] sm:$0xff] }
 0x5b4   : > { %v9782_v47 = vpack.c.bf16 %v5156_v35, %v5155_v34 }
 0x5b5   : > { %v9784_v6 = vpack.c.bf16 %v5154_v21, %v5153_v60  ;;  %v7519_v4 = vpop.f32.mrb[204].mxu1 }
 0x5b6   : > { %v4883_v54 = vadd.f32 %v7519_v4, %v9576_v29  ;;  %v4874_v3 = vpop.f32.mrb[205].mxu1 }
 0x5b7   : > { %v4875_v23 = vadd.f32 %v9576_v29, %v4874_v3  ;;  %v7520_v37 = vpop.f32.mrb[206].mxu1  ;;  %5585 = vmatmul.mubr.bf16.gmra.mrb[72].mxu0 %v9694_v17 }
 0x5b8   : > { %v4886_v7 = vadd.f32 %v7520_v37, %v9576_v29  ;;  %v4877_v30 = vpop.f32.mrb[207].mxu1  ;;  %5592 = vmatprep.mubr.bf16.mxu0 %v8870_v24  ;;  %v5159_v26 = vmax.f32 %v4883_v54, 0.0 }
 0x5b9   : > { %v4878_v1 = vadd.f32 %v9576_v29, %v4877_v30  ;;  %v5157_v43 = vmax.f32 %v4875_v23, 0.0 }
 0x5ba   : > { %v5160_v15 = vmax.f32 %v4886_v7, 0.0 }
 0x5bb   : > { %v5158_v39 = vmax.f32 %v4878_v1, 0.0 }
 0x5bc   : > { %v9792_v31 = vpack.c.bf16 %v5160_v15, %v5159_v26  ;;  %v10919_v15 = vld [vmem:[#allocation119_spill] sm:$0xff] }
 0x5bd   : > { %v9794_v2 = vpack.c.bf16 %v5158_v39, %v5157_v43  ;;  %v7523_v18 = vpop.f32.mrb[208].mxu1 }
 0x5be   : > { %v4899_v28 = vadd.f32 %v7523_v18, %v9576_v29  ;;  %v4890_v20 = vpop.f32.mrb[209].mxu1 }
 0x5bf   : > { %v4891_v17 = vadd.f32 %v9576_v29, %v4890_v20  ;;  %v7524_v33 = vpop.f32.mrb[210].mxu1  ;;  %5593 = vmatmul.mubr.bf16.gmra.mrb[76].mxu0 %v9692_v59 }
 0x5c0   : > { %v4902_v24 = vadd.f32 %v7524_v33, %v9576_v29  ;;  %v4893_v8 = vpop.f32.mrb[211].mxu1  ;;  %5600 = vmatprep.mubr.bf16.mxu0 %v10917_v55  ;;  %v5163_v38 = vmax.f32 %v4899_v28, 0.0 }
 0x5c1   : > { %v4894_v25 = vadd.f32 %v9576_v29, %v4893_v8  ;;  %v5161_v13 = vmax.f32 %v4891_v17, 0.0 }
 0x5c2   : > { %v5164_v46 = vmax.f32 %v4902_v24, 0.0 }
 0x5c3   : > { %v5162_v16 = vmax.f32 %v4894_v25, 0.0 }
 0x5c4   : > { %v9802_v40 = vpack.c.bf16 %v5164_v46, %v5163_v38 }
 0x5c5   : > { %v9804_v5 = vpack.c.bf16 %v5162_v16, %v5161_v13  ;;  %v7527_v51 = vpop.f32.mrb[212].mxu1  ;;  %v10920_v13 = vld [vmem:[#allocation118_spill] sm:$0xff] }
 0x5c6   : > { %v4915_v22 = vadd.f32 %v7527_v51, %v9576_v29  ;;  %v4906_v27 = vpop.f32.mrb[213].mxu1 }
 0x5c7   : > { %v4907_v59 = vadd.f32 %v9576_v29, %v4906_v27  ;;  %v7528_v19 = vpop.f32.mrb[214].mxu1  ;;  %5601 = vmatmul.mubr.bf16.gmra.mrb[80].mxu0 %v9704_v0 }
 0x5c8   : > { %v4918_v62 = vadd.f32 %v7528_v19, %v9576_v29  ;;  %v4909_v53 = vpop.f32.mrb[215].mxu1  ;;  %5608 = vmatprep.mubr.bf16.mxu0 %v10918_v45  ;;  %v5167_v35 = vmax.f32 %v4915_v22, 0.0 }
 0x5c9   : > { %v4910_v34 = vadd.f32 %v9576_v29, %v4909_v53  ;;  %v5165_v21 = vmax.f32 %v4907_v59, 0.0 }
 0x5ca   : > { %v5168_v60 = vmax.f32 %v4918_v62, 0.0 }
 0x5cb   : > { %v5166_v4 = vmax.f32 %v4910_v34, 0.0 }
 0x5cc   : > { %v9812_v54 = vpack.c.bf16 %v5168_v60, %v5167_v35 }
 0x5cd   : > { %v9814_v3 = vpack.c.bf16 %v5166_v4, %v5165_v21  ;;  %v7531_v23 = vpop.f32.mrb[216].mxu1  ;;  %v10921_v4 = vld [vmem:[#allocation121_spill] sm:$0xff] }
 0x5ce   : > { %v4931_v37 = vadd.f32 %v7531_v23, %v9576_v29  ;;  %v4922_v7 = vpop.f32.mrb[217].mxu1 }
 0x5cf   : > { %v4923_v0 = vadd.f32 %v9576_v29, %v4922_v7  ;;  %v7532_v30 = vpop.f32.mrb[218].mxu1  ;;  %5609 = vmatmul.mubr.bf16.gmra.mrb[84].mxu0 %v9702_v10 }
 0x5d0   : > { %v4934_v1 = vadd.f32 %v7532_v30, %v9576_v29  ;;  %v4925_v26 = vpop.f32.mrb[219].mxu1  ;;  %5616 = vmatprep.mubr.bf16.mxu0 %v10919_v15  ;;  %v5171_v39 = vmax.f32 %v4931_v37, 0.0 }
 0x5d1   : > { %v4926_v43 = vadd.f32 %v9576_v29, %v4925_v26  ;;  %v5169_v28 = vmax.f32 %v4923_v0, 0.0 }
 0x5d2   : > { %v5172_v18 = vmax.f32 %v4934_v1, 0.0 }
 0x5d3   : > { %v5170_v20 = vmax.f32 %v4926_v43, 0.0 }
 0x5d4   : > { %v9822_v17 = vpack.c.bf16 %v5172_v18, %v5171_v39 }
 0x5d5   : > { %v9824_v33 = vpack.c.bf16 %v5170_v20, %v5169_v28  ;;  %v7535_v24 = vpop.f32.mrb[220].mxu1 }
 0x5d6   : > { %v4947_v8 = vadd.f32 %v7535_v24, %v9576_v29  ;;  %v4938_v55 = vpop.f32.mrb[221].mxu1  ;;  %v10922_v24 = vld [vmem:[#allocation120_spill] sm:$0xff] }
 0x5d7   : > { %v4939_v10 = vadd.f32 %v9576_v29, %v4938_v55  ;;  %v7536_v25 = vpop.f32.mrb[222].mxu1  ;;  %5617 = vmatmul.mubr.bf16.gmra.mrb[88].mxu0 %v9714_v49 }
 0x5d8   : > { %v4950_v38 = vadd.f32 %v7536_v25, %v9576_v29  ;;  %v4941_v46 = vpop.f32.mrb[223].mxu1  ;;  %5624 = vmatprep.mubr.bf16.mxu0 %v10920_v13  ;;  %v5175_v51 = vmax.f32 %v4947_v8, 0.0 }
 0x5d9   : > { %v4942_v16 = vadd.f32 %v9576_v29, %v4941_v46  ;;  %v5173_v27 = vmax.f32 %v4939_v10, 0.0 }
 0x5da   : > { %v5176_v22 = vmax.f32 %v4950_v38, 0.0 }
 0x5db   : > { %v5174_v59 = vmax.f32 %v4942_v16, 0.0 }
 0x5dc   : > { %v9832_v19 = vpack.c.bf16 %v5176_v22, %v5175_v51 }
 0x5dd   : > { %v9834_v62 = vpack.c.bf16 %v5174_v59, %v5173_v27  ;;  %v7539_v53 = vpop.f32.mrb[224].mxu1 }
 0x5de   : > { %v4963_v45 = vadd.f32 %v7539_v53, %v9576_v29  ;;  %v4954_v34 = vpop.f32.mrb[225].mxu1 }
 0x5df   : > { %v4955_v49 = vadd.f32 %v9576_v29, %v4954_v34  ;;  %v7540_v35 = vpop.f32.mrb[226].mxu1  ;;  %5625 = vmatmul.mubr.bf16.gmra.mrb[92].mxu0 %v9712_v42  ;;  %v9864_v34 = vld [vmem:[%s10599_s10] ss:$0 sm:$0xff] }
 0x5e0   : > { %v4966_v60 = vadd.f32 %v7540_v35, %v9576_v29  ;;  %v4957_v21 = vpop.f32.mrb[227].mxu1  ;;  %5632 = vmatprep.mubr.bf16.mxu0 %v10921_v4  ;;  %v5179_v37 = vmax.f32 %v4963_v45, 0.0  ;;  %v10923_v45 = vld [vmem:[#allocation123_spill] sm:$0xff] }
 0x5e1   : > { %v4958_v23 = vadd.f32 %v9576_v29, %v4957_v21  ;;  %v5177_v0 = vmax.f32 %v4955_v49, 0.0 }
 0x5e2   : > { %v5180_v7 = vmax.f32 %v4966_v60, 0.0 }
 0x5e3   : > { %v5178_v30 = vmax.f32 %v4958_v23, 0.0 }
 0x5e4   : > { %v9842_v1 = vpack.c.bf16 %v5180_v7, %v5179_v37 }
 0x5e5   : > { %v9844_v26 = vpack.c.bf16 %v5178_v30, %v5177_v0  ;;  %v7543_v15 = vpop.f32.mrb[228].mxu1 }
 0x5e6   : > { %v4979_v43 = vadd.f32 %v7543_v15, %v9576_v29  ;;  %v4970_v39 = vpop.f32.mrb[229].mxu1 }
 0x5e7   : > { %v4971_v42 = vadd.f32 %v9576_v29, %v4970_v39  ;;  %v7544_v18 = vpop.f32.mrb[230].mxu1  ;;  %5633 = vmatmul.mubr.bf16.gmra.mrb[96].mxu0 %v9724_v36  ;;  %v10924_v39 = vld [vmem:[#allocation122_spill] sm:$0xff] }
 0x5e8   : > { %v4982_v28 = vadd.f32 %v7544_v18, %v9576_v29  ;;  %v4973_v20 = vpop.f32.mrb[231].mxu1  ;;  %5640 = vmatprep.mubr.bf16.mxu0 %v10922_v24  ;;  %v5183_v55 = vmax.f32 %v4979_v43, 0.0 }
 0x5e9   : > { %v4974_v8 = vadd.f32 %v9576_v29, %v4973_v20  ;;  %v5181_v25 = vmax.f32 %v4971_v42, 0.0  ;;  %v9880_v42 = vld [vmem:[%s10601_s12] ss:$0 sm:$0xff] }
 0x5ea   : > { %v5184_v10 = vmax.f32 %v4982_v28, 0.0 }
 0x5eb   : > { %v5182_v38 = vmax.f32 %v4974_v8, 0.0 }
 0x5ec   : > { %v9852_v46 = vpack.c.bf16 %v5184_v10, %v5183_v55 }
 0x5ed   : > { %v9854_v13 = vpack.c.bf16 %v5182_v38, %v5181_v25  ;;  %v7547_v16 = vpop.f32.mrb[232].mxu1 }
 0x5ee   : > { %v4995_v51 = vadd.f32 %v7547_v16, %v9576_v29  ;;  %v4986_v36 = vpop.f32.mrb[233].mxu1 }
 0x5ef   : > { %v4987_v22 = vadd.f32 %v9576_v29, %v4986_v36  ;;  %v7548_v27 = vpop.f32.mrb[234].mxu1  ;;  %5641 = vmatmul.mubr.bf16.gmra.mrb[100].mxu0 %v9722_v61 }
 0x5f0   : > { %v4998_v59 = vadd.f32 %v7548_v27, %v9576_v29  ;;  %v4989_v53 = vpop.f32.mrb[235].mxu1  ;;  %5648 = vmatprep.mubr.bf16.mxu0 %v10923_v45  ;;  %v5187_v35 = vmax.f32 %v4995_v51, 0.0 }
 0x5f1   : > { %v4990_v49 = vadd.f32 %v9864_v34, %v4989_v53  ;;  %v5185_v21 = vmax.f32 %v4987_v22, 0.0 }
 0x5f2   : > { %v5188_v60 = vmax.f32 %v4998_v59, 0.0 }
 0x5f3   : > { %v5186_v4 = vmax.f32 %v4990_v49, 0.0 }
 0x5f4   : > { %v9867_v23 = vpack.c.bf16 %v5188_v60, %v5187_v35  ;;  %v10925_v60 = vld [vmem:[#allocation125_spill] sm:$0xff] }
 0x5f5   : > { %v9870_v61 = vpack.c.bf16 %v5186_v4, %v5185_v21  ;;  %v7551_v29 = vpop.f32.mrb[236].mxu1 }
 0x5f6   : > { %v5011_v37 = vadd.f32 %v9864_v34, %v7551_v29  ;;  %v5002_v7 = vpop.f32.mrb[237].mxu1 }
 0x5f7   : > { %v5003_v0 = vadd.f32 %v9864_v34, %v5002_v7  ;;  %v7552_v30 = vpop.f32.mrb[238].mxu1  ;;  %5649 = vmatmul.mubr.bf16.gmra.mrb[104].mxu0 %v9734_v58 }
 0x5f8   : > { %v5014_v15 = vadd.f32 %v9864_v34, %v7552_v30  ;;  %v5005_v43 = vpop.f32.mrb[239].mxu1  ;;  %5656 = vmatprep.mubr.bf16.mxu0 %v10924_v39  ;;  %v5191_v28 = vmax.f32 %v5011_v37, 0.0 }
 0x5f9   : > { %v5006_v18 = vadd.f32 %v9864_v34, %v5005_v43  ;;  %v5189_v8 = vmax.f32 %v5003_v0, 0.0 }
 0x5fa   : > { %v5192_v20 = vmax.f32 %v5014_v15, 0.0  ;;  %v5442_v24 = vpop.f32.mrb[0].mxu0 }
 0x5fb   : > { %v5190_v55 = vmax.f32 %v5006_v18, 0.0  ;;  %v5443_v58 = vadd.f32 %v9880_v42, %v5442_v24  ;;  %v5444_v10 = vpop.f32.mrb[1].mxu0 }
 0x5fc   : > { %v9884_v25 = vpack.c.bf16 %v5192_v20, %v5191_v28  ;;  %v5445_v38 = vpop.f32.mrb[2].mxu0 }
 0x5fd   : > { %v9886_v16 = vpack.c.bf16 %v5190_v55, %v5189_v8  ;;  %5954 = vst.msk [vmem:[%s9888_s25] sm:$0xff] %vm5953_vm2, %v5443_v58  ;;  %v5446_v51 = vadd.f32 %v9880_v42, %v5445_v38  ;;  %v7555_v36 = vpop.f32.mrb[240].mxu1  ;;  %v5447_v22 = vpop.f32.mrb[3].mxu0 }
 0x5fe   : > { %v5027_v27 = vadd.f32 %v9864_v34, %v7555_v36  ;;  %v5018_v59 = vpop.f32.mrb[241].mxu1 }
 0x5ff   : > { %5955 = vst.msk [vmem:[%s9888_s25 + $0x8] sm:$0xff] %vm5953_vm2, %v5446_v51  ;;  %v5019_v53 = vadd.f32 %v9864_v34, %v5018_v59  ;;  %v7556_v45 = vpop.f32.mrb[242].mxu1  ;;  %5657 = vmatmul.mubr.bf16.gmra.mrb[108].mxu0 %v9732_v44  ;;  %v10926_v51 = vld [vmem:[#allocation124_spill] sm:$0xff] }
 0x600   : > { %v5030_v49 = vadd.f32 %v9864_v34, %v7556_v45  ;;  %v5021_v35 = vpop.f32.mrb[243].mxu1  ;;  %5664 = vmatprep.mubr.bf16.mxu0 %v10925_v60  ;;  %v5195_v4 = vmax.f32 %v5027_v27, 0.0 }
 0x601   : > { %v5022_v21 = vadd.f32 %v9864_v34, %v5021_v35  ;;  %v5193_v7 = vmax.f32 %v5019_v53, 0.0 }
 0x602   : > { %v5196_v29 = vmax.f32 %v5030_v49, 0.0  ;;  %v5450_v37 = vpop.f32.mrb[4].mxu0 }
 0x603   : > { %v5194_v0 = vmax.f32 %v5022_v21, 0.0  ;;  %v5451_v30 = vadd.f32 %v9880_v42, %v5450_v37  ;;  %v5452_v15 = vpop.f32.mrb[5].mxu0 }
 0x604   : > { %v9902_v43 = vpack.c.bf16 %v5196_v29, %v5195_v4  ;;  %v5453_v39 = vpop.f32.mrb[6].mxu0 }
 0x605   : > { %v9904_v44 = vpack.c.bf16 %v5194_v0, %v5193_v7  ;;  %5956 = vst.msk [vmem:[%s9888_s25 + $0x10] sm:$0xff] %vm5953_vm2, %v5451_v30  ;;  %v5454_v18 = vadd.f32 %v9880_v42, %v5453_v39  ;;  %v7559_v28 = vpop.f32.mrb[244].mxu1  ;;  %v5455_v20 = vpop.f32.mrb[7].mxu0 }
 0x606   : > { %v5043_v24 = vadd.f32 %v9864_v34, %v7559_v28  ;;  %v5034_v8 = vpop.f32.mrb[245].mxu1  ;;  %v10927_v28 = vld [vmem:[#allocation127_spill] sm:$0xff] }
 0x607   : > { %5957 = vst.msk [vmem:[%s9888_s25 + $0x18] sm:$0xff] %vm5953_vm2, %v5454_v18  ;;  %v5035_v55 = vadd.f32 %v9864_v34, %v5034_v8  ;;  %v7560_v58 = vpop.f32.mrb[246].mxu1  ;;  %5665 = vmatmul.mubr.bf16.gmra.mrb[112].mxu0 %v9744_v9 }
 0x608   : > { %v5046_v10 = vadd.f32 %v9864_v34, %v7560_v58  ;;  %v5037_v38 = vpop.f32.mrb[247].mxu1  ;;  %5672 = vmatprep.mubr.bf16.mxu0 %v10926_v51  ;;  %v5199_v22 = vmax.f32 %v5043_v24, 0.0 }
 0x609   : > { %v5038_v36 = vadd.f32 %v9864_v34, %v5037_v38  ;;  %v5197_v53 = vmax.f32 %v5035_v55, 0.0 }
 0x60a   : > { %v5200_v27 = vmax.f32 %v5046_v10, 0.0  ;;  %v5458_v59 = vpop.f32.mrb[8].mxu0 }
 0x60b   : > { %v5198_v45 = vmax.f32 %v5038_v36, 0.0  ;;  %v5459_v49 = vadd.f32 %v9880_v42, %v5458_v59  ;;  %v5460_v35 = vpop.f32.mrb[9].mxu0 }
 0x60c   : > { %v9918_v60 = vpack.c.bf16 %v5200_v27, %v5199_v22  ;;  %v5461_v21 = vpop.f32.mrb[10].mxu0 }
 0x60d   : > { %v9920_v9 = vpack.c.bf16 %v5198_v45, %v5197_v53  ;;  %5958 = vst.msk [vmem:[%s9888_s25 + $0x20] sm:$0xff] %vm5953_vm2, %v5459_v49  ;;  %v5462_v4 = vadd.f32 %v9880_v42, %v5461_v21  ;;  %v7563_v29 = vpop.f32.mrb[248].mxu1  ;;  %v5463_v37 = vpop.f32.mrb[11].mxu0 }
 0x60e   : > { %v5059_v7 = vadd.f32 %v9864_v34, %v7563_v29  ;;  %v5050_v0 = vpop.f32.mrb[249].mxu1  ;;  %v10928_v37 = vld [vmem:[#allocation126_spill] sm:$0xff] }
 0x60f   : > { %5959 = vst.msk [vmem:[%s9888_s25 + $0x28] sm:$0xff] %vm5953_vm2, %v5462_v4  ;;  %v5051_v30 = vadd.f32 %v9864_v34, %v5050_v0  ;;  %v7564_v15 = vpop.f32.mrb[250].mxu1  ;;  %5673 = vmatmul.mubr.bf16.gmra.mrb[116].mxu0 %v9742_v50 }
 0x610   : > { %v5062_v39 = vadd.f32 %v9864_v34, %v7564_v15  ;;  %v5053_v18 = vpop.f32.mrb[251].mxu1  ;;  %5680 = vmatprep.mubr.bf16.mxu0 %v10927_v28  ;;  %v5203_v24 = vmax.f32 %v5059_v7, 0.0 }
 0x611   : > { %v5054_v20 = vadd.f32 %v9864_v34, %v5053_v18  ;;  %v5201_v58 = vmax.f32 %v5051_v30, 0.0 }
 0x612   : > { %v5204_v8 = vmax.f32 %v5062_v39, 0.0  ;;  %v5466_v55 = vpop.f32.mrb[12].mxu0 }
 0x613   : > { %v5202_v10 = vmax.f32 %v5054_v20, 0.0  ;;  %v5467_v38 = vadd.f32 %v9880_v42, %v5466_v55  ;;  %v5468_v51 = vpop.f32.mrb[13].mxu0 }
 0x614   : > { %v9934_v36 = vpack.c.bf16 %v5204_v8, %v5203_v24  ;;  %v5469_v22 = vpop.f32.mrb[14].mxu0 }
 0x615   : > { %v9936_v50 = vpack.c.bf16 %v5202_v10, %v5201_v58  ;;  %5960 = vst.msk [vmem:[%s9888_s25 + $0x30] sm:$0xff] %vm5953_vm2, %v5467_v38  ;;  %v5470_v27 = vadd.f32 %v9880_v42, %v5469_v22  ;;  %v7567_v59 = vpop.f32.mrb[252].mxu1  ;;  %v5471_v53 = vpop.f32.mrb[15].mxu0  ;;  %v10929_v58 = vld [vmem:[#allocation129_spill] sm:$0xff] }
 0x616   : > { %v5075_v45 = vadd.f32 %v9864_v34, %v7567_v59  ;;  %v5066_v49 = vpop.f32.mrb[253].mxu1  ;;  %v10930_v53 = vld [vmem:[#allocation128_spill] sm:$0xff] }
 0x617   : > { %5961 = vst.msk [vmem:[%s9888_s25 + $0x38] sm:$0xff] %vm5953_vm2, %v5470_v27  ;;  %v5067_v35 = vadd.f32 %v9864_v34, %v5066_v49  ;;  %v7568_v21 = vpop.f32.mrb[254].mxu1  ;;  %5681 = vmatmul.mubr.bf16.gmra.mrb[120].mxu0 %v9754_v57 }
 0x618   : > { %v5078_v4 = vadd.f32 %v9864_v34, %v7568_v21  ;;  %v5069_v29 = vpop.f32.mrb[255].mxu1  ;;  %5688 = vmatprep.mubr.bf16.mxu0 %v10928_v37  ;;  %v5207_v0 = vmax.f32 %v5075_v45, 0.0 }
 0x619   : > { %v5070_v7 = vadd.f32 %v9864_v34, %v5069_v29  ;;  %v5205_v39 = vmax.f32 %v5067_v35, 0.0  ;;  %v10931_v29 = vld [vmem:[#allocation131_spill] sm:$0xff] }
 0x61a   : > { %v5208_v30 = vmax.f32 %v5078_v4, 0.0  ;;  %v5474_v15 = vpop.f32.mrb[16].mxu0 }
 0x61b   : > { %v5206_v18 = vmax.f32 %v5070_v7, 0.0  ;;  %v5475_v28 = vadd.f32 %v9880_v42, %v5474_v15  ;;  %v5476_v20 = vpop.f32.mrb[17].mxu0 }
 0x61c   : > { %v9950_v24 = vpack.c.bf16 %v5208_v30, %v5207_v0  ;;  %v5477_v57 = vpop.f32.mrb[18].mxu0 }
 0x61d   : > { %v9952_v8 = vpack.c.bf16 %v5206_v18, %v5205_v39  ;;  %5962 = vst.msk [vmem:[%s9888_s25 + $0x40] sm:$0xff] %vm5953_vm2, %v5475_v28  ;;  %v5478_v55 = vadd.f32 %v9880_v42, %v5477_v57  ;;  %v5479_v34 = vpop.f32.mrb[19].mxu0  ;;  %v10932_v39 = vld [vmem:[#allocation130_spill] sm:$0xff] }
 0x61e   : > { %v10933_v34 = vld [vmem:[#allocation133_spill] sm:$0xff] }
 0x61f   : > { %5963 = vst.msk [vmem:[%s9888_s25 + $0x48] sm:$0xff] %vm5953_vm2, %v5478_v55  ;;  %5689 = vmatmul.mubr.bf16.gmra.mrb[124].mxu0 %v9752_v56 }
 0x620   : > { %5696 = vmatprep.mubr.bf16.mxu0 %v10929_v58 }
 0x622   : > { %v5482_v10 = vpop.f32.mrb[20].mxu0 }
 0x623   : > { %v5483_v38 = vadd.f32 %v9880_v42, %v5482_v10  ;;  %v5484_v51 = vpop.f32.mrb[21].mxu0 }
 0x624   : > { %v5485_v22 = vpop.f32.mrb[22].mxu0 }
 0x625   : > { %5964 = vst.msk [vmem:[%s9888_s25 + $0x50] sm:$0xff] %vm5953_vm2, %v5483_v38  ;;  %v5486_v27 = vadd.f32 %v9880_v42, %v5485_v22  ;;  %v5487_v59 = vpop.f32.mrb[23].mxu0 }
 0x627   : > { %5965 = vst.msk [vmem:[%s9888_s25 + $0x58] sm:$0xff] %vm5953_vm2, %v5486_v27  ;;  %5697 = vmatmul.mubr.bf16.gmra.mrb[128].mxu0 %v9764_v63  ;;  %v10934_v27 = vld [vmem:[#allocation132_spill] sm:$0xff] }
 0x628   : > { %5704 = vmatprep.mubr.bf16.mxu0 %v10930_v53 }
 0x62a   : > { %v5490_v56 = vpop.f32.mrb[24].mxu0 }
 0x62b   : > { %v5491_v45 = vadd.f32 %v9880_v42, %v5490_v56  ;;  %v5492_v49 = vpop.f32.mrb[25].mxu0 }
 0x62c   : > { %v5493_v35 = vpop.f32.mrb[26].mxu0 }
 0x62d   : > { %5966 = vst.msk [vmem:[%s9888_s25 + $0x60] sm:$0xff] %vm5953_vm2, %v5491_v45  ;;  %v5494_v21 = vadd.f32 %v9880_v42, %v5493_v35  ;;  %v5495_v4 = vpop.f32.mrb[27].mxu0  ;;  %v10935_v35 = vld [vmem:[#allocation135_spill] sm:$0xff] }
 0x62f   : > { %5967 = vst.msk [vmem:[%s9888_s25 + $0x68] sm:$0xff] %vm5953_vm2, %v5494_v21  ;;  %5705 = vmatmul.mubr.bf16.gmra.mrb[132].mxu0 %v9762_v11 }
 0x630   : > { %5712 = vmatprep.mubr.bf16.mxu0 %v10931_v29 }
 0x632   : > { %v5498_v63 = vpop.f32.mrb[28].mxu0 }
 0x633   : > { %v5499_v37 = vadd.f32 %v9880_v42, %v5498_v63  ;;  %v5500_v7 = vpop.f32.mrb[29].mxu0 }
 0x634   : > { %v5501_v0 = vpop.f32.mrb[30].mxu0  ;;  %v10936_v7 = vld [vmem:[#allocation134_spill] sm:$0xff] }
 0x635   : > { %5968 = vst.msk [vmem:[%s9888_s25 + $0x70] sm:$0xff] %vm5953_vm2, %v5499_v37  ;;  %v5502_v30 = vadd.f32 %v9880_v42, %v5501_v0  ;;  %v5503_v15 = vpop.f32.mrb[31].mxu0 }
 0x637   : > { %5969 = vst.msk [vmem:[%s9888_s25 + $0x78] sm:$0xff] %vm5953_vm2, %v5502_v30  ;;  %5713 = vmatmul.mubr.bf16.gmra.mrb[136].mxu0 %v9774_v41 }
 0x638   : > { %5720 = vmatprep.mubr.bf16.mxu0 %v10932_v39 }
 0x63a   : > { %v5506_v11 = vpop.f32.mrb[32].mxu0 }
 0x63b   : > { %v5507_v18 = vadd.f32 %v9880_v42, %v5506_v11  ;;  %v5508_v28 = vpop.f32.mrb[33].mxu0 }
 0x63c   : > { %v5509_v20 = vpop.f32.mrb[34].mxu0 }
 0x63d   : > { %5970 = vst.msk [vmem:[%s9888_s25 + $0x80] sm:$0xff] %vm5953_vm2, %v5507_v18  ;;  %v5510_v57 = vadd.f32 %v9880_v42, %v5509_v20  ;;  %v5511_v55 = vpop.f32.mrb[35].mxu0  ;;  %v10937_v18 = vld [vmem:[#allocation137_spill] sm:$0xff] }
 0x63f   : > { %5971 = vst.msk [vmem:[%s9888_s25 + $0x88] sm:$0xff] %vm5953_vm2, %v5510_v57  ;;  %5721 = vmatmul.mubr.bf16.gmra.mrb[140].mxu0 %v9772_v52 }
 0x640   : > { %5728 = vmatprep.mubr.bf16.mxu0 %v10933_v34 }
 0x642   : > { %v5514_v41 = vpop.f32.mrb[36].mxu0 }
 0x643   : > { %v5515_v58 = vadd.f32 %v9880_v42, %v5514_v41  ;;  %v5516_v10 = vpop.f32.mrb[37].mxu0  ;;  %v10938_v41 = vld [vmem:[#allocation136_spill] sm:$0xff] }
 0x644   : > { %v5517_v38 = vpop.f32.mrb[38].mxu0 }
 0x645   : > { %5972 = vst.msk [vmem:[%s9888_s25 + $0x90] sm:$0xff] %vm5953_vm2, %v5515_v58  ;;  %v5518_v51 = vadd.f32 %v9880_v42, %v5517_v38  ;;  %v5519_v22 = vpop.f32.mrb[39].mxu0 }
 0x647   : > { %5973 = vst.msk [vmem:[%s9888_s25 + $0x98] sm:$0xff] %vm5953_vm2, %v5518_v51  ;;  %5729 = vmatmul.mubr.bf16.gmra.mrb[144].mxu0 %v9784_v6 }
 0x648   : > { %5736 = vmatprep.mubr.bf16.mxu0 %v10934_v27  ;;  %v10939_v27 = vld [vmem:[#allocation139_spill] sm:$0xff] }
 0x64a   : > { %v5522_v52 = vpop.f32.mrb[40].mxu0 }
 0x64b   : > { %v5523_v59 = vadd.f32 %v9880_v42, %v5522_v52  ;;  %v5524_v53 = vpop.f32.mrb[41].mxu0 }
 0x64c   : > { %v5525_v56 = vpop.f32.mrb[42].mxu0 }
 0x64d   : > { %5974 = vst.msk [vmem:[%s9888_s25 + $0xa0] sm:$0xff] %vm5953_vm2, %v5523_v59  ;;  %v5526_v45 = vadd.f32 %v9880_v42, %v5525_v56  ;;  %v5527_v49 = vpop.f32.mrb[43].mxu0 }
 0x64e   : > { %v10940_v49 = vld [vmem:[#allocation138_spill] sm:$0xff] }
 0x64f   : > { %5975 = vst.msk [vmem:[%s9888_s25 + $0xa8] sm:$0xff] %vm5953_vm2, %v5526_v45  ;;  %5737 = vmatmul.mubr.bf16.gmra.mrb[148].mxu0 %v9782_v47 }
 0x650   : > { %5744 = vmatprep.mubr.bf16.mxu0 %v10935_v35 }
 0x652   : > { %v5530_v6 = vpop.f32.mrb[44].mxu0 }
 0x653   : > { %v5531_v21 = vadd.f32 %v9880_v42, %v5530_v6  ;;  %v5532_v4 = vpop.f32.mrb[45].mxu0 }
 0x654   : > { %v5533_v29 = vpop.f32.mrb[46].mxu0 }
 0x655   : > { %5976 = vst.msk [vmem:[%s9888_s25 + $0xb0] sm:$0xff] %vm5953_vm2, %v5531_v21  ;;  %v5534_v63 = vadd.f32 %v9880_v42, %v5533_v29  ;;  %v5535_v37 = vpop.f32.mrb[47].mxu0 }
 0x657   : > { %5977 = vst.msk [vmem:[%s9888_s25 + $0xb8] sm:$0xff] %vm5953_vm2, %v5534_v63  ;;  %5745 = vmatmul.mubr.bf16.gmra.mrb[152].mxu0 %v9794_v2  ;;  %v10941_v63 = vld [vmem:[#allocation141_spill] sm:$0xff] }
 0x658   : > { %5752 = vmatprep.mubr.bf16.mxu0 %v10936_v7 }
 0x65a   : > { %v5538_v47 = vpop.f32.mrb[48].mxu0 }
 0x65b   : > { %v5539_v0 = vadd.f32 %v9880_v42, %v5538_v47  ;;  %v5540_v30 = vpop.f32.mrb[49].mxu0 }
 0x65c   : > { %v5541_v15 = vpop.f32.mrb[50].mxu0 }
 0x65d   : > { %5978 = vst.msk [vmem:[%s9888_s25 + $0xc0] sm:$0xff] %vm5953_vm2, %v5539_v0  ;;  %v5542_v39 = vadd.f32 %v9880_v42, %v5541_v15  ;;  %v5543_v11 = vpop.f32.mrb[51].mxu0  ;;  %v10942_v15 = vld [vmem:[#allocation140_spill] sm:$0xff] }
 0x65f   : > { %5979 = vst.msk [vmem:[%s9888_s25 + $0xc8] sm:$0xff] %vm5953_vm2, %v5542_v39  ;;  %5753 = vmatmul.mubr.bf16.gmra.mrb[156].mxu0 %v9792_v31 }
 0x660   : > { %5760 = vmatprep.mubr.bf16.mxu0 %v10937_v18 }
 0x662   : > { %v5546_v2 = vpop.f32.mrb[52].mxu0 }
 0x663   : > { %v5547_v28 = vadd.f32 %v9880_v42, %v5546_v2  ;;  %v5548_v20 = vpop.f32.mrb[53].mxu0 }
 0x664   : > { %v5549_v57 = vpop.f32.mrb[54].mxu0  ;;  %v10943_v20 = vld [vmem:[#allocation143_spill] sm:$0xff] }
 0x665   : > { %5980 = vst.msk [vmem:[%s9888_s25 + $0xd0] sm:$0xff] %vm5953_vm2, %v5547_v28  ;;  %v5550_v55 = vadd.f32 %v9880_v42, %v5549_v57  ;;  %v5551_v34 = vpop.f32.mrb[55].mxu0 }
 0x667   : > { %5981 = vst.msk [vmem:[%s9888_s25 + $0xd8] sm:$0xff] %vm5953_vm2, %v5550_v55  ;;  %5761 = vmatmul.mubr.bf16.gmra.mrb[160].mxu0 %v9804_v5 }
 0x668   : > { %5768 = vmatprep.mubr.bf16.mxu0 %v10938_v41 }
 0x66a   : > { %v5554_v31 = vpop.f32.mrb[56].mxu0 }
 0x66b   : > { %v5555_v58 = vadd.f32 %v9880_v42, %v5554_v31  ;;  %v5556_v10 = vpop.f32.mrb[57].mxu0 }
 0x66c   : > { %v5557_v38 = vpop.f32.mrb[58].mxu0 }
 0x66d   : > { %5982 = vst.msk [vmem:[%s9888_s25 + $0xe0] sm:$0xff] %vm5953_vm2, %v5555_v58  ;;  %v5558_v51 = vadd.f32 %v9880_v42, %v5557_v38  ;;  %v5559_v22 = vpop.f32.mrb[59].mxu0  ;;  %v10944_v58 = vld [vmem:[#allocation142_spill] sm:$0xff] }
 0x66f   : > { %5983 = vst.msk [vmem:[%s9888_s25 + $0xe8] sm:$0xff] %vm5953_vm2, %v5558_v51  ;;  %5769 = vmatmul.mubr.bf16.gmra.mrb[164].mxu0 %v9802_v40 }
 0x670   : > { %5776 = vmatprep.mubr.bf16.mxu0 %v10939_v27 }
 0x672   : > { %v5562_v5 = vpop.f32.mrb[60].mxu0 }
 0x673   : > { %v5563_v52 = vadd.f32 %v9880_v42, %v5562_v5  ;;  %v5564_v59 = vpop.f32.mrb[61].mxu0  ;;  %v10945_v5 = vld [vmem:[#allocation145_spill] sm:$0xff] }
 0x674   : > { %v5565_v53 = vpop.f32.mrb[62].mxu0 }
 0x675   : > { %5984 = vst.msk [vmem:[%s9888_s25 + $0xf0] sm:$0xff] %vm5953_vm2, %v5563_v52  ;;  %v5566_v56 = vadd.f32 %v9880_v42, %v5565_v53  ;;  %v5567_v45 = vpop.f32.mrb[63].mxu0 }
 0x677   : > { %5985 = vst.msk [vmem:[%s9888_s25 + $0xf8] sm:$0xff] %vm5953_vm2, %v5566_v56  ;;  %5777 = vmatmul.mubr.bf16.gmra.mrb[168].mxu0 %v9814_v3 }
 0x678   : > { %5784 = vmatprep.mubr.bf16.mxu0 %v10940_v49  ;;  %v10946_v49 = vld [vmem:[#allocation144_spill] sm:$0xff] }
 0x67a   : > { %v5570_v40 = vpop.f32.mrb[64].mxu0 }
 0x67b   : > { %v5571_v35 = vadd.f32 %v9880_v42, %v5570_v40  ;;  %v5572_v6 = vpop.f32.mrb[65].mxu0 }
 0x67c   : > { %v5573_v21 = vpop.f32.mrb[66].mxu0 }
 0x67d   : > { %5986 = vst.msk [vmem:[%s9888_s25 + $0x100] sm:$0xff] %vm5953_vm2, %v5571_v35  ;;  %v5574_v4 = vadd.f32 %v9880_v42, %v5573_v21  ;;  %v5575_v29 = vpop.f32.mrb[67].mxu0 }
 0x67e   : > { %v10947_v29 = vld [vmem:[#allocation146_spill] sm:$0xff] }
 0x67f   : > { %5987 = vst.msk [vmem:[%s9888_s25 + $0x108] sm:$0xff] %vm5953_vm2, %v5574_v4  ;;  %5785 = vmatmul.mubr.bf16.gmra.mrb[172].mxu0 %v9812_v54 }
 0x680   : > { %5792 = vmatprep.mubr.bf16.mxu0 %v10941_v63 }
 0x682   : > { %v5578_v3 = vpop.f32.mrb[68].mxu0 }
 0x683   : > { %v5579_v37 = vadd.f32 %v9880_v42, %v5578_v3  ;;  %v5580_v7 = vpop.f32.mrb[69].mxu0 }
 0x684   : > { %v5581_v47 = vpop.f32.mrb[70].mxu0 }
 0x685   : > { %5988 = vst.msk [vmem:[%s9888_s25 + $0x110] sm:$0xff] %vm5953_vm2, %v5579_v37  ;;  %v5582_v0 = vadd.f32 %v9880_v42, %v5581_v47  ;;  %v5583_v30 = vpop.f32.mrb[71].mxu0 }
 0x687   : > { %5989 = vst.msk [vmem:[%s9888_s25 + $0x118] sm:$0xff] %vm5953_vm2, %v5582_v0  ;;  %5793 = vmatmul.mubr.bf16.gmra.mrb[176].mxu0 %v9824_v33 }
 0x688   : > { %5800 = vmatprep.mubr.bf16.mxu0 %v10942_v15 }
 0x68a   : > { %v5586_v54 = vpop.f32.mrb[72].mxu0 }
 0x68b   : > { %v5587_v39 = vadd.f32 %v9880_v42, %v5586_v54  ;;  %v5588_v11 = vpop.f32.mrb[73].mxu0 }
 0x68c   : > { %v5589_v18 = vpop.f32.mrb[74].mxu0 }
 0x68d   : > { %5990 = vst.msk [vmem:[%s9888_s25 + $0x120] sm:$0xff] %vm5953_vm2, %v5587_v39  ;;  %v5590_v2 = vadd.f32 %v9880_v42, %v5589_v18  ;;  %v5591_v28 = vpop.f32.mrb[75].mxu0 }
 0x68f   : > { %5991 = vst.msk [vmem:[%s9888_s25 + $0x128] sm:$0xff] %vm5953_vm2, %v5590_v2  ;;  %5801 = vmatmul.mubr.bf16.gmra.mrb[180].mxu0 %v9822_v17 }
 0x690   : > { %5808 = vmatprep.mubr.bf16.mxu0 %v10943_v20  ;;  %v10948_v20 = vld [vmem:[#allocation147_spill] sm:$0xff] }
 0x692   : > { %v5594_v33 = vpop.f32.mrb[76].mxu0 }
 0x693   : > { %v5595_v57 = vadd.f32 %v9880_v42, %v5594_v33  ;;  %v5596_v55 = vpop.f32.mrb[77].mxu0 }
 0x694   : > { %v5597_v34 = vpop.f32.mrb[78].mxu0 }
 0x695   : > { %5992 = vst.msk [vmem:[%s9888_s25 + $0x130] sm:$0xff] %vm5953_vm2, %v5595_v57  ;;  %v5598_v41 = vadd.f32 %v9880_v42, %v5597_v34  ;;  %v5599_v31 = vpop.f32.mrb[79].mxu0 }
 0x697   : > { %5993 = vst.msk [vmem:[%s9888_s25 + $0x138] sm:$0xff] %vm5953_vm2, %v5598_v41  ;;  %5809 = vmatmul.mubr.bf16.gmra.mrb[184].mxu0 %v9834_v62  ;;  %v10949_v41 = vld [vmem:[#allocation148_spill] sm:$0xff] }
 0x698   : > { %5816 = vmatprep.mubr.bf16.mxu0 %v10944_v58 }
 0x69a   : > { %v5602_v17 = vpop.f32.mrb[80].mxu0 }
 0x69b   : > { %v5603_v10 = vadd.f32 %v9880_v42, %v5602_v17  ;;  %v5604_v38 = vpop.f32.mrb[81].mxu0 }
 0x69c   : > { %v5605_v51 = vpop.f32.mrb[82].mxu0 }
 0x69d   : > { %5994 = vst.msk [vmem:[%s9888_s25 + $0x140] sm:$0xff] %vm5953_vm2, %v5603_v10  ;;  %v5606_v22 = vadd.f32 %v9880_v42, %v5605_v51  ;;  %v5607_v27 = vpop.f32.mrb[83].mxu0 }
 0x69f   : > { %5995 = vst.msk [vmem:[%s9888_s25 + $0x148] sm:$0xff] %vm5953_vm2, %v5606_v22  ;;  %5817 = vmatmul.mubr.bf16.gmra.mrb[188].mxu0 %v9832_v19 }
 0x6a0   : > { %5824 = vmatprep.mubr.bf16.mxu0 %v10945_v5 }
 0x6a2   : > { %v5610_v62 = vpop.f32.mrb[84].mxu0 }
 0x6a3   : > { %v5611_v52 = vadd.f32 %v9880_v42, %v5610_v62  ;;  %v5612_v59 = vpop.f32.mrb[85].mxu0 }
 0x6a4   : > { %v5613_v53 = vpop.f32.mrb[86].mxu0 }
 0x6a5   : > { %5996 = vst.msk [vmem:[%s9888_s25 + $0x150] sm:$0xff] %vm5953_vm2, %v5611_v52  ;;  %v5614_v56 = vadd.f32 %v9880_v42, %v5613_v53  ;;  %v5615_v45 = vpop.f32.mrb[87].mxu0 }
 0x6a6   : > { %v10950_v45 = vld [vmem:[#allocation149_spill] sm:$0xff] }
 0x6a7   : > { %5997 = vst.msk [vmem:[%s9888_s25 + $0x158] sm:$0xff] %vm5953_vm2, %v5614_v56  ;;  %5825 = vmatmul.mubr.bf16.gmra.mrb[192].mxu0 %v9844_v26 }
 0x6a8   : > { %5832 = vmatprep.mubr.bf16.mxu0 %v10946_v49 }
 0x6aa   : > { %v5618_v19 = vpop.f32.mrb[88].mxu0 }
 0x6ab   : > { %v5619_v40 = vadd.f32 %v9880_v42, %v5618_v19  ;;  %v5620_v35 = vpop.f32.mrb[89].mxu0 }
 0x6ac   : > { %v5621_v6 = vpop.f32.mrb[90].mxu0 }
 0x6ad   : > { %5998 = vst.msk [vmem:[%s9888_s25 + $0x160] sm:$0xff] %vm5953_vm2, %v5619_v40  ;;  %v5622_v21 = vadd.f32 %v9880_v42, %v5621_v6  ;;  %v5623_v4 = vpop.f32.mrb[91].mxu0  ;;  %v10951_v6 = vld [vmem:[#allocation151_spill] sm:$0xff] }
 0x6af   : > { %5999 = vst.msk [vmem:[%s9888_s25 + $0x168] sm:$0xff] %vm5953_vm2, %v5622_v21  ;;  %5833 = vmatmul.mubr.bf16.gmra.mrb[196].mxu0 %v9842_v1 }
 0x6b0   : > { %5840 = vmatprep.mubr.bf16.mxu0 %v10947_v29 }
 0x6b2   : > { %v5626_v26 = vpop.f32.mrb[92].mxu0 }
 0x6b3   : > { %v5627_v63 = vadd.f32 %v9880_v42, %v5626_v26  ;;  %v5628_v3 = vpop.f32.mrb[93].mxu0 }
 0x6b4   : > { %v5629_v37 = vpop.f32.mrb[94].mxu0  ;;  %v10952_v3 = vld [vmem:[#allocation150_spill] sm:$0xff] }
 0x6b5   : > { %6000 = vst.msk [vmem:[%s9888_s25 + $0x170] sm:$0xff] %vm5953_vm2, %v5627_v63  ;;  %v5630_v7 = vadd.f32 %v9880_v42, %v5629_v37  ;;  %v5631_v47 = vpop.f32.mrb[95].mxu0 }
 0x6b7   : > { %6001 = vst.msk [vmem:[%s9888_s25 + $0x178] sm:$0xff] %vm5953_vm2, %v5630_v7  ;;  %5841 = vmatmul.mubr.bf16.gmra.mrb[200].mxu0 %v9854_v13 }
 0x6b8   : > { %5848 = vmatprep.mubr.bf16.mxu0 %v9061_v12 }
 0x6ba   : > { %v5634_v1 = vpop.f32.mrb[96].mxu0 }
 0x6bb   : > { %v5635_v0 = vadd.f32 %v9880_v42, %v5634_v1  ;;  %v5636_v30 = vpop.f32.mrb[97].mxu0 }
 0x6bc   : > { %v5637_v15 = vpop.f32.mrb[98].mxu0  ;;  %v10953_v30 = vld [vmem:[#allocation153_spill] sm:$0xff] }
 0x6bd   : > { %6002 = vst.msk [vmem:[%s9888_s25 + $0x180] sm:$0xff] %vm5953_vm2, %v5635_v0  ;;  %v5638_v54 = vadd.f32 %v9880_v42, %v5637_v15  ;;  %v5639_v39 = vpop.f32.mrb[99].mxu0 }
 0x6bf   : > { %6003 = vst.msk [vmem:[%s9888_s25 + $0x188] sm:$0xff] %vm5953_vm2, %v5638_v54  ;;  %5849 = vmatmul.mubr.bf16.gmra.mrb[204].mxu0 %v9852_v46 }
 0x6c0   : > { %5856 = vmatprep.mubr.bf16.mxu0 %v9076_v32 }
 0x6c2   : > { %v5642_v13 = vpop.f32.mrb[100].mxu0 }
 0x6c3   : > { %v5643_v12 = vadd.f32 %v9880_v42, %v5642_v13  ;;  %v5644_v11 = vpop.f32.mrb[101].mxu0 }
 0x6c4   : > { %v5645_v18 = vpop.f32.mrb[102].mxu0  ;;  %v10954_v11 = vld [vmem:[#allocation152_spill] sm:$0xff] }
 0x6c5   : > { %6004 = vst.msk [vmem:[%s9888_s25 + $0x190] sm:$0xff] %vm5953_vm2, %v5643_v12  ;;  %v5646_v2 = vadd.f32 %v9880_v42, %v5645_v18  ;;  %v5647_v28 = vpop.f32.mrb[103].mxu0 }
 0x6c7   : > { %6005 = vst.msk [vmem:[%s9888_s25 + $0x198] sm:$0xff] %vm5953_vm2, %v5646_v2  ;;  %5857 = vmatmul.mubr.bf16.gmra.mrb[208].mxu0 %v9870_v61 }
 0x6c8   : > { %5864 = vmatprep.mubr.bf16.mxu0 %v10948_v20 }
 0x6ca   : > { %v5650_v46 = vpop.f32.mrb[104].mxu0 }
 0x6cb   : > { %v5651_v32 = vadd.f32 %v9880_v42, %v5650_v46  ;;  %v5652_v33 = vpop.f32.mrb[105].mxu0 }
 0x6cc   : > { %v5653_v57 = vpop.f32.mrb[106].mxu0 }
 0x6cd   : > { %6006 = vst.msk [vmem:[%s9888_s25 + $0x1a0] sm:$0xff] %vm5953_vm2, %v5651_v32  ;;  %v5654_v55 = vadd.f32 %v9880_v42, %v5653_v57  ;;  %v5655_v34 = vpop.f32.mrb[107].mxu0  ;;  %v10955_v32 = vld [vmem:[#allocation155_spill] sm:$0xff] }
 0x6cf   : > { %6007 = vst.msk [vmem:[%s9888_s25 + $0x1a8] sm:$0xff] %vm5953_vm2, %v5654_v55  ;;  %5865 = vmatmul.mubr.bf16.gmra.mrb[212].mxu0 %v9867_v23 }
 0x6d0   : > { %5872 = vmatprep.mubr.bf16.mxu0 %v10949_v41 }
 0x6d2   : > { %v5658_v61 = vpop.f32.mrb[108].mxu0 }
 0x6d3   : > { %v5659_v31 = vadd.f32 %v9880_v42, %v5658_v61  ;;  %v5660_v58 = vpop.f32.mrb[109].mxu0 }
 0x6d4   : > { %v5661_v17 = vpop.f32.mrb[110].mxu0 }
 0x6d5   : > { %6008 = vst.msk [vmem:[%s9888_s25 + $0x1b0] sm:$0xff] %vm5953_vm2, %v5659_v31  ;;  %v5662_v10 = vadd.f32 %v9880_v42, %v5661_v17  ;;  %v5663_v38 = vpop.f32.mrb[111].mxu0 }
 0x6d7   : > { %6009 = vst.msk [vmem:[%s9888_s25 + $0x1b8] sm:$0xff] %vm5953_vm2, %v5662_v10  ;;  %5873 = vmatmul.mubr.bf16.gmra.mrb[216].mxu0 %v9886_v16 }
 0x6d8   : > { %5880 = vmatprep.mubr.bf16.mxu0 %v9084_v14 }
 0x6da   : > { %v5666_v23 = vpop.f32.mrb[112].mxu0 }
 0x6db   : > { %v5667_v51 = vadd.f32 %v9880_v42, %v5666_v23  ;;  %v5668_v22 = vpop.f32.mrb[113].mxu0 }
 0x6dc   : > { %v5669_v27 = vpop.f32.mrb[114].mxu0 }
 0x6dd   : > { %6010 = vst.msk [vmem:[%s9888_s25 + $0x1c0] sm:$0xff] %vm5953_vm2, %v5667_v51  ;;  %v5670_v5 = vadd.f32 %v9880_v42, %v5669_v27  ;;  %v5671_v62 = vpop.f32.mrb[115].mxu0 }
 0x6df   : > { %6011 = vst.msk [vmem:[%s9888_s25 + $0x1c8] sm:$0xff] %vm5953_vm2, %v5670_v5  ;;  %5881 = vmatmul.mubr.bf16.gmra.mrb[220].mxu0 %v9884_v25 }
 0x6e0   : > { %5888 = vmatprep.mubr.bf16.mxu0 %v9096_v48 }
 0x6e2   : > { %v5674_v16 = vpop.f32.mrb[116].mxu0 }
 0x6e3   : > { %v5675_v14 = vadd.f32 %v9880_v42, %v5674_v16  ;;  %v5676_v52 = vpop.f32.mrb[117].mxu0 }
 0x6e4   : > { %v5677_v59 = vpop.f32.mrb[118].mxu0 }
 0x6e5   : > { %6012 = vst.msk [vmem:[%s9888_s25 + $0x1d0] sm:$0xff] %vm5953_vm2, %v5675_v14  ;;  %v5678_v53 = vadd.f32 %v9880_v42, %v5677_v59  ;;  %v5679_v56 = vpop.f32.mrb[119].mxu0 }
 0x6e7   : > { %6013 = vst.msk [vmem:[%s9888_s25 + $0x1d8] sm:$0xff] %vm5953_vm2, %v5678_v53  ;;  %5889 = vmatmul.mubr.bf16.gmra.mrb[224].mxu0 %v9904_v44 }
 0x6e8   : > { %5896 = vmatprep.mubr.bf16.mxu0 %v10950_v45 }
 0x6ea   : > { %v5682_v25 = vpop.f32.mrb[120].mxu0 }
 0x6eb   : > { %v5683_v48 = vadd.f32 %v9880_v42, %v5682_v25  ;;  %v5684_v49 = vpop.f32.mrb[121].mxu0 }
 0x6ec   : > { %v5685_v19 = vpop.f32.mrb[122].mxu0 }
 0x6ed   : > { %6014 = vst.msk [vmem:[%s9888_s25 + $0x1e0] sm:$0xff] %vm5953_vm2, %v5683_v48  ;;  %v5686_v40 = vadd.f32 %v9880_v42, %v5685_v19  ;;  %v5687_v35 = vpop.f32.mrb[123].mxu0 }
 0x6ef   : > { %6015 = vst.msk [vmem:[%s9888_s25 + $0x1e8] sm:$0xff] %vm5953_vm2, %v5686_v40  ;;  %5897 = vmatmul.mubr.bf16.gmra.mrb[228].mxu0 %v9902_v43 }
 0x6f0   : > { %5904 = vmatprep.mubr.bf16.mxu0 %v10951_v6 }
 0x6f2   : > { %v5690_v44 = vpop.f32.mrb[124].mxu0 }
 0x6f3   : > { %v5691_v21 = vadd.f32 %v9880_v42, %v5690_v44  ;;  %v5692_v4 = vpop.f32.mrb[125].mxu0 }
 0x6f4   : > { %v5693_v29 = vpop.f32.mrb[126].mxu0 }
 0x6f5   : > { %6016 = vst.msk [vmem:[%s9888_s25 + $0x1f0] sm:$0xff] %vm5953_vm2, %v5691_v21  ;;  %v5694_v26 = vadd.f32 %v9880_v42, %v5693_v29  ;;  %v5695_v63 = vpop.f32.mrb[127].mxu0 }
 0x6f7   : > { %6017 = vst.msk [vmem:[%s9888_s25 + $0x1f8] sm:$0xff] %vm5953_vm2, %v5694_v26  ;;  %5905 = vmatmul.mubr.bf16.gmra.mrb[232].mxu0 %v9920_v9 }
 0x6f8   : > { %5912 = vmatprep.mubr.bf16.mxu0 %v10952_v3 }
 0x6fa   : > { %v5698_v43 = vpop.f32.mrb[128].mxu0 }
 0x6fb   : > { %v5699_v37 = vadd.f32 %v9880_v42, %v5698_v43  ;;  %v5700_v7 = vpop.f32.mrb[129].mxu0 }
 0x6fc   : > { %v5701_v47 = vpop.f32.mrb[130].mxu0 }
 0x6fd   : > { %6018 = vst.msk [vmem:[%s9888_s25 + $0x200] sm:$0xff] %vm5953_vm2, %v5699_v37  ;;  %v5702_v1 = vadd.f32 %v9880_v42, %v5701_v47  ;;  %v5703_v0 = vpop.f32.mrb[131].mxu0 }
 0x6ff   : > { %6019 = vst.msk [vmem:[%s9888_s25 + $0x208] sm:$0xff] %vm5953_vm2, %v5702_v1  ;;  %5913 = vmatmul.mubr.bf16.gmra.mrb[236].mxu0 %v9918_v60 }
 0x700   : > { %5920 = vmatprep.mubr.bf16.mxu0 %v10953_v30 }
 0x702   : > { %v5706_v9 = vpop.f32.mrb[132].mxu0 }
 0x703   : > { %v5707_v15 = vadd.f32 %v9880_v42, %v5706_v9  ;;  %v5708_v54 = vpop.f32.mrb[133].mxu0 }
 0x704   : > { %v5709_v39 = vpop.f32.mrb[134].mxu0 }
 0x705   : > { %6020 = vst.msk [vmem:[%s9888_s25 + $0x210] sm:$0xff] %vm5953_vm2, %v5707_v15  ;;  %v5710_v13 = vadd.f32 %v9880_v42, %v5709_v39  ;;  %v5711_v12 = vpop.f32.mrb[135].mxu0 }
 0x707   : > { %6021 = vst.msk [vmem:[%s9888_s25 + $0x218] sm:$0xff] %vm5953_vm2, %v5710_v13  ;;  %5921 = vmatmul.mubr.bf16.gmra.mrb[240].mxu0 %v9936_v50 }
 0x708   : > { %5928 = vmatprep.mubr.bf16.mxu0 %v10954_v11 }
 0x70a   : > { %v5714_v60 = vpop.f32.mrb[136].mxu0 }
 0x70b   : > { %v5715_v18 = vadd.f32 %v9880_v42, %v5714_v60  ;;  %v5716_v2 = vpop.f32.mrb[137].mxu0 }
 0x70c   : > { %v5717_v28 = vpop.f32.mrb[138].mxu0 }
 0x70d   : > { %6022 = vst.msk [vmem:[%s9888_s25 + $0x220] sm:$0xff] %vm5953_vm2, %v5715_v18  ;;  %v5718_v20 = vadd.f32 %v9880_v42, %v5717_v28  ;;  %v5719_v46 = vpop.f32.mrb[139].mxu0 }
 0x70f   : > { %6023 = vst.msk [vmem:[%s9888_s25 + $0x228] sm:$0xff] %vm5953_vm2, %v5718_v20  ;;  %5929 = vmatmul.mubr.bf16.gmra.mrb[244].mxu0 %v9934_v36  ;;  %v10956_v36 = vld [vmem:[#allocation154_spill] sm:$0xff] }
 0x710   : > { %5936 = vmatprep.mubr.bf16.mxu0 %v10955_v32 }
 0x712   : > { %v5722_v50 = vpop.f32.mrb[140].mxu0 }
 0x713   : > { %v5723_v33 = vadd.f32 %v9880_v42, %v5722_v50  ;;  %v5724_v57 = vpop.f32.mrb[141].mxu0 }
 0x714   : > { %v5725_v55 = vpop.f32.mrb[142].mxu0 }
 0x715   : > { %6024 = vst.msk [vmem:[%s9888_s25 + $0x230] sm:$0xff] %vm5953_vm2, %v5723_v33  ;;  %v5726_v34 = vadd.f32 %v9880_v42, %v5725_v55  ;;  %v5727_v41 = vpop.f32.mrb[143].mxu0 }
 0x717   : > { %6025 = vst.msk [vmem:[%s9888_s25 + $0x238] sm:$0xff] %vm5953_vm2, %v5726_v34  ;;  %5937 = vmatmul.mubr.bf16.gmra.mrb[248].mxu0 %v9952_v8 }
 0x718   : > { %5944 = vmatprep.mubr.bf16.mxu0 %v10956_v36 }
 0x71a   : > { %v5730_v61 = vpop.f32.mrb[144].mxu0 }
 0x71b   : > { %v5731_v31 = vadd.f32 %v9880_v42, %v5730_v61  ;;  %v5732_v58 = vpop.f32.mrb[145].mxu0 }
 0x71c   : > { %v5733_v17 = vpop.f32.mrb[146].mxu0 }
 0x71d   : > { %6026 = vst.msk [vmem:[%s9888_s25 + $0x240] sm:$0xff] %vm5953_vm2, %v5731_v31  ;;  %v5734_v10 = vadd.f32 %v9880_v42, %v5733_v17  ;;  %v5735_v38 = vpop.f32.mrb[147].mxu0  ;;  %v10276_v31 = vld [vmem:[%s10601_s12] ss:$0 sm:$0xff] }
 0x71f   : > { %6027 = vst.msk [vmem:[%s9888_s25 + $0x248] sm:$0xff] %vm5953_vm2, %v5734_v10  ;;  %5945 = vmatmul.mubr.bf16.gmra.mrb[252].mxu0 %v9950_v24 }
 0x722   : > { %v5738_v8 = vpop.f32.mrb[148].mxu0 }
 0x723   : > { %v5739_v23 = vadd.f32 %v9880_v42, %v5738_v8  ;;  %v5740_v51 = vpop.f32.mrb[149].mxu0 }
 0x724   : > { %v5741_v22 = vpop.f32.mrb[150].mxu0 }
 0x725   : > { %6028 = vst.msk [vmem:[%s9888_s25 + $0x250] sm:$0xff] %vm5953_vm2, %v5739_v23  ;;  %v5742_v27 = vadd.f32 %v9880_v42, %v5741_v22  ;;  %v5743_v5 = vpop.f32.mrb[151].mxu0 }
 0x727   : > { %6029 = vst.msk [vmem:[%s9888_s25 + $0x258] sm:$0xff] %vm5953_vm2, %v5742_v27 }
 0x72a   : > { %v5746_v62 = vpop.f32.mrb[152].mxu0 }
 0x72b   : > { %v5747_v16 = vadd.f32 %v9880_v42, %v5746_v62  ;;  %v5748_v14 = vpop.f32.mrb[153].mxu0 }
 0x72c   : > { %v5749_v24 = vpop.f32.mrb[154].mxu0 }
 0x72d   : > { %6030 = vst.msk [vmem:[%s9888_s25 + $0x260] sm:$0xff] %vm5953_vm2, %v5747_v16  ;;  %v5750_v52 = vadd.f32 %v9880_v42, %v5749_v24  ;;  %v5751_v59 = vpop.f32.mrb[155].mxu0 }
 0x72f   : > { %6031 = vst.msk [vmem:[%s9888_s25 + $0x268] sm:$0xff] %vm5953_vm2, %v5750_v52 }
 0x732   : > { %v5754_v53 = vpop.f32.mrb[156].mxu0 }
 0x733   : > { %v5755_v56 = vadd.f32 %v9880_v42, %v5754_v53  ;;  %v5756_v45 = vpop.f32.mrb[157].mxu0 }
 0x734   : > { %v5757_v25 = vpop.f32.mrb[158].mxu0 }
 0x735   : > { %6032 = vst.msk [vmem:[%s9888_s25 + $0x270] sm:$0xff] %vm5953_vm2, %v5755_v56  ;;  %v5758_v48 = vadd.f32 %v9880_v42, %v5757_v25  ;;  %v5759_v49 = vpop.f32.mrb[159].mxu0 }
 0x737   : > { %6033 = vst.msk [vmem:[%s9888_s25 + $0x278] sm:$0xff] %vm5953_vm2, %v5758_v48 }
 0x73a   : > { %v5762_v19 = vpop.f32.mrb[160].mxu0 }
 0x73b   : > { %v5763_v40 = vadd.f32 %v9880_v42, %v5762_v19  ;;  %v5764_v35 = vpop.f32.mrb[161].mxu0 }
 0x73c   : > { %v5765_v6 = vpop.f32.mrb[162].mxu0 }
 0x73d   : > { %6034 = vst.msk [vmem:[%s9888_s25 + $0x280] sm:$0xff] %vm5953_vm2, %v5763_v40  ;;  %v5766_v44 = vadd.f32 %v9880_v42, %v5765_v6  ;;  %v5767_v21 = vpop.f32.mrb[163].mxu0 }
 0x73f   : > { %6035 = vst.msk [vmem:[%s9888_s25 + $0x288] sm:$0xff] %vm5953_vm2, %v5766_v44 }
 0x742   : > { %v5770_v4 = vpop.f32.mrb[164].mxu0 }
 0x743   : > { %v5771_v29 = vadd.f32 %v9880_v42, %v5770_v4  ;;  %v5772_v26 = vpop.f32.mrb[165].mxu0 }
 0x744   : > { %v5773_v63 = vpop.f32.mrb[166].mxu0 }
 0x745   : > { %6036 = vst.msk [vmem:[%s9888_s25 + $0x290] sm:$0xff] %vm5953_vm2, %v5771_v29  ;;  %v5774_v3 = vadd.f32 %v9880_v42, %v5773_v63  ;;  %v5775_v43 = vpop.f32.mrb[167].mxu0 }
 0x747   : > { %6037 = vst.msk [vmem:[%s9888_s25 + $0x298] sm:$0xff] %vm5953_vm2, %v5774_v3 }
 0x74a   : > { %v5778_v37 = vpop.f32.mrb[168].mxu0 }
 0x74b   : > { %v5779_v7 = vadd.f32 %v9880_v42, %v5778_v37  ;;  %v5780_v47 = vpop.f32.mrb[169].mxu0 }
 0x74c   : > { %v5781_v1 = vpop.f32.mrb[170].mxu0 }
 0x74d   : > { %6038 = vst.msk [vmem:[%s9888_s25 + $0x2a0] sm:$0xff] %vm5953_vm2, %v5779_v7  ;;  %v5782_v0 = vadd.f32 %v9880_v42, %v5781_v1  ;;  %v5783_v30 = vpop.f32.mrb[171].mxu0 }
 0x74f   : > { %6039 = vst.msk [vmem:[%s9888_s25 + $0x2a8] sm:$0xff] %vm5953_vm2, %v5782_v0 }
 0x752   : > { %v5786_v9 = vpop.f32.mrb[172].mxu0 }
 0x753   : > { %v5787_v15 = vadd.f32 %v9880_v42, %v5786_v9  ;;  %v5788_v54 = vpop.f32.mrb[173].mxu0 }
 0x754   : > { %v5789_v39 = vpop.f32.mrb[174].mxu0 }
 0x755   : > { %6040 = vst.msk [vmem:[%s9888_s25 + $0x2b0] sm:$0xff] %vm5953_vm2, %v5787_v15  ;;  %v5790_v13 = vadd.f32 %v9880_v42, %v5789_v39  ;;  %v5791_v12 = vpop.f32.mrb[175].mxu0 }
 0x757   : > { %6041 = vst.msk [vmem:[%s9888_s25 + $0x2b8] sm:$0xff] %vm5953_vm2, %v5790_v13 }
 0x75a   : > { %v5794_v11 = vpop.f32.mrb[176].mxu0 }
 0x75b   : > { %v5795_v60 = vadd.f32 %v9880_v42, %v5794_v11  ;;  %v5796_v18 = vpop.f32.mrb[177].mxu0 }
 0x75c   : > { %v5797_v2 = vpop.f32.mrb[178].mxu0 }
 0x75d   : > { %6042 = vst.msk [vmem:[%s9888_s25 + $0x2c0] sm:$0xff] %vm5953_vm2, %v5795_v60  ;;  %v5798_v28 = vadd.f32 %v9880_v42, %v5797_v2  ;;  %v5799_v20 = vpop.f32.mrb[179].mxu0 }
 0x75f   : > { %6043 = vst.msk [vmem:[%s9888_s25 + $0x2c8] sm:$0xff] %vm5953_vm2, %v5798_v28 }
 0x762   : > { %v5802_v46 = vpop.f32.mrb[180].mxu0 }
 0x763   : > { %v5803_v32 = vadd.f32 %v9880_v42, %v5802_v46  ;;  %v5804_v50 = vpop.f32.mrb[181].mxu0 }
 0x764   : > { %v5805_v33 = vpop.f32.mrb[182].mxu0 }
 0x765   : > { %6044 = vst.msk [vmem:[%s9888_s25 + $0x2d0] sm:$0xff] %vm5953_vm2, %v5803_v32  ;;  %v5806_v57 = vadd.f32 %v9880_v42, %v5805_v33  ;;  %v5807_v55 = vpop.f32.mrb[183].mxu0 }
 0x767   : > { %6045 = vst.msk [vmem:[%s9888_s25 + $0x2d8] sm:$0xff] %vm5953_vm2, %v5806_v57 }
 0x76a   : > { %v5810_v34 = vpop.f32.mrb[184].mxu0 }
 0x76b   : > { %v5811_v41 = vadd.f32 %v9880_v42, %v5810_v34  ;;  %v5812_v36 = vpop.f32.mrb[185].mxu0 }
 0x76c   : > { %v5813_v61 = vpop.f32.mrb[186].mxu0 }
 0x76d   : > { %6046 = vst.msk [vmem:[%s9888_s25 + $0x2e0] sm:$0xff] %vm5953_vm2, %v5811_v41  ;;  %v5814_v58 = vadd.f32 %v10276_v31, %v5813_v61  ;;  %v5815_v17 = vpop.f32.mrb[187].mxu0 }
 0x76f   : > { %6047 = vst.msk [vmem:[%s9888_s25 + $0x2e8] sm:$0xff] %vm5953_vm2, %v5814_v58 }
 0x772   : > { %v5818_v10 = vpop.f32.mrb[188].mxu0 }
 0x773   : > { %v5819_v38 = vadd.f32 %v10276_v31, %v5818_v10  ;;  %v5820_v42 = vpop.f32.mrb[189].mxu0 }
 0x774   : > { %v5821_v8 = vpop.f32.mrb[190].mxu0 }
 0x775   : > { %6048 = vst.msk [vmem:[%s9888_s25 + $0x2f0] sm:$0xff] %vm5953_vm2, %v5819_v38  ;;  %v5822_v23 = vadd.f32 %v10276_v31, %v5821_v8  ;;  %v5823_v51 = vpop.f32.mrb[191].mxu0 }
 0x777   : > { %6049 = vst.msk [vmem:[%s9888_s25 + $0x2f8] sm:$0xff] %vm5953_vm2, %v5822_v23 }
 0x77a   : > { %v5826_v22 = vpop.f32.mrb[192].mxu0 }
 0x77b   : > { %v5827_v27 = vadd.f32 %v10276_v31, %v5826_v22  ;;  %v5828_v5 = vpop.f32.mrb[193].mxu0 }
 0x77c   : > { %v5829_v62 = vpop.f32.mrb[194].mxu0 }
 0x77d   : > { %6050 = vst.msk [vmem:[%s9888_s25 + $0x300] sm:$0xff] %vm5953_vm2, %v5827_v27  ;;  %v5830_v16 = vadd.f32 %v10276_v31, %v5829_v62  ;;  %v5831_v14 = vpop.f32.mrb[195].mxu0 }
 0x77f   : > { %6051 = vst.msk [vmem:[%s9888_s25 + $0x308] sm:$0xff] %vm5953_vm2, %v5830_v16 }
 0x782   : > { %v5834_v24 = vpop.f32.mrb[196].mxu0 }
 0x783   : > { %v5835_v52 = vadd.f32 %v10276_v31, %v5834_v24  ;;  %v5836_v59 = vpop.f32.mrb[197].mxu0 }
 0x784   : > { %v5837_v53 = vpop.f32.mrb[198].mxu0 }
 0x785   : > { %6052 = vst.msk [vmem:[%s9888_s25 + $0x310] sm:$0xff] %vm5953_vm2, %v5835_v52  ;;  %v5838_v56 = vadd.f32 %v10276_v31, %v5837_v53  ;;  %v5839_v45 = vpop.f32.mrb[199].mxu0 }
 0x787   : > { %6053 = vst.msk [vmem:[%s9888_s25 + $0x318] sm:$0xff] %vm5953_vm2, %v5838_v56 }
 0x78a   : > { %v5842_v25 = vpop.f32.mrb[200].mxu0 }
 0x78b   : > { %v5843_v48 = vadd.f32 %v10276_v31, %v5842_v25  ;;  %v5844_v49 = vpop.f32.mrb[201].mxu0 }
 0x78c   : > { %v5845_v19 = vpop.f32.mrb[202].mxu0 }
 0x78d   : > { %6054 = vst.msk [vmem:[%s9888_s25 + $0x320] sm:$0xff] %vm5953_vm2, %v5843_v48  ;;  %v5846_v40 = vadd.f32 %v10276_v31, %v5845_v19  ;;  %v5847_v35 = vpop.f32.mrb[203].mxu0 }
 0x78f   : > { %6055 = vst.msk [vmem:[%s9888_s25 + $0x328] sm:$0xff] %vm5953_vm2, %v5846_v40 }
 0x792   : > { %v5850_v6 = vpop.f32.mrb[204].mxu0 }
 0x793   : > { %v5851_v44 = vadd.f32 %v10276_v31, %v5850_v6  ;;  %v5852_v21 = vpop.f32.mrb[205].mxu0 }
 0x794   : > { %v5853_v4 = vpop.f32.mrb[206].mxu0 }
 0x795   : > { %6056 = vst.msk [vmem:[%s9888_s25 + $0x330] sm:$0xff] %vm5953_vm2, %v5851_v44  ;;  %v5854_v29 = vadd.f32 %v10276_v31, %v5853_v4  ;;  %v5855_v26 = vpop.f32.mrb[207].mxu0 }
 0x797   : > { %6057 = vst.msk [vmem:[%s9888_s25 + $0x338] sm:$0xff] %vm5953_vm2, %v5854_v29 }
 0x79a   : > { %v5858_v63 = vpop.f32.mrb[208].mxu0 }
 0x79b   : > { %v5859_v3 = vadd.f32 %v10276_v31, %v5858_v63  ;;  %v5860_v43 = vpop.f32.mrb[209].mxu0 }
 0x79c   : > { %v5861_v37 = vpop.f32.mrb[210].mxu0 }
 0x79d   : > { %6058 = vst.msk [vmem:[%s9888_s25 + $0x340] sm:$0xff] %vm5953_vm2, %v5859_v3  ;;  %v5862_v7 = vadd.f32 %v10276_v31, %v5861_v37  ;;  %v5863_v47 = vpop.f32.mrb[211].mxu0 }
 0x79f   : > { %6059 = vst.msk [vmem:[%s9888_s25 + $0x348] sm:$0xff] %vm5953_vm2, %v5862_v7 }
 0x7a2   : > { %v5866_v1 = vpop.f32.mrb[212].mxu0 }
 0x7a3   : > { %v5867_v0 = vadd.f32 %v10276_v31, %v5866_v1  ;;  %v5868_v30 = vpop.f32.mrb[213].mxu0 }
 0x7a4   : > { %v5869_v9 = vpop.f32.mrb[214].mxu0 }
 0x7a5   : > { %6060 = vst.msk [vmem:[%s9888_s25 + $0x350] sm:$0xff] %vm5953_vm2, %v5867_v0  ;;  %v5870_v15 = vadd.f32 %v10276_v31, %v5869_v9  ;;  %v5871_v54 = vpop.f32.mrb[215].mxu0 }
 0x7a7   : > { %6061 = vst.msk [vmem:[%s9888_s25 + $0x358] sm:$0xff] %vm5953_vm2, %v5870_v15 }
 0x7aa   : > { %v5874_v39 = vpop.f32.mrb[216].mxu0 }
 0x7ab   : > { %v5875_v13 = vadd.f32 %v10276_v31, %v5874_v39  ;;  %v5876_v12 = vpop.f32.mrb[217].mxu0 }
 0x7ac   : > { %v5877_v11 = vpop.f32.mrb[218].mxu0 }
 0x7ad   : > { %6062 = vst.msk [vmem:[%s9888_s25 + $0x360] sm:$0xff] %vm5953_vm2, %v5875_v13  ;;  %v5878_v60 = vadd.f32 %v10276_v31, %v5877_v11  ;;  %v5879_v18 = vpop.f32.mrb[219].mxu0 }
 0x7af   : > { %6063 = vst.msk [vmem:[%s9888_s25 + $0x368] sm:$0xff] %vm5953_vm2, %v5878_v60 }
 0x7b2   : > { %v5882_v2 = vpop.f32.mrb[220].mxu0 }
 0x7b3   : > { %v5883_v28 = vadd.f32 %v10276_v31, %v5882_v2  ;;  %v5884_v20 = vpop.f32.mrb[221].mxu0 }
 0x7b4   : > { %v5885_v46 = vpop.f32.mrb[222].mxu0 }
 0x7b5   : > { %6064 = vst.msk [vmem:[%s9888_s25 + $0x370] sm:$0xff] %vm5953_vm2, %v5883_v28  ;;  %v5886_v32 = vadd.f32 %v10276_v31, %v5885_v46  ;;  %v5887_v50 = vpop.f32.mrb[223].mxu0 }
 0x7b7   : > { %6065 = vst.msk [vmem:[%s9888_s25 + $0x378] sm:$0xff] %vm5953_vm2, %v5886_v32 }
 0x7ba   : > { %v5890_v33 = vpop.f32.mrb[224].mxu0 }
 0x7bb   : > { %v5891_v57 = vadd.f32 %v10276_v31, %v5890_v33  ;;  %v5892_v55 = vpop.f32.mrb[225].mxu0 }
 0x7bc   : > { %v5893_v34 = vpop.f32.mrb[226].mxu0 }
 0x7bd   : > { %6066 = vst.msk [vmem:[%s9888_s25 + $0x380] sm:$0xff] %vm5953_vm2, %v5891_v57  ;;  %v5894_v41 = vadd.f32 %v10276_v31, %v5893_v34  ;;  %v5895_v36 = vpop.f32.mrb[227].mxu0 }
 0x7bf   : > { %6067 = vst.msk [vmem:[%s9888_s25 + $0x388] sm:$0xff] %vm5953_vm2, %v5894_v41 }
 0x7c2   : > { %v5898_v61 = vpop.f32.mrb[228].mxu0 }
 0x7c3   : > { %v5899_v58 = vadd.f32 %v10276_v31, %v5898_v61  ;;  %v5900_v17 = vpop.f32.mrb[229].mxu0 }
 0x7c4   : > { %v5901_v10 = vpop.f32.mrb[230].mxu0 }
 0x7c5   : > { %6068 = vst.msk [vmem:[%s9888_s25 + $0x390] sm:$0xff] %vm5953_vm2, %v5899_v58  ;;  %v5902_v38 = vadd.f32 %v10276_v31, %v5901_v10  ;;  %v5903_v42 = vpop.f32.mrb[231].mxu0 }
 0x7c7   : > { %6069 = vst.msk [vmem:[%s9888_s25 + $0x398] sm:$0xff] %vm5953_vm2, %v5902_v38 }
 0x7ca   : > { %v5906_v8 = vpop.f32.mrb[232].mxu0 }
 0x7cb   : > { %v5907_v23 = vadd.f32 %v10276_v31, %v5906_v8  ;;  %v5908_v51 = vpop.f32.mrb[233].mxu0 }
 0x7cc   : > { %v5909_v22 = vpop.f32.mrb[234].mxu0 }
 0x7cd   : > { %6070 = vst.msk [vmem:[%s9888_s25 + $0x3a0] sm:$0xff] %vm5953_vm2, %v5907_v23  ;;  %v5910_v27 = vadd.f32 %v10276_v31, %v5909_v22  ;;  %v5911_v5 = vpop.f32.mrb[235].mxu0 }
 0x7cf   : > { %6071 = vst.msk [vmem:[%s9888_s25 + $0x3a8] sm:$0xff] %vm5953_vm2, %v5910_v27 }
 0x7d2   : > { %v5914_v62 = vpop.f32.mrb[236].mxu0 }
 0x7d3   : > { %v5915_v16 = vadd.f32 %v10276_v31, %v5914_v62  ;;  %v5916_v14 = vpop.f32.mrb[237].mxu0 }
 0x7d4   : > { %v5917_v24 = vpop.f32.mrb[238].mxu0 }
 0x7d5   : > { %6072 = vst.msk [vmem:[%s9888_s25 + $0x3b0] sm:$0xff] %vm5953_vm2, %v5915_v16  ;;  %v5918_v52 = vadd.f32 %v10276_v31, %v5917_v24  ;;  %v5919_v59 = vpop.f32.mrb[239].mxu0 }
 0x7d7   : > { %6073 = vst.msk [vmem:[%s9888_s25 + $0x3b8] sm:$0xff] %vm5953_vm2, %v5918_v52 }
 0x7da   : > { %v5922_v53 = vpop.f32.mrb[240].mxu0 }
 0x7db   : > { %v5923_v56 = vadd.f32 %v10276_v31, %v5922_v53  ;;  %v5924_v45 = vpop.f32.mrb[241].mxu0 }
 0x7dc   : > { %v5925_v25 = vpop.f32.mrb[242].mxu0 }
 0x7dd   : > { %6074 = vst.msk [vmem:[%s9888_s25 + $0x3c0] sm:$0xff] %vm5953_vm2, %v5923_v56  ;;  %v5926_v48 = vadd.f32 %v10276_v31, %v5925_v25  ;;  %v5927_v49 = vpop.f32.mrb[243].mxu0 }
 0x7df   : > { %6075 = vst.msk [vmem:[%s9888_s25 + $0x3c8] sm:$0xff] %vm5953_vm2, %v5926_v48 }
 0x7e2   : > { %v5930_v19 = vpop.f32.mrb[244].mxu0 }
 0x7e3   : > { %v5931_v40 = vadd.f32 %v10276_v31, %v5930_v19  ;;  %v5932_v35 = vpop.f32.mrb[245].mxu0 }
 0x7e4   : > { %v5933_v6 = vpop.f32.mrb[246].mxu0 }
 0x7e5   : > { %6076 = vst.msk [vmem:[%s9888_s25 + $0x3d0] sm:$0xff] %vm5953_vm2, %v5931_v40  ;;  %v5934_v44 = vadd.f32 %v10276_v31, %v5933_v6  ;;  %v5935_v21 = vpop.f32.mrb[247].mxu0 }
 0x7e7   : > { %6077 = vst.msk [vmem:[%s9888_s25 + $0x3d8] sm:$0xff] %vm5953_vm2, %v5934_v44 }
 0x7ea   : > { %v5938_v4 = vpop.f32.mrb[248].mxu0 }
 0x7eb   : > { %v5939_v29 = vadd.f32 %v10276_v31, %v5938_v4  ;;  %v5940_v26 = vpop.f32.mrb[249].mxu0 }
 0x7ec   : > { %v5941_v63 = vpop.f32.mrb[250].mxu0 }
 0x7ed   : > { %6078 = vst.msk [vmem:[%s9888_s25 + $0x3e0] sm:$0xff] %vm5953_vm2, %v5939_v29  ;;  %v5942_v3 = vadd.f32 %v10276_v31, %v5941_v63  ;;  %v5943_v43 = vpop.f32.mrb[251].mxu0 }
 0x7ef   : > { %6079 = vst.msk [vmem:[%s9888_s25 + $0x3e8] sm:$0xff] %vm5953_vm2, %v5942_v3 }
 0x7f1   : > { %6088 = sbr.rel (!%p7921_p4) target bundleno = 2112 (0x840), region = 76 }
 0x7f2   : > { %v5946_v37 = vpop.f32.mrb[252].mxu0 }
 0x7f3   : > { %v5947_v7 = vadd.f32 %v10276_v31, %v5946_v37  ;;  %v5948_v47 = vpop.f32.mrb[253].mxu0 }
 0x7f4   : > { %v5949_v1 = vpop.f32.mrb[254].mxu0 }
 0x7f5   : > { %6080 = vst.msk [vmem:[%s9888_s25 + $0x3f0] sm:$0xff] %vm5953_vm2, %v5947_v7  ;;  %v5950_v0 = vadd.f32 %v10276_v31, %v5949_v1  ;;  %v5951_v30 = vpop.f32.mrb[255].mxu0 }
 0x7f7   : > { %6081 = vst.msk [vmem:[%s9888_s25 + $0x3f8] sm:$0xff] %vm5953_vm2, %v5950_v0 }
 0x7f8   : > { %s10966_s30 = smov (!%p6091_p8, %s6090_s30), 128 }
 0x7f9   : > { %s6687_s22 = sshll.u32 %s10966_s30, 7 }
 0x7fa   : > { %p6690_p9 = scmp.eq.s32.totalorder %s6687_s22, 0 }
 0x7fb   : > { %s10396_s23 = sshrl.u32 (!%p6690_p9), %s10966_s30, 6 }
 0x7fc   : > { %6099 = sbr.rel (%p6690_p9) target bundleno = 2112 (0x840), region = 80  ;;  %p6691_p10 = scmp.le.s32.totalorder (!%p6690_p9), %s10396_s23, 0 }
 0x803   : > { %6505 = sbr.rel (%p6691_p10) target bundleno = 2091 (0x82b), region = 156  ;;  %s10957_s28 = smov (!%p6691_p10), %s10390_s17 }
 0x804   : > { %s10958_s16 = smov (!%p6691_p10), %s9888_s25  ;;  %s10405_s21 = smov (!%p6691_p10), 0  }
 0x805   : > { %s10407_s24 = smov (!%p6691_p10), 0  }
 0x80a LB: >> { %v6287_v31 = vld [vmem:[%s7799_s16] sm:$0xff]  ;;  %v6289_v9 = vld [vmem:[%s7799_s16 + $0x8] sm:$0xff]  ;;  %v6291_v15 = vld [vmem:[%s7799_s16 + $0x10] sm:$0xff]  ;;  %s6415_s18 = sadd.s32 1, %s7803_s21  ;;  %s6281_s24 = sadd.s32 1, %s7807_s24   ;;  %s7807_s24 = sphi %s10407_s24, %s6281_s24   ;;  %s7803_s21 = sphi %s10405_s21, %s10961_s21   ;;  %s7799_s16 = sphi %s10958_s16, %s10960_s16   ;;  %s7795_s28 = sphi %s10957_s28, %s10959_s28  }
 0x80b   : >> { %6288 = vst [vmem:[%s7795_s28] sm:$0xff] %v6287_v31  ;;  %6290 = vst [vmem:[%s7795_s28 + $0x8] sm:$0xff] %v6289_v9  ;;  %v6293_v54 = vld [vmem:[%s7799_s16 + $0x18] sm:$0xff]  ;;  %v6295_v39 = vld [vmem:[%s7799_s16 + $0x20] sm:$0xff]  ;;  %p6416_p11 = scmp.ge.s32.totalorder %s6415_s18, %s10396_s23  ;;  %p6280_p12 = scmp.ge.s32.totalorder %s6281_s24, %s10396_s23 }
 0x80c   : >> { %6292 = vst [vmem:[%s7795_s28 + $0x10] sm:$0xff] %v6291_v15  ;;  %v6297_v13 = vld [vmem:[%s7799_s16 + $0x28] sm:$0xff]  ;;  %6294 = vst [vmem:[%s7795_s28 + $0x18] sm:$0xff] %v6293_v54  ;;  %v6299_v12 = vld [vmem:[%s7799_s16 + $0x30] sm:$0xff] }
 0x80d   : >> { %6296 = vst [vmem:[%s7795_s28 + $0x20] sm:$0xff] %v6295_v39  ;;  %6298 = vst [vmem:[%s7795_s28 + $0x28] sm:$0xff] %v6297_v13  ;;  %v6301_v11 = vld [vmem:[%s7799_s16 + $0x38] sm:$0xff]  ;;  %v6303_v60 = vld [vmem:[%s7799_s16 + $0x40] sm:$0xff]  ;;  %s10968_s18 = smov (%p6416_p11, %s6415_s18), 0 }
 0x80e   : >> { %6300 = vst [vmem:[%s7795_s28 + $0x30] sm:$0xff] %v6299_v12  ;;  %6302 = vst [vmem:[%s7795_s28 + $0x38] sm:$0xff] %v6301_v11  ;;  %v6305_v18 = vld [vmem:[%s7799_s16 + $0x48] sm:$0xff]  ;;  %v6307_v2 = vld [vmem:[%s7799_s16 + $0x50] sm:$0xff]  ;;  %s6692_s27 = sshll.u32 %s10968_s18, 9  ;;  %s10961_s21 = smov %s10968_s18 }
 0x80f   : >> { %6304 = vst [vmem:[%s7795_s28 + $0x40] sm:$0xff] %v6303_v60  ;;  %v6309_v28 = vld [vmem:[%s7799_s16 + $0x58] sm:$0xff]  ;;  %6306 = vst [vmem:[%s7795_s28 + $0x48] sm:$0xff] %v6305_v18  ;;  %v6311_v20 = vld [vmem:[%s7799_s16 + $0x60] sm:$0xff]  ;;  %s10463_s14 = scalar_lea.vmem %s9888_s25, %s6692_s27 [#allocation2]   ;;  %s10466_s19 = scalar_lea.vmem %s10390_s17, %s6692_s27  }
 0x810   : >> { %6308 = vst [vmem:[%s7795_s28 + $0x50] sm:$0xff] %v6307_v2  ;;  %6310 = vst [vmem:[%s7795_s28 + $0x58] sm:$0xff] %v6309_v28  ;;  %v6313_v46 = vld [vmem:[%s7799_s16 + $0x68] sm:$0xff]  ;;  %v6315_v32 = vld [vmem:[%s7799_s16 + $0x70] sm:$0xff] }
 0x811   : >> { %6312 = vst [vmem:[%s7795_s28 + $0x60] sm:$0xff] %v6311_v20  ;;  %6314 = vst [vmem:[%s7795_s28 + $0x68] sm:$0xff] %v6313_v46  ;;  %v6317_v50 = vld [vmem:[%s7799_s16 + $0x78] sm:$0xff]  ;;  %v6319_v33 = vld [vmem:[%s7799_s16 + $0x80] sm:$0xff] }
 0x812   : >> { %6316 = vst [vmem:[%s7795_s28 + $0x70] sm:$0xff] %v6315_v32  ;;  %v6321_v57 = vld [vmem:[%s7799_s16 + $0x88] sm:$0xff]  ;;  %6318 = vst [vmem:[%s7795_s28 + $0x78] sm:$0xff] %v6317_v50  ;;  %v6323_v55 = vld [vmem:[%s7799_s16 + $0x90] sm:$0xff] }
 0x813   : >> { %6320 = vst [vmem:[%s7795_s28 + $0x80] sm:$0xff] %v6319_v33  ;;  %6322 = vst [vmem:[%s7795_s28 + $0x88] sm:$0xff] %v6321_v57  ;;  %v6325_v34 = vld [vmem:[%s7799_s16 + $0x98] sm:$0xff]  ;;  %v6327_v41 = vld [vmem:[%s7799_s16 + $0xa0] sm:$0xff] }
 0x814   : >> { %6324 = vst [vmem:[%s7795_s28 + $0x90] sm:$0xff] %v6323_v55  ;;  %6326 = vst [vmem:[%s7795_s28 + $0x98] sm:$0xff] %v6325_v34  ;;  %v6329_v36 = vld [vmem:[%s7799_s16 + $0xa8] sm:$0xff]  ;;  %v6331_v61 = vld [vmem:[%s7799_s16 + $0xb0] sm:$0xff] }
 0x815   : >> { %6328 = vst [vmem:[%s7795_s28 + $0xa0] sm:$0xff] %v6327_v41  ;;  %v6333_v58 = vld [vmem:[%s7799_s16 + $0xb8] sm:$0xff]  ;;  %6330 = vst [vmem:[%s7795_s28 + $0xa8] sm:$0xff] %v6329_v36  ;;  %v6335_v17 = vld [vmem:[%s7799_s16 + $0xc0] sm:$0xff] }
 0x816   : >> { %6332 = vst [vmem:[%s7795_s28 + $0xb0] sm:$0xff] %v6331_v61  ;;  %6334 = vst [vmem:[%s7795_s28 + $0xb8] sm:$0xff] %v6333_v58  ;;  %v6337_v10 = vld [vmem:[%s7799_s16 + $0xc8] sm:$0xff]  ;;  %v6339_v38 = vld [vmem:[%s7799_s16 + $0xd0] sm:$0xff] }
 0x817   : >> { %6336 = vst [vmem:[%s7795_s28 + $0xc0] sm:$0xff] %v6335_v17  ;;  %6338 = vst [vmem:[%s7795_s28 + $0xc8] sm:$0xff] %v6337_v10  ;;  %v6341_v42 = vld [vmem:[%s7799_s16 + $0xd8] sm:$0xff]  ;;  %v6343_v8 = vld [vmem:[%s7799_s16 + $0xe0] sm:$0xff] }
 0x818   : >> { %6340 = vst [vmem:[%s7795_s28 + $0xd0] sm:$0xff] %v6339_v38  ;;  %v6345_v23 = vld [vmem:[%s7799_s16 + $0xe8] sm:$0xff]  ;;  %6342 = vst [vmem:[%s7795_s28 + $0xd8] sm:$0xff] %v6341_v42  ;;  %v6347_v51 = vld [vmem:[%s7799_s16 + $0xf0] sm:$0xff] }
 0x819   : >> { %6344 = vst [vmem:[%s7795_s28 + $0xe0] sm:$0xff] %v6343_v8  ;;  %6346 = vst [vmem:[%s7795_s28 + $0xe8] sm:$0xff] %v6345_v23  ;;  %v6349_v22 = vld [vmem:[%s7799_s16 + $0xf8] sm:$0xff]  ;;  %v6351_v27 = vld [vmem:[%s7799_s16 + $0x100] sm:$0xff] }
 0x81a   : >> { %6348 = vst [vmem:[%s7795_s28 + $0xf0] sm:$0xff] %v6347_v51  ;;  %6350 = vst [vmem:[%s7795_s28 + $0xf8] sm:$0xff] %v6349_v22  ;;  %v6353_v5 = vld [vmem:[%s7799_s16 + $0x108] sm:$0xff]  ;;  %v6355_v62 = vld [vmem:[%s7799_s16 + $0x110] sm:$0xff] }
 0x81b   : >> { %6352 = vst [vmem:[%s7795_s28 + $0x100] sm:$0xff] %v6351_v27  ;;  %v6357_v16 = vld [vmem:[%s7799_s16 + $0x118] sm:$0xff]  ;;  %6354 = vst [vmem:[%s7795_s28 + $0x108] sm:$0xff] %v6353_v5  ;;  %v6359_v14 = vld [vmem:[%s7799_s16 + $0x120] sm:$0xff] }
 0x81c   : >> { %6356 = vst [vmem:[%s7795_s28 + $0x110] sm:$0xff] %v6355_v62  ;;  %6358 = vst [vmem:[%s7795_s28 + $0x118] sm:$0xff] %v6357_v16  ;;  %v6361_v24 = vld [vmem:[%s7799_s16 + $0x128] sm:$0xff]  ;;  %v6363_v52 = vld [vmem:[%s7799_s16 + $0x130] sm:$0xff] }
 0x81d   : >> { %6360 = vst [vmem:[%s7795_s28 + $0x120] sm:$0xff] %v6359_v14  ;;  %6362 = vst [vmem:[%s7795_s28 + $0x128] sm:$0xff] %v6361_v24  ;;  %v6365_v59 = vld [vmem:[%s7799_s16 + $0x138] sm:$0xff]  ;;  %v6367_v53 = vld [vmem:[%s7799_s16 + $0x140] sm:$0xff] }
 0x81e   : >> { %6364 = vst [vmem:[%s7795_s28 + $0x130] sm:$0xff] %v6363_v52  ;;  %v6369_v56 = vld [vmem:[%s7799_s16 + $0x148] sm:$0xff]  ;;  %6366 = vst [vmem:[%s7795_s28 + $0x138] sm:$0xff] %v6365_v59  ;;  %v6371_v45 = vld [vmem:[%s7799_s16 + $0x150] sm:$0xff] }
 0x81f   : >> { %6368 = vst [vmem:[%s7795_s28 + $0x140] sm:$0xff] %v6367_v53  ;;  %6370 = vst [vmem:[%s7795_s28 + $0x148] sm:$0xff] %v6369_v56  ;;  %v6373_v25 = vld [vmem:[%s7799_s16 + $0x158] sm:$0xff]  ;;  %v6375_v48 = vld [vmem:[%s7799_s16 + $0x160] sm:$0xff] }
 0x820   : >> { %6372 = vst [vmem:[%s7795_s28 + $0x150] sm:$0xff] %v6371_v45  ;;  %6374 = vst [vmem:[%s7795_s28 + $0x158] sm:$0xff] %v6373_v25  ;;  %v6377_v49 = vld [vmem:[%s7799_s16 + $0x168] sm:$0xff]  ;;  %v6379_v19 = vld [vmem:[%s7799_s16 + $0x170] sm:$0xff] }
 0x821   : >> { %6376 = vst [vmem:[%s7795_s28 + $0x160] sm:$0xff] %v6375_v48  ;;  %v6381_v40 = vld [vmem:[%s7799_s16 + $0x178] sm:$0xff]  ;;  %6378 = vst [vmem:[%s7795_s28 + $0x168] sm:$0xff] %v6377_v49  ;;  %v6383_v35 = vld [vmem:[%s7799_s16 + $0x180] sm:$0xff] }
 0x822   : >> { %6380 = vst [vmem:[%s7795_s28 + $0x170] sm:$0xff] %v6379_v19  ;;  %6382 = vst [vmem:[%s7795_s28 + $0x178] sm:$0xff] %v6381_v40  ;;  %v6385_v6 = vld [vmem:[%s7799_s16 + $0x188] sm:$0xff]  ;;  %v6387_v44 = vld [vmem:[%s7799_s16 + $0x190] sm:$0xff] }
 0x823   : >> { %6384 = vst [vmem:[%s7795_s28 + $0x180] sm:$0xff] %v6383_v35  ;;  %6386 = vst [vmem:[%s7795_s28 + $0x188] sm:$0xff] %v6385_v6  ;;  %v6389_v21 = vld [vmem:[%s7799_s16 + $0x198] sm:$0xff]  ;;  %v6391_v4 = vld [vmem:[%s7799_s16 + $0x1a0] sm:$0xff] }
 0x824   : >> { %6388 = vst [vmem:[%s7795_s28 + $0x190] sm:$0xff] %v6387_v44  ;;  %v6393_v29 = vld [vmem:[%s7799_s16 + $0x1a8] sm:$0xff]  ;;  %6390 = vst [vmem:[%s7795_s28 + $0x198] sm:$0xff] %v6389_v21  ;;  %v6395_v26 = vld [vmem:[%s7799_s16 + $0x1b0] sm:$0xff]  ;;  %6283 = sbr.rel (!%p6280_p12) target bundleno = 2058 (0x80a), region = 162 }
 0x825   : >> { %6392 = vst [vmem:[%s7795_s28 + $0x1a0] sm:$0xff] %v6391_v4  ;;  %6394 = vst [vmem:[%s7795_s28 + $0x1a8] sm:$0xff] %v6393_v29  ;;  %v6397_v63 = vld [vmem:[%s7799_s16 + $0x1b8] sm:$0xff]  ;;  %v6399_v3 = vld [vmem:[%s7799_s16 + $0x1c0] sm:$0xff] }
 0x826   : >> { %6396 = vst [vmem:[%s7795_s28 + $0x1b0] sm:$0xff] %v6395_v26  ;;  %6398 = vst [vmem:[%s7795_s28 + $0x1b8] sm:$0xff] %v6397_v63  ;;  %v6401_v43 = vld [vmem:[%s7799_s16 + $0x1c8] sm:$0xff]  ;;  %v6403_v37 = vld [vmem:[%s7799_s16 + $0x1d0] sm:$0xff] }
 0x827   : >> { %6400 = vst [vmem:[%s7795_s28 + $0x1c0] sm:$0xff] %v6399_v3  ;;  %v6405_v7 = vld [vmem:[%s7799_s16 + $0x1d8] sm:$0xff]  ;;  %6402 = vst [vmem:[%s7795_s28 + $0x1c8] sm:$0xff] %v6401_v43  ;;  %v6407_v47 = vld [vmem:[%s7799_s16 + $0x1e0] sm:$0xff] }
 0x828   : >> { %6404 = vst [vmem:[%s7795_s28 + $0x1d0] sm:$0xff] %v6403_v37  ;;  %6406 = vst [vmem:[%s7795_s28 + $0x1d8] sm:$0xff] %v6405_v7  ;;  %v6409_v1 = vld [vmem:[%s7799_s16 + $0x1e8] sm:$0xff]  ;;  %v6411_v0 = vld [vmem:[%s7799_s16 + $0x1f0] sm:$0xff] }
 0x829   : >> { %6408 = vst [vmem:[%s7795_s28 + $0x1e0] sm:$0xff] %v6407_v47  ;;  %6410 = vst [vmem:[%s7795_s28 + $0x1e8] sm:$0xff] %v6409_v1  ;;  %v6413_v30 = vld [vmem:[%s7799_s16 + $0x1f8] sm:$0xff]  ;;  %s10960_s16 = smov %s10463_s14 }
 0x82a   : >> { %6412 = vst [vmem:[%s7795_s28 + $0x1f0] sm:$0xff] %v6411_v0  ;;  %6414 = vst [vmem:[%s7795_s28 + $0x1f8] sm:$0xff] %v6413_v30  ;;  %s10959_s28 = smov %s10466_s19 }
 0x82b PF: > { %s10571_s20 = sand.u32 63, %s10966_s30   ;;  %s6703_s22 = sshll.u32 %s10396_s23, 9 }
 0x82c   : > { %s6426_s27 = scalar_lea.vmem %s9888_s25, %s6703_s22 [#allocation2]   ;;  %s6428_s0 = scalar_lea.vmem %s10390_s17, %s6703_s22  }
 0x82d   : > { %p6697_p13 = scmp.le.s32.totalorder %s10571_s20, 0 }
 0x82e   : > { %s7809_s19 = smov (!%p6697_p13), %s6428_s0   ;;  %s7813_s14 = smov (!%p6697_p13), %s6426_s27  }
 0x82f   : > { %6519 = sbr.rel (%p6697_p13) target bundleno = 2112 (0x840), region = 167  ;;  %s7817_s1 = smov (!%p6697_p13), 0  }
 0x830   : > { %s7821_s18 = smov (!%p6697_p13), 0  }
 0x836 LB: >> { %v6438_v31 = vld [vmem:[%s7815_s14] sm:$0xff]  ;;  %s6440_s30 = sadd.s32 1, %s7819_s1  ;;  %s6432_s18 = sadd.s32 1, %s7823_s18   ;;  %s7823_s18 = sphi %s7821_s18, %s6432_s18   ;;  %s7819_s1 = sphi %s7817_s1, %s7818_s1   ;;  %s7815_s14 = sphi %s7813_s14, %s6445_s14   ;;  %s7811_s19 = sphi %s7809_s19, %s6446_s19  }
 0x837   : >> { %6439 = vst [vmem:[%s7811_s19] sm:$0xff] %v6438_v31  ;;  %p6441_p0 = scmp.ge.s32.totalorder %s6440_s30, %s10571_s20  ;;  %p6431_p1 = scmp.ge.s32.totalorder %s6432_s18, %s10571_s20 }
 0x839   : >> { %s10970_s30 = smov (%p6441_p0, %s6440_s30), 0  ;;  %6434 = sbr.rel (!%p6431_p1) target bundleno = 2102 (0x836), region = 173 }
 0x83a   : >> { %s6698_s25 = sshll.u32 %s10970_s30, 3  ;;  %s7818_s1 = smov %s10970_s30  }
 0x83b   : >> { %s6445_s14 = scalar_lea.vmem %s6426_s27, %s6698_s25 [#allocation2]   ;;  %s6446_s19 = scalar_lea.vmem %s6428_s0, %s6698_s25  }
 0x840 PF: > { %p20_p2 = scmp.ge.s32.totalorder %s7911_s29, 5   ;;  %s10962_s25 = smov %s7787_s26 }
 0x841   : > { %s10963_s26 = smov %s7919_s15  ;;  %s10964_s27 = smov %s7911_s29 }
 0x842   :  { %22 = sbr.rel (!%p20_p2) target bundleno = 5 (0x5), region = 184 }

</bundles_post_ra>
